<compile_context>
chip_gen: v7x
topology: tpu7x:2x2x1
jax: 0.10.0
libtpu: 0.0.40
codegen_flags: <defaults>
</compile_context>

<pallas_src>
import functools

import numpy as np
import jax
import jax.numpy as jnp
from jax.experimental import pallas as pl
from jax.experimental.pallas import tpu as pltpu


# ------------------------------ Pallas kernel -------------------------------

def _shift_rows_zero(a, s):
    """result[p] = a[p + s] if 0 <= p + s < HW else 0   (a: (HW, C), s static int)."""
    hw, c = a.shape
    if s == 0:
        return a
    z = jnp.zeros((abs(s), c), a.dtype)
    if s > 0:
        return jnp.concatenate([a[s:, :], z], axis=0)
    return jnp.concatenate([z, a[:hw + s, :]], axis=0)


def _cbam(x, ca_w1, ca_w2, sp_mat):
    """CBAM for one (HW, C) feature map; channel MLP and 7x7 spatial conv on the MXU.

    x:      (HW, C) f32
    ca_w1:  (C, Crp)   channel-attn fc1 weight (hidden dim zero-padded to Crp)
    ca_w2:  (Crp, C)   channel-attn fc2 weight
    sp_mat: (HW, 2*HW) dense matrix encoding the zero-padded 7x7 spatial conv
    """
    hw, c = x.shape

    # ---- channel attention ----
    avg_c = jnp.sum(x, axis=0, keepdims=True) * (1.0 / hw)        # (1, C)
    max_c = jnp.max(x, axis=0, keepdims=True)                     # (1, C)
    pooled = jnp.concatenate([avg_c, max_c], axis=0)              # (2, C)
    h = jnp.maximum(jnp.dot(pooled, ca_w1, preferred_element_type=jnp.float32), 0.0)
    att = jnp.dot(h, ca_w2, preferred_element_type=jnp.float32)   # (2, C)
    ca = jax.nn.sigmoid(att[0:1, :] + att[1:2, :])                # (1, C)
    x1 = x * ca

    # ---- spatial attention (7x7 conv as one matmul against the baked matrix) ----
    avg_s = jnp.sum(x1, axis=1, keepdims=True) * (1.0 / c)        # (HW, 1)
    max_s = jnp.max(x1, axis=1, keepdims=True)                    # (HW, 1)
    cat = jnp.concatenate([avg_s, max_s], axis=0)                 # (2*HW, 1)
    rhs = jnp.broadcast_to(cat, (2 * hw, 8))                      # lane-pad the matvec
    conv = jnp.dot(sp_mat, rhs, preferred_element_type=jnp.float32)[:, 0:1]
    sa = jax.nn.sigmoid(conv)                                     # (HW, 1)
    return x1 * sa


def _feature_embedding_kernel(x_ref, w1_ref, b1_ref, ca1w1_ref, ca1w2_ref, sp1_ref,
                              w2_ref, b2_ref, ca2w1_ref, ca2w2_ref, sp2_ref,
                              o_ref, *, H, W):
    HW = H * W

    # ---- conv1 (1x1, BN scale folded into w1) + shift + ReLU ----
    x = x_ref[0]                                                   # (HW, Cin)
    y = jnp.dot(x, w1_ref[...], preferred_element_type=jnp.float32) + b1_ref[...]
    y = jnp.maximum(y, 0.0)                                        # (HW, Cmid)

    # ---- CBAM 1 ----
    y = _cbam(y, ca1w1_ref[...], ca1w2_ref[...], sp1_ref[...])

    # ---- conv2: 3x3, pad 1 (BN scale folded) as 9 shifted matmuls on the VMEM tile ----
    cmid = y.shape[1]
    cout = o_ref.shape[2]
    # Row validity is handled by the zero fill of the flat shifts; only the column wrap
    # needs masking, so pre-mask the source once per dx (hoisted out of the tap loop).
    p = jax.lax.broadcasted_iota(jnp.int32, (HW, 1), 0)
    if (W & (W - 1)) == 0:
        col = jnp.bitwise_and(p, W - 1)
    else:
        # TODO(synk): integer-div fallback for non power-of-two W (untested lowering).
        col = p - (p // W) * W
    not_first = (col != 0).astype(jnp.float32)                     # for dx = +1 taps
    not_last = (col != (W - 1)).astype(jnp.float32)                # for dx = -1 taps
    src_by_dx = {-1: y * not_last, 0: y, 1: y * not_first}

    acc = jnp.zeros((HW, cout), jnp.float32)
    for kh in range(3):
        for kw in range(3):
            dy, dx = kh - 1, kw - 1
            t = kh * 3 + kw
            sh = _shift_rows_zero(src_by_dx[dx], dy * W + dx)
            acc = acc + jnp.dot(sh, w2_ref[t * cmid:(t + 1) * cmid, :],
                                preferred_element_type=jnp.float32)
    z = acc + b2_ref[...]

    # ---- CBAM 2 ----
    z = _cbam(z, ca2w1_ref[...], ca2w2_ref[...], sp2_ref[...])

    o_ref[0] = z.astype(o_ref.dtype)


# ------------------------------- glue (JAX) ---------------------------------

def fold_bn(gamma, beta, mean, var, eps=1e-5):
    scale = gamma / jnp.sqrt(var + eps)
    shift = beta - mean * scale
    return scale.astype(jnp.float32), shift.astype(jnp.float32)


def build_spatial_matrix(sa_w, H, W):
    """Bake the zero-padded 7x7 (2ch -> 1ch) spatial-attention conv into (HW, 2*HW)."""
    HW = H * W
    r = jnp.arange(H)
    c = jnp.arange(W)
    dr = r[None, :] - r[:, None]                   # (H, H): src_row - out_row
    dc = c[None, :] - c[:, None]                   # (W, W): src_col - out_col
    vr = (dr >= -3) & (dr <= 3)
    vc = (dc >= -3) & (dc <= 3)
    kr = jnp.clip(dr + 3, 0, 6)
    kc = jnp.clip(dc + 3, 0, 6)
    valid = vr[:, None, :, None] & vc[None, :, None, :]            # (H, W, H, W)
    w = sa_w[0].astype(jnp.float32)                # (2, 7, 7); in-ch 0 = mean, 1 = max

    def one(ch):
        m = w[ch][kr[:, None, :, None], kc[None, :, None, :]]      # (H, W, H, W)
        return jnp.where(valid, m, 0.0).reshape(HW, HW)

    return jnp.concatenate([one(0), one(1)], axis=1)               # (HW, 2*HW)


def _pad_channel_mlp(w1, w2):
    """(Cr,C,1,1),(C,Cr,1,1) -> (C,Crp),(Crp,C) with hidden dim padded to a multiple of 8."""
    cr = w1.shape[0]
    crp = max(8, ((cr + 7) // 8) * 8)
    w1t = jnp.transpose(w1[:, :, 0, 0], (1, 0))    # (C, Cr)
    w2t = jnp.transpose(w2[:, :, 0, 0], (1, 0))    # (Cr, C)
    w1p = jnp.pad(w1t, ((0, 0), (0, crp - cr)))
    w2p = jnp.pad(w2t, ((0, crp - cr), (0, 0)))
    return w1p.astype(jnp.float32), w2p.astype(jnp.float32)


def feature_embedding_forward(x_nchw, p):
    N, Cin, H, W = x_nchw.shape
    HW = H * W
    x = jnp.transpose(x_nchw, (0, 2, 3, 1)).astype(jnp.float32).reshape(N, HW, Cin)

    # conv1 (1x1): fold BN scale into the weight matrix (feedback: drop s_ref + per-tile mul)
    s1, b1 = fold_bn(p["bn1_gamma"], p["bn1_beta"], p["bn1_mean"], p["bn1_var"])
    w1m = jnp.transpose(p["conv1_w"][:, :, 0, 0], (1, 0)) * s1[None, :]     # (Cin, Cmid)
    Cmid = w1m.shape[1]

    # conv2 (3x3): per-tap (Cmid, Cout) blocks stacked as rows, BN scale folded
    s2, b2 = fold_bn(p["bn2_gamma"], p["bn2_beta"], p["bn2_mean"], p["bn2_var"])
    Cout = p["conv2_w"].shape[0]
    w2m = jnp.transpose(p["conv2_w"], (2, 3, 1, 0)).reshape(9 * Cmid, Cout) * s2[None, :]

    ca1w1, ca1w2 = _pad_channel_mlp(p["ca1_w1"], p["ca1_w2"])
    ca2w1, ca2w2 = _pad_channel_mlp(p["ca2_w1"], p["ca2_w2"])
    sp1 = build_spatial_matrix(p["sa1_w"], H, W)
    sp2 = build_spatial_matrix(p["sa2_w"], H, W)
    crp1 = ca1w1.shape[1]
    crp2 = ca2w1.shape[1]

    kern = functools.partial(_feature_embedding_kernel, H=H, W=W)
    out = pl.pallas_call(
        kern,
        out_shape=jax.ShapeDtypeStruct((N, HW, Cout), jnp.float32),
        grid=(N,),
        in_specs=[
            pl.BlockSpec((1, HW, Cin), lambda n: (n, 0, 0)),
            pl.BlockSpec((Cin, Cmid), lambda n: (0, 0)),
            pl.BlockSpec((1, Cmid), lambda n: (0, 0)),
            pl.BlockSpec((Cmid, crp1), lambda n: (0, 0)),
            pl.BlockSpec((crp1, Cmid), lambda n: (0, 0)),
            pl.BlockSpec((HW, 2 * HW), lambda n: (0, 0)),
            pl.BlockSpec((9 * Cmid, Cout), lambda n: (0, 0)),
            pl.BlockSpec((1, Cout), lambda n: (0, 0)),
            pl.BlockSpec((Cout, crp2), lambda n: (0, 0)),
            pl.BlockSpec((crp2, Cout), lambda n: (0, 0)),
            pl.BlockSpec((HW, 2 * HW), lambda n: (0, 0)),
        ],
        out_specs=pl.BlockSpec((1, HW, Cout), lambda n: (n, 0, 0)),
        compiler_params=pltpu.CompilerParams(
            dimension_semantics=("parallel",),          # batch axis -> both v7x TCs
            vmem_limit_bytes=32 * 1024 * 1024),          # explicit, portable across v5e/v6e/v7x
    )(x, w1m, b1.reshape(1, Cmid), ca1w1, ca1w2, sp1,
      w2m, b2.reshape(1, Cout), ca2w1, ca2w2, sp2)

    return jnp.transpose(out.reshape(N, H, W, Cout), (0, 3, 1, 2))          # NCHW


# --------------------------- pure-JAX reference -----------------------------

def _conv2d_nhwc(x, w_oihw, pad):
    w = jnp.transpose(w_oihw, (2, 3, 1, 0))                                  # HWIO
    return jax.lax.conv_general_dilated(
        x, w, window_strides=(1, 1), padding=[(pad, pad), (pad, pad)],
        dimension_numbers=("NHWC", "HWIO", "NHWC"),
        precision=jax.lax.Precision.HIGHEST)


def ref_forward(x_nchw, p, eps=1e-5):
    x = jnp.transpose(x_nchw, (0, 2, 3, 1)).astype(jnp.float32)

    def bn(v, g, b, m, s):
        return g * (v - m) / jnp.sqrt(s + eps) + b

    def channel_att(v, w1, w2):
        avg = jnp.mean(v, axis=(1, 2), keepdims=True)
        mxx = jnp.max(v, axis=(1, 2), keepdims=True)

        def fc(u):
            h = jnp.maximum(_conv2d_nhwc(u, w1, 0), 0.0)
            return _conv2d_nhwc(h, w2, 0)

        return jax.nn.sigmoid(fc(avg) + fc(mxx))

    def spatial_att(v, w):
        avg = jnp.mean(v, axis=3, keepdims=True)
        mxx = jnp.max(v, axis=3, keepdims=True)
        cat = jnp.concatenate([avg, mxx], axis=3)
        return jax.nn.sigmoid(_conv2d_nhwc(cat, w, 3))

    def cbam(v, caw1, caw2, saw):
        v = v * channel_att(v, caw1, caw2)
        v = v * spatial_att(v, saw)
        return v

    y = _conv2d_nhwc(x, p["conv1_w"], 0)
    y = jnp.maximum(bn(y, p["bn1_gamma"], p["bn1_beta"], p["bn1_mean"], p["bn1_var"]), 0.0)
    y = cbam(y, p["ca1_w1"], p["ca1_w2"], p["sa1_w"])
    z = _conv2d_nhwc(y, p["conv2_w"], 1)
    z = bn(z, p["bn2_gamma"], p["bn2_beta"], p["bn2_mean"], p["bn2_var"])
    z = cbam(z, p["ca2_w1"], p["ca2_w2"], p["sa2_w"])
    return jnp.transpose(z, (0, 3, 1, 2))


# ----------------------------------- main ------------------------------------

if __name__ == "__main__":
    N, CIN, H, W = 2, 4, 16, 16
    MID, OUT = 32, 32                 # reduction_ratio=16 -> hidden width 2

    key = jax.random.PRNGKey(0)
    ks = jax.random.split(key, 20)

    def nrm(k, shape, scale):
        return scale * jax.random.normal(k, shape, dtype=jnp.float32)

    params = {
        "conv1_w": nrm(ks[0], (MID, CIN, 1, 1), 0.3),
        "bn1_gamma": 1.0 + nrm(ks[1], (MID,), 0.1),
        "bn1_beta": nrm(ks[2], (MID,), 0.05),
        "bn1_mean": nrm(ks[3], (MID,), 0.05),
        "bn1_var": 0.8 + jnp.abs(nrm(ks[4], (MID,), 0.2)),
        "ca1_w1": nrm(ks[5], (MID // 16, MID, 1, 1), 0.3),
        "ca1_w2": nrm(ks[6], (MID, MID // 16, 1, 1), 0.3),
        "sa1_w": nrm(ks[7], (1, 2, 7, 7), 0.2),
        "conv2_w": nrm(ks[8], (OUT, MID, 3, 3), 0.08),
        "bn2_gamma": 1.0 + nrm(ks[9], (OUT,), 0.1),
        "bn2_beta": nrm(ks[10], (OUT,), 0.05),
        "bn2_mean": nrm(ks[11], (OUT,), 0.05),
        "bn2_var": 0.8 + jnp.abs(nrm(ks[12], (OUT,), 0.2)),
        "ca2_w1": nrm(ks[13], (OUT // 16, OUT, 1, 1), 0.3),
        "ca2_w2": nrm(ks[14], (OUT, OUT // 16, 1, 1), 0.3),
        "sa2_w": nrm(ks[15], (1, 2, 7, 7), 0.2),
    }

    x = jax.random.normal(ks[16], (N, CIN, H, W), dtype=jnp.float32)

    fwd = jax.jit(feature_embedding_forward)
    out = jax.block_until_ready(fwd(x, params))
    ref = jax.block_until_ready(ref_forward(x, params))

    assert out.shape == (N, OUT, H, W), out.shape
    err = float(jnp.max(jnp.abs(out - ref)))
    assert np.isfinite(err) and err < 1e-2, f"max abs err {err}"
    print("KERNEL_OK")
</pallas_src>

<mosaic_0001>
module attributes {stable_mosaic.version = 11 : i64} {
  func.func @_feature_embedding_kernel(%arg0: i32, %arg1: memref<1x256x4xf32, #tpu.memory_space<vmem>>, %arg2: memref<4x32xf32, #tpu.memory_space<vmem>>, %arg3: memref<1x32xf32, #tpu.memory_space<vmem>>, %arg4: memref<32x8xf32, #tpu.memory_space<vmem>>, %arg5: memref<8x32xf32, #tpu.memory_space<vmem>>, %arg6: memref<256x512xf32, #tpu.memory_space<vmem>>, %arg7: memref<288x32xf32, #tpu.memory_space<vmem>>, %arg8: memref<1x32xf32, #tpu.memory_space<vmem>>, %arg9: memref<32x8xf32, #tpu.memory_space<vmem>>, %arg10: memref<8x32xf32, #tpu.memory_space<vmem>>, %arg11: memref<256x512xf32, #tpu.memory_space<vmem>>, %arg12: memref<1x256x32xf32, #tpu.memory_space<vmem>>) attributes {dimension_semantics = [#tpu.dimension_semantics<parallel>], iteration_bounds = array<i64: 2>, scalar_prefetch = 0 : i64, scratch_operands = 0 : i64, tpu.core_type = #tpu.core_type<tc>, window_params = [{transform_indices = @transform_0, window_bounds = array<i64: 1, 256, 4>}, {pipeline_mode = #tpu.pipeline_mode<synchronous>, transform_indices = @transform_1, window_bounds = array<i64: 4, 32>}, {pipeline_mode = #tpu.pipeline_mode<synchronous>, transform_indices = @transform_2, window_bounds = array<i64: 1, 32>}, {pipeline_mode = #tpu.pipeline_mode<synchronous>, transform_indices = @transform_3, window_bounds = array<i64: 32, 8>}, {pipeline_mode = #tpu.pipeline_mode<synchronous>, transform_indices = @transform_4, window_bounds = array<i64: 8, 32>}, {pipeline_mode = #tpu.pipeline_mode<synchronous>, transform_indices = @transform_5, window_bounds = array<i64: 256, 512>}, {pipeline_mode = #tpu.pipeline_mode<synchronous>, transform_indices = @transform_6, window_bounds = array<i64: 288, 32>}, {pipeline_mode = #tpu.pipeline_mode<synchronous>, transform_indices = @transform_7, window_bounds = array<i64: 1, 32>}, {pipeline_mode = #tpu.pipeline_mode<synchronous>, transform_indices = @transform_8, window_bounds = array<i64: 32, 8>}, {pipeline_mode = #tpu.pipeline_mode<synchronous>, transform_indices = @transform_9, window_bounds = array<i64: 8, 32>}, {pipeline_mode = #tpu.pipeline_mode<synchronous>, transform_indices = @transform_10, window_bounds = array<i64: 256, 512>}, {transform_indices = @transform_11, window_bounds = array<i64: 1, 256, 32>}]} {
    %c0 = arith.constant 0 : index
    %c0_0 = arith.constant 0 : index
    %c0_1 = arith.constant 0 : index
    %0 = vector.load %arg1[%c0, %c0_0, %c0_1] : memref<1x256x4xf32, #tpu.memory_space<vmem>>, vector<1x256x4xf32>
    %1 = vector.shape_cast %0 : vector<1x256x4xf32> to vector<256x4xf32>
    %c0_2 = arith.constant 0 : index
    %c0_3 = arith.constant 0 : index
    %2 = vector.load %arg2[%c0_2, %c0_3] : memref<4x32xf32, #tpu.memory_space<vmem>>, vector<4x32xf32>
    %cst = arith.constant dense<0.000000e+00> : vector<256x32xf32>
    %3 = tpu.matmul %1, %2, %cst {dimension_numbers = #tpu.dot_dimension_numbers<[1], [0], [0], [1], [0, 0, 1, 1], [], []>} : vector<256x4xf32>, vector<4x32xf32>, vector<256x32xf32> -> vector<256x32xf32>
    %c0_4 = arith.constant 0 : index
    %c0_5 = arith.constant 0 : index
    %4 = vector.load %arg3[%c0_4, %c0_5] : memref<1x32xf32, #tpu.memory_space<vmem>>, vector<1x32xf32>
    %5 = vector.broadcast %4 : vector<1x32xf32> to vector<256x32xf32>
    %6 = arith.addf %3, %5 : vector<256x32xf32>
    %cst_6 = arith.constant 0.000000e+00 : f32
    %7 = vector.broadcast %cst_6 : f32 to vector<256x32xf32>
    %8 = arith.maximumf %6, %7 : vector<256x32xf32>
    %c0_7 = arith.constant 0 : index
    %c0_8 = arith.constant 0 : index
    %9 = vector.load %arg4[%c0_7, %c0_8] : memref<32x8xf32, #tpu.memory_space<vmem>>, vector<32x8xf32>
    %c0_9 = arith.constant 0 : index
    %c0_10 = arith.constant 0 : index
    %10 = vector.load %arg5[%c0_9, %c0_10] : memref<8x32xf32, #tpu.memory_space<vmem>>, vector<8x32xf32>
    %c0_11 = arith.constant 0 : index
    %c0_12 = arith.constant 0 : index
    %11 = vector.load %arg6[%c0_11, %c0_12] : memref<256x512xf32, #tpu.memory_space<vmem>>, vector<256x512xf32>
    %cst_13 = arith.constant dense<0.000000e+00> : vector<32xf32>
    %12 = vector.multi_reduction <add>, %8, %cst_13 [0] : vector<256x32xf32> to vector<32xf32>
    %13 = vector.shape_cast %12 : vector<32xf32> to vector<1x32xf32>
    %cst_14 = arith.constant 3.906250e-03 : f32
    %14 = vector.broadcast %cst_14 : f32 to vector<1x32xf32>
    %15 = arith.mulf %13, %14 : vector<1x32xf32>
    %cst_15 = arith.constant dense<0xFF800000> : vector<32xf32>
    %16 = vector.multi_reduction <maximumf>, %8, %cst_15 [0] : vector<256x32xf32> to vector<32xf32>
    %17 = vector.shape_cast %16 : vector<32xf32> to vector<1x32xf32>
    %18 = tpu.concatenate %15, %17 in 0 : vector<1x32xf32>, vector<1x32xf32> -> vector<2x32xf32>
    %cst_16 = arith.constant dense<0.000000e+00> : vector<2x8xf32>
    %19 = tpu.matmul %18, %9, %cst_16 {dimension_numbers = #tpu.dot_dimension_numbers<[1], [0], [0], [1], [0, 0, 1, 1], [], []>} : vector<2x32xf32>, vector<32x8xf32>, vector<2x8xf32> -> vector<2x8xf32>
    %cst_17 = arith.constant 0.000000e+00 : f32
    %20 = vector.broadcast %cst_17 : f32 to vector<2x8xf32>
    %21 = arith.maximumf %19, %20 : vector<2x8xf32>
    %cst_18 = arith.constant dense<0.000000e+00> : vector<2x32xf32>
    %22 = tpu.matmul %21, %10, %cst_18 {dimension_numbers = #tpu.dot_dimension_numbers<[1], [0], [0], [1], [0, 0, 1, 1], [], []>} : vector<2x8xf32>, vector<8x32xf32>, vector<2x32xf32> -> vector<2x32xf32>
    %23 = vector.extract_strided_slice %22 {offsets = [0, 0], sizes = [1, 32], strides = [1, 1]} : vector<2x32xf32> to vector<1x32xf32>
    %24 = vector.extract_strided_slice %22 {offsets = [1, 0], sizes = [1, 32], strides = [1, 1]} : vector<2x32xf32> to vector<1x32xf32>
    %25 = arith.addf %23, %24 : vector<1x32xf32>
    %26 = arith.negf %25 : vector<1x32xf32>
    %27 = math.exp %26 : vector<1x32xf32>
    %cst_19 = arith.constant 1.000000e+00 : f32
    %28 = vector.broadcast %cst_19 : f32 to vector<1x32xf32>
    %29 = arith.addf %28, %27 : vector<1x32xf32>
    %30 = arith.divf %28, %29 : vector<1x32xf32>
    %31 = vector.broadcast %30 : vector<1x32xf32> to vector<256x32xf32>
    %32 = arith.mulf %8, %31 : vector<256x32xf32>
    %cst_20 = arith.constant dense<0.000000e+00> : vector<256xf32>
    %33 = vector.multi_reduction <add>, %32, %cst_20 [1] : vector<256x32xf32> to vector<256xf32>
    %34 = vector.shape_cast %33 : vector<256xf32> to vector<256x1xf32>
    %cst_21 = arith.constant 3.125000e-02 : f32
    %35 = vector.broadcast %cst_21 : f32 to vector<256x1xf32>
    %36 = arith.mulf %34, %35 : vector<256x1xf32>
    %cst_22 = arith.constant dense<0xFF800000> : vector<256xf32>
    %37 = vector.multi_reduction <maximumf>, %32, %cst_22 [1] : vector<256x32xf32> to vector<256xf32>
    %38 = vector.shape_cast %37 : vector<256xf32> to vector<256x1xf32>
    %39 = tpu.concatenate %36, %38 in 0 : vector<256x1xf32>, vector<256x1xf32> -> vector<512x1xf32>
    %40 = vector.shape_cast %39 : vector<512x1xf32> to vector<512x1xf32>
    %41 = vector.broadcast %40 : vector<512x1xf32> to vector<512x8xf32>
    %cst_23 = arith.constant dense<0.000000e+00> : vector<256x8xf32>
    %42 = tpu.matmul %11, %41, %cst_23 {dimension_numbers = #tpu.dot_dimension_numbers<[1], [0], [0], [1], [0, 0, 1, 1], [], []>} : vector<256x512xf32>, vector<512x8xf32>, vector<256x8xf32> -> vector<256x8xf32>
    %43 = vector.extract_strided_slice %42 {offsets = [0, 0], sizes = [256, 1], strides = [1, 1]} : vector<256x8xf32> to vector<256x1xf32>
    %44 = arith.negf %43 : vector<256x1xf32>
    %45 = math.exp %44 : vector<256x1xf32>
    %cst_24 = arith.constant 1.000000e+00 : f32
    %46 = vector.broadcast %cst_24 : f32 to vector<256x1xf32>
    %47 = arith.addf %46, %45 : vector<256x1xf32>
    %48 = arith.divf %46, %47 : vector<256x1xf32>
    %49 = vector.broadcast %48 : vector<256x1xf32> to vector<256x32xf32>
    %50 = arith.mulf %32, %49 : vector<256x32xf32>
    %51 = tpu.iota {dimensions = array<i32: 0>} : vector<256x1xi32>
    %c15_i32 = arith.constant 15 : i32
    %52 = vector.broadcast %c15_i32 : i32 to vector<256x1xi32>
    %53 = arith.andi %51, %52 : vector<256x1xi32>
    %c0_i32 = arith.constant 0 : i32
    %54 = vector.broadcast %c0_i32 : i32 to vector<256x1xi32>
    %55 = arith.cmpi ne, %53, %54 : vector<256x1xi32>
    %56 = arith.extui %55 : vector<256x1xi1> to vector<256x1xi32>
    %57 = arith.sitofp %56 : vector<256x1xi32> to vector<256x1xf32>
    %c15_i32_25 = arith.constant 15 : i32
    %58 = vector.broadcast %c15_i32_25 : i32 to vector<256x1xi32>
    %59 = arith.cmpi ne, %53, %58 : vector<256x1xi32>
    %60 = arith.extui %59 : vector<256x1xi1> to vector<256x1xi32>
    %61 = arith.sitofp %60 : vector<256x1xi32> to vector<256x1xf32>
    %62 = vector.broadcast %61 : vector<256x1xf32> to vector<256x32xf32>
    %63 = arith.mulf %50, %62 : vector<256x32xf32>
    %64 = vector.broadcast %57 : vector<256x1xf32> to vector<256x32xf32>
    %65 = arith.mulf %50, %64 : vector<256x32xf32>
    %cst_26 = arith.constant 0.000000e+00 : f32
    %66 = vector.broadcast %cst_26 : f32 to vector<256x32xf32>
    %cst_27 = arith.constant 0.000000e+00 : f32
    %67 = vector.broadcast %cst_27 : f32 to vector<17x32xf32>
    %68 = vector.extract_strided_slice %63 {offsets = [0, 0], sizes = [239, 32], strides = [1, 1]} : vector<256x32xf32> to vector<239x32xf32>
    %69 = tpu.concatenate %67, %68 in 0 : vector<17x32xf32>, vector<239x32xf32> -> vector<256x32xf32>
    %c0_28 = arith.constant 0 : index
    %c0_29 = arith.constant 0 : index
    %70 = vector.load %arg7[%c0_28, %c0_29] : memref<288x32xf32, #tpu.memory_space<vmem>>, vector<32x32xf32>
    %cst_30 = arith.constant dense<0.000000e+00> : vector<256x32xf32>
    %71 = tpu.matmul %69, %70, %cst_30 {dimension_numbers = #tpu.dot_dimension_numbers<[1], [0], [0], [1], [0, 0, 1, 1], [], []>} : vector<256x32xf32>, vector<32x32xf32>, vector<256x32xf32> -> vector<256x32xf32>
    %72 = arith.addf %66, %71 : vector<256x32xf32>
    %cst_31 = arith.constant 0.000000e+00 : f32
    %73 = vector.broadcast %cst_31 : f32 to vector<16x32xf32>
    %74 = vector.extract_strided_slice %50 {offsets = [0, 0], sizes = [240, 32], strides = [1, 1]} : vector<256x32xf32> to vector<240x32xf32>
    %75 = tpu.concatenate %73, %74 in 0 : vector<16x32xf32>, vector<240x32xf32> -> vector<256x32xf32>
    %c32 = arith.constant 32 : index
    %c0_32 = arith.constant 0 : index
    %76 = vector.load %arg7[%c32, %c0_32] : memref<288x32xf32, #tpu.memory_space<vmem>>, vector<32x32xf32>
    %cst_33 = arith.constant dense<0.000000e+00> : vector<256x32xf32>
    %77 = tpu.matmul %75, %76, %cst_33 {dimension_numbers = #tpu.dot_dimension_numbers<[1], [0], [0], [1], [0, 0, 1, 1], [], []>} : vector<256x32xf32>, vector<32x32xf32>, vector<256x32xf32> -> vector<256x32xf32>
    %78 = arith.addf %72, %77 : vector<256x32xf32>
    %cst_34 = arith.constant 0.000000e+00 : f32
    %79 = vector.broadcast %cst_34 : f32 to vector<15x32xf32>
    %80 = vector.extract_strided_slice %65 {offsets = [0, 0], sizes = [241, 32], strides = [1, 1]} : vector<256x32xf32> to vector<241x32xf32>
    %81 = tpu.concatenate %79, %80 in 0 : vector<15x32xf32>, vector<241x32xf32> -> vector<256x32xf32>
    %c64 = arith.constant 64 : index
    %c0_35 = arith.constant 0 : index
    %82 = vector.load %arg7[%c64, %c0_35] : memref<288x32xf32, #tpu.memory_space<vmem>>, vector<32x32xf32>
    %cst_36 = arith.constant dense<0.000000e+00> : vector<256x32xf32>
    %83 = tpu.matmul %81, %82, %cst_36 {dimension_numbers = #tpu.dot_dimension_numbers<[1], [0], [0], [1], [0, 0, 1, 1], [], []>} : vector<256x32xf32>, vector<32x32xf32>, vector<256x32xf32> -> vector<256x32xf32>
    %84 = arith.addf %78, %83 : vector<256x32xf32>
    %cst_37 = arith.constant 0.000000e+00 : f32
    %85 = vector.broadcast %cst_37 : f32 to vector<1x32xf32>
    %86 = vector.extract_strided_slice %63 {offsets = [0, 0], sizes = [255, 32], strides = [1, 1]} : vector<256x32xf32> to vector<255x32xf32>
    %87 = tpu.concatenate %85, %86 in 0 : vector<1x32xf32>, vector<255x32xf32> -> vector<256x32xf32>
    %c96 = arith.constant 96 : index
    %c0_38 = arith.constant 0 : index
    %88 = vector.load %arg7[%c96, %c0_38] : memref<288x32xf32, #tpu.memory_space<vmem>>, vector<32x32xf32>
    %cst_39 = arith.constant dense<0.000000e+00> : vector<256x32xf32>
    %89 = tpu.matmul %87, %88, %cst_39 {dimension_numbers = #tpu.dot_dimension_numbers<[1], [0], [0], [1], [0, 0, 1, 1], [], []>} : vector<256x32xf32>, vector<32x32xf32>, vector<256x32xf32> -> vector<256x32xf32>
    %90 = arith.addf %84, %89 : vector<256x32xf32>
    %c128 = arith.constant 128 : index
    %c0_40 = arith.constant 0 : index
    %91 = vector.load %arg7[%c128, %c0_40] : memref<288x32xf32, #tpu.memory_space<vmem>>, vector<32x32xf32>
    %cst_41 = arith.constant dense<0.000000e+00> : vector<256x32xf32>
    %92 = tpu.matmul %50, %91, %cst_41 {dimension_numbers = #tpu.dot_dimension_numbers<[1], [0], [0], [1], [0, 0, 1, 1], [], []>} : vector<256x32xf32>, vector<32x32xf32>, vector<256x32xf32> -> vector<256x32xf32>
    %93 = arith.addf %90, %92 : vector<256x32xf32>
    %cst_42 = arith.constant 0.000000e+00 : f32
    %94 = vector.broadcast %cst_42 : f32 to vector<1x32xf32>
    %95 = vector.extract_strided_slice %65 {offsets = [1, 0], sizes = [255, 32], strides = [1, 1]} : vector<256x32xf32> to vector<255x32xf32>
    %96 = tpu.concatenate %95, %94 in 0 : vector<255x32xf32>, vector<1x32xf32> -> vector<256x32xf32>
    %c160 = arith.constant 160 : index
    %c0_43 = arith.constant 0 : index
    %97 = vector.load %arg7[%c160, %c0_43] : memref<288x32xf32, #tpu.memory_space<vmem>>, vector<32x32xf32>
    %cst_44 = arith.constant dense<0.000000e+00> : vector<256x32xf32>
    %98 = tpu.matmul %96, %97, %cst_44 {dimension_numbers = #tpu.dot_dimension_numbers<[1], [0], [0], [1], [0, 0, 1, 1], [], []>} : vector<256x32xf32>, vector<32x32xf32>, vector<256x32xf32> -> vector<256x32xf32>
    %99 = arith.addf %93, %98 : vector<256x32xf32>
    %cst_45 = arith.constant 0.000000e+00 : f32
    %100 = vector.broadcast %cst_45 : f32 to vector<15x32xf32>
    %101 = vector.extract_strided_slice %63 {offsets = [15, 0], sizes = [241, 32], strides = [1, 1]} : vector<256x32xf32> to vector<241x32xf32>
    %102 = tpu.concatenate %101, %100 in 0 : vector<241x32xf32>, vector<15x32xf32> -> vector<256x32xf32>
    %c192 = arith.constant 192 : index
    %c0_46 = arith.constant 0 : index
    %103 = vector.load %arg7[%c192, %c0_46] : memref<288x32xf32, #tpu.memory_space<vmem>>, vector<32x32xf32>
    %cst_47 = arith.constant dense<0.000000e+00> : vector<256x32xf32>
    %104 = tpu.matmul %102, %103, %cst_47 {dimension_numbers = #tpu.dot_dimension_numbers<[1], [0], [0], [1], [0, 0, 1, 1], [], []>} : vector<256x32xf32>, vector<32x32xf32>, vector<256x32xf32> -> vector<256x32xf32>
    %105 = arith.addf %99, %104 : vector<256x32xf32>
    %cst_48 = arith.constant 0.000000e+00 : f32
    %106 = vector.broadcast %cst_48 : f32 to vector<16x32xf32>
    %107 = vector.extract_strided_slice %50 {offsets = [16, 0], sizes = [240, 32], strides = [1, 1]} : vector<256x32xf32> to vector<240x32xf32>
    %108 = tpu.concatenate %107, %106 in 0 : vector<240x32xf32>, vector<16x32xf32> -> vector<256x32xf32>
    %c224 = arith.constant 224 : index
    %c0_49 = arith.constant 0 : index
    %109 = vector.load %arg7[%c224, %c0_49] : memref<288x32xf32, #tpu.memory_space<vmem>>, vector<32x32xf32>
    %cst_50 = arith.constant dense<0.000000e+00> : vector<256x32xf32>
    %110 = tpu.matmul %108, %109, %cst_50 {dimension_numbers = #tpu.dot_dimension_numbers<[1], [0], [0], [1], [0, 0, 1, 1], [], []>} : vector<256x32xf32>, vector<32x32xf32>, vector<256x32xf32> -> vector<256x32xf32>
    %111 = arith.addf %105, %110 : vector<256x32xf32>
    %cst_51 = arith.constant 0.000000e+00 : f32
    %112 = vector.broadcast %cst_51 : f32 to vector<17x32xf32>
    %113 = vector.extract_strided_slice %65 {offsets = [17, 0], sizes = [239, 32], strides = [1, 1]} : vector<256x32xf32> to vector<239x32xf32>
    %114 = tpu.concatenate %113, %112 in 0 : vector<239x32xf32>, vector<17x32xf32> -> vector<256x32xf32>
    %c256 = arith.constant 256 : index
    %c0_52 = arith.constant 0 : index
    %115 = vector.load %arg7[%c256, %c0_52] : memref<288x32xf32, #tpu.memory_space<vmem>>, vector<32x32xf32>
    %cst_53 = arith.constant dense<0.000000e+00> : vector<256x32xf32>
    %116 = tpu.matmul %114, %115, %cst_53 {dimension_numbers = #tpu.dot_dimension_numbers<[1], [0], [0], [1], [0, 0, 1, 1], [], []>} : vector<256x32xf32>, vector<32x32xf32>, vector<256x32xf32> -> vector<256x32xf32>
    %117 = arith.addf %111, %116 : vector<256x32xf32>
    %c0_54 = arith.constant 0 : index
    %c0_55 = arith.constant 0 : index
    %118 = vector.load %arg8[%c0_54, %c0_55] : memref<1x32xf32, #tpu.memory_space<vmem>>, vector<1x32xf32>
    %119 = vector.broadcast %118 : vector<1x32xf32> to vector<256x32xf32>
    %120 = arith.addf %117, %119 : vector<256x32xf32>
    %c0_56 = arith.constant 0 : index
    %c0_57 = arith.constant 0 : index
    %121 = vector.load %arg9[%c0_56, %c0_57] : memref<32x8xf32, #tpu.memory_space<vmem>>, vector<32x8xf32>
    %c0_58 = arith.constant 0 : index
    %c0_59 = arith.constant 0 : index
    %122 = vector.load %arg10[%c0_58, %c0_59] : memref<8x32xf32, #tpu.memory_space<vmem>>, vector<8x32xf32>
    %c0_60 = arith.constant 0 : index
    %c0_61 = arith.constant 0 : index
    %123 = vector.load %arg11[%c0_60, %c0_61] : memref<256x512xf32, #tpu.memory_space<vmem>>, vector<256x512xf32>
    %cst_62 = arith.constant dense<0.000000e+00> : vector<32xf32>
    %124 = vector.multi_reduction <add>, %120, %cst_62 [0] : vector<256x32xf32> to vector<32xf32>
    %125 = vector.shape_cast %124 : vector<32xf32> to vector<1x32xf32>
    %cst_63 = arith.constant 3.906250e-03 : f32
    %126 = vector.broadcast %cst_63 : f32 to vector<1x32xf32>
    %127 = arith.mulf %125, %126 : vector<1x32xf32>
    %cst_64 = arith.constant dense<0xFF800000> : vector<32xf32>
    %128 = vector.multi_reduction <maximumf>, %120, %cst_64 [0] : vector<256x32xf32> to vector<32xf32>
    %129 = vector.shape_cast %128 : vector<32xf32> to vector<1x32xf32>
    %130 = tpu.concatenate %127, %129 in 0 : vector<1x32xf32>, vector<1x32xf32> -> vector<2x32xf32>
    %cst_65 = arith.constant dense<0.000000e+00> : vector<2x8xf32>
    %131 = tpu.matmul %130, %121, %cst_65 {dimension_numbers = #tpu.dot_dimension_numbers<[1], [0], [0], [1], [0, 0, 1, 1], [], []>} : vector<2x32xf32>, vector<32x8xf32>, vector<2x8xf32> -> vector<2x8xf32>
    %cst_66 = arith.constant 0.000000e+00 : f32
    %132 = vector.broadcast %cst_66 : f32 to vector<2x8xf32>
    %133 = arith.maximumf %131, %132 : vector<2x8xf32>
    %cst_67 = arith.constant dense<0.000000e+00> : vector<2x32xf32>
    %134 = tpu.matmul %133, %122, %cst_67 {dimension_numbers = #tpu.dot_dimension_numbers<[1], [0], [0], [1], [0, 0, 1, 1], [], []>} : vector<2x8xf32>, vector<8x32xf32>, vector<2x32xf32> -> vector<2x32xf32>
    %135 = vector.extract_strided_slice %134 {offsets = [0, 0], sizes = [1, 32], strides = [1, 1]} : vector<2x32xf32> to vector<1x32xf32>
    %136 = vector.extract_strided_slice %134 {offsets = [1, 0], sizes = [1, 32], strides = [1, 1]} : vector<2x32xf32> to vector<1x32xf32>
    %137 = arith.addf %135, %136 : vector<1x32xf32>
    %138 = arith.negf %137 : vector<1x32xf32>
    %139 = math.exp %138 : vector<1x32xf32>
    %cst_68 = arith.constant 1.000000e+00 : f32
    %140 = vector.broadcast %cst_68 : f32 to vector<1x32xf32>
    %141 = arith.addf %140, %139 : vector<1x32xf32>
    %142 = arith.divf %140, %141 : vector<1x32xf32>
    %143 = vector.broadcast %142 : vector<1x32xf32> to vector<256x32xf32>
    %144 = arith.mulf %120, %143 : vector<256x32xf32>
    %cst_69 = arith.constant dense<0.000000e+00> : vector<256xf32>
    %145 = vector.multi_reduction <add>, %144, %cst_69 [1] : vector<256x32xf32> to vector<256xf32>
    %146 = vector.shape_cast %145 : vector<256xf32> to vector<256x1xf32>
    %cst_70 = arith.constant 3.125000e-02 : f32
    %147 = vector.broadcast %cst_70 : f32 to vector<256x1xf32>
    %148 = arith.mulf %146, %147 : vector<256x1xf32>
    %cst_71 = arith.constant dense<0xFF800000> : vector<256xf32>
    %149 = vector.multi_reduction <maximumf>, %144, %cst_71 [1] : vector<256x32xf32> to vector<256xf32>
    %150 = vector.shape_cast %149 : vector<256xf32> to vector<256x1xf32>
    %151 = tpu.concatenate %148, %150 in 0 : vector<256x1xf32>, vector<256x1xf32> -> vector<512x1xf32>
    %152 = vector.shape_cast %151 : vector<512x1xf32> to vector<512x1xf32>
    %153 = vector.broadcast %152 : vector<512x1xf32> to vector<512x8xf32>
    %cst_72 = arith.constant dense<0.000000e+00> : vector<256x8xf32>
    %154 = tpu.matmul %123, %153, %cst_72 {dimension_numbers = #tpu.dot_dimension_numbers<[1], [0], [0], [1], [0, 0, 1, 1], [], []>} : vector<256x512xf32>, vector<512x8xf32>, vector<256x8xf32> -> vector<256x8xf32>
    %155 = vector.extract_strided_slice %154 {offsets = [0, 0], sizes = [256, 1], strides = [1, 1]} : vector<256x8xf32> to vector<256x1xf32>
    %156 = arith.negf %155 : vector<256x1xf32>
    %157 = math.exp %156 : vector<256x1xf32>
    %cst_73 = arith.constant 1.000000e+00 : f32
    %158 = vector.broadcast %cst_73 : f32 to vector<256x1xf32>
    %159 = arith.addf %158, %157 : vector<256x1xf32>
    %160 = arith.divf %158, %159 : vector<256x1xf32>
    %161 = vector.broadcast %160 : vector<256x1xf32> to vector<256x32xf32>
    %162 = arith.mulf %144, %161 : vector<256x32xf32>
    %c0_74 = arith.constant 0 : index
    %c0_75 = arith.constant 0 : index
    %c0_76 = arith.constant 0 : index
    %163 = vector.load %arg12[%c0_74, %c0_75, %c0_76] : memref<1x256x32xf32, #tpu.memory_space<vmem>>, vector<1x256x32xf32>
    %164 = vector.shape_cast %163 : vector<1x256x32xf32> to vector<256x32xf32>
    %165 = vector.shape_cast %162 : vector<256x32xf32> to vector<1x256x32xf32>
    tpu.vector_store %arg12[%c0_74, %c0_75, %c0_76], %165 {strides = array<i32>} : memref<1x256x32xf32, #tpu.memory_space<vmem>>, vector<1x256x32xf32>,
    return
  }
  func.func @transform_0(%arg0: i32) -> (i32, i32, i32) {
    %c0_i32 = arith.constant 0 : i32
    %c0_i32_0 = arith.constant 0 : i32
    %c0_i32_1 = arith.constant 0 : i32
    return %arg0, %c0_i32, %c0_i32_0 : i32, i32, i32
  }
  func.func @transform_1(%arg0: i32) -> (i32, i32) {
    %c0_i32 = arith.constant 0 : i32
    %c0_i32_0 = arith.constant 0 : i32
    %c0_i32_1 = arith.constant 0 : i32
    return %c0_i32, %c0_i32_0 : i32, i32
  }
  func.func @transform_2(%arg0: i32) -> (i32, i32) {
    %c0_i32 = arith.constant 0 : i32
    %c0_i32_0 = arith.constant 0 : i32
    %c0_i32_1 = arith.constant 0 : i32
    return %c0_i32, %c0_i32_0 : i32, i32
  }
  func.func @transform_3(%arg0: i32) -> (i32, i32) {
    %c0_i32 = arith.constant 0 : i32
    %c0_i32_0 = arith.constant 0 : i32
    %c0_i32_1 = arith.constant 0 : i32
    return %c0_i32, %c0_i32_0 : i32, i32
  }
  func.func @transform_4(%arg0: i32) -> (i32, i32) {
    %c0_i32 = arith.constant 0 : i32
    %c0_i32_0 = arith.constant 0 : i32
    %c0_i32_1 = arith.constant 0 : i32
    return %c0_i32, %c0_i32_0 : i32, i32
  }
  func.func @transform_5(%arg0: i32) -> (i32, i32) {
    %c0_i32 = arith.constant 0 : i32
    %c0_i32_0 = arith.constant 0 : i32
    %c0_i32_1 = arith.constant 0 : i32
    return %c0_i32, %c0_i32_0 : i32, i32
  }
  func.func @transform_6(%arg0: i32) -> (i32, i32) {
    %c0_i32 = arith.constant 0 : i32
    %c0_i32_0 = arith.constant 0 : i32
    %c0_i32_1 = arith.constant 0 : i32
    return %c0_i32, %c0_i32_0 : i32, i32
  }
  func.func @transform_7(%arg0: i32) -> (i32, i32) {
    %c0_i32 = arith.constant 0 : i32
    %c0_i32_0 = arith.constant 0 : i32
    %c0_i32_1 = arith.constant 0 : i32
    return %c0_i32, %c0_i32_0 : i32, i32
  }
  func.func @transform_8(%arg0: i32) -> (i32, i32) {
    %c0_i32 = arith.constant 0 : i32
    %c0_i32_0 = arith.constant 0 : i32
    %c0_i32_1 = arith.constant 0 : i32
    return %c0_i32, %c0_i32_0 : i32, i32
  }
  func.func @transform_9(%arg0: i32) -> (i32, i32) {
    %c0_i32 = arith.constant 0 : i32
    %c0_i32_0 = arith.constant 0 : i32
    %c0_i32_1 = arith.constant 0 : i32
    return %c0_i32, %c0_i32_0 : i32, i32
  }
  func.func @transform_10(%arg0: i32) -> (i32, i32) {
    %c0_i32 = arith.constant 0 : i32
    %c0_i32_0 = arith.constant 0 : i32
    %c0_i32_1 = arith.constant 0 : i32
    return %c0_i32, %c0_i32_0 : i32, i32
  }
  func.func @transform_11(%arg0: i32) -> (i32, i32, i32) {
    %c0_i32 = arith.constant 0 : i32
    %c0_i32_0 = arith.constant 0 : i32
    %c0_i32_1 = arith.constant 0 : i32
    return %arg0, %c0_i32, %c0_i32_0 : i32, i32, i32
  }
}

</mosaic_0001>

<bundles_post_ra>
// kernel: feature_embedding_forward.1
= control target key start
LH: loop header
LB: loop body
LE: loop exit
PB: predicated region body
PF: predicated region fallthrough
CT: control target
= control target key end

     0   :  { %16 = vsyncpa [#allocation3], 0  ;;  %s13937_s0 = inlined_call_operand.vmem [shape: f32[2,256,4], index: 0, kind: input, shape index: {}]   ;;  %s13938_s1 = inlined_call_operand.vmem [shape: f32[4,32], index: 1, kind: input, shape index: {}]   ;;  %s13939_s2 = inlined_call_operand.vmem [shape: f32[1,32], index: 2, kind: input, shape index: {}]   ;;  %s13940_s3 = inlined_call_operand.vmem [shape: f32[32,8], index: 3, kind: input, shape index: {}]   ;;  %s13941_s4 = inlined_call_operand.vmem [shape: f32[8,32], index: 4, kind: input, shape index: {}]   ;;  %s13942_s5 = inlined_call_operand.vmem [shape: f32[256,512], index: 5, kind: input, shape index: {}]   ;;  %s13943_s6 = inlined_call_operand.vmem [shape: f32[288,32], index: 6, kind: input, shape index: {}]   ;;  %s13944_s7 = inlined_call_operand.vmem [shape: f32[1,32], index: 7, kind: input, shape index: {}]   ;;  %s13945_s8 = inlined_call_operand.vmem [shape: f32[32,8], index: 8, kind: input, shape index: {}]   ;;  %s13946_s9 = inlined_call_operand.vmem [shape: f32[8,32], index: 9, kind: input, shape index: {}]   ;;  %s13947_s10 = inlined_call_operand.vmem [shape: f32[256,512], index: 10, kind: input, shape index: {}]   ;;  %s13948_s11 = inlined_call_operand.hbm [shape: f32[2,256,32], index: 11, kind: output, shape index: {}]  }
   0x1   :  { %18 = vsyncpa [#allocation3 + $0x1], 0  ;;  %s10495_s17 = smov 0   ;;  %s10497_s18 = smov 0  }
   0x2   :  { %s10499_s19 = smov 0   ;;  %s10501_s20 = smov 0  }
   0x3 LB: > { %s10516_s21 = sadd.s32 4294967295, %s10426_s20   ;;  %s7661_s22 = sadd.s32 4294967294, %s10426_s20   ;;  %s10426_s20 = sphi %s10501_s20, %s14224_s20   ;;  %s10422_s19 = sphi %s10499_s19, %s14223_s19   ;;  %s10418_s18 = sphi %s10497_s18, %s14222_s18   ;;  %s10414_s17 = sphi %s10495_s17, %s14221_s17  }
   0x4   : > { %s10520_s23 = sadd.s32 1, %s10426_s20   ;;  %s267_s24 = sadd.s32 1, %s10422_s19 }
   0x5   : > { %s264_s25 = ssub.s32 %s10426_s20, %s10520_s23  ;;  %p277_p0 = scmp.ne.s32.totalorder %s10422_s19, %s10418_s18 }
   0x6   : > { %p265_p1 = scmp.eq.s32.totalorder %s264_s25, 0  ;;  %p278_p2 = scmp.eq.s32.totalorder %s10516_s21, 1 }
   0x7   : > { %p283_p3 = scmp.ne.s32.totalorder %s10418_s18, %s10414_s17  ;;  %p284_p4 = scmp.eq.s32.totalorder %s7661_s22, 1 }
   0x8   : > { %s10531_s26 = scalar_select %p265_p1, %s10422_s19, %s267_s24  }
   0x9   : > { %p10533_p5 = por %p278_p2, %p277_p0  ;;  %p10537_p6 = por %p284_p4, %p283_p3 }
   0xa   : > { %p7664_p7 = scmp.ge.s32.totalorder %s10426_s20, 1  ;;  %p340_p8 = scmp.lt.s32.totalorder %s10426_s20, 3 }
   0xc   : > { %p341_p9 = pnand %p7664_p7, %p340_p8 }
   0xe   : > { %344 = sbr.rel (%p341_p9) target bundleno = 4132 (0x1024), region = 64 }
  0x15   : > { %v417_v0 = vld [vmem:[%s13938_s1] sm:$0xf]  ;;  %vm522_vm0 = vcmask 1043456   ;;  %p380_p10 = scmp.lt.s32.totalorder %s10516_s21, 1  ;;  %vm425_vm1 = vcmask 31744   ;;  %v784_v34 = vld [vmem:[%s13940_s3 + $0x8] sm:$0xff] }
  0x16   : > { %8461 = vmatprep.subr.msk.mxu0 %vm522_vm0, %v417_v0  ;;  %v783_v33 = vld [vmem:[%s13940_s3] sm:$0xff]  ;;  %v785_v35 = vld [vmem:[%s13940_s3 + $0x10] sm:$0xff]  ;;  %v13956_v36 = vmov 0.0|0.0   ;;  %v786_v38 = vld [vmem:[%s13940_s3 + $0x18] sm:$0xff]  ;;  %vm10429_vm2 = vmmov 0   ;;  %v13950_v39 = vmov 0.0  }
  0x17   : > { %8462 = vmatpush3.msk.msra.mxu0 %vm522_vm0, %v417_v0  ;;  %s381_s12 = scalar_select %p380_p10, %s10516_s21, 1  ;;  %9047 = vmatprep.subr.bf16.mxu1 %v13956_v36  ;;  %v9048_v37 = vpack.c.bf16 %v784_v34, %v783_v33  ;;  %v9051_v40 = vpack.c.bf16 %v786_v38, %v785_v35  ;;  %v10638_v41 = vld [vmem:[%s13939_s2] ss:$0 sm:$0xff]  ;;  %vm916_vm3 = vcmask 261120   ;;  %vm1056_vm4 = vcmask 1040384  }
  0x18   : > { %8519 = vmatprep.mubr.msk.f32.mxu1 %vm10429_vm2, %v13950_v39  ;;  %9053 = vmatprep.subr.bf16.mxu0 %v13956_v36  ;;  %vm1132_vm5 = vcmask 64512   ;;  %s377_s15 = sand.u32 1, %s10418_s18   ;;  %s8089_s24 = sshll.u32 %s10516_s21, 12 }
  0x19   : > { %s8088_s13 = sshll.u32 %s381_s12, 8  ;;  %9049 = vmatpush3.bf16.msra.mxu1 %v9048_v37  ;;  %s13887_s12 = scalar_lea.hbm %s13948_s11, %s8089_s24 }
  0x1a   : > { %s10551_s16 = scalar_lea.vmem %s13937_s0, %s8088_s13  ;;  %9050 = vmatprep.subr.bf16.mxu1 %v13956_v36  ;;  %s13896_s21 = scalar_lea.sflag [#allocation3], %s377_s15 }
  0x1b   : > { %v385_v1 = vld [vmem:[%s10551_s16] sm:$0xff]  ;;  %v386_v2 = vld [vmem:[%s10551_s16 + $0x8] sm:$0xff]  ;;  %v387_v3 = vld [vmem:[%s10551_s16 + $0x10] sm:$0xff]  ;;  %s10432_s14 = smov [#allocation2]  }
  0x1c   : > { %8463 = vmatprep.mubr.msk.f32.mxu0 %vm425_vm1, %v385_v1  ;;  %v388_v4 = vld [vmem:[%s10551_s16 + $0x18] sm:$0xff]  ;;  %v389_v5 = vld [vmem:[%s10551_s16 + $0x20] sm:$0xff]  ;;  %v390_v6 = vld [vmem:[%s10551_s16 + $0x28] sm:$0xff] }
  0x1d   : > { %8464 = vmatmul.mubr.msk.f32.vlgmr.msra.gmra.mrb[0].mxu0 %vm425_vm1, %v386_v2  ;;  %v391_v7 = vld [vmem:[%s10551_s16 + $0x30] sm:$0xff]  ;;  %v392_v8 = vld [vmem:[%s10551_s16 + $0x38] sm:$0xff]  ;;  %v393_v9 = vld [vmem:[%s10551_s16 + $0x40] sm:$0xff]  ;;  %9052 = vmatpush3.bf16.msra.mxu1 %v9051_v40 }
  0x1e   : > { %8466 = vmatprep.mubr.msk.f32.mxu0 %vm425_vm1, %v387_v3  ;;  %v394_v10 = vld [vmem:[%s10551_s16 + $0x48] sm:$0xff]  ;;  %v395_v11 = vld [vmem:[%s10551_s16 + $0x50] sm:$0xff]  ;;  %v396_v12 = vld [vmem:[%s10551_s16 + $0x58] sm:$0xff]  ;;  %8522 = vmatprep.subr.mxu1 %v13950_v39 }
  0x1f   : > { %v397_v13 = vld [vmem:[%s10551_s16 + $0x60] sm:$0xff]  ;;  %v398_v14 = vld [vmem:[%s10551_s16 + $0x68] sm:$0xff]  ;;  %v399_v15 = vld [vmem:[%s10551_s16 + $0x70] sm:$0xff] }
  0x20   : > { %v400_v16 = vld [vmem:[%s10551_s16 + $0x78] sm:$0xff]  ;;  %v401_v17 = vld [vmem:[%s10551_s16 + $0x80] sm:$0xff]  ;;  %v402_v18 = vld [vmem:[%s10551_s16 + $0x88] sm:$0xff] }
  0x21   : > { %8467 = vmatmul.mubr.msk.f32.gmra.mrb[2].mxu0 %vm425_vm1, %v388_v4  ;;  %v403_v19 = vld [vmem:[%s10551_s16 + $0x90] sm:$0xff]  ;;  %v404_v20 = vld [vmem:[%s10551_s16 + $0x98] sm:$0xff]  ;;  %v405_v21 = vld [vmem:[%s10551_s16 + $0xa0] sm:$0xff] }
  0x22   : > { %8469 = vmatprep.mubr.msk.f32.mxu0 %vm425_vm1, %v389_v5  ;;  %v406_v22 = vld [vmem:[%s10551_s16 + $0xa8] sm:$0xff]  ;;  %v407_v23 = vld [vmem:[%s10551_s16 + $0xb0] sm:$0xff]  ;;  %v408_v24 = vld [vmem:[%s10551_s16 + $0xb8] sm:$0xff] }
  0x23   : > { %v409_v25 = vld [vmem:[%s10551_s16 + $0xc0] sm:$0xff]  ;;  %v410_v26 = vld [vmem:[%s10551_s16 + $0xc8] sm:$0xff]  ;;  %v411_v27 = vld [vmem:[%s10551_s16 + $0xd0] sm:$0xff] }
  0x24   : > { %v412_v28 = vld [vmem:[%s10551_s16 + $0xd8] sm:$0xff]  ;;  %v413_v29 = vld [vmem:[%s10551_s16 + $0xe0] sm:$0xff]  ;;  %v414_v30 = vld [vmem:[%s10551_s16 + $0xe8] sm:$0xff] }
  0x25   : > { %8470 = vmatmul.mubr.msk.f32.gmra.mrb[4].mxu0 %vm425_vm1, %v390_v6  ;;  %v415_v31 = vld [vmem:[%s10551_s16 + $0xf0] sm:$0xff]  ;;  %v416_v32 = vld [vmem:[%s10551_s16 + $0xf8] sm:$0xff]  ;;  %s7665_s16 = sshll.u32 %s377_s15, 8 }
  0x26   : > { %8472 = vmatprep.mubr.msk.f32.mxu0 %vm425_vm1, %v391_v7  ;;  %s13788_s22 = scalar_lea.vmem [#allocation2], %s7665_s16  ;;  %s10368_s16 = sshll.u32 %s10432_s14, 4  ;;  %s10369_s16 = int_to_ptr.vmem [resolvable:$false] %s10368_s16 }
  0x27   : > { %s7599_s25 = sshll.u32 %s13788_s22, 4  ;;  %s10370_s24 = scalar_lea.vmem %s10369_s16, 8192  ;;  %s13889_s25 = int_to_ptr.vmem [resolvable:$true] %s7599_s25 }
  0x28   : > { %s10364_s13 = scalar_lea.vmem %s13889_s25, 4096  ;;  %p10371_p0 = scmp.lt.s32.totalorder %s13889_s25, %s10369_s16 }
  0x29   : > { %8473 = vmatmul.mubr.msk.f32.gmra.mrb[6].mxu0 %vm425_vm1, %v392_v8  ;;  %p10365_p11 = scmp.ne.s32.totalorder %s13889_s25, %s10364_s13  ;;  %p10372_p1 = scmp.lt.s32.totalorder %s10370_s24, %s10364_s13 }
  0x2a   : > { %8475 = vmatprep.mubr.msk.f32.mxu0 %vm425_vm1, %v393_v9 }
  0x2b   : > { %p10366_p12 = pnand %p10365_p11, %p10533_p5  ;;  %p10373_p2 = por %p10372_p1, %p10371_p0 }
  0x2d   : > { %8476 = vmatmul.mubr.msk.f32.gmra.mrb[8].mxu0 %vm425_vm1, %v394_v10  ;;  %p10367_p13 = pneg %p10366_p12 }
  0x2e   : > { %8478 = vmatprep.mubr.msk.f32.mxu0 %vm425_vm1, %v395_v11 }
  0x2f   : > { %p10374_p3 = pnand %p10373_p2, %p10367_p13 }
  0x31   : > { %8479 = vmatmul.mubr.msk.f32.gmra.mrb[10].mxu0 %vm425_vm1, %v396_v12 }
  0x32   : > { %8481 = vmatprep.mubr.msk.f32.mxu0 %vm425_vm1, %v397_v13 }
  0x35   : > { %8482 = vmatmul.mubr.msk.f32.gmra.mrb[12].mxu0 %vm425_vm1, %v398_v14 }
  0x36   : > { %8484 = vmatprep.mubr.msk.f32.mxu0 %vm425_vm1, %v399_v15 }
  0x39   : > { %8485 = vmatmul.mubr.msk.f32.gmra.mrb[14].mxu0 %vm425_vm1, %v400_v16 }
  0x3a   : > { %8487 = vmatprep.mubr.msk.f32.mxu0 %vm425_vm1, %v401_v17 }
  0x3d   : > { %8488 = vmatmul.mubr.msk.f32.gmra.mrb[16].mxu0 %vm425_vm1, %v402_v18 }
  0x3e   : > { %8490 = vmatprep.mubr.msk.f32.mxu0 %vm425_vm1, %v403_v19 }
  0x41   : > { %8491 = vmatmul.mubr.msk.f32.gmra.mrb[18].mxu0 %vm425_vm1, %v404_v20 }
  0x42   : > { %8493 = vmatprep.mubr.msk.f32.mxu0 %vm425_vm1, %v405_v21 }
  0x45   : > { %8494 = vmatmul.mubr.msk.f32.gmra.mrb[20].mxu0 %vm425_vm1, %v406_v22 }
  0x46   : > { %8496 = vmatprep.mubr.msk.f32.mxu0 %vm425_vm1, %v407_v23 }
  0x49   : > { %8497 = vmatmul.mubr.msk.f32.gmra.mrb[22].mxu0 %vm425_vm1, %v408_v24 }
  0x4a   : > { %8499 = vmatprep.mubr.msk.f32.mxu0 %vm425_vm1, %v409_v25 }
  0x4d   : > { %8500 = vmatmul.mubr.msk.f32.gmra.mrb[24].mxu0 %vm425_vm1, %v410_v26 }
  0x4e   : > { %8502 = vmatprep.mubr.msk.f32.mxu0 %vm425_vm1, %v411_v27 }
  0x51   : > { %8503 = vmatmul.mubr.msk.f32.gmra.mrb[26].mxu0 %vm425_vm1, %v412_v28 }
  0x52   : > { %8505 = vmatprep.mubr.msk.f32.mxu0 %vm425_vm1, %v413_v29 }
  0x55   : > { %8506 = vmatmul.mubr.msk.f32.gmra.mrb[28].mxu0 %vm425_vm1, %v414_v30 }
  0x56   : > { %8508 = vmatprep.mubr.msk.f32.mxu0 %vm425_vm1, %v415_v31 }
  0x59   : > { %8509 = vmatmul.mubr.msk.f32.gmra.mrb[30].mxu0 %vm425_vm1, %v416_v32 }
  0xf0   : > { %v8465_v42 = vpop.f32.mrb[0].mxu0 }
  0xf1   : > { %v598_v43 = vadd.f32 %v8465_v42, %v10638_v41  ;;  %v592_v44 = vpop.f32.mrb[1].mxu0 }
  0xf2   : > { %v593_v45 = vadd.f32 %v10638_v41, %v592_v44 }
  0xf3   : > { %v10642_v46 = vmax.f32 %v598_v43, 0.0 }
  0xf4   : > { %v10644_v47 = vmax.f32 %v593_v45, 0.0  ;;  %v8468_v48 = vpop.f32.mrb[2].mxu0 }
  0xf5   : > { %v608_v49 = vadd.f32 %v8468_v48, %v10638_v41  ;;  %v602_v50 = vpop.f32.mrb[3].mxu0  ;;  %v918_v51 = vsel %vm916_vm3, %v10642_v46, 0.0 }
  0xf6   : > { %v917_v52 = vsel %vm916_vm3, %v10644_v47, 0.0  ;;  %v603_v53 = vadd.f32 %v10638_v41, %v602_v50 }
  0xf7   : > { %v10652_v54 = vmax.f32 %v608_v49, 0.0  ;;  %v919_v57 = vadd.f32 %v918_v51, %v917_v52 }
  0xf8   : > { %v10654_v55 = vmax.f32 %v603_v53, 0.0  ;;  %v8471_v56 = vpop.f32.mrb[4].mxu0 }
  0xf9   : > { %v618_v58 = vadd.f32 %v8471_v56, %v10638_v41  ;;  %v612_v59 = vpop.f32.mrb[5].mxu0  ;;  %v922_v63 = vsel %vm916_vm3, %v10652_v54, 0.0 }
  0xfa   : > { %v920_v60 = vsel %vm916_vm3, %v10654_v55, 0.0  ;;  %v613_v61 = vadd.f32 %v10638_v41, %v612_v59 }
  0xfb   : > { %v921_v62 = vadd.f32 %v920_v60, %v919_v57  ;;  %v10662_v0 = vmax.f32 %v618_v58, 0.0 }
  0xfc   : > { %v10664_v1 = vmax.f32 %v613_v61, 0.0  ;;  %v8474_v2 = vpop.f32.mrb[6].mxu0 }
  0xfd   : > { %v923_v3 = vadd.f32 %v922_v63, %v921_v62  ;;  %v628_v4 = vadd.f32 %v8474_v2, %v10638_v41  ;;  %v622_v5 = vpop.f32.mrb[7].mxu0  ;;  %v926_v9 = vsel %vm916_vm3, %v10662_v0, 0.0 }
  0xfe   : > { %v924_v6 = vsel %vm916_vm3, %v10664_v1, 0.0  ;;  %v623_v7 = vadd.f32 %v10638_v41, %v622_v5 }
  0xff   : > { %v925_v8 = vadd.f32 %v924_v6, %v923_v3  ;;  %v10672_v10 = vmax.f32 %v628_v4, 0.0 }
 0x100   : > { %v10674_v11 = vmax.f32 %v623_v7, 0.0  ;;  %v8477_v12 = vpop.f32.mrb[8].mxu0 }
 0x101   : > { %v927_v13 = vadd.f32 %v926_v9, %v925_v8  ;;  %v638_v14 = vadd.f32 %v8477_v12, %v10638_v41  ;;  %v632_v15 = vpop.f32.mrb[9].mxu0  ;;  %v930_v19 = vsel %vm916_vm3, %v10672_v10, 0.0 }
 0x102   : > { %v928_v16 = vsel %vm916_vm3, %v10674_v11, 0.0  ;;  %v633_v17 = vadd.f32 %v10638_v41, %v632_v15 }
 0x103   : > { %v929_v18 = vadd.f32 %v928_v16, %v927_v13  ;;  %v10682_v20 = vmax.f32 %v638_v14, 0.0  ;;  %v988_v13 = vsel %vm916_vm3, %v10642_v46, -inf  ;;  %v993_v14 = vsel %vm916_vm3, %v10662_v0, -inf }
 0x104   : > { %v10684_v21 = vmax.f32 %v633_v17, 0.0  ;;  %v8480_v22 = vpop.f32.mrb[10].mxu0  ;;  %v987_v17 = vsel %vm916_vm3, %v10644_v47, -inf }
 0x105   : > { %v931_v23 = vadd.f32 %v930_v19, %v929_v18  ;;  %v648_v24 = vadd.f32 %v8480_v22, %v10638_v41  ;;  %v642_v25 = vpop.f32.mrb[11].mxu0  ;;  %v934_v29 = vsel %vm916_vm3, %v10682_v20, 0.0  ;;  %v990_v18 = vsel %vm916_vm3, %v10652_v54, -inf }
 0x106   : > { %v932_v26 = vsel %vm916_vm3, %v10684_v21, 0.0  ;;  %v643_v27 = vadd.f32 %v10638_v41, %v642_v25  ;;  %v991_v19 = vsel %vm916_vm3, %v10664_v1, -inf }
 0x107   : > { %v933_v28 = vadd.f32 %v932_v26, %v931_v23  ;;  %v10692_v30 = vmax.f32 %v648_v24, 0.0  ;;  %v997_v23 = vsel %vm916_vm3, %v10672_v10, -inf }
 0x108   : > { %v10694_v31 = vmax.f32 %v643_v27, 0.0  ;;  %v8483_v32 = vpop.f32.mrb[12].mxu0 }
 0x109   : > { %v935_v33 = vadd.f32 %v934_v29, %v933_v28  ;;  %v658_v34 = vadd.f32 %v8483_v32, %v10638_v41  ;;  %v652_v35 = vpop.f32.mrb[13].mxu0  ;;  %v938_v42 = vsel %vm916_vm3, %v10692_v30, 0.0  ;;  %v989_v28 = vsel %vm916_vm3, %v10654_v55, -inf }
 0x10a   : > { %v936_v37 = vsel %vm916_vm3, %v10694_v31, 0.0  ;;  %v653_v38 = vadd.f32 %v10638_v41, %v652_v35  ;;  %v994_v29 = vmax.f32 %v988_v13, %v993_v14  ;;  %v995_v35 = vsel %vm916_vm3, %v10674_v11, -inf }
 0x10b   : > { %v937_v40 = vadd.f32 %v936_v37, %v935_v33  ;;  %v10702_v43 = vmax.f32 %v658_v34, 0.0  ;;  %v1001_v37 = vsel %vm916_vm3, %v10682_v20, -inf }
 0x10c   : > { %v10704_v44 = vmax.f32 %v653_v38, 0.0  ;;  %v8486_v45 = vpop.f32.mrb[14].mxu0 }
 0x10d   : > { %v939_v48 = vadd.f32 %v938_v42, %v937_v40  ;;  %v668_v49 = vadd.f32 %v8486_v45, %v10638_v41  ;;  %v662_v50 = vpop.f32.mrb[15].mxu0  ;;  %v942_v56 = vsel %vm916_vm3, %v10702_v43, 0.0  ;;  %v992_v42 = vmax.f32 %v987_v17, %v991_v19 }
 0x10e   : > { %v940_v51 = vsel %vm916_vm3, %v10704_v44, 0.0  ;;  %v663_v52 = vadd.f32 %v10638_v41, %v662_v50  ;;  %v998_v45 = vmax.f32 %v990_v18, %v997_v23  ;;  %v1005_v50 = vsel %vm916_vm3, %v10692_v30, -inf }
 0x10f   : > { %v941_v53 = vadd.f32 %v940_v51, %v939_v48  ;;  %v10712_v57 = vmax.f32 %v668_v49, 0.0  ;;  %v999_v48 = vsel %vm916_vm3, %v10684_v21, -inf }
 0x110   : > { %v10714_v58 = vmax.f32 %v663_v52, 0.0  ;;  %v8489_v59 = vpop.f32.mrb[16].mxu0 }
 0x111   : > { %v943_v60 = vadd.f32 %v942_v56, %v941_v53  ;;  %v678_v61 = vadd.f32 %v8489_v59, %v10638_v41  ;;  %v672_v62 = vpop.f32.mrb[17].mxu0  ;;  %v946_v4 = vsel %vm916_vm3, %v10712_v57, 0.0  ;;  %v996_v59 = vmax.f32 %v989_v28, %v995_v35 }
 0x112   : > { %v944_v63 = vsel %vm916_vm3, %v10714_v58, 0.0  ;;  %v673_v2 = vadd.f32 %v10638_v41, %v672_v62  ;;  %v1013_v14 = vsel %vm916_vm3, %v10712_v57, -inf }
 0x113   : > { %v945_v3 = vadd.f32 %v944_v63, %v943_v60  ;;  %v10722_v5 = vmax.f32 %v678_v61, 0.0  ;;  %v1002_v60 = vmax.f32 %v994_v29, %v1001_v37 }
 0x114   : > { %v10724_v6 = vmax.f32 %v673_v2, 0.0  ;;  %v8492_v7 = vpop.f32.mrb[18].mxu0  ;;  %v1000_v2 = vmax.f32 %v992_v42, %v999_v48 }
 0x115   : > { %v947_v8 = vadd.f32 %v946_v4, %v945_v3  ;;  %v688_v9 = vadd.f32 %v8492_v7, %v10638_v41  ;;  %v682_v12 = vpop.f32.mrb[19].mxu0  ;;  %v950_v24 = vsel %vm916_vm3, %v10722_v5, 0.0  ;;  %v1003_v3 = vsel %vm916_vm3, %v10694_v31, -inf }
 0x116   : > { %v948_v15 = vsel %vm916_vm3, %v10724_v6, 0.0  ;;  %v683_v16 = vadd.f32 %v10638_v41, %v682_v12  ;;  %v1007_v12 = vsel %vm916_vm3, %v10704_v44, -inf  ;;  %v1004_v19 = vmax.f32 %v996_v59, %v1003_v3 }
 0x117   : > { %v949_v22 = vadd.f32 %v948_v15, %v947_v8  ;;  %v10744_v25 = vmax.f32 %v688_v9, 0.0  ;;  %v1006_v8 = vmax.f32 %v998_v45, %v1005_v50  ;;  %v1009_v9 = vsel %vm916_vm3, %v10702_v43, -inf }
 0x118   : > { %v10746_v26 = vmax.f32 %v683_v16, 0.0  ;;  %v8495_v27 = vpop.f32.mrb[20].mxu0  ;;  %v1017_v28 = vsel %vm916_vm3, %v10722_v5, -inf  ;;  %v1015_v29 = vsel %vm916_vm3, %v10724_v6, -inf  ;;  %v1008_v35 = vmax.f32 %v1000_v2, %v1007_v12 }
 0x119   : > { %v951_v32 = vadd.f32 %v950_v24, %v949_v22  ;;  %v698_v33 = vadd.f32 %v8495_v27, %v10638_v41  ;;  %v692_v34 = vpop.f32.mrb[21].mxu0  ;;  %v954_v51 = vsel %vm916_vm3, %v10744_v25, 0.0  ;;  %v1011_v22 = vsel %vm916_vm3, %v10714_v58, -inf }
 0x11a   : > { %v952_v38 = vsel %vm916_vm3, %v10746_v26, 0.0  ;;  %v693_v40 = vadd.f32 %v10638_v41, %v692_v34  ;;  %v1010_v34 = vmax.f32 %v1002_v60, %v1009_v9  ;;  %v1014_v37 = vmax.f32 %v1006_v8, %v1013_v14 }
 0x11b   : > { %v953_v49 = vadd.f32 %v952_v38, %v951_v32  ;;  %v10764_v52 = vmax.f32 %v698_v33, 0.0  ;;  %v1021_v60 = vsel %vm916_vm3, %v10744_v25, -inf }
 0x11c   : > { %v10766_v53 = vmax.f32 %v693_v40, 0.0  ;;  %v8498_v56 = vpop.f32.mrb[22].mxu0  ;;  %v1012_v40 = vmax.f32 %v1004_v19, %v1011_v22  ;;  %v1018_v50 = vmax.f32 %v1010_v34, %v1017_v28 }
 0x11d   : > { %v955_v61 = vadd.f32 %v954_v51, %v953_v49  ;;  %v708_v62 = vadd.f32 %v8498_v56, %v10638_v41  ;;  %v702_v63 = vpop.f32.mrb[23].mxu0  ;;  %v958_v15 = vsel %vm916_vm3, %v10764_v52, 0.0  ;;  %v1016_v51 = vmax.f32 %v1008_v35, %v1015_v29 }
 0x11e   : > { %v956_v4 = vsel %vm916_vm3, %v10766_v53, 0.0  ;;  %v703_v7 = vadd.f32 %v10638_v41, %v702_v63  ;;  %v1025_v3 = vsel %vm916_vm3, %v10764_v52, -inf }
 0x11f   : > { %v957_v13 = vadd.f32 %v956_v4, %v955_v61  ;;  %v10782_v16 = vmax.f32 %v708_v62, 0.0  ;;  %v1019_v62 = vsel %vm916_vm3, %v10746_v26, -inf  ;;  %v1023_v4 = vsel %vm916_vm3, %v10766_v53, -inf }
 0x120   : > { %v10784_v17 = vmax.f32 %v703_v7, 0.0  ;;  %v8501_v18 = vpop.f32.mrb[24].mxu0  ;;  %v1020_v19 = vmax.f32 %v1012_v40, %v1019_v62  ;;  %v1024_v28 = vmax.f32 %v1016_v51, %v1023_v4 }
 0x121   : > { %v959_v23 = vadd.f32 %v958_v15, %v957_v13  ;;  %v718_v24 = vadd.f32 %v8501_v18, %v10638_v41  ;;  %v712_v27 = vpop.f32.mrb[25].mxu0  ;;  %v962_v42 = vsel %vm916_vm3, %v10782_v16, 0.0  ;;  %v1029_v7 = vsel %vm916_vm3, %v10782_v16, -inf }
 0x122   : > { %v960_v32 = vsel %vm916_vm3, %v10784_v17, 0.0  ;;  %v713_v33 = vadd.f32 %v10638_v41, %v712_v27  ;;  %v1027_v9 = vsel %vm916_vm3, %v10784_v17, -inf  ;;  %v1022_v18 = vmax.f32 %v1014_v37, %v1021_v60 }
 0x123   : > { %v961_v38 = vadd.f32 %v960_v32, %v959_v23  ;;  %v10798_v45 = vmax.f32 %v718_v24, 0.0  ;;  %v1026_v27 = vmax.f32 %v1018_v50, %v1025_v3  ;;  %v1028_v34 = vmax.f32 %v1020_v19, %v1027_v9 }
 0x124   : > { %v10800_v48 = vmax.f32 %v713_v33, 0.0  ;;  %v8504_v49 = vpop.f32.mrb[26].mxu0  ;;  %v1030_v33 = vmax.f32 %v1022_v18, %v1029_v7 }
 0x125   : > { %v963_v56 = vadd.f32 %v962_v42, %v961_v38  ;;  %v728_v59 = vadd.f32 %v8504_v49, %v10638_v41  ;;  %v722_v61 = vpop.f32.mrb[27].mxu0  ;;  %v966_v12 = vsel %vm916_vm3, %v10798_v45, 0.0  ;;  %v1033_v37 = vsel %vm916_vm3, %v10798_v45, -inf }
 0x126   : > { %v964_v63 = vsel %vm916_vm3, %v10800_v48, 0.0  ;;  %v723_v2 = vadd.f32 %v10638_v41, %v722_v61  ;;  %v1031_v40 = vsel %vm916_vm3, %v10800_v48, -inf  ;;  %v1034_v4 = vmax.f32 %v1026_v27, %v1033_v37 }
 0x127   : > { %v965_v8 = vadd.f32 %v964_v63, %v963_v56  ;;  %v10820_v13 = vmax.f32 %v728_v59, 0.0  ;;  %v1032_v7 = vmax.f32 %v1024_v28, %v1031_v40 }
 0x128   : > { %v10822_v14 = vmax.f32 %v723_v2, 0.0  ;;  %v8507_v15 = vpop.f32.mrb[28].mxu0 }
 0x129   : > { %v967_v22 = vadd.f32 %v966_v12, %v965_v8  ;;  %v738_v23 = vadd.f32 %v8507_v15, %v10638_v41  ;;  %v732_v24 = vpop.f32.mrb[29].mxu0  ;;  %v970_v42 = vsel %vm916_vm3, %v10820_v13, 0.0  ;;  %v1037_v51 = vsel %vm916_vm3, %v10820_v13, -inf }
 0x12a   : > { %v968_v29 = vsel %vm916_vm3, %v10822_v14, 0.0  ;;  %v733_v32 = vadd.f32 %v10638_v41, %v732_v24  ;;  %v1035_v56 = vsel %vm916_vm3, %v10822_v14, -inf  ;;  %v1038_v12 = vmax.f32 %v1030_v33, %v1037_v51 }
 0x12b   : > { %v969_v35 = vadd.f32 %v968_v29, %v967_v22  ;;  %v10828_v38 = vmax.f32 %v738_v23, 0.0  ;;  %v1036_v15 = vmax.f32 %v1028_v34, %v1035_v56 }
 0x12c   : > { %v10836_v49 = vmax.f32 %v733_v32, 0.0  ;;  %v8510_v50 = vpop.f32.mrb[30].mxu0 }
 0x12d   : > { %v971_v59 = vadd.f32 %v970_v42, %v969_v35  ;;  %v748_v61 = vadd.f32 %v8510_v50, %v10638_v41  ;;  %v742_v60 = vpop.f32.mrb[31].mxu0  ;;  %v1041_v62 = vsel %vm916_vm3, %v10828_v38, -inf  ;;  %v974_v18 = vsel %vm916_vm3, %v10828_v38, 0.0 }
 0x12e   : > { %v972_v63 = vsel %vm916_vm3, %v10836_v49, 0.0  ;;  %v1039_v2 = vsel %vm916_vm3, %v10836_v49, -inf  ;;  %v743_v3 = vadd.f32 %v10638_v41, %v742_v60  ;;  %v1042_v22 = vmax.f32 %v1034_v4, %v1041_v62 }
 0x12f   : > { %v973_v8 = vadd.f32 %v972_v63, %v971_v59  ;;  %v10850_v9 = vmax.f32 %v748_v61, 0.0  ;;  %v1040_v23 = vmax.f32 %v1032_v7, %v1039_v2 }
 0x130   : > { %v10854_v19 = vmax.f32 %v743_v3, 0.0 }
 0x131   : > { %v1045_v24 = vsel %vm916_vm3, %v10850_v9, -inf  ;;  %v975_v29 = vadd.f32 %v974_v18, %v973_v8  ;;  %v978_v34 = vsel %vm916_vm3, %v10850_v9, 0.0  ;;  %v1047_v35 = vmax.f32 %v1040_v23, %v1042_v22 }
 0x132   : > { %v1046_v32 = vmax.f32 %v1038_v12, %v1045_v24  ;;  %v976_v41 = vsel %vm916_vm3, %v10854_v19, 0.0  ;;  %v1043_v27 = vsel %vm916_vm3, %v10854_v19, -inf }
 0x133   : > { %v977_v28 = vadd.f32 %v976_v41, %v975_v29  ;;  %v1044_v33 = vmax.f32 %v1036_v15, %v1043_v27  ;;  %v787_v15 = vld [vmem:[%s13941_s4] sm:$0xff] }
 0x135   : > { %v979_v37 = vadd.f32 %v978_v34, %v977_v28  ;;  %v1048_v40 = vmax.f32 %v1044_v33, %v1046_v32  ;;  %v1216_v34 = vlaneseq }
 0x137   : > { %v980_v42 = vrot.slane %v979_v37, 4  ;;  %v1049_v50 = vmax.f32 %v1047_v35, %v1048_v40  ;;  %v10873_v35 = vshrl.u32 %v1216_v34, 7 }
 0x139   : > { %v981_v51 = vadd.f32 %v980_v42, %v979_v37  ;;  %v1050_v56 = vrot.slane %v1049_v50, 4  ;;  %14061 = vst [vmem:[#allocation5_spill] sm:$0xff] %v10873_v35  ;;  %v13949_v37 = vsub.s32 0, %v10873_v35 }
 0x13b   : > { %v982_v59 = vrot.slane %v981_v51, 2  ;;  %v1051_v61 = vmax.f32 %v1049_v50, %v1050_v56 }
 0x13d   : > { %v983_v60 = vadd.f32 %v982_v59, %v981_v51  ;;  %v1052_v62 = vrot.slane %v1051_v61, 2 }
 0x13f   : > { %v984_v63 = vrot.slane %v983_v60, 1  ;;  %v1053_v2 = vmax.f32 %v1051_v61, %v1052_v62 }
 0x141   : > { %v985_v3 = vadd.f32 %v984_v63, %v983_v60  ;;  %v1054_v4 = vrot.slane %v1053_v2, 1 }
 0x143   : > { %v986_v7 = vmul.f32 0.00390625, %v985_v3  ;;  %v1055_v8 = vmax.f32 %v1053_v2, %v1054_v4 }
 0x145   : > { %v1057_v12 = vsel %vm1056_vm4, %v986_v7, %v1055_v8 }
 0x146   : > { %8520 = vmatmul.mubr.msk.f32.vlgmr.msra.gmra.mrb[0].mxu1 %vm916_vm3, %v1057_v12 }
 0x147   : > { %8524 = vmatprep.mubr.msk.f32.mxu1 %vm10429_vm2, %v13950_v39  ;;  %8523 = vmatpush3.msra.mxu1 %v787_v15 }
 0x219   : > { %v1127_v18 = vpop.f32.mrb[0].mxu1 }
 0x21a   : > { %v1131_v22 = vmax.f32 %v1127_v18, 0.0  ;;  %v8521_v23 = vpop.f32.mrb[1].mxu1 }
 0x21c   : > { %8525 = vmatmul.mubr.msk.f32.vlgmr.msra.gmra.mrb[2].mxu1 %vm1132_vm5, %v1131_v22 }
 0x21d   : > { %8535 = vmatprep.mubr.f32.mxu1 %v13950_v39 }
 0x2ef   : > { %v1202_v24 = vpop.f32.mrb[2].mxu1 }
 0x2f0   : > { %v1207_v29 = vrot.slane %v1202_v24, 1  ;;  %v8526_v32 = vpop.f32.mrb[3].mxu1 }
 0x2f2   : > { %v1209_v41 = vadd.f32 %v1207_v29, %v1202_v24 }
 0x2f4   : > { %v7704_v27 = vmul.f32 -1.442695, %v1209_v41 }
 0x2f6   : > { %10100 = vpow2.f32 %v7704_v27 }
 0x300   : > { %v10101_v28 = vpop.eup %10100 }
 0x301   : > { %v1213_v33 = vadd.f32 1.0, %v10101_v28 }
 0x303   : > { %10102 = vrcp.f32 %v1213_v33 }
 0x30d   : > { %v10103_v40 = vpop.eup %10102 }
 0x30e   : > { %v10878_v42 = vrot.slane %v10103_v40, %v13949_v37 }
 0x310   : > { %v10882_v50 = vmul.f32 %v10878_v42, %v10654_v55  ;;  %v10886_v51 = vmul.f32 %v10878_v42, %v10644_v47  ;;  %v10894_v61 = vmul.f32 %v10878_v42, %v10652_v54  ;;  %v10898_v60 = vmul.f32 %v10878_v42, %v10642_v46 }
 0x311   : > { %v10906_v62 = vmul.f32 %v10878_v42, %v10662_v0  ;;  %v10910_v54 = vmul.f32 %v10878_v42, %v10664_v1  ;;  %v10918_v2 = vmul.f32 %v10878_v42, %v10672_v10  ;;  %v10922_v0 = vmul.f32 %v10878_v42, %v10674_v11 }
 0x312   : > { %v1258_v56 = vsel %vm916_vm3, %v10882_v50, 0.0  ;;  %v1252_v59 = vsel %vm916_vm3, %v10886_v51, 0.0  ;;  %v1261_v47 = vsel %vm916_vm3, %v10894_v61, 0.0  ;;  %v1255_v55 = vsel %vm916_vm3, %v10898_v60, 0.0 }
 0x313   : > { %1259 = vadd.xlane.f32.xlu1 %v1258_v56  ;;  %1253 = vadd.xlane.f32.xlu0 %v1252_v59  ;;  %v1267_v46 = vsel %vm916_vm3, %v10906_v62, 0.0  ;;  %v1264_v63 = vsel %vm916_vm3, %v10910_v54, 0.0  ;;  %v1273_v1 = vsel %vm916_vm3, %v10918_v2, 0.0  ;;  %v1270_v3 = vsel %vm916_vm3, %v10922_v0, 0.0 }
 0x314   : > { %v10930_v4 = vmul.f32 %v10878_v42, %v10682_v20  ;;  %v10934_v10 = vmul.f32 %v10878_v42, %v10684_v21  ;;  %v10942_v8 = vmul.f32 %v10878_v42, %v10692_v30  ;;  %v10946_v20 = vmul.f32 %v10878_v42, %v10694_v31 }
 0x315   : > { %v10954_v15 = vmul.f32 %v10878_v42, %v10702_v43  ;;  %v10958_v30 = vmul.f32 %v10878_v42, %v10704_v44  ;;  %v10431_v31 = vmov 0   ;;  %v10966_v23 = vmul.f32 %v10878_v42, %v10712_v57 }
 0x316   : > { %v1279_v11 = vsel %vm916_vm3, %v10930_v4, 0.0  ;;  %v1276_v7 = vsel %vm916_vm3, %v10934_v10, 0.0  ;;  %v1285_v21 = vsel %vm916_vm3, %v10942_v8, 0.0  ;;  %v1282_v12 = vsel %vm916_vm3, %v10946_v20, 0.0  ;;  %9784 = vset.pattern.permute.xlu1 %v10431_v31  ;;  %9778 = vset.pattern.permute.xlu0 %v10431_v31 }
 0x317   : > { %1262 = vadd.xlane.f32.xlu1 %v1261_v47  ;;  %1256 = vadd.xlane.f32.xlu0 %v1255_v55  ;;  %v1291_v18 = vsel %vm916_vm3, %v10954_v15, 0.0  ;;  %v1288_v22 = vsel %vm916_vm3, %v10958_v30, 0.0  ;;  %v10970_v43 = vmul.f32 %v10878_v42, %v10714_v58  ;;  %v1297_v44 = vsel %vm916_vm3, %v10966_v23, 0.0 }
 0x318   : > { %v10978_v29 = vmul.f32 %v10878_v42, %v10722_v5  ;;  %v10982_v57 = vmul.f32 %v10878_v42, %v10724_v6  ;;  %v10990_v41 = vmul.f32 %v10878_v42, %v10744_v25  ;;  %v10994_v5 = vmul.f32 %v10878_v42, %v10746_v26 }
 0x319   : > { %v1294_v24 = vsel %vm916_vm3, %v10970_v43, 0.0  ;;  %v11002_v28 = vmul.f32 %v10878_v42, %v10764_v52  ;;  %v11006_v25 = vmul.f32 %v10878_v42, %v10766_v53  ;;  %v11014_v34 = vmul.f32 %v10878_v42, %v10782_v16 }
 0x31a   : > { %v1303_v58 = vsel %vm916_vm3, %v10978_v29, 0.0  ;;  %v1300_v32 = vsel %vm916_vm3, %v10982_v57, 0.0  ;;  %v1309_v6 = vsel %vm916_vm3, %v10990_v41, 0.0  ;;  %v1306_v27 = vsel %vm916_vm3, %v10994_v5, 0.0 }
 0x31b   : > { %1268 = vadd.xlane.f32.xlu1 %v1267_v46  ;;  %1265 = vadd.xlane.f32.xlu0 %v1264_v63  ;;  %14062 = vst [vmem:[#allocation6_spill] sm:$0xff] %v11006_v25  ;;  %v1315_v26 = vsel %vm916_vm3, %v11002_v28, 0.0  ;;  %v1312_v33 = vsel %vm916_vm3, %v11006_v25, 0.0  ;;  %v11018_v52 = vmul.f32 %v10878_v42, %v10784_v17  ;;  %v1321_v53 = vsel %vm916_vm3, %v11014_v34, 0.0 }
 0x31c   : > { %v11026_v56 = vmul.f32 %v10878_v42, %v10798_v45  ;;  %v11030_v16 = vmul.f32 %v10878_v42, %v10800_v48  ;;  %v11038_v47 = vmul.f32 %v10878_v42, %v10820_v13  ;;  %v11042_v45 = vmul.f32 %v10878_v42, %v10822_v14 }
 0x31d   : > { %v1318_v40 = vsel %vm916_vm3, %v11018_v52, 0.0  ;;  %v11050_v46 = vmul.f32 %v10878_v42, %v10828_v38  ;;  %v11054_v13 = vmul.f32 %v10878_v42, %v10836_v49  ;;  %v11066_v38 = vmul.f32 %v10878_v42, %v10854_v19 }
 0x31e   : > { %v1327_v17 = vsel %vm916_vm3, %v11026_v56, 0.0  ;;  %v1324_v59 = vsel %vm916_vm3, %v11030_v16, 0.0  ;;  %v1333_v48 = vsel %vm916_vm3, %v11038_v47, 0.0  ;;  %v1330_v55 = vsel %vm916_vm3, %v11042_v45, 0.0 }
 0x31f   : > { %1274 = vadd.xlane.f32.xlu1 %v1273_v1  ;;  %1271 = vadd.xlane.f32.xlu0 %v1270_v3  ;;  %v1339_v14 = vsel %vm916_vm3, %v11050_v46, 0.0  ;;  %v1336_v63 = vsel %vm916_vm3, %v11054_v13, 0.0  ;;  %v11062_v1 = vmul.f32 %v10878_v42, %v10850_v9  ;;  %v1342_v3 = vsel %vm916_vm3, %v11066_v38, 0.0 }
 0x320   : > { %v1383_v9 = vsel %vm916_vm3, %v10898_v60, -inf  ;;  %v1386_v19 = vsel %vm916_vm3, %v10882_v50, -inf  ;;  %v1392_v42 = vsel %vm916_vm3, %v10910_v54, -inf  ;;  %v1401_v31 = vsel %vm916_vm3, %v10918_v2, -inf }
 0x321   : > { %14063 = vst [vmem:[#allocation7_spill] sm:$0xff] %v11062_v1  ;;  %v1345_v49 = vsel %vm916_vm3, %v11062_v1, 0.0  ;;  %v1443_v37 = vsel %vm916_vm3, %v11002_v28, -inf }
 0x323   : > { %1280 = vadd.xlane.f32.xlu1 %v1279_v11  ;;  %1277 = vadd.xlane.f32.xlu0 %v1276_v7  ;;  %v1380_v11 = vsel %vm916_vm3, %v10886_v51, -inf  ;;  %v1389_v7 = vsel %vm916_vm3, %v10894_v61, -inf }
 0x327   : > { %1286 = vadd.xlane.f32.xlu1 %v1285_v21  ;;  %1283 = vadd.xlane.f32.xlu0 %v1282_v12  ;;  %v1398_v21 = vsel %vm916_vm3, %v10922_v0, -inf  ;;  %v1395_v12 = vsel %vm916_vm3, %v10906_v62, -inf }
 0x32b   : > { %1292 = vadd.xlane.f32.xlu1 %v1291_v18  ;;  %1289 = vadd.xlane.f32.xlu0 %v1288_v22  ;;  %v1407_v18 = vsel %vm916_vm3, %v10930_v4, -inf  ;;  %v1404_v22 = vsel %vm916_vm3, %v10934_v10, -inf }
 0x32f   : > { %1298 = vadd.xlane.f32.xlu1 %v1297_v44  ;;  %1295 = vadd.xlane.f32.xlu0 %v1294_v24  ;;  %v1413_v44 = vsel %vm916_vm3, %v10942_v8, -inf  ;;  %v1410_v24 = vsel %vm916_vm3, %v10946_v20, -inf }
 0x333   : > { %1304 = vadd.xlane.f32.xlu1 %v1303_v58  ;;  %1301 = vadd.xlane.f32.xlu0 %v1300_v32  ;;  %v1419_v58 = vsel %vm916_vm3, %v10954_v15, -inf  ;;  %v1416_v32 = vsel %vm916_vm3, %v10958_v30, -inf }
 0x337   : > { %1310 = vadd.xlane.f32.xlu1 %v1309_v6  ;;  %1307 = vadd.xlane.f32.xlu0 %v1306_v27  ;;  %v1425_v6 = vsel %vm916_vm3, %v10966_v23, -inf  ;;  %v1422_v27 = vsel %vm916_vm3, %v10970_v43, -inf }
 0x33b   : > { %1316 = vadd.xlane.f32.xlu1 %v1315_v26  ;;  %1313 = vadd.xlane.f32.xlu0 %v1312_v33  ;;  %v1431_v26 = vsel %vm916_vm3, %v10978_v29, -inf  ;;  %v1428_v33 = vsel %vm916_vm3, %v10982_v57, -inf }
 0x33f   : > { %1322 = vadd.xlane.f32.xlu1 %v1321_v53  ;;  %1319 = vadd.xlane.f32.xlu0 %v1318_v40 }
 0x343   : > { %1328 = vadd.xlane.f32.xlu1 %v1327_v17  ;;  %1325 = vadd.xlane.f32.xlu0 %v1324_v59 }
 0x347   : > { %1334 = vadd.xlane.f32.xlu1 %v1333_v48  ;;  %1331 = vadd.xlane.f32.xlu0 %v1330_v55 }
 0x34b   : > { %1340 = vadd.xlane.f32.xlu1 %v1339_v14  ;;  %1337 = vadd.xlane.f32.xlu0 %v1336_v63 }
 0x34f   : > { %1346 = vadd.xlane.f32.xlu1 %v1345_v49  ;;  %1343 = vadd.xlane.f32.xlu0 %v1342_v3 }
 0x353   : > { %1381 = vmax.xlane.f32.xlu1 %v1380_v11  ;;  %1384 = vmax.xlane.f32.xlu0 %v1383_v9 }
 0x357   : > { %1387 = vmax.xlane.f32.xlu1 %v1386_v19  ;;  %1393 = vmax.xlane.f32.xlu0 %v1392_v42 }
 0x35b   : > { %1390 = vmax.xlane.f32.xlu1 %v1389_v7  ;;  %1399 = vmax.xlane.f32.xlu0 %v1398_v21 }
 0x35f   : > { %1396 = vmax.xlane.f32.xlu1 %v1395_v12  ;;  %1402 = vmax.xlane.f32.xlu0 %v1401_v31 }
 0x363   : > { %1408 = vmax.xlane.f32.xlu1 %v1407_v18  ;;  %1405 = vmax.xlane.f32.xlu0 %v1404_v22 }
 0x367   : > { %1414 = vmax.xlane.f32.xlu1 %v1413_v44  ;;  %1411 = vmax.xlane.f32.xlu0 %v1410_v24 }
 0x36b   : > { %1420 = vmax.xlane.f32.xlu1 %v1419_v58  ;;  %1417 = vmax.xlane.f32.xlu0 %v1416_v32 }
 0x36f   : > { %1426 = vmax.xlane.f32.xlu1 %v1425_v6  ;;  %1423 = vmax.xlane.f32.xlu0 %v1422_v27 }
 0x373   : > { %1432 = vmax.xlane.f32.xlu1 %v1431_v26  ;;  %1429 = vmax.xlane.f32.xlu0 %v1428_v33 }
 0x3a0   : > { %v1260_v53 = vpop.xlane.xlu1 %1259  ;;  %v1254_v40 = vpop.xlane.xlu0 %1253 }
 0x3a1   : > { %v1350_v48 = vmul.f32 0.03125, %v1260_v53  ;;  %v1348_v55 = vmul.f32 0.03125, %v1254_v40 }
 0x3a4   : > { %v1263_v17 = vpop.xlane.xlu1 %1262  ;;  %v1257_v59 = vpop.xlane.xlu0 %1256 }
 0x3a5   : > { %v1351_v14 = vmul.f32 0.03125, %v1263_v17  ;;  %v1349_v63 = vmul.f32 0.03125, %v1257_v59 }
 0x3a7   : > { %v9785_v49 = vpack.i.bf16 %v1351_v14, %v1350_v48  ;;  %v9779_v3 = vpack.i.bf16 %v1349_v63, %v1348_v55 }
 0x3a8   : > { %v1269_v11 = vpop.xlane.xlu1 %1268  ;;  %v1266_v9 = vpop.xlane.xlu0 %1265 }
 0x3a9   : > { %v1353_v19 = vmul.f32 0.03125, %v1269_v11  ;;  %v1352_v42 = vmul.f32 0.03125, %v1266_v9  ;;  %9786 = vperm.xlu1 %9784, %v9785_v49   ;;  %9780 = vperm.xlu0 %9778, %v9779_v3  }
 0x3ab   : > { %v9790_v7 = vpack.i.bf16 %v1353_v19, %v1352_v42 }
 0x3ac   : > { %v1275_v21 = vpop.xlane.xlu1 %1274  ;;  %v1272_v12 = vpop.xlane.xlu0 %1271 }
 0x3ad   : > { %v1355_v31 = vmul.f32 0.03125, %v1275_v21  ;;  %v1354_v18 = vmul.f32 0.03125, %v1272_v12  ;;  %9791 = vperm.xlu1 %9784, %v9790_v7  }
 0x3af   : > { %v9795_v22 = vpack.i.bf16 %v1355_v31, %v1354_v18 }
 0x3b0   : > { %v1281_v44 = vpop.xlane.xlu1 %1280  ;;  %v1278_v24 = vpop.xlane.xlu0 %1277 }
 0x3b1   : > { %v1357_v58 = vmul.f32 0.03125, %v1281_v44  ;;  %v1356_v32 = vmul.f32 0.03125, %v1278_v24  ;;  %9796 = vperm.xlu1 %9784, %v9795_v22  }
 0x3b3   : > { %v9800_v6 = vpack.i.bf16 %v1357_v58, %v1356_v32 }
 0x3b4   : > { %v1287_v27 = vpop.xlane.xlu1 %1286  ;;  %v1284_v26 = vpop.xlane.xlu0 %1283 }
 0x3b5   : > { %v1359_v33 = vmul.f32 0.03125, %v1287_v27  ;;  %v1358_v53 = vmul.f32 0.03125, %v1284_v26  ;;  %9801 = vperm.xlu1 %9784, %v9800_v6  }
 0x3b7   : > { %v9805_v40 = vpack.i.bf16 %v1359_v33, %v1358_v53 }
 0x3b8   : > { %v1293_v17 = vpop.xlane.xlu1 %1292  ;;  %v1290_v59 = vpop.xlane.xlu0 %1289 }
 0x3b9   : > { %v1361_v48 = vmul.f32 0.03125, %v1293_v17  ;;  %v1360_v55 = vmul.f32 0.03125, %v1290_v59  ;;  %9806 = vperm.xlu1 %9784, %v9805_v40  }
 0x3bb   : > { %v9810_v14 = vpack.i.bf16 %v1361_v48, %v1360_v55 }
 0x3bc   : > { %v1299_v63 = vpop.xlane.xlu1 %1298  ;;  %v1296_v49 = vpop.xlane.xlu0 %1295 }
 0x3bd   : > { %v1363_v3 = vmul.f32 0.03125, %v1299_v63  ;;  %v1362_v11 = vmul.f32 0.03125, %v1296_v49  ;;  %9811 = vperm.xlu1 %9784, %v9810_v14  }
 0x3bf   : > { %v9815_v9 = vpack.i.bf16 %v1363_v3, %v1362_v11 }
 0x3c0   : > { %v1305_v19 = vpop.xlane.xlu1 %1304  ;;  %v1302_v42 = vpop.xlane.xlu0 %1301 }
 0x3c1   : > { %v1365_v7 = vmul.f32 0.03125, %v1305_v19  ;;  %v1364_v21 = vmul.f32 0.03125, %v1302_v42  ;;  %9816 = vperm.xlu1 %9784, %v9815_v9  }
 0x3c3   : > { %v9820_v12 = vpack.i.bf16 %v1365_v7, %v1364_v21  ;;  %v1434_v21 = vsel %vm916_vm3, %v10994_v5, -inf }
 0x3c4   : > { %v1311_v31 = vpop.xlane.xlu1 %1310  ;;  %v1308_v18 = vpop.xlane.xlu0 %1307 }
 0x3c5   : > { %v1367_v22 = vmul.f32 0.03125, %v1311_v31  ;;  %v1366_v44 = vmul.f32 0.03125, %v1308_v18  ;;  %9821 = vperm.xlu1 %9784, %v9820_v12   ;;  %v1437_v18 = vsel %vm916_vm3, %v10990_v41, -inf }
 0x3c7   : > { %v9825_v24 = vpack.i.bf16 %v1367_v22, %v1366_v44 }
 0x3c8   : > { %v1317_v58 = vpop.xlane.xlu1 %1316  ;;  %v1314_v32 = vpop.xlane.xlu0 %1313 }
 0x3c9   : > { %v1369_v6 = vmul.f32 0.03125, %v1317_v58  ;;  %v1368_v27 = vmul.f32 0.03125, %v1314_v32  ;;  %9826 = vperm.xlu0 %9778, %v9825_v24  }
 0x3cb   : > { %v9830_v26 = vpack.i.bf16 %v1369_v6, %v1368_v27 }
 0x3cc   : > { %v1323_v33 = vpop.xlane.xlu1 %1322  ;;  %v1320_v53 = vpop.xlane.xlu0 %1319 }
 0x3cd   : > { %v1371_v40 = vmul.f32 0.03125, %v1323_v33  ;;  %v1370_v17 = vmul.f32 0.03125, %v1320_v53  ;;  %9831 = vperm.xlu1 %9784, %v9830_v26  }
 0x3cf   : > { %v9835_v59 = vpack.i.bf16 %v1371_v40, %v1370_v17 }
 0x3d0   : > { %v1329_v48 = vpop.xlane.xlu1 %1328  ;;  %v1326_v55 = vpop.xlane.xlu0 %1325 }
 0x3d1   : > { %v1373_v14 = vmul.f32 0.03125, %v1329_v48  ;;  %v1372_v63 = vmul.f32 0.03125, %v1326_v55  ;;  %9836 = vperm.xlu0 %9778, %v9835_v59  }
 0x3d3   : > { %v9840_v49 = vpack.i.bf16 %v1373_v14, %v1372_v63 }
 0x3d4   : > { %v1335_v3 = vpop.xlane.xlu1 %1334  ;;  %v1332_v11 = vpop.xlane.xlu0 %1331 }
 0x3d5   : > { %9841 = vperm.xlu1 %9784, %v9840_v49   ;;  %v1375_v24 = vmul.f32 0.03125, %v1335_v3  ;;  %v1374_v58 = vmul.f32 0.03125, %v1332_v11 }
 0x3d7   : > { %v9845_v27 = vpack.i.bf16 %v1375_v24, %v1374_v58  ;;  %v1440_v58 = vsel %vm916_vm3, %v11006_v25, -inf }
 0x3d8   : > { %v1341_v9 = vpop.xlane.xlu1 %1340  ;;  %v1338_v19 = vpop.xlane.xlu0 %1337 }
 0x3d9   : > { %v1377_v26 = vmul.f32 0.03125, %v1341_v9  ;;  %v1376_v33 = vmul.f32 0.03125, %v1338_v19 }
 0x3db   : > { %v9850_v48 = vpack.i.bf16 %v1377_v26, %v1376_v33 }
 0x3dc   : > { %v1347_v42 = vpop.xlane.xlu1 %1346  ;;  %v1344_v7 = vpop.xlane.xlu0 %1343 }
 0x3dd   : > { %v1379_v53 = vmul.f32 0.03125, %v1347_v42  ;;  %v1378_v40 = vmul.f32 0.03125, %v1344_v7 }
 0x3df   : > { %v9855_v55 = vpack.i.bf16 %v1379_v53, %v1378_v40 }
 0x3e0   : > { %v11110_v12 = vpop.xlane.xlu1 %1381  ;;  %v11112_v31 = vpop.xlane.xlu0 %1384 }
 0x3e4   : > { %v11116_v22 = vpop.xlane.xlu1 %1387  ;;  %v11118_v44 = vpop.xlane.xlu0 %1393 }
 0x3e8   : > { %v11120_v32 = vpop.xlane.xlu1 %1390  ;;  %v11122_v6 = vpop.xlane.xlu0 %1399 }
 0x3ec   : > { %v11124_v17 = vpop.xlane.xlu1 %1396  ;;  %v11126_v59 = vpop.xlane.xlu0 %1402 }
 0x3f0   : > { %1435 = vmax.xlane.f32.xlu0 %v1434_v21  ;;  %v11128_v14 = vpop.xlane.xlu1 %1408  ;;  %v11130_v63 = vpop.xlane.xlu0 %1405 }
 0x3f4   : > { %v11132_v49 = vpop.xlane.xlu1 %1414  ;;  %v11134_v3 = vpop.xlane.xlu0 %1411 }
 0x3f8   : > { %v11136_v11 = vpop.xlane.xlu1 %1420  ;;  %v11138_v9 = vpop.xlane.xlu0 %1417 }
 0x3f9   : > { %1438 = vmax.xlane.f32.xlu1 %v1437_v18 }
 0x3fc   : > { %v11140_v19 = vpop.xlane.xlu1 %1426  ;;  %v11142_v42 = vpop.xlane.xlu0 %1423 }
 0x400   : > { %v11144_v7 = vpop.xlane.xlu1 %1432  ;;  %v11146_v21 = vpop.xlane.xlu0 %1429 }
 0x406   : > { %9846 = vperm.xlu0 %9778, %v9845_v27  }
 0x40a   : > { %9851 = vperm.xlu0 %9778, %v9850_v48   ;;  %9856 = vperm.xlu1 %9784, %v9855_v55   ;;  %v1446_v55 = vsel %vm916_vm3, %v11018_v52, -inf }
 0x428   : > { %v9787_v18 = vpop.permute.xlu1 %9786  ;;  %v9781_v24 = vpop.permute.xlu0 %9780 }
 0x429   : > { %v9783_v27 = vunpack.i.h.bf16 %v9781_v24  ;;  %v9782_v26 = vunpack.i.l.bf16 %v9781_v24  ;;  %1441 = vmax.xlane.f32.xlu0 %v1440_v58  ;;  %v9789_v33 = vunpack.i.h.bf16 %v9787_v18  ;;  %v9788_v53 = vunpack.i.l.bf16 %v9787_v18 }
 0x42a   : > { %v1452_v18 = vsel %vm916_vm3, %v11030_v16, -inf  ;;  %v1449_v58 = vsel %vm916_vm3, %v11014_v34, -inf }
 0x42b   : > { %v9054_v40 = vpack.c.bf16 %v9783_v27, %v9782_v26  ;;  %v9057_v39 = vpack.c.bf16 %v9789_v33, %v9788_v53  ;;  %v1458_v33 = vsel %vm916_vm3, %v11042_v45, -inf  ;;  %v1455_v53 = vsel %vm916_vm3, %v11026_v56, -inf }
 0x42c   : > { %v9792_v48 = vpop.permute.xlu1 %9791 }
 0x42d   : > { %1447 = vmax.xlane.f32.xlu0 %v1446_v55  ;;  %9055 = vmatpush1.bf16.msra.mxu0 %v9054_v40  ;;  %v9794_v35 = vunpack.i.h.bf16 %v9792_v48  ;;  %v9793_v25 = vunpack.i.l.bf16 %v9792_v48 }
 0x42e   : > { %1444 = vmax.xlane.f32.xlu1 %v1443_v37  ;;  %9056 = vmatprep.subr.bf16.mxu0 %v13956_v36 }
 0x42f   : > { %v9060_v27 = vpack.c.bf16 %v9794_v35, %v9793_v25  ;;  %v1464_v35 = vsel %vm916_vm3, %v11054_v13, -inf  ;;  %v1461_v25 = vsel %vm916_vm3, %v11038_v47, -inf }
 0x430   : > { %v9797_v24 = vpop.permute.xlu1 %9796 }
 0x431   : > { %1453 = vmax.xlane.f32.xlu0 %v1452_v18  ;;  %9058 = vmatpush1.bf16.msra.mxu0 %v9057_v39  ;;  %v9799_v26 = vunpack.i.h.bf16 %v9797_v24  ;;  %v9798_v37 = vunpack.i.l.bf16 %v9797_v24 }
 0x432   : > { %1450 = vmax.xlane.f32.xlu1 %v1449_v58  ;;  %9059 = vmatprep.subr.bf16.mxu0 %v13956_v36 }
 0x433   : > { %v9063_v39 = vpack.c.bf16 %v9799_v26, %v9798_v37  ;;  %v1470_v26 = vsel %vm916_vm3, %v11066_v38, -inf  ;;  %v1467_v37 = vsel %vm916_vm3, %v11050_v46, -inf }
 0x434   : > { %v9802_v40 = vpop.permute.xlu1 %9801 }
 0x435   : > { %1459 = vmax.xlane.f32.xlu0 %v1458_v33  ;;  %9061 = vmatpush1.bf16.msra.mxu0 %v9060_v27  ;;  %v9804_v48 = vunpack.i.h.bf16 %v9802_v40  ;;  %v9803_v55 = vunpack.i.l.bf16 %v9802_v40 }
 0x436   : > { %1456 = vmax.xlane.f32.xlu1 %v1455_v53  ;;  %9062 = vmatprep.subr.bf16.mxu0 %v13956_v36 }
 0x437   : > { %v9066_v24 = vpack.c.bf16 %v9804_v48, %v9803_v55  ;;  %v1473_v48 = vsel %vm916_vm3, %v11062_v1, -inf }
 0x438   : > { %v9807_v18 = vpop.permute.xlu1 %9806 }
 0x439   : > { %1465 = vmax.xlane.f32.xlu0 %v1464_v35  ;;  %9064 = vmatpush1.bf16.msra.mxu0 %v9063_v39  ;;  %v9809_v58 = vunpack.i.h.bf16 %v9807_v18  ;;  %v9808_v27 = vunpack.i.l.bf16 %v9807_v18 }
 0x43a   : > { %1462 = vmax.xlane.f32.xlu1 %v1461_v25  ;;  %9065 = vmatprep.subr.bf16.mxu0 %v13956_v36 }
 0x43b   : > { %v9069_v40 = vpack.c.bf16 %v9809_v58, %v9808_v27 }
 0x43c   : > { %v9812_v33 = vpop.permute.xlu1 %9811 }
 0x43d   : > { %1471 = vmax.xlane.f32.xlu0 %v1470_v26  ;;  %9067 = vmatpush1.bf16.msra.mxu0 %v9066_v24  ;;  %v9814_v53 = vunpack.i.h.bf16 %v9812_v33  ;;  %v9813_v39 = vunpack.i.l.bf16 %v9812_v33 }
 0x43e   : > { %1468 = vmax.xlane.f32.xlu1 %v1467_v37  ;;  %9068 = vmatprep.subr.bf16.mxu0 %v13956_v36 }
 0x43f   : > { %v9072_v55 = vpack.c.bf16 %v9814_v53, %v9813_v39 }
 0x440   : > { %v9817_v35 = vpop.permute.xlu1 %9816 }
 0x441   : > { %9070 = vmatpush1.bf16.msra.mxu0 %v9069_v40  ;;  %v9819_v18 = vunpack.i.h.bf16 %v9817_v35  ;;  %v9818_v25 = vunpack.i.l.bf16 %v9817_v35 }
 0x442   : > { %1474 = vmax.xlane.f32.xlu1 %v1473_v48  ;;  %9071 = vmatprep.subr.bf16.mxu0 %v13956_v36 }
 0x443   : > { %v9075_v26 = vpack.c.bf16 %v9819_v18, %v9818_v25  ;;  %v9860_v18 = vpack.i.bf16 %v11112_v31, %v11110_v12  ;;  %v9865_v25 = vpack.i.bf16 %v11120_v32, %v11116_v22  ;;  %v789_v12 = vld [vmem:[%s13942_s5 + $0x8] sm:$0xff] }
 0x444   : > { %v9822_v24 = vpop.permute.xlu1 %9821  ;;  %1860 = vmatprep.mubr.f32.mxu0 %v789_v12  ;;  %v804_v12 = vld [vmem:[%s13942_s5 + $0x80] sm:$0xff] }
 0x445   : > { %9073 = vmatpush1.bf16.msra.mxu0 %v9072_v55  ;;  %v9824_v37 = vunpack.i.h.bf16 %v9822_v24  ;;  %v9823_v58 = vunpack.i.l.bf16 %v9822_v24 }
 0x446   : > { %9074 = vmatprep.subr.bf16.mxu0 %v13956_v36 }
 0x447   : > { %v9078_v33 = vpack.c.bf16 %v9824_v37, %v9823_v58 }
 0x448   : > { %v9827_v27 = vpop.permute.xlu0 %9826 }
 0x449   : > { %9076 = vmatpush1.bf16.msra.mxu0 %v9075_v26  ;;  %v9829_v40 = vunpack.i.h.bf16 %v9827_v27  ;;  %v9828_v1 = vunpack.i.l.bf16 %v9827_v27  ;;  %v9875_v27 = vpack.i.bf16 %v11126_v59, %v11122_v6  ;;  %v9895_v59 = vpack.i.bf16 %v11140_v19, %v11142_v42 }
 0x44a   : > { %9077 = vmatprep.subr.bf16.mxu0 %v13956_v36 }
 0x44b   : > { %v9081_v53 = vpack.c.bf16 %v9829_v40, %v9828_v1  ;;  %v9870_v1 = vpack.i.bf16 %v11124_v17, %v11118_v44  ;;  %v9885_v44 = vpack.i.bf16 %v11132_v49, %v11134_v3  ;;  %v9890_v17 = vpack.i.bf16 %v11136_v11, %v11138_v9 }
 0x44c   : > { %v9832_v48 = vpop.permute.xlu1 %9831 }
 0x44d   : > { %9079 = vmatpush1.bf16.msra.mxu0 %v9078_v33  ;;  %v9834_v39 = vunpack.i.h.bf16 %v9832_v48  ;;  %v9833_v35 = vunpack.i.l.bf16 %v9832_v48  ;;  %v9880_v33 = vpack.i.bf16 %v11128_v14, %v11130_v63  ;;  %v9900_v14 = vpack.i.bf16 %v11144_v7, %v11146_v21  ;;  %v788_v21 = vld [vmem:[%s13942_s5] sm:$0xff] }
 0x44e   : > { %9080 = vmatprep.subr.bf16.mxu0 %v13956_v36 }
 0x44f   : > { %v9084_v24 = vpack.c.bf16 %v9834_v39, %v9833_v35 }
 0x450   : > { %v9837_v55 = vpop.permute.xlu0 %9836 }
 0x451   : > { %9082 = vmatpush1.bf16.msra.mxu0 %v9081_v53  ;;  %v9839_v26 = vunpack.i.h.bf16 %v9837_v55  ;;  %v9838_v37 = vunpack.i.l.bf16 %v9837_v55 }
 0x452   : > { %9083 = vmatprep.subr.bf16.mxu0 %v13956_v36 }
 0x453   : > { %9866 = vperm.xlu1 %9784, %v9865_v25   ;;  %9861 = vperm.xlu0 %9778, %v9860_v18   ;;  %v9087_v31 = vpack.c.bf16 %v9839_v26, %v9838_v37  ;;  %v793_v25 = vld [vmem:[%s13942_s5 + $0x28] sm:$0xff]  ;;  %v796_v37 = vld [vmem:[%s13942_s5 + $0x40] sm:$0xff] }
 0x454   : > { %v9842_v58 = vpop.permute.xlu1 %9841  ;;  %v797_v26 = vld [vmem:[%s13942_s5 + $0x48] sm:$0xff] }
 0x455   : > { %9085 = vmatpush1.bf16.msra.mxu0 %v9084_v24  ;;  %v9844_v22 = vunpack.i.h.bf16 %v9842_v58  ;;  %v9843_v32 = vunpack.i.l.bf16 %v9842_v58  ;;  %v792_v24 = vld [vmem:[%s13942_s5 + $0x20] sm:$0xff]  ;;  %v801_v58 = vld [vmem:[%s13942_s5 + $0x68] sm:$0xff] }
 0x456   : > { %9086 = vmatprep.subr.bf16.mxu0 %v13956_v36 }
 0x457   : > { %9871 = vperm.xlu1 %9784, %v9870_v1   ;;  %9876 = vperm.xlu0 %9778, %v9875_v27   ;;  %v9090_v6 = vpack.c.bf16 %v9844_v22, %v9843_v32  ;;  %v800_v1 = vld [vmem:[%s13942_s5 + $0x60] sm:$0xff]  ;;  %v805_v27 = vld [vmem:[%s13942_s5 + $0x88] sm:$0xff] }
 0x458   : > { %v808_v22 = vld [vmem:[%s13942_s5 + $0xa0] sm:$0xff]  ;;  %v813_v32 = vld [vmem:[%s13942_s5 + $0xc8] sm:$0xff] }
 0x459   : > { %9088 = vmatpush1.bf16.msra.mxu0 %v9087_v31  ;;  %v809_v31 = vld [vmem:[%s13942_s5 + $0xa8] sm:$0xff] }
 0x45a   : > { %9089 = vmatprep.subr.bf16.mxu0 %v13956_v36 }
 0x45b   : > { %9881 = vperm.xlu1 %9784, %v9880_v33   ;;  %9886 = vperm.xlu0 %9778, %v9885_v44   ;;  %v812_v33 = vld [vmem:[%s13942_s5 + $0xc0] sm:$0xff]  ;;  %v817_v44 = vld [vmem:[%s13942_s5 + $0xe8] sm:$0xff] }
 0x45d   : > { %9091 = vmatpush1.bf16.msra.mxu0 %v9090_v6  ;;  %v816_v6 = vld [vmem:[%s13942_s5 + $0xe0] sm:$0xff] }
 0x45e   : > { %9092 = vmatprep.subr.bf16.mxu0 %v13956_v36 }
 0x45f   : > { %9891 = vperm.xlu1 %9784, %v9890_v17   ;;  %9896 = vperm.xlu0 %9778, %v9895_v59   ;;  %v821_v17 = vld [vmem:[%s13942_s5 + $0x108] sm:$0xff]  ;;  %v820_v59 = vld [vmem:[%s13942_s5 + $0x100] sm:$0xff] }
 0x463   : > { %9901 = vperm.xlu1 %9784, %v9900_v14   ;;  %v825_v14 = vld [vmem:[%s13942_s5 + $0x128] sm:$0xff] }
 0x47d   : > { %v1436_v63 = vpop.xlane.xlu0 %1435 }
 0x485   : > { %v9847_v49 = vpop.permute.xlu0 %9846 }
 0x486   : > { %v9849_v3 = vunpack.i.h.bf16 %v9847_v49  ;;  %v9848_v40 = vunpack.i.l.bf16 %v9847_v49  ;;  %v1439_v48 = vpop.xlane.xlu1 %1438  ;;  %v824_v49 = vld [vmem:[%s13942_s5 + $0x120] sm:$0xff] }
 0x487   : > { %v9905_v53 = vpack.i.bf16 %v1439_v48, %v1436_v63  ;;  %v828_v48 = vld [vmem:[%s13942_s5 + $0x140] sm:$0xff] }
 0x488   : > { %v9093_v39 = vpack.c.bf16 %v9849_v3, %v9848_v40  ;;  %v829_v3 = vld [vmem:[%s13942_s5 + $0x148] sm:$0xff] }
 0x489   : > { %9906 = vperm.xlu0 %9778, %v9905_v53   ;;  %v9852_v11 = vpop.permute.xlu0 %9851 }
 0x48a   : > { %v9854_v9 = vunpack.i.h.bf16 %v9852_v11  ;;  %v9853_v19 = vunpack.i.l.bf16 %v9852_v11  ;;  %v9857_v42 = vpop.permute.xlu1 %9856  ;;  %9094 = vmatpush1.bf16.msra.mxu0 %v9093_v39  ;;  %v833_v39 = vld [vmem:[%s13942_s5 + $0x168] sm:$0xff] }
 0x48b   : > { %9095 = vmatprep.subr.bf16.mxu0 %v13956_v36  ;;  %v9859_v55 = vunpack.i.h.bf16 %v9857_v42  ;;  %v9858_v18 = vunpack.i.l.bf16 %v9857_v42 }
 0x48c   : > { %v9096_v35 = vpack.c.bf16 %v9854_v9, %v9853_v19  ;;  %v832_v19 = vld [vmem:[%s13942_s5 + $0x160] sm:$0xff] }
 0x48d   : > { %v9099_v7 = vpack.c.bf16 %v9859_v55, %v9858_v18 }
 0x48e   : > { %9097 = vmatpush1.bf16.msra.mxu0 %v9096_v35  ;;  %v837_v35 = vld [vmem:[%s13942_s5 + $0x188] sm:$0xff] }
 0x48f   : > { %9098 = vmatprep.subr.bf16.mxu0 %v13956_v36 }
 0x492   : > { %9100 = vmatpush1.bf16.msra.mxu0 %v9099_v7  ;;  %v836_v7 = vld [vmem:[%s13942_s5 + $0x180] sm:$0xff] }
 0x493   : > { %9101 = vmatprep.subr.bf16.mxu0 %v13956_v36 }
 0x495   : > { %1861 = vmatmul.mubr.f32.vlgmr.msra.gmra.mrb[32].mxu0 %v788_v21 }
 0x496   : > { %1865 = vmatprep.mubr.f32.mxu0 %v793_v25  ;;  %v841_v25 = vld [vmem:[%s13942_s5 + $0x1a8] sm:$0xff] }
 0x499   : > { %1866 = vmatmul.mubr.f32.gmra.mrb[34].mxu0 %v792_v24 }
 0x49a   : > { %1870 = vmatprep.mubr.f32.mxu0 %v797_v26  ;;  %v840_v26 = vld [vmem:[%s13942_s5 + $0x1a0] sm:$0xff] }
 0x49d   : > { %1871 = vmatmul.mubr.f32.gmra.mrb[36].mxu0 %v796_v37 }
 0x49e   : > { %1875 = vmatprep.mubr.f32.mxu0 %v801_v58  ;;  %v845_v58 = vld [vmem:[%s13942_s5 + $0x1c8] sm:$0xff] }
 0x4a1   : > { %1876 = vmatmul.mubr.f32.gmra.mrb[38].mxu0 %v800_v1 }
 0x4a2   : > { %1880 = vmatprep.mubr.f32.mxu0 %v805_v27 }
 0x4a5   : > { %1881 = vmatmul.mubr.f32.gmra.mrb[40].mxu0 %v804_v12  ;;  %v844_v12 = vld [vmem:[%s13942_s5 + $0x1c0] sm:$0xff] }
 0x4a6   : > { %1885 = vmatprep.mubr.f32.mxu0 %v809_v31 }
 0x4a9   : > { %1886 = vmatmul.mubr.f32.gmra.mrb[42].mxu0 %v808_v22  ;;  %v849_v22 = vld [vmem:[%s13942_s5 + $0x1e8] sm:$0xff] }
 0x4aa   : > { %1890 = vmatprep.mubr.f32.mxu0 %v813_v32 }
 0x4ad   : > { %1891 = vmatmul.mubr.f32.gmra.mrb[44].mxu0 %v812_v33 }
 0x4ae   : > { %1895 = vmatprep.mubr.f32.mxu0 %v817_v44  ;;  %v848_v44 = vld [vmem:[%s13942_s5 + $0x1e0] sm:$0xff] }
 0x4b1   : > { %1896 = vmatmul.mubr.f32.gmra.mrb[46].mxu0 %v816_v6 }
 0x4b2   : > { %1900 = vmatprep.mubr.f32.mxu0 %v821_v17  ;;  %v853_v17 = vld [vmem:[%s13942_s5 + $0x208] sm:$0xff] }
 0x4b5   : > { %1901 = vmatmul.mubr.f32.gmra.mrb[48].mxu0 %v820_v59 }
 0x4b6   : > { %v1442_v63 = vpop.xlane.xlu0 %1441  ;;  %1905 = vmatprep.mubr.f32.mxu0 %v825_v14 }
 0x4b9   : > { %1906 = vmatmul.mubr.f32.gmra.mrb[50].mxu0 %v824_v49 }
 0x4ba   : > { %v1448_v40 = vpop.xlane.xlu0 %1447  ;;  %1910 = vmatprep.mubr.f32.mxu0 %v829_v3 }
 0x4bb   : > { %v1445_v53 = vpop.xlane.xlu1 %1444 }
 0x4bc   : > { %v9910_v11 = vpack.i.bf16 %v1445_v53, %v1442_v63  ;;  %v852_v63 = vld [vmem:[%s13942_s5 + $0x200] sm:$0xff] }
 0x4bd   : > { %1911 = vmatmul.mubr.f32.gmra.mrb[52].mxu0 %v828_v48  ;;  %v857_v48 = vld [vmem:[%s13942_s5 + $0x228] sm:$0xff] }
 0x4be   : > { %9911 = vperm.xlu1 %9784, %v9910_v11   ;;  %v1454_v9 = vpop.xlane.xlu0 %1453  ;;  %1915 = vmatprep.mubr.f32.mxu0 %v833_v39 }
 0x4bf   : > { %v1451_v42 = vpop.xlane.xlu1 %1450 }
 0x4c0   : > { %v9915_v55 = vpack.i.bf16 %v1451_v42, %v1448_v40  ;;  %v861_v42 = vld [vmem:[%s13942_s5 + $0x248] sm:$0xff] }
 0x4c1   : > { %1916 = vmatmul.mubr.f32.gmra.mrb[54].mxu0 %v832_v19 }
 0x4c2   : > { %9916 = vperm.xlu0 %9778, %v9915_v55   ;;  %v1460_v18 = vpop.xlane.xlu0 %1459  ;;  %1920 = vmatprep.mubr.f32.mxu0 %v837_v35 }
 0x4c3   : > { %v1457_v21 = vpop.xlane.xlu1 %1456 }
 0x4c4   : > { %v9920_v24 = vpack.i.bf16 %v1457_v21, %v1454_v9  ;;  %v856_v9 = vld [vmem:[%s13942_s5 + $0x220] sm:$0xff] }
 0x4c5   : > { %1921 = vmatmul.mubr.f32.gmra.mrb[56].mxu0 %v836_v7  ;;  %v860_v21 = vld [vmem:[%s13942_s5 + $0x240] sm:$0xff] }
 0x4c6   : > { %9921 = vperm.xlu1 %9784, %v9920_v24   ;;  %1925 = vmatprep.mubr.f32.mxu0 %v841_v25  ;;  %v1466_v1 = vpop.xlane.xlu0 %1465  ;;  %v865_v25 = vld [vmem:[%s13942_s5 + $0x268] sm:$0xff] }
 0x4c7   : > { %v1463_v37 = vpop.xlane.xlu1 %1462 }
 0x4c8   : > { %v9925_v27 = vpack.i.bf16 %v1463_v37, %v1460_v18 }
 0x4c9   : > { %1926 = vmatmul.mubr.f32.gmra.mrb[58].mxu0 %v840_v26 }
 0x4ca   : > { %9926 = vperm.xlu0 %9778, %v9925_v27   ;;  %1930 = vmatprep.mubr.f32.mxu0 %v845_v58  ;;  %v1472_v33 = vpop.xlane.xlu0 %1471  ;;  %v869_v27 = vld [vmem:[%s13942_s5 + $0x288] sm:$0xff] }
 0x4cb   : > { %v1469_v31 = vpop.xlane.xlu1 %1468 }
 0x4cc   : > { %v9930_v32 = vpack.i.bf16 %v1469_v31, %v1466_v1  ;;  %v864_v1 = vld [vmem:[%s13942_s5 + $0x260] sm:$0xff] }
 0x4cd   : > { %1931 = vmatmul.mubr.f32.gmra.mrb[60].mxu0 %v844_v12 }
 0x4ce   : > { %9931 = vperm.xlu1 %9784, %v9930_v32   ;;  %1935 = vmatprep.mubr.f32.mxu0 %v849_v22 }
 0x4cf   : > { %v1475_v6 = vpop.xlane.xlu1 %1474 }
 0x4d0   : > { %v9935_v59 = vpack.i.bf16 %v1475_v6, %v1472_v33  ;;  %v868_v33 = vld [vmem:[%s13942_s5 + $0x280] sm:$0xff] }
 0x4d1   : > { %1936 = vmatmul.mubr.f32.gmra.mrb[62].mxu0 %v848_v44  ;;  %v873_v44 = vld [vmem:[%s13942_s5 + $0x2a8] sm:$0xff] }
 0x4d2   : > { %9936 = vperm.xlu0 %9778, %v9935_v59   ;;  %v9862_v14 = vpop.permute.xlu0 %9861  ;;  %1940 = vmatprep.mubr.f32.mxu0 %v853_v17 }
 0x4d3   : > { %v9864_v49 = vunpack.i.h.bf16 %v9862_v14  ;;  %v9863_v3 = vunpack.i.l.bf16 %v9862_v14  ;;  %v9867_v40 = vpop.permute.xlu1 %9866 }
 0x4d4   : > { %v9869_v39 = vunpack.i.h.bf16 %v9867_v40  ;;  %v9868_v11 = vunpack.i.l.bf16 %v9867_v40 }
 0x4d5   : > { %v9102_v53 = vpack.c.bf16 %v9864_v49, %v9863_v3  ;;  %1941 = vmatmul.mubr.f32.gmra.mrb[64].mxu0 %v852_v63  ;;  %v872_v63 = vld [vmem:[%s13942_s5 + $0x2a0] sm:$0xff]  ;;  %v877_v49 = vld [vmem:[%s13942_s5 + $0x2c8] sm:$0xff] }
 0x4d6   : > { %1945 = vmatprep.mubr.f32.mxu0 %v857_v48  ;;  %v9105_v35 = vpack.c.bf16 %v9869_v39, %v9868_v11  ;;  %v9877_v7 = vpop.permute.xlu0 %9876  ;;  %v876_v39 = vld [vmem:[%s13942_s5 + $0x2c0] sm:$0xff]  ;;  %v881_v11 = vld [vmem:[%s13942_s5 + $0x2e8] sm:$0xff] }
 0x4d7   : > { %v9872_v19 = vpop.permute.xlu1 %9871  ;;  %9103 = vmatpush1.bf16.msra.mxu0 %v9102_v53  ;;  %v9879_v24 = vunpack.i.h.bf16 %v9877_v7  ;;  %v9878_v26 = vunpack.i.l.bf16 %v9877_v7 }
 0x4d8   : > { %9104 = vmatprep.subr.bf16.mxu0 %v13956_v36  ;;  %v9874_v55 = vunpack.i.h.bf16 %v9872_v19  ;;  %v9873_v18 = vunpack.i.l.bf16 %v9872_v19 }
 0x4d9   : > { %1946 = vmatmul.mubr.f32.gmra.mrb[66].mxu0 %v856_v9  ;;  %v9111_v12 = vpack.c.bf16 %v9879_v24, %v9878_v26  ;;  %v884_v24 = vld [vmem:[%s13942_s5 + $0x300] sm:$0xff]  ;;  %v889_v26 = vld [vmem:[%s13942_s5 + $0x328] sm:$0xff] }
 0x4da   : > { %1950 = vmatprep.mubr.f32.mxu0 %v861_v42  ;;  %v9108_v37 = vpack.c.bf16 %v9874_v55, %v9873_v18  ;;  %v9887_v32 = vpop.permute.xlu0 %9886  ;;  %v880_v55 = vld [vmem:[%s13942_s5 + $0x2e0] sm:$0xff]  ;;  %v885_v18 = vld [vmem:[%s13942_s5 + $0x308] sm:$0xff] }
 0x4db   : > { %9106 = vmatpush1.bf16.msra.mxu0 %v9105_v35  ;;  %v9882_v58 = vpop.permute.xlu1 %9881  ;;  %v9889_v6 = vunpack.i.h.bf16 %v9887_v32  ;;  %v9888_v17 = vunpack.i.l.bf16 %v9887_v32  ;;  %v900_v32 = vld [vmem:[%s13942_s5 + $0x380] sm:$0xff] }
 0x4dc   : > { %9107 = vmatprep.subr.bf16.mxu0 %v13956_v36  ;;  %v9884_v31 = vunpack.i.h.bf16 %v9882_v58  ;;  %v9883_v22 = vunpack.i.l.bf16 %v9882_v58  ;;  %v888_v58 = vld [vmem:[%s13942_s5 + $0x320] sm:$0xff] }
 0x4dd   : > { %1951 = vmatmul.mubr.f32.gmra.mrb[68].mxu0 %v860_v21  ;;  %v9117_v3 = vpack.c.bf16 %v9889_v6, %v9888_v17  ;;  %v909_v6 = vld [vmem:[%s13942_s5 + $0x3c8] sm:$0xff] }
 0x4de   : > { %1955 = vmatprep.mubr.f32.mxu0 %v865_v25  ;;  %v9114_v59 = vpack.c.bf16 %v9884_v31, %v9883_v22  ;;  %v9897_v53 = vpop.permute.xlu0 %9896  ;;  %v896_v31 = vld [vmem:[%s13942_s5 + $0x360] sm:$0xff]  ;;  %v901_v22 = vld [vmem:[%s13942_s5 + $0x388] sm:$0xff] }
 0x4df   : > { %9109 = vmatpush1.bf16.msra.mxu0 %v9108_v37  ;;  %v9892_v14 = vpop.permute.xlu1 %9891  ;;  %v9899_v9 = vunpack.i.h.bf16 %v9897_v53  ;;  %v9898_v19 = vunpack.i.l.bf16 %v9897_v53 }
 0x4e0   : > { %9110 = vmatprep.subr.bf16.mxu0 %v13956_v36  ;;  %v9894_v40 = vunpack.i.h.bf16 %v9892_v14  ;;  %v9893_v48 = vunpack.i.l.bf16 %v9892_v14 }
 0x4e1   : > { %1956 = vmatmul.mubr.f32.gmra.mrb[70].mxu0 %v864_v1  ;;  %v9123_v7 = vpack.c.bf16 %v9899_v9, %v9898_v19  ;;  %v893_v1 = vld [vmem:[%s13942_s5 + $0x348] sm:$0xff] }
 0x4e2   : > { %1960 = vmatprep.mubr.f32.mxu0 %v869_v27  ;;  %v9120_v42 = vpack.c.bf16 %v9894_v40, %v9893_v48  ;;  %v892_v27 = vld [vmem:[%s13942_s5 + $0x340] sm:$0xff]  ;;  %v791_v48 = vld [vmem:[%s13942_s5 + $0x18] sm:$0xff] }
 0x4e3   : > { %9112 = vmatpush1.bf16.msra.mxu0 %v9111_v12  ;;  %v9902_v35 = vpop.permute.xlu1 %9901  ;;  %v897_v12 = vld [vmem:[%s13942_s5 + $0x368] sm:$0xff]  ;;  %v912_v40 = vld [vmem:[%s13942_s5 + $0x3e0] sm:$0xff] }
 0x4e4   : > { %9113 = vmatprep.subr.bf16.mxu0 %v13956_v36  ;;  %v9904_v21 = vunpack.i.h.bf16 %v9902_v35  ;;  %v9903_v25 = vunpack.i.l.bf16 %v9902_v35 }
 0x4e5   : > { %1961 = vmatmul.mubr.f32.gmra.mrb[72].mxu0 %v868_v33  ;;  %v905_v33 = vld [vmem:[%s13942_s5 + $0x3a8] sm:$0xff] }
 0x4e6   : > { %1965 = vmatprep.mubr.f32.mxu0 %v873_v44  ;;  %v9126_v37 = vpack.c.bf16 %v9904_v21, %v9903_v25  ;;  %v904_v44 = vld [vmem:[%s13942_s5 + $0x3a0] sm:$0xff] }
 0x4e7   : > { %9115 = vmatpush1.bf16.msra.mxu0 %v9114_v59 }
 0x4e8   : > { %9116 = vmatprep.subr.bf16.mxu0 %v13956_v36 }
 0x4e9   : > { %1966 = vmatmul.mubr.f32.gmra.mrb[74].mxu0 %v872_v63 }
 0x4ea   : > { %1970 = vmatprep.mubr.f32.mxu0 %v877_v49  ;;  %v908_v49 = vld [vmem:[%s13942_s5 + $0x3c0] sm:$0xff] }
 0x4eb   : > { %9118 = vmatpush1.bf16.msra.mxu0 %v9117_v3  ;;  %v913_v3 = vld [vmem:[%s13942_s5 + $0x3e8] sm:$0xff] }
 0x4ec   : > { %9119 = vmatprep.subr.bf16.mxu0 %v13956_v36 }
 0x4ed   : > { %1971 = vmatmul.mubr.f32.gmra.mrb[76].mxu0 %v876_v39 }
 0x4ee   : > { %1975 = vmatprep.mubr.f32.mxu0 %v881_v11 }
 0x4ef   : > { %9121 = vmatpush1.bf16.msra.mxu0 %v9120_v42 }
 0x4f0   : > { %9122 = vmatprep.subr.bf16.mxu0 %v13956_v36 }
 0x4f1   : > { %1976 = vmatmul.mubr.f32.gmra.mrb[78].mxu0 %v880_v55 }
 0x4f2   : > { %1980 = vmatprep.mubr.f32.mxu0 %v885_v18 }
 0x4f3   : > { %9124 = vmatpush1.bf16.msra.mxu0 %v9123_v7 }
 0x4f4   : > { %9125 = vmatprep.subr.bf16.mxu0 %v13956_v36 }
 0x4f5   : > { %1981 = vmatmul.mubr.f32.gmra.mrb[80].mxu0 %v884_v24 }
 0x4f6   : > { %1985 = vmatprep.mubr.f32.mxu0 %v889_v26 }
 0x4f7   : > { %9127 = vmatpush1.bf16.msra.mxu0 %v9126_v37 }
 0x4f8   : > { %9128 = vmatprep.subr.bf16.mxu0 %v13956_v36 }
 0x4f9   : > { %1986 = vmatmul.mubr.f32.gmra.mrb[82].mxu0 %v888_v58 }
 0x4fa   : > { %1990 = vmatprep.mubr.f32.mxu0 %v893_v1 }
 0x4fd   : > { %1991 = vmatmul.mubr.f32.gmra.mrb[84].mxu0 %v892_v27 }
 0x4fe   : > { %1995 = vmatprep.mubr.f32.mxu0 %v897_v12 }
 0x501   : > { %1996 = vmatmul.mubr.f32.gmra.mrb[86].mxu0 %v896_v31 }
 0x502   : > { %2000 = vmatprep.mubr.f32.mxu0 %v901_v22 }
 0x505   : > { %2001 = vmatmul.mubr.f32.gmra.mrb[88].mxu0 %v900_v32 }
 0x506   : > { %2005 = vmatprep.mubr.f32.mxu0 %v905_v33 }
 0x508   : > { %v9907_v17 = vpop.permute.xlu0 %9906 }
 0x509   : > { %v9909_v59 = vunpack.i.h.bf16 %v9907_v17  ;;  %v9908_v14 = vunpack.i.l.bf16 %v9907_v17  ;;  %2006 = vmatmul.mubr.f32.gmra.mrb[90].mxu0 %v904_v44  ;;  %v795_v17 = vld [vmem:[%s13942_s5 + $0x38] sm:$0xff] }
 0x50a   : > { %2010 = vmatprep.mubr.f32.mxu0 %v909_v6  ;;  %v790_v6 = vld [vmem:[%s13942_s5 + $0x10] sm:$0xff] }
 0x50b   : > { %v9129_v63 = vpack.c.bf16 %v9909_v59, %v9908_v14  ;;  %v794_v59 = vld [vmem:[%s13942_s5 + $0x30] sm:$0xff]  ;;  %v799_v14 = vld [vmem:[%s13942_s5 + $0x58] sm:$0xff] }
 0x50d   : > { %9130 = vmatpush1.bf16.msra.mxu0 %v9129_v63  ;;  %v798_v63 = vld [vmem:[%s13942_s5 + $0x50] sm:$0xff] }
 0x50e   : > { %9131 = vmatprep.subr.bf16.mxu0 %v13956_v36  ;;  %2011 = vmatmul.mubr.f32.gmra.mrb[92].mxu0 %v908_v49  ;;  %v803_v49 = vld [vmem:[%s13942_s5 + $0x78] sm:$0xff] }
 0x50f   : > { %2015 = vmatprep.mubr.f32.mxu0 %v913_v3  ;;  %v802_v3 = vld [vmem:[%s13942_s5 + $0x70] sm:$0xff] }
 0x512   : > { %2016 = vmatmul.mubr.f32.gmra.mrb[94].mxu0 %v912_v40  ;;  %v807_v40 = vld [vmem:[%s13942_s5 + $0x98] sm:$0xff] }
 0x513   : > { %2085 = vmatprep.mubr.f32.mxu0 %v791_v48  ;;  %v806_v48 = vld [vmem:[%s13942_s5 + $0x90] sm:$0xff] }
 0x53d   : > { %v9912_v53 = vpop.permute.xlu1 %9911 }
 0x53e   : > { %v9914_v39 = vunpack.i.h.bf16 %v9912_v53  ;;  %v9913_v11 = vunpack.i.l.bf16 %v9912_v53  ;;  %v811_v53 = vld [vmem:[%s13942_s5 + $0xb8] sm:$0xff] }
 0x540   : > { %v9132_v9 = vpack.c.bf16 %v9914_v39, %v9913_v11  ;;  %v810_v39 = vld [vmem:[%s13942_s5 + $0xb0] sm:$0xff]  ;;  %v815_v11 = vld [vmem:[%s13942_s5 + $0xd8] sm:$0xff] }
 0x541   : > { %v9917_v19 = vpop.permute.xlu0 %9916 }
 0x542   : > { %v9919_v42 = vunpack.i.h.bf16 %v9917_v19  ;;  %v9918_v35 = vunpack.i.l.bf16 %v9917_v19  ;;  %9133 = vmatpush1.bf16.msra.mxu0 %v9132_v9  ;;  %v814_v9 = vld [vmem:[%s13942_s5 + $0xd0] sm:$0xff]  ;;  %v819_v19 = vld [vmem:[%s13942_s5 + $0xf8] sm:$0xff] }
 0x543   : > { %9134 = vmatprep.subr.bf16.mxu0 %v13956_v36 }
 0x544   : > { %v9135_v55 = vpack.c.bf16 %v9919_v42, %v9918_v35  ;;  %v818_v42 = vld [vmem:[%s13942_s5 + $0xf0] sm:$0xff]  ;;  %v823_v35 = vld [vmem:[%s13942_s5 + $0x118] sm:$0xff] }
 0x545   : > { %v9922_v18 = vpop.permute.xlu1 %9921 }
 0x546   : > { %v9924_v7 = vunpack.i.h.bf16 %v9922_v18  ;;  %v9923_v21 = vunpack.i.l.bf16 %v9922_v18  ;;  %9136 = vmatpush1.bf16.msra.mxu0 %v9135_v55  ;;  %v822_v55 = vld [vmem:[%s13942_s5 + $0x110] sm:$0xff]  ;;  %v827_v18 = vld [vmem:[%s13942_s5 + $0x138] sm:$0xff] }
 0x547   : > { %9137 = vmatprep.subr.bf16.mxu0 %v13956_v36 }
 0x548   : > { %v9138_v25 = vpack.c.bf16 %v9924_v7, %v9923_v21  ;;  %v826_v7 = vld [vmem:[%s13942_s5 + $0x130] sm:$0xff]  ;;  %v831_v21 = vld [vmem:[%s13942_s5 + $0x158] sm:$0xff] }
 0x549   : > { %v9927_v24 = vpop.permute.xlu0 %9926 }
 0x54a   : > { %v9929_v26 = vunpack.i.h.bf16 %v9927_v24  ;;  %v9928_v37 = vunpack.i.l.bf16 %v9927_v24  ;;  %9139 = vmatpush1.bf16.msra.mxu0 %v9138_v25  ;;  %v830_v25 = vld [vmem:[%s13942_s5 + $0x150] sm:$0xff]  ;;  %v835_v24 = vld [vmem:[%s13942_s5 + $0x178] sm:$0xff] }
 0x54b   : > { %9140 = vmatprep.subr.bf16.mxu0 %v13956_v36 }
 0x54c   : > { %v9141_v58 = vpack.c.bf16 %v9929_v26, %v9928_v37  ;;  %v834_v26 = vld [vmem:[%s13942_s5 + $0x170] sm:$0xff]  ;;  %v839_v37 = vld [vmem:[%s13942_s5 + $0x198] sm:$0xff] }
 0x54d   : > { %v9932_v1 = vpop.permute.xlu1 %9931 }
 0x54e   : > { %v9934_v27 = vunpack.i.h.bf16 %v9932_v1  ;;  %v9933_v12 = vunpack.i.l.bf16 %v9932_v1  ;;  %9142 = vmatpush1.bf16.msra.mxu0 %v9141_v58  ;;  %v838_v58 = vld [vmem:[%s13942_s5 + $0x190] sm:$0xff]  ;;  %v843_v1 = vld [vmem:[%s13942_s5 + $0x1b8] sm:$0xff] }
 0x54f   : > { %9143 = vmatprep.subr.bf16.mxu0 %v13956_v36 }
 0x550   : > { %v9144_v31 = vpack.c.bf16 %v9934_v27, %v9933_v12  ;;  %v842_v27 = vld [vmem:[%s13942_s5 + $0x1b0] sm:$0xff]  ;;  %v847_v12 = vld [vmem:[%s13942_s5 + $0x1d8] sm:$0xff] }
 0x551   : > { %v9937_v22 = vpop.permute.xlu0 %9936 }
 0x552   : > { %v9939_v32 = vunpack.i.h.bf16 %v9937_v22  ;;  %v9938_v33 = vunpack.i.l.bf16 %v9937_v22  ;;  %9145 = vmatpush1.bf16.msra.mxu0 %v9144_v31  ;;  %v846_v31 = vld [vmem:[%s13942_s5 + $0x1d0] sm:$0xff]  ;;  %v851_v22 = vld [vmem:[%s13942_s5 + $0x1f8] sm:$0xff] }
 0x553   : > { %9146 = vmatprep.subr.bf16.mxu0 %v13956_v36 }
 0x554   : > { %v9147_v44 = vpack.c.bf16 %v9939_v32, %v9938_v33  ;;  %v850_v32 = vld [vmem:[%s13942_s5 + $0x1f0] sm:$0xff]  ;;  %v855_v33 = vld [vmem:[%s13942_s5 + $0x218] sm:$0xff] }
 0x556   : > { %9148 = vmatpush1.bf16.msra.mxu0 %v9147_v44  ;;  %v854_v44 = vld [vmem:[%s13942_s5 + $0x210] sm:$0xff] }
 0x557   : > { %9221 = vmatprep.subr.bf16.mxu0 %v13956_v36 }
 0x559   : > { %2086 = vmatmul.mubr.f32.vlgmr.msra.gmra.mrb[32].mxu0 %v790_v6  ;;  %v859_v6 = vld [vmem:[%s13942_s5 + $0x238] sm:$0xff] }
 0x55a   : > { %2090 = vmatprep.mubr.f32.mxu0 %v795_v17  ;;  %v858_v17 = vld [vmem:[%s13942_s5 + $0x230] sm:$0xff] }
 0x55d   : > { %2091 = vmatmul.mubr.f32.gmra.mrb[34].mxu0 %v794_v59  ;;  %v863_v59 = vld [vmem:[%s13942_s5 + $0x258] sm:$0xff] }
 0x55e   : > { %2095 = vmatprep.mubr.f32.mxu0 %v799_v14  ;;  %v862_v14 = vld [vmem:[%s13942_s5 + $0x250] sm:$0xff] }
 0x561   : > { %2096 = vmatmul.mubr.f32.gmra.mrb[36].mxu0 %v798_v63  ;;  %v867_v63 = vld [vmem:[%s13942_s5 + $0x278] sm:$0xff] }
 0x562   : > { %2100 = vmatprep.mubr.f32.mxu0 %v803_v49  ;;  %v866_v49 = vld [vmem:[%s13942_s5 + $0x270] sm:$0xff] }
 0x565   : > { %2101 = vmatmul.mubr.f32.gmra.mrb[38].mxu0 %v802_v3  ;;  %v871_v3 = vld [vmem:[%s13942_s5 + $0x298] sm:$0xff] }
 0x566   : > { %2105 = vmatprep.mubr.f32.mxu0 %v807_v40  ;;  %v870_v40 = vld [vmem:[%s13942_s5 + $0x290] sm:$0xff] }
 0x569   : > { %2106 = vmatmul.mubr.f32.gmra.mrb[40].mxu0 %v806_v48  ;;  %v875_v48 = vld [vmem:[%s13942_s5 + $0x2b8] sm:$0xff] }
 0x56a   : > { %2110 = vmatprep.mubr.f32.mxu0 %v811_v53  ;;  %v874_v53 = vld [vmem:[%s13942_s5 + $0x2b0] sm:$0xff] }
 0x56d   : > { %2111 = vmatmul.mubr.f32.gmra.mrb[42].mxu0 %v810_v39  ;;  %v879_v39 = vld [vmem:[%s13942_s5 + $0x2d8] sm:$0xff] }
 0x56e   : > { %2115 = vmatprep.mubr.f32.mxu0 %v815_v11  ;;  %v878_v11 = vld [vmem:[%s13942_s5 + $0x2d0] sm:$0xff] }
 0x571   : > { %2116 = vmatmul.mubr.f32.gmra.mrb[44].mxu0 %v814_v9  ;;  %v883_v9 = vld [vmem:[%s13942_s5 + $0x2f8] sm:$0xff] }
 0x572   : > { %2120 = vmatprep.mubr.f32.mxu0 %v819_v19  ;;  %v882_v19 = vld [vmem:[%s13942_s5 + $0x2f0] sm:$0xff] }
 0x575   : > { %2121 = vmatmul.mubr.f32.gmra.mrb[46].mxu0 %v818_v42  ;;  %v887_v42 = vld [vmem:[%s13942_s5 + $0x318] sm:$0xff] }
 0x576   : > { %2125 = vmatprep.mubr.f32.mxu0 %v823_v35  ;;  %v886_v35 = vld [vmem:[%s13942_s5 + $0x310] sm:$0xff] }
 0x579   : > { %2126 = vmatmul.mubr.f32.gmra.mrb[48].mxu0 %v822_v55  ;;  %v891_v55 = vld [vmem:[%s13942_s5 + $0x338] sm:$0xff] }
 0x57a   : > { %2130 = vmatprep.mubr.f32.mxu0 %v827_v18  ;;  %v890_v18 = vld [vmem:[%s13942_s5 + $0x330] sm:$0xff] }
 0x57d   : > { %2131 = vmatmul.mubr.f32.gmra.mrb[50].mxu0 %v826_v7  ;;  %v895_v7 = vld [vmem:[%s13942_s5 + $0x358] sm:$0xff] }
 0x57e   : > { %2135 = vmatprep.mubr.f32.mxu0 %v831_v21  ;;  %v894_v21 = vld [vmem:[%s13942_s5 + $0x350] sm:$0xff] }
 0x581   : > { %2136 = vmatmul.mubr.f32.gmra.mrb[52].mxu0 %v830_v25  ;;  %v899_v25 = vld [vmem:[%s13942_s5 + $0x378] sm:$0xff] }
 0x582   : > { %2140 = vmatprep.mubr.f32.mxu0 %v835_v24  ;;  %v898_v24 = vld [vmem:[%s13942_s5 + $0x370] sm:$0xff] }
 0x585   : > { %2141 = vmatmul.mubr.f32.gmra.mrb[54].mxu0 %v834_v26  ;;  %v903_v26 = vld [vmem:[%s13942_s5 + $0x398] sm:$0xff] }
 0x586   : > { %2145 = vmatprep.mubr.f32.mxu0 %v839_v37  ;;  %v902_v37 = vld [vmem:[%s13942_s5 + $0x390] sm:$0xff] }
 0x589   : > { %2146 = vmatmul.mubr.f32.gmra.mrb[56].mxu0 %v838_v58  ;;  %v907_v58 = vld [vmem:[%s13942_s5 + $0x3b8] sm:$0xff] }
 0x58a   : > { %2150 = vmatprep.mubr.f32.mxu0 %v843_v1  ;;  %v906_v1 = vld [vmem:[%s13942_s5 + $0x3b0] sm:$0xff] }
 0x58d   : > { %2151 = vmatmul.mubr.f32.gmra.mrb[58].mxu0 %v842_v27  ;;  %v911_v27 = vld [vmem:[%s13942_s5 + $0x3d8] sm:$0xff] }
 0x58e   : > { %2155 = vmatprep.mubr.f32.mxu0 %v847_v12  ;;  %v910_v12 = vld [vmem:[%s13942_s5 + $0x3d0] sm:$0xff] }
 0x591   : > { %2156 = vmatmul.mubr.f32.gmra.mrb[60].mxu0 %v846_v31  ;;  %v915_v31 = vld [vmem:[%s13942_s5 + $0x3f8] sm:$0xff] }
 0x592   : > { %2160 = vmatprep.mubr.f32.mxu0 %v851_v22  ;;  %v914_v22 = vld [vmem:[%s13942_s5 + $0x3f0] sm:$0xff] }
 0x595   : > { %2161 = vmatmul.mubr.f32.gmra.mrb[62].mxu0 %v850_v32  ;;  %v14064_v32 = vmov 0.0  }
 0x596   : > { %2165 = vmatprep.mubr.f32.mxu0 %v855_v33 }
 0x599   : > { %2166 = vmatmul.mubr.f32.gmra.mrb[64].mxu0 %v854_v44 }
 0x59a   : > { %2170 = vmatprep.mubr.f32.mxu0 %v859_v6 }
 0x59d   : > { %2171 = vmatmul.mubr.f32.gmra.mrb[66].mxu0 %v858_v17 }
 0x59e   : > { %2175 = vmatprep.mubr.f32.mxu0 %v863_v59 }
 0x5a1   : > { %2176 = vmatmul.mubr.f32.gmra.mrb[68].mxu0 %v862_v14 }
 0x5a2   : > { %2180 = vmatprep.mubr.f32.mxu0 %v867_v63 }
 0x5a5   : > { %2181 = vmatmul.mubr.f32.gmra.mrb[70].mxu0 %v866_v49 }
 0x5a6   : > { %2185 = vmatprep.mubr.f32.mxu0 %v871_v3 }
 0x5a9   : > { %2186 = vmatmul.mubr.f32.gmra.mrb[72].mxu0 %v870_v40 }
 0x5aa   : > { %2190 = vmatprep.mubr.f32.mxu0 %v875_v48 }
 0x5ad   : > { %2191 = vmatmul.mubr.f32.gmra.mrb[74].mxu0 %v874_v53 }
 0x5ae   : > { %2195 = vmatprep.mubr.f32.mxu0 %v879_v39 }
 0x5b1   : > { %2196 = vmatmul.mubr.f32.gmra.mrb[76].mxu0 %v878_v11 }
 0x5b2   : > { %2200 = vmatprep.mubr.f32.mxu0 %v883_v9 }
 0x5b5   : > { %2201 = vmatmul.mubr.f32.gmra.mrb[78].mxu0 %v882_v19 }
 0x5b6   : > { %2205 = vmatprep.mubr.f32.mxu0 %v887_v42 }
 0x5b9   : > { %2206 = vmatmul.mubr.f32.gmra.mrb[80].mxu0 %v886_v35 }
 0x5ba   : > { %2210 = vmatprep.mubr.f32.mxu0 %v891_v55 }
 0x5bd   : > { %2211 = vmatmul.mubr.f32.gmra.mrb[82].mxu0 %v890_v18  ;;  %v3046_v18 = vld [vmem:[%s13943_s6 + $0x20] sm:$0xff] }
 0x5be   : > { %2215 = vmatprep.mubr.f32.mxu0 %v895_v7  ;;  %v3047_v7 = vld [vmem:[%s13943_s6 + $0x28] sm:$0xff] }
 0x5c1   : > { %2216 = vmatmul.mubr.f32.gmra.mrb[84].mxu0 %v894_v21 }
 0x5c2   : > { %2220 = vmatprep.mubr.f32.mxu0 %v899_v25  ;;  %v9149_v25 = vpack.c.bf16 %v3047_v7, %v3046_v18 }
 0x5c4   : > { %9150 = vmatprep.subr.bf16.mxu1 %v9149_v25 }
 0x5c5   : > { %2221 = vmatmul.mubr.f32.gmra.mrb[86].mxu0 %v898_v24  ;;  %9152 = vmatpush3.bf16.msra.mxu1 %v9149_v25 }
 0x5c6   : > { %2225 = vmatprep.mubr.f32.mxu0 %v903_v26 }
 0x5c9   : > { %2226 = vmatmul.mubr.f32.gmra.mrb[88].mxu0 %v902_v37 }
 0x5ca   : > { %2230 = vmatprep.mubr.f32.mxu0 %v907_v58 }
 0x5cd   : > { %2231 = vmatmul.mubr.f32.gmra.mrb[90].mxu0 %v906_v1  ;;  %v3048_v1 = vld [vmem:[%s13943_s6 + $0x30] sm:$0xff] }
 0x5ce   : > { %2235 = vmatprep.mubr.f32.mxu0 %v911_v27  ;;  %v3049_v27 = vld [vmem:[%s13943_s6 + $0x38] sm:$0xff] }
 0x5d1   : > { %2236 = vmatmul.mubr.f32.gmra.mrb[92].mxu0 %v910_v12 }
 0x5d2   : > { %2240 = vmatprep.mubr.f32.mxu0 %v915_v31  ;;  %v9153_v31 = vpack.c.bf16 %v3049_v27, %v3048_v1 }
 0x5d4   : > { %9154 = vmatprep.subr.bf16.mxu1 %v9153_v31 }
 0x5d5   : > { %2241 = vmatmul.mubr.f32.gmra.mrb[94].mxu0 %v914_v22  ;;  %9156 = vmatpush3.bf16.msra.mxu1 %v9153_v31 }
 0x5d6   : > { %9039 = vmatprep.mubr.msk.f32.mxu0 %vm10429_vm2, %v14064_v32 }
 0x5d8   : > { %8536 = vmatmul.mubr.f32.vlgmr.msra.gmra.mrb[4].mxu1 %v14064_v32 }
 0x62c   : > { %v2087_v33 = vpop.f32.mrb[32].mxu0 }
 0x62d   : > { %v7705_v44 = vmul.f32 -1.442695, %v2087_v33  ;;  %v2089_v6 = vpop.f32.mrb[33].mxu0 }
 0x62f   : > { %10104 = vpow2.f32 %v7705_v44 }
 0x630   : > { %v2092_v17 = vpop.f32.mrb[34].mxu0 }
 0x631   : > { %v7706_v59 = vmul.f32 -1.442695, %v2092_v17  ;;  %v2094_v14 = vpop.f32.mrb[35].mxu0 }
 0x633   : > { %10106 = vpow2.f32 %v7706_v59 }
 0x634   : > { %v2097_v63 = vpop.f32.mrb[36].mxu0 }
 0x635   : > { %v7707_v49 = vmul.f32 -1.442695, %v2097_v63  ;;  %v2099_v3 = vpop.f32.mrb[37].mxu0 }
 0x637   : > { %10108 = vpow2.f32 %v7707_v49 }
 0x638   : > { %v2102_v40 = vpop.f32.mrb[38].mxu0 }
 0x639   : > { %v10105_v48 = vpop.eup %10104  ;;  %v7708_v53 = vmul.f32 -1.442695, %v2102_v40  ;;  %v2104_v39 = vpop.f32.mrb[39].mxu0 }
 0x63a   : > { %v2342_v11 = vadd.f32 1.0, %v10105_v48 }
 0x63b   : > { %10110 = vpow2.f32 %v7708_v53 }
 0x63c   : > { %10112 = vrcp.f32 %v2342_v11  ;;  %v2107_v9 = vpop.f32.mrb[40].mxu0 }
 0x63d   : > { %v10107_v19 = vpop.eup %10106  ;;  %v7709_v42 = vmul.f32 -1.442695, %v2107_v9  ;;  %v2109_v35 = vpop.f32.mrb[41].mxu0 }
 0x63e   : > { %v2343_v55 = vadd.f32 1.0, %v10107_v19 }
 0x63f   : > { %10114 = vpow2.f32 %v7709_v42 }
 0x640   : > { %10116 = vrcp.f32 %v2343_v55  ;;  %v2112_v21 = vpop.f32.mrb[42].mxu0 }
 0x641   : > { %v10109_v24 = vpop.eup %10108  ;;  %v7710_v26 = vmul.f32 -1.442695, %v2112_v21  ;;  %v2114_v37 = vpop.f32.mrb[43].mxu0 }
 0x642   : > { %v2344_v58 = vadd.f32 1.0, %v10109_v24 }
 0x643   : > { %10118 = vpow2.f32 %v7710_v26 }
 0x644   : > { %10120 = vrcp.f32 %v2344_v58  ;;  %v2117_v12 = vpop.f32.mrb[44].mxu0 }
 0x645   : > { %v10111_v22 = vpop.eup %10110  ;;  %v7711_v33 = vmul.f32 -1.442695, %v2117_v12  ;;  %v2119_v44 = vpop.f32.mrb[45].mxu0 }
 0x646   : > { %v10113_v6 = vpop.eup %10112  ;;  %v2345_v17 = vadd.f32 1.0, %v10111_v22 }
 0x647   : > { %10122 = vpow2.f32 %v7711_v33  ;;  %2440 = vperm.xlu1 %9784, %v10113_v6  }
 0x648   : > { %10124 = vrcp.f32 %v2345_v17  ;;  %v2122_v59 = vpop.f32.mrb[46].mxu0 }
 0x649   : > { %v10115_v14 = vpop.eup %10114  ;;  %v7712_v63 = vmul.f32 -1.442695, %v2122_v59  ;;  %v2124_v49 = vpop.f32.mrb[47].mxu0 }
 0x64a   : > { %v10117_v3 = vpop.eup %10116  ;;  %v2346_v40 = vadd.f32 1.0, %v10115_v14 }
 0x64b   : > { %10126 = vpow2.f32 %v7712_v63  ;;  %2445 = vperm.xlu0 %9778, %v10117_v3  }
 0x64c   : > { %10128 = vrcp.f32 %v2346_v40  ;;  %v2127_v48 = vpop.f32.mrb[48].mxu0 }
 0x64d   : > { %v10119_v53 = vpop.eup %10118  ;;  %v7713_v39 = vmul.f32 -1.442695, %v2127_v48  ;;  %v2129_v11 = vpop.f32.mrb[49].mxu0 }
 0x64e   : > { %v10121_v9 = vpop.eup %10120  ;;  %v2347_v19 = vadd.f32 1.0, %v10119_v53 }
 0x64f   : > { %10130 = vpow2.f32 %v7713_v39  ;;  %2450 = vperm.xlu1 %9784, %v10121_v9  }
 0x650   : > { %10132 = vrcp.f32 %v2347_v19  ;;  %v2132_v42 = vpop.f32.mrb[50].mxu0 }
 0x651   : > { %v10123_v35 = vpop.eup %10122  ;;  %v7714_v55 = vmul.f32 -1.442695, %v2132_v42  ;;  %v2134_v18 = vpop.f32.mrb[51].mxu0 }
 0x652   : > { %v10125_v7 = vpop.eup %10124  ;;  %v2348_v21 = vadd.f32 1.0, %v10123_v35 }
 0x653   : > { %10134 = vpow2.f32 %v7714_v55  ;;  %2455 = vperm.xlu0 %9778, %v10125_v7  }
 0x654   : > { %10136 = vrcp.f32 %v2348_v21  ;;  %v2137_v25 = vpop.f32.mrb[52].mxu0 }
 0x655   : > { %v10127_v24 = vpop.eup %10126  ;;  %v7715_v26 = vmul.f32 -1.442695, %v2137_v25  ;;  %v2139_v37 = vpop.f32.mrb[53].mxu0 }
 0x656   : > { %v10129_v58 = vpop.eup %10128  ;;  %v2349_v1 = vadd.f32 1.0, %v10127_v24 }
 0x657   : > { %10138 = vpow2.f32 %v7715_v26  ;;  %2460 = vperm.xlu1 %9784, %v10129_v58  }
 0x658   : > { %10140 = vrcp.f32 %v2349_v1  ;;  %v2142_v27 = vpop.f32.mrb[54].mxu0 }
 0x659   : > { %v10131_v12 = vpop.eup %10130  ;;  %v7716_v31 = vmul.f32 -1.442695, %v2142_v27  ;;  %v2144_v22 = vpop.f32.mrb[55].mxu0 }
 0x65a   : > { %v10133_v33 = vpop.eup %10132  ;;  %v2350_v44 = vadd.f32 1.0, %v10131_v12 }
 0x65b   : > { %10142 = vpow2.f32 %v7716_v31  ;;  %2465 = vperm.xlu0 %9778, %v10133_v33  }
 0x65c   : > { %10144 = vrcp.f32 %v2350_v44  ;;  %v2147_v6 = vpop.f32.mrb[56].mxu0 }
 0x65d   : > { %v10135_v17 = vpop.eup %10134  ;;  %v7717_v59 = vmul.f32 -1.442695, %v2147_v6  ;;  %v2149_v14 = vpop.f32.mrb[57].mxu0 }
 0x65e   : > { %v10137_v63 = vpop.eup %10136  ;;  %v2351_v49 = vadd.f32 1.0, %v10135_v17 }
 0x65f   : > { %10146 = vpow2.f32 %v7717_v59  ;;  %2470 = vperm.xlu1 %9784, %v10137_v63  }
 0x660   : > { %10148 = vrcp.f32 %v2351_v49  ;;  %v2152_v3 = vpop.f32.mrb[58].mxu0 }
 0x661   : > { %v10139_v40 = vpop.eup %10138  ;;  %v7718_v48 = vmul.f32 -1.442695, %v2152_v3  ;;  %v2154_v53 = vpop.f32.mrb[59].mxu0 }
 0x662   : > { %v10141_v39 = vpop.eup %10140  ;;  %v2352_v11 = vadd.f32 1.0, %v10139_v40 }
 0x663   : > { %10150 = vpow2.f32 %v7718_v48  ;;  %2475 = vperm.xlu0 %9778, %v10141_v39  }
 0x664   : > { %10152 = vrcp.f32 %v2352_v11  ;;  %v2157_v9 = vpop.f32.mrb[60].mxu0 }
 0x665   : > { %v10143_v19 = vpop.eup %10142  ;;  %v7719_v42 = vmul.f32 -1.442695, %v2157_v9  ;;  %v2159_v35 = vpop.f32.mrb[61].mxu0 }
 0x666   : > { %v10145_v55 = vpop.eup %10144  ;;  %v2353_v18 = vadd.f32 1.0, %v10143_v19 }
 0x667   : > { %10154 = vpow2.f32 %v7719_v42  ;;  %2480 = vperm.xlu1 %9784, %v10145_v55  }
 0x668   : > { %10156 = vrcp.f32 %v2353_v18  ;;  %v2162_v7 = vpop.f32.mrb[62].mxu0 }
 0x669   : > { %v10147_v21 = vpop.eup %10146  ;;  %v7720_v25 = vmul.f32 -1.442695, %v2162_v7  ;;  %v2164_v24 = vpop.f32.mrb[63].mxu0 }
 0x66a   : > { %v10149_v26 = vpop.eup %10148  ;;  %v2354_v37 = vadd.f32 1.0, %v10147_v21 }
 0x66b   : > { %10158 = vpow2.f32 %v7720_v25  ;;  %2485 = vperm.xlu0 %9778, %v10149_v26  }
 0x66c   : > { %10160 = vrcp.f32 %v2354_v37  ;;  %v2167_v58 = vpop.f32.mrb[64].mxu0 }
 0x66d   : > { %v10151_v1 = vpop.eup %10150  ;;  %v7721_v27 = vmul.f32 -1.442695, %v2167_v58  ;;  %v2169_v12 = vpop.f32.mrb[65].mxu0 }
 0x66e   : > { %v10153_v31 = vpop.eup %10152  ;;  %v2355_v22 = vadd.f32 1.0, %v10151_v1 }
 0x66f   : > { %10162 = vpow2.f32 %v7721_v27  ;;  %2490 = vperm.xlu1 %9784, %v10153_v31  }
 0x670   : > { %10164 = vrcp.f32 %v2355_v22  ;;  %v2172_v33 = vpop.f32.mrb[66].mxu0 }
 0x671   : > { %v10155_v44 = vpop.eup %10154  ;;  %v7722_v6 = vmul.f32 -1.442695, %v2172_v33  ;;  %v2174_v17 = vpop.f32.mrb[67].mxu0 }
 0x672   : > { %v10157_v59 = vpop.eup %10156  ;;  %v2356_v14 = vadd.f32 1.0, %v10155_v44 }
 0x673   : > { %10166 = vpow2.f32 %v7722_v6  ;;  %2495 = vperm.xlu0 %9778, %v10157_v59  }
 0x674   : > { %10168 = vrcp.f32 %v2356_v14  ;;  %v2177_v63 = vpop.f32.mrb[68].mxu0 }
 0x675   : > { %v10159_v49 = vpop.eup %10158  ;;  %v7723_v3 = vmul.f32 -1.442695, %v2177_v63  ;;  %v2179_v40 = vpop.f32.mrb[69].mxu0 }
 0x676   : > { %v10161_v48 = vpop.eup %10160  ;;  %v2357_v53 = vadd.f32 1.0, %v10159_v49 }
 0x677   : > { %10170 = vpow2.f32 %v7723_v3  ;;  %2500 = vperm.xlu1 %9784, %v10161_v48  }
 0x678   : > { %10172 = vrcp.f32 %v2357_v53  ;;  %v2182_v39 = vpop.f32.mrb[70].mxu0 }
 0x679   : > { %v10163_v11 = vpop.eup %10162  ;;  %v7724_v9 = vmul.f32 -1.442695, %v2182_v39  ;;  %v2184_v19 = vpop.f32.mrb[71].mxu0 }
 0x67a   : > { %v10165_v42 = vpop.eup %10164  ;;  %v2358_v35 = vadd.f32 1.0, %v10163_v11 }
 0x67b   : > { %10174 = vpow2.f32 %v7724_v9  ;;  %2505 = vperm.xlu0 %9778, %v10165_v42  }
 0x67c   : > { %10176 = vrcp.f32 %v2358_v35  ;;  %v2187_v55 = vpop.f32.mrb[72].mxu0 }
 0x67d   : > { %v10167_v18 = vpop.eup %10166  ;;  %v7725_v7 = vmul.f32 -1.442695, %v2187_v55  ;;  %v2189_v21 = vpop.f32.mrb[73].mxu0 }
 0x67e   : > { %v10169_v25 = vpop.eup %10168  ;;  %v2359_v24 = vadd.f32 1.0, %v10167_v18 }
 0x67f   : > { %10178 = vpow2.f32 %v7725_v7  ;;  %2510 = vperm.xlu1 %9784, %v10169_v25  }
 0x680   : > { %10180 = vrcp.f32 %v2359_v24  ;;  %v2192_v26 = vpop.f32.mrb[74].mxu0 }
 0x681   : > { %v10171_v37 = vpop.eup %10170  ;;  %v7726_v58 = vmul.f32 -1.442695, %v2192_v26  ;;  %v2194_v1 = vpop.f32.mrb[75].mxu0 }
 0x682   : > { %v10173_v27 = vpop.eup %10172  ;;  %v2360_v12 = vadd.f32 1.0, %v10171_v37 }
 0x683   : > { %10182 = vpow2.f32 %v7726_v58  ;;  %2515 = vperm.xlu0 %9778, %v10173_v27  }
 0x684   : > { %10184 = vrcp.f32 %v2360_v12  ;;  %v2197_v31 = vpop.f32.mrb[76].mxu0 }
 0x685   : > { %v10175_v22 = vpop.eup %10174  ;;  %v7727_v33 = vmul.f32 -1.442695, %v2197_v31  ;;  %v2199_v44 = vpop.f32.mrb[77].mxu0 }
 0x686   : > { %v10177_v6 = vpop.eup %10176  ;;  %v2361_v17 = vadd.f32 1.0, %v10175_v22  ;;  %v3043_v44 = vld [vmem:[%s13943_s6 + $0x8] sm:$0xff] }
 0x687   : > { %10186 = vpow2.f32 %v7727_v33  ;;  %2520 = vperm.xlu1 %9784, %v10177_v6   ;;  %v3042_v33 = vld [vmem:[%s13943_s6] sm:$0xff] }
 0x688   : > { %10188 = vrcp.f32 %v2361_v17  ;;  %v2202_v59 = vpop.f32.mrb[78].mxu0 }
 0x689   : > { %v10179_v14 = vpop.eup %10178  ;;  %v7728_v63 = vmul.f32 -1.442695, %v2202_v59  ;;  %v2204_v49 = vpop.f32.mrb[79].mxu0  ;;  %v9157_v59 = vpack.c.bf16 %v3043_v44, %v3042_v33 }
 0x68a   : > { %v10181_v3 = vpop.eup %10180  ;;  %v2362_v40 = vadd.f32 1.0, %v10179_v14 }
 0x68b   : > { %10190 = vpow2.f32 %v7728_v63  ;;  %2525 = vperm.xlu0 %9778, %v10181_v3   ;;  %9158 = vmatprep.subr.bf16.mxu1 %v9157_v59 }
 0x68c   : > { %10192 = vrcp.f32 %v2362_v40  ;;  %v2207_v48 = vpop.f32.mrb[80].mxu0  ;;  %9160 = vmatpush3.bf16.msra.mxu1 %v9157_v59 }
 0x68d   : > { %v10183_v53 = vpop.eup %10182  ;;  %v7729_v39 = vmul.f32 -1.442695, %v2207_v48  ;;  %v2209_v11 = vpop.f32.mrb[81].mxu0 }
 0x68e   : > { %v10185_v9 = vpop.eup %10184  ;;  %v2363_v19 = vadd.f32 1.0, %v10183_v53 }
 0x68f   : > { %10194 = vpow2.f32 %v7729_v39  ;;  %2530 = vperm.xlu1 %9784, %v10185_v9  }
 0x690   : > { %10196 = vrcp.f32 %v2363_v19  ;;  %v2212_v42 = vpop.f32.mrb[82].mxu0 }
 0x691   : > { %v10187_v35 = vpop.eup %10186  ;;  %v7730_v55 = vmul.f32 -1.442695, %v2212_v42  ;;  %v2214_v18 = vpop.f32.mrb[83].mxu0 }
 0x692   : > { %v10189_v7 = vpop.eup %10188  ;;  %v2364_v21 = vadd.f32 1.0, %v10187_v35 }
 0x693   : > { %10198 = vpow2.f32 %v7730_v55  ;;  %2535 = vperm.xlu0 %9778, %v10189_v7  }
 0x694   : > { %10200 = vrcp.f32 %v2364_v21  ;;  %v2217_v25 = vpop.f32.mrb[84].mxu0 }
 0x695   : > { %v10191_v24 = vpop.eup %10190  ;;  %v7731_v26 = vmul.f32 -1.442695, %v2217_v25  ;;  %v2219_v37 = vpop.f32.mrb[85].mxu0 }
 0x696   : > { %v10193_v58 = vpop.eup %10192  ;;  %v2365_v1 = vadd.f32 1.0, %v10191_v24 }
 0x697   : > { %10202 = vpow2.f32 %v7731_v26  ;;  %2540 = vperm.xlu1 %9784, %v10193_v58  }
 0x698   : > { %10204 = vrcp.f32 %v2365_v1  ;;  %v2222_v27 = vpop.f32.mrb[86].mxu0 }
 0x699   : > { %v10195_v12 = vpop.eup %10194  ;;  %v7732_v31 = vmul.f32 -1.442695, %v2222_v27  ;;  %v2224_v22 = vpop.f32.mrb[87].mxu0 }
 0x69a   : > { %v10197_v6 = vpop.eup %10196  ;;  %v2366_v17 = vadd.f32 1.0, %v10195_v12 }
 0x69b   : > { %10206 = vpow2.f32 %v7732_v31  ;;  %2545 = vperm.xlu0 %9778, %v10197_v6  }
 0x69c   : > { %10208 = vrcp.f32 %v2366_v17  ;;  %v2227_v14 = vpop.f32.mrb[88].mxu0 }
 0x69d   : > { %v10199_v63 = vpop.eup %10198  ;;  %v7733_v49 = vmul.f32 -1.442695, %v2227_v14  ;;  %v2229_v3 = vpop.f32.mrb[89].mxu0 }
 0x69e   : > { %v10201_v40 = vpop.eup %10200  ;;  %v2367_v48 = vadd.f32 1.0, %v10199_v63  ;;  %v3044_v63 = vld [vmem:[%s13943_s6 + $0x10] sm:$0xff] }
 0x69f   : > { %10210 = vpow2.f32 %v7733_v49  ;;  %2550 = vperm.xlu1 %9784, %v10201_v40   ;;  %v3045_v49 = vld [vmem:[%s13943_s6 + $0x18] sm:$0xff] }
 0x6a0   : > { %10212 = vrcp.f32 %v2367_v48  ;;  %v2232_v53 = vpop.f32.mrb[90].mxu0  ;;  %v9161_v40 = vpack.c.bf16 %v3045_v49, %v3044_v63 }
 0x6a1   : > { %v10203_v39 = vpop.eup %10202  ;;  %v7734_v11 = vmul.f32 -1.442695, %v2232_v53  ;;  %v2234_v9 = vpop.f32.mrb[91].mxu0 }
 0x6a2   : > { %v10205_v19 = vpop.eup %10204  ;;  %v2368_v42 = vadd.f32 1.0, %v10203_v39  ;;  %9162 = vmatprep.subr.bf16.mxu1 %v9161_v40 }
 0x6a3   : > { %10214 = vpow2.f32 %v7734_v11  ;;  %2555 = vperm.xlu0 %9778, %v10205_v19   ;;  %9164 = vmatpush3.bf16.msra.mxu1 %v9161_v40 }
 0x6a4   : > { %10216 = vrcp.f32 %v2368_v42  ;;  %v2237_v35 = vpop.f32.mrb[92].mxu0 }
 0x6a5   : > { %v10207_v55 = vpop.eup %10206  ;;  %v7735_v18 = vmul.f32 -1.442695, %v2237_v35  ;;  %v2239_v7 = vpop.f32.mrb[93].mxu0 }
 0x6a6   : > { %v10209_v21 = vpop.eup %10208  ;;  %v2369_v25 = vadd.f32 1.0, %v10207_v55  ;;  %v3750_v7 = vld [vmem:[%s13943_s6 + $0x48] sm:$0xff] }
 0x6a7   : > { %10218 = vpow2.f32 %v7735_v18  ;;  %2560 = vperm.xlu1 %9784, %v10209_v21  }
 0x6a8   : > { %10220 = vrcp.f32 %v2369_v25  ;;  %v2242_v24 = vpop.f32.mrb[94].mxu0 }
 0x6a9   : > { %v10211_v26 = vpop.eup %10210  ;;  %v7736_v37 = vmul.f32 -1.442695, %v2242_v24  ;;  %v2244_v58 = vpop.f32.mrb[95].mxu0 }
 0x6aa   : > { %v10213_v1 = vpop.eup %10212  ;;  %v2370_v27 = vadd.f32 1.0, %v10211_v26 }
 0x6ab   : > { %10222 = vpow2.f32 %v7736_v37  ;;  %2565 = vperm.xlu0 %9778, %v10213_v1  }
 0x6ac   : > { %10224 = vrcp.f32 %v2370_v27 }
 0x6ad   : > { %v10215_v12 = vpop.eup %10214 }
 0x6ae   : > { %v10217_v31 = vpop.eup %10216  ;;  %v2371_v22 = vadd.f32 1.0, %v10215_v12 }
 0x6af   : > { %2570 = vperm.xlu1 %9784, %v10217_v31  }
 0x6b0   : > { %10226 = vrcp.f32 %v2371_v22 }
 0x6b1   : > { %v10219_v33 = vpop.eup %10218 }
 0x6b2   : > { %v10221_v44 = vpop.eup %10220  ;;  %v2372_v6 = vadd.f32 1.0, %v10219_v33 }
 0x6b3   : > { %2575 = vperm.xlu0 %9778, %v10221_v44  }
 0x6b4   : > { %10228 = vrcp.f32 %v2372_v6 }
 0x6b5   : > { %v10223_v17 = vpop.eup %10222 }
 0x6b6   : > { %v10225_v59 = vpop.eup %10224  ;;  %v2373_v14 = vadd.f32 1.0, %v10223_v17 }
 0x6b7   : > { %2580 = vperm.xlu1 %9784, %v10225_v59  }
 0x6b8   : > { %10230 = vrcp.f32 %v2373_v14 }
 0x6ba   : > { %v10227_v3 = vpop.eup %10226 }
 0x6bb   : > { %2585 = vperm.xlu0 %9778, %v10227_v3  }
 0x6be   : > { %v10229_v48 = vpop.eup %10228 }
 0x6bf   : > { %2590 = vperm.xlu1 %9784, %v10229_v48  }
 0x6c2   : > { %v10231_v53 = vpop.eup %10230 }
 0x6c3   : > { %2595 = vperm.xlu0 %9778, %v10231_v53  }
 0x6c6   : > { %v2441_v39 = vpop.permute.xlu1 %2440 }
 0x6c7   : > { %v11634_v11 = vmul.f32 %v2441_v39, %v10886_v51 }
 0x6c9   : > { %14065 = vst [vmem:[#allocation8_spill] sm:$0xff] %v11634_v11  ;;  %8538 = vmatprep.mubr.msk.f32.mxu1 %vm916_vm3, %v11634_v11 }
 0x6ca   : > { %v2446_v9 = vpop.permute.xlu0 %2445 }
 0x6cb   : > { %v11639_v19 = vmul.f32 %v2446_v9, %v10898_v60 }
 0x6cd   : > { %14066 = vst [vmem:[#allocation9_spill] sm:$0xff] %v11639_v19  ;;  %8539 = vmatmul.mubr.msk.f32.gmra.mrb[6].mxu1 %vm916_vm3, %v11639_v19 }
 0x6ce   : > { %v2451_v42 = vpop.permute.xlu1 %2450 }
 0x6cf   : > { %v11644_v35 = vmul.f32 %v2451_v42, %v10882_v50  ;;  %v3749_v50 = vld [vmem:[%s13943_s6 + $0x40] sm:$0xff] }
 0x6d0   : > { %v11664_v21 = vpack.c.bf16 %v3750_v7, %v3749_v50 }
 0x6d1   : > { %14067 = vst [vmem:[#allocation10_spill] sm:$0xff] %v11644_v35  ;;  %8541 = vmatprep.mubr.msk.f32.mxu1 %vm916_vm3, %v11644_v35 }
 0x6d2   : > { %v2456_v55 = vpop.permute.xlu0 %2455  ;;  %9166 = vmatprep.subr.bf16.mxu1 %v11664_v21 }
 0x6d3   : > { %v11649_v51 = vmul.f32 %v2456_v55, %v10894_v61 }
 0x6d5   : > { %8542 = vmatmul.mubr.msk.f32.gmra.mrb[8].mxu1 %vm916_vm3, %v11649_v51 }
 0x6d6   : > { %v2461_v18 = vpop.permute.xlu1 %2460 }
 0x6d7   : > { %v11654_v60 = vmul.f32 %v2461_v18, %v10910_v54 }
 0x6d9   : > { %14068 = vst [vmem:[#allocation11_spill] sm:$0xff] %v11654_v60  ;;  %8544 = vmatprep.mubr.msk.f32.mxu1 %vm916_vm3, %v11654_v60 }
 0x6da   : > { %v2466_v61 = vpop.permute.xlu0 %2465 }
 0x6db   : > { %v11667_v25 = vmul.f32 %v2466_v61, %v10906_v62 }
 0x6dd   : > { %8545 = vmatmul.mubr.msk.f32.gmra.mrb[10].mxu1 %vm916_vm3, %v11667_v25 }
 0x6de   : > { %v2471_v54 = vpop.permute.xlu1 %2470 }
 0x6df   : > { %v11673_v24 = vmul.f32 %v2471_v54, %v10922_v0 }
 0x6e1   : > { %8547 = vmatprep.mubr.msk.f32.mxu1 %vm916_vm3, %v11673_v24 }
 0x6e2   : > { %v2476_v26 = vpop.permute.xlu0 %2475 }
 0x6e3   : > { %v11678_v37 = vmul.f32 %v2476_v26, %v10918_v2 }
 0x6e5   : > { %8548 = vmatmul.mubr.msk.f32.gmra.mrb[12].mxu1 %vm916_vm3, %v11678_v37 }
 0x6e6   : > { %v2481_v62 = vpop.permute.xlu1 %2480 }
 0x6e7   : > { %v11683_v58 = vmul.f32 %v2481_v62, %v10934_v10 }
 0x6e9   : > { %8550 = vmatprep.mubr.msk.f32.mxu1 %vm916_vm3, %v11683_v58 }
 0x6ea   : > { %v2486_v1 = vpop.permute.xlu0 %2485 }
 0x6eb   : > { %v11688_v0 = vmul.f32 %v2486_v1, %v10930_v4 }
 0x6ed   : > { %8551 = vmatmul.mubr.msk.f32.gmra.mrb[14].mxu1 %vm916_vm3, %v11688_v0 }
 0x6ee   : > { %v2491_v27 = vpop.permute.xlu1 %2490 }
 0x6ef   : > { %v11693_v2 = vmul.f32 %v2491_v27, %v10946_v20 }
 0x6f1   : > { %8553 = vmatprep.mubr.msk.f32.mxu1 %vm916_vm3, %v11693_v2 }
 0x6f2   : > { %v2496_v12 = vpop.permute.xlu0 %2495 }
 0x6f3   : > { %v11698_v10 = vmul.f32 %v2496_v12, %v10942_v8 }
 0x6f5   : > { %8554 = vmatmul.mubr.msk.f32.gmra.mrb[16].mxu1 %vm916_vm3, %v11698_v10 }
 0x6f6   : > { %v2501_v31 = vpop.permute.xlu1 %2500 }
 0x6f7   : > { %v11703_v4 = vmul.f32 %v2501_v31, %v10958_v30 }
 0x6f9   : > { %8556 = vmatprep.mubr.msk.f32.mxu1 %vm916_vm3, %v11703_v4 }
 0x6fa   : > { %v2506_v22 = vpop.permute.xlu0 %2505 }
 0x6fb   : > { %v11708_v20 = vmul.f32 %v2506_v22, %v10954_v15  ;;  %v3752_v22 = vld [vmem:[%s13943_s6 + $0x58] sm:$0xff] }
 0x6fd   : > { %8557 = vmatmul.mubr.msk.f32.gmra.mrb[18].mxu1 %vm916_vm3, %v11708_v20 }
 0x6fe   : > { %v2511_v33 = vpop.permute.xlu1 %2510 }
 0x6ff   : > { %v11713_v8 = vmul.f32 %v2511_v33, %v10970_v43  ;;  %v2981_v33 = vrot.slane %v11634_v11, 7 }
 0x701   : > { %8559 = vmatprep.mubr.msk.f32.mxu1 %vm916_vm3, %v11713_v8 }
 0x702   : > { %v2516_v44 = vpop.permute.xlu0 %2515 }
 0x703   : > { %v11718_v30 = vmul.f32 %v2516_v44, %v10966_v23 }
 0x705   : > { %8560 = vmatmul.mubr.msk.f32.gmra.mrb[20].mxu1 %vm916_vm3, %v11718_v30 }
 0x706   : > { %v2521_v6 = vpop.permute.xlu1 %2520 }
 0x707   : > { %v11723_v15 = vmul.f32 %v2521_v6, %v10982_v57 }
 0x709   : > { %8562 = vmatprep.mubr.msk.f32.mxu1 %vm916_vm3, %v11723_v15 }
 0x70a   : > { %v2526_v17 = vpop.permute.xlu0 %2525 }
 0x70b   : > { %v11728_v43 = vmul.f32 %v2526_v17, %v10978_v29  ;;  %v14069_v29 = vld [vmem:[#allocation6_spill] sm:$0xff] }
 0x70d   : > { %8563 = vmatmul.mubr.msk.f32.gmra.mrb[22].mxu1 %vm916_vm3, %v11728_v43 }
 0x70e   : > { %v2531_v59 = vpop.permute.xlu1 %2530 }
 0x70f   : > { %v11733_v23 = vmul.f32 %v2531_v59, %v10994_v5 }
 0x711   : > { %8565 = vmatprep.mubr.msk.f32.mxu1 %vm916_vm3, %v11733_v23 }
 0x712   : > { %v2536_v14 = vpop.permute.xlu0 %2535 }
 0x713   : > { %v11738_v57 = vmul.f32 %v2536_v14, %v10990_v41 }
 0x715   : > { %8566 = vmatmul.mubr.msk.f32.gmra.mrb[24].mxu1 %vm916_vm3, %v11738_v57 }
 0x716   : > { %v2541_v63 = vpop.permute.xlu1 %2540 }
 0x717   : > { %v11743_v49 = vmul.f32 %v2541_v63, %v14069_v29  ;;  %v4079_v63 = vld [vmem:[%s13943_s6 + $0x60] sm:$0xff]  ;;  %v4080_v29 = vld [vmem:[%s13943_s6 + $0x68] sm:$0xff] }
 0x719   : > { %8568 = vmatprep.mubr.msk.f32.mxu1 %vm916_vm3, %v11743_v49 }
 0x71a   : > { %v2546_v3 = vpop.permute.xlu0 %2545 }
 0x71b   : > { %v11748_v5 = vmul.f32 %v2546_v3, %v11002_v28  ;;  %v11817_v3 = vsel %vm1056_vm4, 0.0, %v2981_v33 }
 0x71d   : > { %8569 = vmatmul.mubr.msk.f32.gmra.mrb[26].mxu1 %vm916_vm3, %v11748_v5 }
 0x71e   : > { %v2551_v40 = vpop.permute.xlu1 %2550 }
 0x71f   : > { %v11753_v41 = vmul.f32 %v2551_v40, %v11018_v52  ;;  %v2984_v40 = vrot.slane %v11644_v35, 7 }
 0x721   : > { %8571 = vmatprep.mubr.msk.f32.mxu1 %vm916_vm3, %v11753_v41 }
 0x722   : > { %v2556_v48 = vpop.permute.xlu0 %2555 }
 0x723   : > { %v11758_v53 = vmul.f32 %v2556_v48, %v11014_v34  ;;  %v14070_v34 = vld [vmem:[#allocation5_spill] sm:$0xff] }
 0x724   : > { %v2632_v55 = vadd.s32 8, %v14070_v34  ;;  %v2634_v7 = vadd.s32 24, %v14070_v34  ;;  %v2636_v26 = vadd.s32 40, %v14070_v34  ;;  %v2638_v27 = vadd.s32 56, %v14070_v34 }
 0x725   : > { %8572 = vmatmul.mubr.msk.f32.gmra.mrb[28].mxu1 %vm916_vm3, %v11758_v53  ;;  %v2640_v6 = vadd.s32 72, %v14070_v34 }
 0x726   : > { %v2561_v39 = vpop.permute.xlu1 %2560  ;;  %v2664_v50 = vand.u32 15, %v2632_v55  ;;  %v2666_v54 = vand.u32 15, %v2634_v7 }
 0x727   : > { %v11763_v28 = vmul.f32 %v2561_v39, %v11030_v16  ;;  %v2672_v39 = vand.u32 15, %v2640_v6 }
 0x728   : > { %vm2792_vm6 = vcmp.ne.s32.totalorder %v2664_v50, 15  ;;  %vm2794_vm7 = vcmp.ne.s32.totalorder %v2666_v54, 15 }
 0x729   : > { %8574 = vmatprep.mubr.msk.f32.mxu1 %vm916_vm3, %v11763_v28  ;;  %v7753_v62 = vsel %vm2792_vm6, 1.0, %v14064_v32  ;;  %v7754_v44 = vsel %vm2794_vm7, 1.0, %v14064_v32  ;;  %vm2800_vm10 = vcmp.ne.s32.totalorder %v2672_v39, 15 }
 0x72a   : > { %v2566_v9 = vpop.permute.xlu0 %2565  ;;  %v2888_v31 = vmul.f32 %v7753_v62, %v11639_v19  ;;  %v2890_v14 = vmul.f32 %v7754_v44, %v11649_v51 }
 0x72b   : > { %v11768_v52 = vmul.f32 %v2566_v9, %v11026_v56  ;;  %v2642_v9 = vadd.s32 88, %v14070_v34 }
 0x72c   : > { %v2982_v59 = vrot.slane %v2888_v31, 7  ;;  %v2992_v31 = vrot.slane %v11673_v24, 7 }
 0x72d   : > { %8575 = vmatmul.mubr.msk.f32.gmra.mrb[30].mxu1 %vm916_vm3, %v11768_v52 }
 0x72e   : > { %v2571_v42 = vpop.permute.xlu1 %2570  ;;  %v11828_v55 = vsel %vm1056_vm4, %v2981_v33, %v2982_v59  ;;  %v11834_v7 = vsel %vm1056_vm4, %v2982_v59, %v2984_v40  ;;  %v2646_v33 = vadd.s32 120, %v14070_v34  ;;  %v2996_v59 = vrot.slane %v11683_v58, 7 }
 0x72f   : > { %v11774_v18 = vmul.f32 %v2571_v42, %v11042_v45  ;;  %v11825_v42 = vpack.c.bf16 %v4080_v29, %v4079_v63  ;;  %v2648_v29 = vadd.s32 136, %v14070_v34 }
 0x730   : > { %v2678_v63 = vand.u32 15, %v2646_v33  ;;  %v2652_v33 = vadd.s32 168, %v14070_v34 }
 0x731   : > { %8577 = vmatprep.mubr.msk.f32.mxu1 %vm916_vm3, %v11774_v18 }
 0x732   : > { %v2576_v16 = vpop.permute.xlu0 %2575  ;;  %vm2806_vm13 = vcmp.ne.s32.totalorder %v2678_v63, 15  ;;  %v3008_v63 = vrot.slane %v11713_v8, 7 }
 0x733   : > { %v11780_v61 = vmul.f32 %v2576_v16, %v11038_v47  ;;  %v2668_v47 = vand.u32 15, %v2636_v26  ;;  %v2986_v16 = vrot.slane %v2890_v14, 7  ;;  %v2644_v26 = vadd.s32 104, %v14070_v34 }
 0x735   : > { %8578 = vmatmul.mubr.msk.f32.gmra.mrb[32].mxu1 %vm916_vm3, %v11780_v61  ;;  %vm2796_vm8 = vcmp.ne.s32.totalorder %v2668_v47, 15  ;;  %v11843_v62 = vsel %vm1056_vm4, %v2984_v40, %v2986_v16 }
 0x736   : > { %v2581_v56 = vpop.permute.xlu1 %2580  ;;  %v7755_v48 = vsel %vm2796_vm8, 1.0, %v14064_v32 }
 0x737   : > { %v11786_v45 = vmul.f32 %v2581_v56, %v11054_v13  ;;  %v3751_v13 = vld [vmem:[%s13943_s6 + $0x50] sm:$0xff]  ;;  %v2892_v50 = vmul.f32 %v7755_v48, %v11667_v25  ;;  %v2988_v56 = vrot.slane %v11654_v60, 7 }
 0x738   : > { %v9169_v17 = vpack.c.bf16 %v3752_v22, %v3751_v13  ;;  %v7757_v13 = vsel %vm2800_vm10, 1.0, %v14064_v32  ;;  %v2676_v22 = vand.u32 15, %v2644_v26 }
 0x739   : > { %8580 = vmatprep.mubr.msk.f32.mxu1 %vm916_vm3, %v11786_v45  ;;  %v2896_v6 = vmul.f32 %v7757_v13, %v11688_v0  ;;  %v7760_v13 = vsel %vm2806_vm13, 1.0, %v14064_v32 }
 0x73a   : > { %v2586_v1 = vpop.permute.xlu0 %2585  ;;  %vm2804_vm12 = vcmp.ne.s32.totalorder %v2676_v22, 15 }
 0x73b   : > { %v11793_v12 = vmul.f32 %v2586_v1, %v11050_v46  ;;  %v2670_v46 = vand.u32 15, %v2638_v27  ;;  %v2990_v1 = vrot.slane %v2892_v50, 7  ;;  %v11849_v27 = vsel %vm1056_vm4, %v2986_v16, %v2988_v56 }
 0x73c   : > { %v2998_v48 = vrot.slane %v2896_v6, 7  ;;  %v3000_v16 = vrot.slane %v11693_v2, 7  ;;  %v7759_v50 = vsel %vm2804_vm12, 1.0, %v14064_v32  ;;  %vm3685_vm12 = vcmask 1046528  }
 0x73d   : > { %14071 = vst [vmem:[#allocation6_spill] sm:$0xff] %v11793_v12  ;;  %8581 = vmatmul.mubr.msk.f32.gmra.mrb[34].mxu1 %vm916_vm3, %v11793_v12  ;;  %vm2798_vm9 = vcmp.ne.s32.totalorder %v2670_v46, 15  ;;  %v11857_v44 = vsel %vm1056_vm4, %v2988_v56, %v2990_v1  ;;  %v2680_v56 = vand.u32 15, %v2648_v29 }
 0x73e   : > { %8591 = vmatprep.mubr.f32.mxu1 %v14064_v32  ;;  %v7756_v54 = vsel %vm2798_vm9, 1.0, %v14064_v32 }
 0x73f   : > { %v2894_v47 = vmul.f32 %v7756_v54, %v11678_v37  ;;  %v2650_v54 = vadd.s32 152, %v14070_v34  ;;  %vm2808_vm14 = vcmp.ne.s32.totalorder %v2680_v56, 15 }
 0x740   : > { %v7761_v29 = vsel %vm2808_vm14, 1.0, %v14064_v32 }
 0x741   : > { %8592 = vmatmul.mubr.f32.vlgmr.msra.gmra.mrb[4].mxu1 %v14064_v32  ;;  %v2994_v46 = vrot.slane %v2894_v47, 7  ;;  %v11891_v47 = vsel %vm1056_vm4, %v2998_v48, %v3000_v16  ;;  %v2682_v22 = vand.u32 15, %v2650_v54  ;;  %v2904_v56 = vmul.f32 %v7761_v29, %v11728_v43 }
 0x742   : > { %8594 = vmatprep.mubr.msk.f32.mxu1 %vm916_vm3, %v11817_v3  ;;  %9168 = vmatpush3.bf16.msra.mxu1 %v11664_v21  ;;  %v2674_v21 = vand.u32 15, %v2642_v9  ;;  %v3016_v29 = vrot.slane %v11733_v23, 7 }
 0x743   : > { %9170 = vmatprep.subr.bf16.mxu1 %v9169_v17  ;;  %v11871_v40 = vsel %vm1056_vm4, %v2992_v31, %v2994_v46  ;;  %v11877_v9 = vsel %vm1056_vm4, %v2994_v46, %v2996_v59  ;;  %vm2810_vm15 = vcmp.ne.s32.totalorder %v2682_v22, 15 }
 0x744   : > { %vm2802_vm11 = vcmp.ne.s32.totalorder %v2674_v21, 15  ;;  %v11885_v21 = vsel %vm1056_vm4, %v2996_v59, %v2998_v48  ;;  %v2902_v59 = vmul.f32 %v7760_v13, %v11718_v30  ;;  %v2684_v48 = vand.u32 15, %v2652_v33 }
 0x745   : > { %8595 = vmatmul.mubr.msk.f32.gmra.mrb[6].mxu1 %vm916_vm3, %v11828_v55  ;;  %v7758_v14 = vsel %vm2802_vm11, 1.0, %v14064_v32  ;;  %v3014_v33 = vrot.slane %v2904_v56, 7 }
 0x746   : > { %8597 = vmatprep.mubr.msk.f32.mxu1 %vm916_vm3, %v11834_v7  ;;  %9172 = vmatpush3.bf16.msra.mxu1 %v9169_v17  ;;  %v11863_v17 = vsel %vm1056_vm4, %v2990_v1, %v2992_v31  ;;  %v2898_v39 = vmul.f32 %v7758_v14, %v11698_v10  ;;  %v2900_v1 = vmul.f32 %v7759_v50, %v11708_v20  ;;  %v3004_v31 = vrot.slane %v11703_v4, 7 }
 0x747   : > { %9174 = vmatprep.subr.bf16.mxu1 %v11825_v42  ;;  %v3010_v50 = vrot.slane %v2902_v59, 7  ;;  %vm2812_vm0 = vcmp.ne.s32.totalorder %v2684_v48, 15 }
 0x748   : > { %v3002_v26 = vrot.slane %v2898_v39, 7  ;;  %v3006_v6 = vrot.slane %v2900_v1, 7  ;;  %v2654_v39 = vadd.s32 184, %v14070_v34  ;;  %v7762_v1 = vsel %vm2810_vm15, 1.0, %v14064_v32 }
 0x749   : > { %8598 = vmatmul.mubr.msk.f32.gmra.mrb[8].mxu1 %vm916_vm3, %v11843_v62  ;;  %v11927_v22 = vsel %vm1056_vm4, %v3008_v63, %v3010_v50  ;;  %v2906_v59 = vmul.f32 %v7762_v1, %v11738_v57  ;;  %v7763_v36 = vsel %vm2812_vm0, 1.0, %v14064_v32 }
 0x74a   : > { %8600 = vmatprep.mubr.msk.f32.mxu1 %vm916_vm3, %v11849_v27  ;;  %v11899_v46 = vsel %vm1056_vm4, %v3000_v16, %v3002_v26  ;;  %v11905_v14 = vsel %vm1056_vm4, %v3002_v26, %v3004_v31  ;;  %v11913_v16 = vsel %vm1056_vm4, %v3004_v31, %v3006_v6  ;;  %v11919_v54 = vsel %vm1056_vm4, %v3006_v6, %v3008_v63 }
 0x74b   : > { %14072 = vst [vmem:[#allocation12_spill] sm:$0xff] %v11913_v16  ;;  %14073 = vst [vmem:[#allocation13_spill] sm:$0xff] %v11919_v54  ;;  %v3012_v26 = vrot.slane %v11723_v15, 7  ;;  %v2686_v13 = vand.u32 15, %v2654_v39  ;;  %v2656_v31 = vadd.s32 200, %v14070_v34  ;;  %v2658_v63 = vadd.s32 216, %v14070_v34 }
 0x74c   : > { %14074 = vst [vmem:[#allocation14_spill] sm:$0xff] %v11927_v22  ;;  %v3018_v56 = vrot.slane %v2906_v59, 7  ;;  %v2908_v1 = vmul.f32 %v7763_v36, %v11748_v5 }
 0x74d   : > { %8601 = vmatmul.mubr.msk.f32.gmra.mrb[10].mxu1 %vm916_vm3, %v11857_v44  ;;  %v11933_v6 = vsel %vm1056_vm4, %v3010_v50, %v3012_v26  ;;  %vm2814_vm1 = vcmp.ne.s32.totalorder %v2686_v13, 15  ;;  %v2688_v48 = vand.u32 15, %v2656_v31  ;;  %v11941_v39 = vsel %vm1056_vm4, %v3012_v26, %v3014_v33 }
 0x74e   : > { %8603 = vmatprep.mubr.msk.f32.mxu1 %vm916_vm3, %v11863_v17  ;;  %14075 = vst [vmem:[#allocation15_spill] sm:$0xff] %v11933_v6  ;;  %14076 = vst [vmem:[#allocation16_spill] sm:$0xff] %v11941_v39  ;;  %v11947_v50 = vsel %vm1056_vm4, %v3014_v33, %v3016_v29  ;;  %v2690_v13 = vand.u32 15, %v2658_v63  ;;  %v2660_v26 = vadd.s32 232, %v14070_v34  ;;  %v11955_v31 = vsel %vm1056_vm4, %v3016_v29, %v3018_v56 }
 0x74f   : > { %14077 = vst [vmem:[#allocation17_spill] sm:$0xff] %v11947_v50  ;;  %vm2816_vm6 = vcmp.ne.s32.totalorder %v2688_v48, 15  ;;  %14078 = vst [vmem:[#allocation18_spill] sm:$0xff] %v11955_v31  ;;  %v3022_v36 = vrot.slane %v2908_v1, 7  ;;  %v3028_v1 = vrot.slane %v11763_v28, 7 }
 0x750   : > { %vm2818_vm7 = vcmp.ne.s32.totalorder %v2690_v13, 15  ;;  %v2692_v48 = vand.u32 15, %v2660_v26 }
 0x751   : > { %8604 = vmatmul.mubr.msk.f32.gmra.mrb[12].mxu1 %vm916_vm3, %v11871_v40 }
 0x752   : > { %8606 = vmatprep.mubr.msk.f32.mxu1 %vm916_vm3, %v11877_v9  ;;  %vm2820_vm8 = vcmp.ne.s32.totalorder %v2692_v48, 15 }
 0x755   : > { %8607 = vmatmul.mubr.msk.f32.gmra.mrb[14].mxu1 %vm916_vm3, %v11885_v21 }
 0x756   : > { %8609 = vmatprep.mubr.msk.f32.mxu1 %vm916_vm3, %v11891_v47 }
 0x759   : > { %8610 = vmatmul.mubr.msk.f32.gmra.mrb[16].mxu1 %vm916_vm3, %v11899_v46 }
 0x75a   : > { %8612 = vmatprep.mubr.msk.f32.mxu1 %vm916_vm3, %v11905_v14 }
 0x75d   : > { %8613 = vmatmul.mubr.msk.f32.gmra.mrb[18].mxu1 %vm916_vm3, %v11913_v16 }
 0x75e   : > { %8615 = vmatprep.mubr.msk.f32.mxu1 %vm916_vm3, %v11919_v54 }
 0x761   : > { %8616 = vmatmul.mubr.msk.f32.gmra.mrb[20].mxu1 %vm916_vm3, %v11927_v22  ;;  %v3020_v22 = vrot.slane %v11743_v49, 7 }
 0x762   : > { %8618 = vmatprep.mubr.msk.f32.mxu1 %vm916_vm3, %v11933_v6  ;;  %v7764_v6 = vsel %vm2814_vm1, 1.0, %v14064_v32 }
 0x763   : > { %v2910_v59 = vmul.f32 %v7764_v6, %v11758_v53  ;;  %v11961_v33 = vsel %vm1056_vm4, %v3018_v56, %v3020_v22  ;;  %v11968_v29 = vsel %vm1056_vm4, %v3020_v22, %v3022_v36  ;;  %v2633_v22 = vadd.s32 16, %v14070_v34 }
 0x764   : > { %14079 = vst [vmem:[#allocation19_spill] sm:$0xff] %v11961_v33  ;;  %14080 = vst [vmem:[#allocation20_spill] sm:$0xff] %v11968_v29 }
 0x765   : > { %8619 = vmatmul.mubr.msk.f32.gmra.mrb[22].mxu1 %vm916_vm3, %v11941_v39  ;;  %v3024_v39 = vrot.slane %v11753_v41, 7  ;;  %v3026_v63 = vrot.slane %v2910_v59, 7  ;;  %v3032_v59 = vrot.slane %v11774_v18, 7  ;;  %v2665_v48 = vand.u32 15, %v2633_v22 }
 0x766   : > { %8621 = vmatprep.mubr.msk.f32.mxu1 %vm916_vm3, %v11947_v50  ;;  %v7765_v50 = vsel %vm2816_vm6, 1.0, %v14064_v32  ;;  %v2637_v22 = vadd.s32 48, %v14070_v34 }
 0x767   : > { %v2912_v6 = vmul.f32 %v7765_v50, %v11768_v52  ;;  %v11974_v56 = vsel %vm1056_vm4, %v3022_v36, %v3024_v39  ;;  %v11983_v50 = vsel %vm1056_vm4, %v3024_v39, %v3026_v63  ;;  %v11989_v36 = vsel %vm1056_vm4, %v3026_v63, %v3028_v1 }
 0x768   : > { %14081 = vst [vmem:[#allocation21_spill] sm:$0xff] %v11974_v56  ;;  %14082 = vst [vmem:[#allocation22_spill] sm:$0xff] %v11983_v50  ;;  %v2635_v39 = vadd.s32 32, %v14070_v34  ;;  %vm2697_vm10 = vcmp.ne.s32.totalorder %v2665_v48, 0  ;;  %v2669_v48 = vand.u32 15, %v2637_v22 }
 0x769   : > { %8622 = vmatmul.mubr.msk.f32.gmra.mrb[24].mxu1 %vm916_vm3, %v11955_v31  ;;  %v7766_v31 = vsel %vm2818_vm7, 1.0, %v14064_v32  ;;  %v3030_v13 = vrot.slane %v2912_v6, 7  ;;  %14083 = vst [vmem:[#allocation23_spill] sm:$0xff] %v11989_v36 }
 0x76a   : > { %8624 = vmatprep.mubr.msk.f32.mxu1 %vm916_vm3, %v11961_v33  ;;  %v2663_v33 = vand.u32 15, %v14070_v34  ;;  %v2914_v26 = vmul.f32 %v7766_v31, %v11780_v61  ;;  %vm2701_vm13 = vcmp.ne.s32.totalorder %v2669_v48, 0 }
 0x76b   : > { %v11997_v6 = vsel %vm1056_vm4, %v3028_v1, %v3030_v13  ;;  %v2667_v1 = vand.u32 15, %v2635_v39  ;;  %v2639_v39 = vadd.s32 64, %v14070_v34 }
 0x76c   : > { %vm2695_vm9 = vcmp.ne.s32.totalorder %v2663_v33, 0  ;;  %14084 = vst [vmem:[#allocation24_spill] sm:$0xff] %v11997_v6  ;;  %v3034_v31 = vrot.slane %v2914_v26, 7  ;;  %v12006_v33 = vsel %vm1056_vm4, %v3030_v13, %v3032_v59 }
 0x76d   : > { %8625 = vmatmul.mubr.msk.f32.gmra.mrb[26].mxu1 %vm916_vm3, %v11968_v29  ;;  %v7767_v29 = vsel %vm2820_vm8, 1.0, %v14064_v32  ;;  %v7737_v63 = vsel %vm2695_vm9, 1.0, %v14064_v32  ;;  %14086 = vst [vmem:[#allocation26_spill] sm:$0xff] %v12006_v33  ;;  %vm2699_vm11 = vcmp.ne.s32.totalorder %v2667_v1, 0  ;;  %v3687_v1 = vrot.slane %v11639_v19, 1  ;;  %v4345_v19 = vld [vmem:[%s13943_s6 + $0x88] sm:$0xff] }
 0x76e   : > { %8627 = vmatprep.mubr.msk.f32.mxu1 %vm916_vm3, %v11974_v56  ;;  %v12014_v26 = vsel %vm1056_vm4, %v3032_v59, %v3034_v31  ;;  %v7739_v22 = vsel %vm2699_vm11, 1.0, %v14064_v32 }
 0x771   : > { %8628 = vmatmul.mubr.msk.f32.gmra.mrb[28].mxu1 %vm916_vm3, %v11983_v50  ;;  %v12000_v50 = vmul.f32 %v7767_v29, %v11793_v12  ;;  %v2919_v29 = vmul.f32 %v7737_v63, %v11634_v11 }
 0x772   : > { %8630 = vmatprep.mubr.msk.f32.mxu1 %vm916_vm3, %v11989_v36  ;;  %v3036_v36 = vrot.slane %v11786_v45, 7 }
 0x773   : > { %14085 = vst [vmem:[#allocation25_spill] sm:$0xff] %v12000_v50  ;;  %v13983_v56 = vrot.slane %v12000_v50, 7  ;;  %v3686_v63 = vrot.slane %v2919_v29, 1  ;;  %v2923_v50 = vmul.f32 %v7739_v22, %v11654_v60 }
 0x774   : > { %v12020_v13 = vsel %vm1056_vm4, %v3034_v31, %v3036_v36  ;;  %v4081_v31 = vld [vmem:[%s13943_s6 + $0x70] sm:$0xff] }
 0x775   : > { %8631 = vmatmul.mubr.msk.f32.gmra.mrb[30].mxu1 %vm916_vm3, %v11997_v6  ;;  %14087 = vst [vmem:[#allocation27_spill] sm:$0xff] %v12020_v13  ;;  %v7738_v6 = vsel %vm2697_vm10, 1.0, %v14064_v32  ;;  %v12029_v59 = vsel %vm1056_vm4, %v3036_v36, %v13983_v56  ;;  %v2671_v36 = vand.u32 15, %v2639_v39  ;;  %v3748_v56 = vsel %vm3685_vm12, 0.0, %v3686_v63 }
 0x776   : > { %8633 = vmatprep.mubr.msk.f32.mxu1 %vm916_vm3, %v12006_v33  ;;  %14088 = vst [vmem:[#allocation28_spill] sm:$0xff] %v12029_v59  ;;  %v2921_v11 = vmul.f32 %v7738_v6, %v11644_v35  ;;  %v2641_v6 = vadd.s32 80, %v14070_v34  ;;  %v12054_v48 = vsel %vm3685_vm12, %v3686_v63, %v3687_v1  ;;  %v7740_v39 = vsel %vm2701_vm13, 1.0, %v14064_v32 }
 0x777   : > { %14089 = vst [vmem:[#allocation29_spill] sm:$0xff] %v12054_v48  ;;  %vm2703_vm14 = vcmp.ne.s32.totalorder %v2671_v36, 0  ;;  %v3693_v63 = vrot.slane %v2923_v50, 1  ;;  %v2925_v60 = vmul.f32 %v7740_v39, %v11673_v24  ;;  %v3695_v36 = vrot.slane %v11667_v25, 1 }
 0x778   : > { %v3689_v35 = vrot.slane %v2921_v11, 1  ;;  %v2673_v11 = vand.u32 15, %v2641_v6  ;;  %v7741_v6 = vsel %vm2703_vm14, 1.0, %v14064_v32  ;;  %v3699_v39 = vrot.slane %v11678_v37, 1 }
 0x779   : > { %8634 = vmatmul.mubr.msk.f32.gmra.mrb[32].mxu1 %vm916_vm3, %v12014_v26 }
 0x77a   : > { %8636 = vmatprep.mubr.msk.f32.mxu1 %vm916_vm3, %v12020_v13  ;;  %v4082_v13 = vld [vmem:[%s13943_s6 + $0x78] sm:$0xff]  ;;  %vm2705_vm15 = vcmp.ne.s32.totalorder %v2673_v11, 0 }
 0x77b   : > { %v9177_v29 = vpack.c.bf16 %v4082_v13, %v4081_v31  ;;  %v3691_v13 = vrot.slane %v11649_v51, 1  ;;  %v2643_v31 = vadd.s32 96, %v14070_v34  ;;  %v7742_v11 = vsel %vm2705_vm15, 1.0, %v14064_v32 }
 0x77d   : > { %8637 = vmatmul.mubr.msk.f32.gmra.mrb[34].mxu1 %vm916_vm3, %v12029_v59  ;;  %v4344_v59 = vld [vmem:[%s13943_s6 + $0x80] sm:$0xff]  ;;  %v12080_v50 = vsel %vm3685_vm12, %v3691_v13, %v3693_v63 }
 0x77e   : > { %8647 = vmatprep.mubr.f32.mxu1 %v14064_v32  ;;  %v12062_v22 = vpack.c.bf16 %v4345_v19, %v4344_v59  ;;  %v2675_v19 = vand.u32 15, %v2643_v31  ;;  %14091 = vst [vmem:[#allocation31_spill] sm:$0xff] %v12080_v50  ;;  %v3697_v59 = vrot.slane %v2925_v60, 1 }
 0x780   : > { %vm2707_vm0 = vcmp.ne.s32.totalorder %v2675_v19, 0  ;;  %v12094_v60 = vsel %vm3685_vm12, %v3695_v36, %v3697_v59 }
 0x781   : > { %8648 = vmatmul.mubr.msk.f32.vlgmr.msra.gmra.mrb[4].mxu1 %vm916_vm3, %v3748_v56  ;;  %v12065_v56 = vsel %vm3685_vm12, %v3687_v1, %v3689_v35  ;;  %v12086_v1 = vsel %vm3685_vm12, %v3693_v63, %v3695_v36  ;;  %14093 = vst [vmem:[#allocation33_spill] sm:$0xff] %v12094_v60  ;;  %v12100_v63 = vsel %vm3685_vm12, %v3697_v59, %v3699_v39  ;;  %v2649_v36 = vadd.s32 144, %v14070_v34 }
 0x782   : > { %8650 = vmatprep.mubr.msk.f32.mxu1 %vm916_vm3, %v12054_v48  ;;  %9176 = vmatpush3.bf16.msra.mxu1 %v11825_v42  ;;  %v12071_v48 = vsel %vm3685_vm12, %v3689_v35, %v3691_v13  ;;  %v2645_v42 = vadd.s32 112, %v14070_v34  ;;  %v2927_v35 = vmul.f32 %v7741_v6, %v11683_v58  ;;  %14092 = vst [vmem:[#allocation32_spill] sm:$0xff] %v12086_v1  ;;  %v2647_v13 = vadd.s32 128, %v14070_v34 }
 0x783   : > { %9178 = vmatprep.subr.bf16.mxu1 %v9177_v29  ;;  %14090 = vst [vmem:[#allocation30_spill] sm:$0xff] %v12071_v48  ;;  %v2929_v6 = vmul.f32 %v7742_v11, %v11693_v2  ;;  %14094 = vst [vmem:[#allocation34_spill] sm:$0xff] %v12100_v63 }
 0x784   : > { %v3701_v31 = vrot.slane %v2927_v35, 1  ;;  %v2679_v19 = vand.u32 15, %v2647_v13 }
 0x785   : > { %8651 = vmatmul.mubr.msk.f32.gmra.mrb[6].mxu1 %vm916_vm3, %v12065_v56  ;;  %v3705_v35 = vrot.slane %v2929_v6, 1 }
 0x786   : > { %8653 = vmatprep.mubr.msk.f32.mxu1 %vm916_vm3, %v12071_v48  ;;  %9180 = vmatpush3.bf16.msra.mxu1 %v9177_v29  ;;  %v2677_v29 = vand.u32 15, %v2645_v42  ;;  %v12108_v42 = vsel %vm3685_vm12, %v3699_v39, %v3701_v31  ;;  %vm2711_vm6 = vcmp.ne.s32.totalorder %v2679_v19, 0  ;;  %v2651_v39 = vadd.s32 160, %v14070_v34 }
 0x787   : > { %9182 = vmatprep.subr.bf16.mxu1 %v12062_v22  ;;  %14095 = vst [vmem:[#allocation35_spill] sm:$0xff] %v12108_v42 }
 0x788   : > { %vm2709_vm1 = vcmp.ne.s32.totalorder %v2677_v29, 0  ;;  %v2681_v29 = vand.u32 15, %v2649_v36  ;;  %v2683_v19 = vand.u32 15, %v2651_v39 }
 0x789   : > { %8654 = vmatmul.mubr.msk.f32.gmra.mrb[8].mxu1 %vm916_vm3, %v12080_v50  ;;  %v3703_v50 = vrot.slane %v11688_v0, 1 }
 0x78a   : > { %8656 = vmatprep.mubr.msk.f32.mxu1 %vm916_vm3, %v12086_v1  ;;  %v7743_v1 = vsel %vm2707_vm0, 1.0, %v14064_v32  ;;  %vm2713_vm7 = vcmp.ne.s32.totalorder %v2681_v29, 0  ;;  %vm2715_vm8 = vcmp.ne.s32.totalorder %v2683_v19, 0 }
 0x78b   : > { %v2931_v11 = vmul.f32 %v7743_v1, %v11703_v4  ;;  %v12114_v59 = vsel %vm3685_vm12, %v3701_v31, %v3703_v50  ;;  %v12122_v13 = vsel %vm3685_vm12, %v3703_v50, %v3705_v35  ;;  %v2653_v50 = vadd.s32 176, %v14070_v34 }
 0x78c   : > { %14096 = vst [vmem:[#allocation36_spill] sm:$0xff] %v12114_v59  ;;  %14097 = vst [vmem:[#allocation37_spill] sm:$0xff] %v12122_v13 }
 0x78d   : > { %8657 = vmatmul.mubr.msk.f32.gmra.mrb[10].mxu1 %vm916_vm3, %v12094_v60  ;;  %v3707_v60 = vrot.slane %v11698_v10, 1  ;;  %v3709_v1 = vrot.slane %v2931_v11, 1  ;;  %v2685_v29 = vand.u32 15, %v2653_v50 }
 0x78e   : > { %8659 = vmatprep.mubr.msk.f32.mxu1 %vm916_vm3, %v12100_v63  ;;  %v7744_v63 = vsel %vm2709_vm1, 1.0, %v14064_v32 }
 0x78f   : > { %v2933_v6 = vmul.f32 %v7744_v63, %v11713_v8  ;;  %v12128_v31 = vsel %vm3685_vm12, %v3705_v35, %v3707_v60  ;;  %v12136_v36 = vsel %vm3685_vm12, %v3707_v60, %v3709_v1  ;;  %v2655_v60 = vadd.s32 192, %v14070_v34 }
 0x790   : > { %14098 = vst [vmem:[#allocation38_spill] sm:$0xff] %v12128_v31  ;;  %14099 = vst [vmem:[#allocation39_spill] sm:$0xff] %v12136_v36  ;;  %vm2717_vm9 = vcmp.ne.s32.totalorder %v2685_v29, 0 }
 0x791   : > { %8660 = vmatmul.mubr.msk.f32.gmra.mrb[12].mxu1 %vm916_vm3, %v12108_v42  ;;  %v3711_v42 = vrot.slane %v11708_v20, 1  ;;  %v3713_v63 = vrot.slane %v2933_v6, 1  ;;  %v2687_v19 = vand.u32 15, %v2655_v60 }
 0x792   : > { %8662 = vmatprep.mubr.msk.f32.mxu1 %vm916_vm3, %v12114_v59  ;;  %v7745_v59 = vsel %vm2711_vm6, 1.0, %v14064_v32 }
 0x793   : > { %v2935_v11 = vmul.f32 %v7745_v59, %v11723_v15  ;;  %v12142_v35 = vsel %vm3685_vm12, %v3709_v1, %v3711_v42  ;;  %v12150_v39 = vsel %vm3685_vm12, %v3711_v42, %v3713_v63  ;;  %v2657_v42 = vadd.s32 208, %v14070_v34 }
 0x794   : > { %14100 = vst [vmem:[#allocation40_spill] sm:$0xff] %v12142_v35  ;;  %14101 = vst [vmem:[#allocation41_spill] sm:$0xff] %v12150_v39  ;;  %vm2719_vm10 = vcmp.ne.s32.totalorder %v2687_v19, 0 }
 0x795   : > { %8663 = vmatmul.mubr.msk.f32.gmra.mrb[14].mxu1 %vm916_vm3, %v12122_v13  ;;  %v3715_v13 = vrot.slane %v11718_v30, 1  ;;  %v3717_v59 = vrot.slane %v2935_v11, 1  ;;  %v2689_v29 = vand.u32 15, %v2657_v42 }
 0x796   : > { %8665 = vmatprep.mubr.msk.f32.mxu1 %vm916_vm3, %v12128_v31  ;;  %v7746_v31 = vsel %vm2713_vm7, 1.0, %v14064_v32 }
 0x797   : > { %v2937_v6 = vmul.f32 %v7746_v31, %v11733_v23  ;;  %v12156_v1 = vsel %vm3685_vm12, %v3713_v63, %v3715_v13  ;;  %v12164_v50 = vsel %vm3685_vm12, %v3715_v13, %v3717_v59  ;;  %v2659_v13 = vadd.s32 224, %v14070_v34 }
 0x798   : > { %14102 = vst [vmem:[#allocation42_spill] sm:$0xff] %v12156_v1  ;;  %14103 = vst [vmem:[#allocation43_spill] sm:$0xff] %v12164_v50  ;;  %vm2721_vm11 = vcmp.ne.s32.totalorder %v2689_v29, 0 }
 0x799   : > { %8666 = vmatmul.mubr.msk.f32.gmra.mrb[16].mxu1 %vm916_vm3, %v12136_v36  ;;  %v3719_v36 = vrot.slane %v11728_v43, 1  ;;  %v3721_v31 = vrot.slane %v2937_v6, 1  ;;  %v2691_v19 = vand.u32 15, %v2659_v13 }
 0x79a   : > { %8668 = vmatprep.mubr.msk.f32.mxu1 %vm916_vm3, %v12142_v35  ;;  %v7747_v35 = vsel %vm2715_vm8, 1.0, %v14064_v32 }
 0x79b   : > { %v2939_v11 = vmul.f32 %v7747_v35, %v11743_v49  ;;  %v12170_v63 = vsel %vm3685_vm12, %v3717_v59, %v3719_v36  ;;  %v12178_v60 = vsel %vm3685_vm12, %v3719_v36, %v3721_v31  ;;  %v2661_v36 = vadd.s32 240, %v14070_v34 }
 0x79c   : > { %14104 = vst [vmem:[#allocation44_spill] sm:$0xff] %v12170_v63  ;;  %14105 = vst [vmem:[#allocation45_spill] sm:$0xff] %v12178_v60  ;;  %vm2723_vm13 = vcmp.ne.s32.totalorder %v2691_v19, 0 }
 0x79d   : > { %8669 = vmatmul.mubr.msk.f32.gmra.mrb[18].mxu1 %vm916_vm3, %v12150_v39  ;;  %v3723_v39 = vrot.slane %v11738_v57, 1  ;;  %v3725_v35 = vrot.slane %v2939_v11, 1  ;;  %v2693_v29 = vand.u32 15, %v2661_v36  ;;  %v7751_v48 = vsel %vm2723_vm13, 1.0, %v14064_v32 }
 0x79e   : > { %8671 = vmatprep.mubr.msk.f32.mxu1 %vm916_vm3, %v12156_v1  ;;  %v7748_v1 = vsel %vm2717_vm9, 1.0, %v14064_v32  ;;  %v2947_v36 = vmul.f32 %v7751_v48, %v11786_v45 }
 0x79f   : > { %v2941_v6 = vmul.f32 %v7748_v1, %v11753_v41  ;;  %v12184_v59 = vsel %vm3685_vm12, %v3721_v31, %v3723_v39  ;;  %v12192_v42 = vsel %vm3685_vm12, %v3723_v39, %v3725_v35  ;;  %vm2725_vm14 = vcmp.ne.s32.totalorder %v2693_v29, 0 }
 0x7a0   : > { %14106 = vst [vmem:[#allocation46_spill] sm:$0xff] %v12184_v59  ;;  %14107 = vst [vmem:[#allocation47_spill] sm:$0xff] %v12192_v42 }
 0x7a1   : > { %8672 = vmatmul.mubr.msk.f32.gmra.mrb[20].mxu1 %vm916_vm3, %v12164_v50  ;;  %v3727_v50 = vrot.slane %v11748_v5, 1  ;;  %v3729_v1 = vrot.slane %v2941_v6, 1  ;;  %v2591_v6 = vpop.permute.xlu1 %2590 }
 0x7a2   : > { %8674 = vmatprep.mubr.msk.f32.mxu1 %vm916_vm3, %v12170_v63  ;;  %v7749_v63 = vsel %vm2719_vm10, 1.0, %v14064_v32 }
 0x7a3   : > { %v2943_v11 = vmul.f32 %v7749_v63, %v11763_v28  ;;  %v12198_v31 = vsel %vm3685_vm12, %v3725_v35, %v3727_v50  ;;  %v12205_v39 = vsel %vm3685_vm12, %v3727_v50, %v3729_v1  ;;  %v12218_v50 = vmul.f32 %v2591_v6, %v11066_v38 }
 0x7a4   : > { %14108 = vst [vmem:[#allocation48_spill] sm:$0xff] %v12205_v39 }
 0x7a5   : > { %8675 = vmatmul.mubr.msk.f32.gmra.mrb[22].mxu1 %vm916_vm3, %v12178_v60  ;;  %v3731_v60 = vrot.slane %v11758_v53, 1  ;;  %v3733_v13 = vrot.slane %v2943_v11, 1  ;;  %14110 = vst [vmem:[#allocation50_spill] sm:$0xff] %v12218_v50  ;;  %v3739_v11 = vrot.slane %v11780_v61, 1 }
 0x7a6   : > { %8677 = vmatprep.mubr.msk.f32.mxu1 %vm916_vm3, %v12184_v59  ;;  %v7750_v59 = vsel %vm2721_vm11, 1.0, %v14064_v32 }
 0x7a7   : > { %v2945_v63 = vmul.f32 %v7750_v59, %v11774_v18  ;;  %v12211_v35 = vsel %vm3685_vm12, %v3729_v1, %v3731_v60  ;;  %v12221_v59 = vsel %vm3685_vm12, %v3731_v60, %v3733_v13  ;;  %v3741_v60 = vrot.slane %v2947_v36, 1  ;;  %v4347_v36 = vld [vmem:[%s13943_s6 + $0x98] sm:$0xff] }
 0x7a8   : > { %14109 = vst [vmem:[#allocation49_spill] sm:$0xff] %v12211_v35  ;;  %14111 = vst [vmem:[#allocation51_spill] sm:$0xff] %v12221_v59 }
 0x7a9   : > { %8678 = vmatmul.mubr.msk.f32.gmra.mrb[24].mxu1 %vm916_vm3, %v12192_v42  ;;  %v3735_v42 = vrot.slane %v11768_v52, 1  ;;  %v3737_v19 = vrot.slane %v2945_v63, 1  ;;  %v12248_v63 = vsel %vm3685_vm12, %v3739_v11, %v3741_v60 }
 0x7aa   : > { %8680 = vmatprep.mubr.msk.f32.mxu1 %vm916_vm3, %v12198_v31  ;;  %14114 = vst [vmem:[#allocation54_spill] sm:$0xff] %v12248_v63 }
 0x7ab   : > { %v12227_v1 = vsel %vm3685_vm12, %v3733_v13, %v3735_v42  ;;  %v12234_v38 = vsel %vm3685_vm12, %v3735_v42, %v3737_v19  ;;  %v12242_v48 = vsel %vm3685_vm12, %v3737_v19, %v3739_v11  ;;  %v3743_v13 = vrot.slane %v11793_v12, 1  ;;  %v4346_v19 = vld [vmem:[%s13943_s6 + $0x90] sm:$0xff] }
 0x7ac   : > { %14112 = vst [vmem:[#allocation52_spill] sm:$0xff] %v12227_v1  ;;  %14113 = vst [vmem:[#allocation53_spill] sm:$0xff] %v12242_v48  ;;  %v9185_v11 = vpack.c.bf16 %v4347_v36, %v4346_v19  ;;  %v14119_v19 = vld [vmem:[#allocation17_spill] sm:$0xff]  ;;  %v14120_v36 = vld [vmem:[#allocation18_spill] sm:$0xff] }
 0x7ad   : > { %8681 = vmatmul.mubr.msk.f32.gmra.mrb[26].mxu1 %vm916_vm3, %v12205_v39  ;;  %v12254_v6 = vsel %vm3685_vm12, %v3741_v60, %v3743_v13  ;;  %v4616_v60 = vld [vmem:[%s13943_s6 + $0xa0] sm:$0xff] }
 0x7ae   : > { %8683 = vmatprep.mubr.msk.f32.mxu1 %vm916_vm3, %v12211_v35  ;;  %v7752_v35 = vsel %vm2725_vm14, 1.0, %v14064_v32  ;;  %14115 = vst [vmem:[#allocation55_spill] sm:$0xff] %v12254_v6 }
 0x7af   : > { %v12237_v29 = vmul.f32 %v7752_v35, %v12218_v50 }
 0x7b1   : > { %8684 = vmatmul.mubr.msk.f32.gmra.mrb[28].mxu1 %vm916_vm3, %v12221_v59  ;;  %v14031_v42 = vrot.slane %v12237_v29, 1 }
 0x7b2   : > { %8686 = vmatprep.mubr.msk.f32.mxu1 %vm916_vm3, %v12227_v1 }
 0x7b3   : > { %v12261_v35 = vsel %vm3685_vm12, %v3743_v13, %v14031_v42  ;;  %v4617_v13 = vld [vmem:[%s13943_s6 + $0xa8] sm:$0xff] }
 0x7b4   : > { %v9189_v42 = vpack.c.bf16 %v4617_v13, %v4616_v60  ;;  %v2662_v60 = vadd.s32 248, %v14070_v34  ;;  %v14122_v13 = vld [vmem:[#allocation20_spill] sm:$0xff] }
 0x7b5   : > { %8687 = vmatmul.mubr.msk.f32.gmra.mrb[30].mxu1 %vm916_vm3, %v12234_v38 }
 0x7b6   : > { %8689 = vmatprep.mubr.msk.f32.mxu1 %vm916_vm3, %v12242_v48 }
 0x7b9   : > { %8690 = vmatmul.mubr.msk.f32.gmra.mrb[32].mxu1 %vm916_vm3, %v12248_v63 }
 0x7ba   : > { %8692 = vmatprep.mubr.msk.f32.mxu1 %vm916_vm3, %v12254_v6 }
 0x7bd   : > { %8693 = vmatmul.mubr.msk.f32.gmra.mrb[34].mxu1 %vm916_vm3, %v12261_v35 }
 0x7be   : > { %8703 = vmatprep.mubr.msk.f32.mxu1 %vm916_vm3, %v11817_v3  ;;  %v14116_v3 = vld [vmem:[#allocation14_spill] sm:$0xff] }
 0x7c1   : > { %8704 = vmatmul.mubr.msk.f32.vlgmr.msra.gmra.mrb[4].mxu1 %vm916_vm3, %v11828_v55  ;;  %v14117_v55 = vld [vmem:[#allocation15_spill] sm:$0xff] }
 0x7c2   : > { %8706 = vmatprep.mubr.msk.f32.mxu1 %vm916_vm3, %v11834_v7  ;;  %9184 = vmatpush3.bf16.msra.mxu1 %v12062_v22  ;;  %v14118_v22 = vld [vmem:[#allocation16_spill] sm:$0xff] }
 0x7c3   : > { %9186 = vmatprep.subr.bf16.mxu1 %v9185_v11 }
 0x7c5   : > { %8707 = vmatmul.mubr.msk.f32.gmra.mrb[6].mxu1 %vm916_vm3, %v11843_v62 }
 0x7c6   : > { %8709 = vmatprep.mubr.msk.f32.mxu1 %vm916_vm3, %v11849_v27  ;;  %9188 = vmatpush3.bf16.msra.mxu1 %v9185_v11  ;;  %v14121_v11 = vld [vmem:[#allocation19_spill] sm:$0xff] }
 0x7c7   : > { %9190 = vmatprep.subr.bf16.mxu1 %v9189_v42 }
 0x7c9   : > { %8710 = vmatmul.mubr.msk.f32.gmra.mrb[8].mxu1 %vm916_vm3, %v11857_v44 }
 0x7ca   : > { %8712 = vmatprep.mubr.msk.f32.mxu1 %vm916_vm3, %v11863_v17 }
 0x7cd   : > { %8713 = vmatmul.mubr.msk.f32.gmra.mrb[10].mxu1 %vm916_vm3, %v11871_v40 }
 0x7ce   : > { %8715 = vmatprep.mubr.msk.f32.mxu1 %vm916_vm3, %v11877_v9 }
 0x7d1   : > { %8716 = vmatmul.mubr.msk.f32.gmra.mrb[12].mxu1 %vm916_vm3, %v11885_v21 }
 0x7d2   : > { %8718 = vmatprep.mubr.msk.f32.mxu1 %vm916_vm3, %v11891_v47 }
 0x7d5   : > { %8719 = vmatmul.mubr.msk.f32.gmra.mrb[14].mxu1 %vm916_vm3, %v11899_v46 }
 0x7d6   : > { %8721 = vmatprep.mubr.msk.f32.mxu1 %vm916_vm3, %v11905_v14 }
 0x7d9   : > { %8722 = vmatmul.mubr.msk.f32.gmra.mrb[16].mxu1 %vm916_vm3, %v11913_v16 }
 0x7da   : > { %8724 = vmatprep.mubr.msk.f32.mxu1 %vm916_vm3, %v11919_v54  ;;  %v2596_v54 = vpop.permute.xlu0 %2595 }
 0x7dd   : > { %8725 = vmatmul.mubr.msk.f32.gmra.mrb[18].mxu1 %vm916_vm3, %v14116_v3  ;;  %v14123_v3 = vld [vmem:[#allocation21_spill] sm:$0xff] }
 0x7de   : > { %8727 = vmatprep.mubr.msk.f32.mxu1 %vm916_vm3, %v14117_v55  ;;  %v2694_v55 = vand.u32 15, %v2662_v60 }
 0x7e0   : > { %vm2822_vm15 = vcmp.ne.s32.totalorder %v2694_v55, 15  ;;  %v14129_v55 = vld [vmem:[#allocation27_spill] sm:$0xff] }
 0x7e1   : > { %8728 = vmatmul.mubr.msk.f32.gmra.mrb[20].mxu1 %vm916_vm3, %v14118_v22  ;;  %v14124_v22 = vld [vmem:[#allocation22_spill] sm:$0xff]  ;;  %v7768_v34 = vsel %vm2822_vm15, 1.0, %v14064_v32  ;;  %v14131_v32 = vld [vmem:[#allocation25_spill] sm:$0xff] }
 0x7e2   : > { %8730 = vmatprep.mubr.msk.f32.mxu1 %vm916_vm3, %v14119_v19  ;;  %v14125_v19 = vld [vmem:[#allocation23_spill] sm:$0xff] }
 0x7e5   : > { %8731 = vmatmul.mubr.msk.f32.gmra.mrb[22].mxu1 %vm916_vm3, %v14120_v36  ;;  %v14126_v36 = vld [vmem:[#allocation7_spill] sm:$0xff] }
 0x7e6   : > { %8733 = vmatprep.mubr.msk.f32.mxu1 %vm916_vm3, %v14121_v11  ;;  %v12330_v16 = vmul.f32 %v2596_v54, %v14126_v36  ;;  %v14127_v11 = vld [vmem:[#allocation24_spill] sm:$0xff] }
 0x7e7   : > { %v14130_v36 = vld [vmem:[#allocation28_spill] sm:$0xff] }
 0x7e8   : > { %v12338_v60 = vmul.f32 %v7768_v34, %v12330_v16 }
 0x7e9   : > { %8734 = vmatmul.mubr.msk.f32.gmra.mrb[24].mxu1 %vm916_vm3, %v14122_v13 }
 0x7ea   : > { %8736 = vmatprep.mubr.msk.f32.mxu1 %vm916_vm3, %v14123_v3  ;;  %14128 = vst [vmem:[#allocation20_spill] sm:$0xff] %v12338_v60  ;;  %v14037_v54 = vrot.slane %v12338_v60, 7  ;;  %v14136_v60 = vld [vmem:[#allocation9_spill] sm:$0xff] }
 0x7ed   : > { %8737 = vmatmul.mubr.msk.f32.gmra.mrb[26].mxu1 %vm916_vm3, %v14124_v22 }
 0x7ee   : > { %8739 = vmatprep.mubr.msk.f32.mxu1 %vm916_vm3, %v14125_v19  ;;  %v4075_v19 = vrot.slane %v12218_v50, 7 }
 0x7f0   : > { %v12358_v34 = vsel %vm1056_vm4, %v4075_v19, %v14037_v54  ;;  %v4885_v54 = vld [vmem:[%s13943_s6 + $0xc8] sm:$0xff] }
 0x7f1   : > { %8740 = vmatmul.mubr.msk.f32.gmra.mrb[28].mxu1 %vm916_vm3, %v14127_v11  ;;  %v14132_v11 = vrot.slane %v14131_v32, 7  ;;  %14134 = vst [vmem:[#allocation22_spill] sm:$0xff] %v12358_v34  ;;  %v14135_v32 = vld [vmem:[#allocation8_spill] sm:$0xff] }
 0x7f2   : > { %8742 = vmatprep.mubr.msk.f32.mxu1 %vm916_vm3, %v12006_v33 }
 0x7f3   : > { %v12351_v33 = vsel %vm1056_vm4, %v14132_v11, %v4075_v19  ;;  %v4884_v19 = vld [vmem:[%s13943_s6 + $0xc0] sm:$0xff] }
 0x7f4   : > { %14133 = vst [vmem:[#allocation21_spill] sm:$0xff] %v12351_v33 }
 0x7f5   : > { %8743 = vmatmul.mubr.msk.f32.gmra.mrb[30].mxu1 %vm916_vm3, %v12014_v26 }
 0x7f6   : > { %8745 = vmatprep.mubr.msk.f32.mxu1 %vm916_vm3, %v14129_v55  ;;  %v4618_v55 = vld [vmem:[%s13943_s6 + $0xb0] sm:$0xff] }
 0x7f9   : > { %8746 = vmatmul.mubr.msk.f32.gmra.mrb[32].mxu1 %vm916_vm3, %v14130_v36  ;;  %v4619_v36 = vld [vmem:[%s13943_s6 + $0xb8] sm:$0xff] }
 0x7fa   : > { %8748 = vmatprep.mubr.msk.f32.mxu1 %vm916_vm3, %v12351_v33  ;;  %v9193_v11 = vpack.c.bf16 %v4619_v36, %v4618_v55  ;;  %v14137_v33 = vld [vmem:[#allocation10_spill] sm:$0xff]  ;;  %v14138_v55 = vld [vmem:[#allocation11_spill] sm:$0xff] }
 0x7fd   : > { %8749 = vmatmul.mubr.msk.f32.gmra.mrb[34].mxu1 %vm916_vm3, %v12358_v34  ;;  %v9197_v34 = vpack.c.bf16 %v4885_v54, %v4884_v19  ;;  %v14139_v54 = vld [vmem:[#allocation29_spill] sm:$0xff]  ;;  %v14140_v19 = vld [vmem:[#allocation30_spill] sm:$0xff] }
 0x7fe   : > { %8759 = vmatprep.mubr.msk.f32.mxu1 %vm916_vm3, %v14135_v32  ;;  %v5148_v32 = vld [vmem:[%s13943_s6 + $0xe0] sm:$0xff] }
 0x801   : > { %8760 = vmatmul.mubr.msk.f32.vlgmr.msra.gmra.mrb[4].mxu1 %vm916_vm3, %v14136_v60  ;;  %v4887_v60 = vld [vmem:[%s13943_s6 + $0xd8] sm:$0xff] }
 0x802   : > { %8762 = vmatprep.mubr.msk.f32.mxu1 %vm916_vm3, %v14137_v33  ;;  %9192 = vmatpush3.bf16.msra.mxu1 %v9189_v42  ;;  %v4886_v42 = vld [vmem:[%s13943_s6 + $0xd0] sm:$0xff] }
 0x803   : > { %9194 = vmatprep.subr.bf16.mxu1 %v9193_v11  ;;  %v9201_v36 = vpack.c.bf16 %v4887_v60, %v4886_v42  ;;  %v14142_v42 = vld [vmem:[#allocation32_spill] sm:$0xff]  ;;  %v14143_v60 = vld [vmem:[#allocation33_spill] sm:$0xff] }
 0x805   : > { %8763 = vmatmul.mubr.msk.f32.gmra.mrb[6].mxu1 %vm916_vm3, %v11649_v51 }
 0x806   : > { %8765 = vmatprep.mubr.msk.f32.mxu1 %vm916_vm3, %v14138_v55  ;;  %9196 = vmatpush3.bf16.msra.mxu1 %v9193_v11  ;;  %v5149_v11 = vld [vmem:[%s13943_s6 + $0xe8] sm:$0xff] }
 0x807   : > { %9198 = vmatprep.subr.bf16.mxu1 %v9197_v34 }
 0x809   : > { %8766 = vmatmul.mubr.msk.f32.gmra.mrb[8].mxu1 %vm916_vm3, %v11667_v25 }
 0x80a   : > { %8768 = vmatprep.mubr.msk.f32.mxu1 %vm916_vm3, %v11673_v24 }
 0x80d   : > { %8769 = vmatmul.mubr.msk.f32.gmra.mrb[10].mxu1 %vm916_vm3, %v11678_v37 }
 0x80e   : > { %8771 = vmatprep.mubr.msk.f32.mxu1 %vm916_vm3, %v11683_v58 }
 0x811   : > { %8772 = vmatmul.mubr.msk.f32.gmra.mrb[12].mxu1 %vm916_vm3, %v11688_v0 }
 0x812   : > { %8774 = vmatprep.mubr.msk.f32.mxu1 %vm916_vm3, %v11693_v2 }
 0x815   : > { %8775 = vmatmul.mubr.msk.f32.gmra.mrb[14].mxu1 %vm916_vm3, %v11698_v10 }
 0x816   : > { %8777 = vmatprep.mubr.msk.f32.mxu1 %vm916_vm3, %v11703_v4 }
 0x819   : > { %8778 = vmatmul.mubr.msk.f32.gmra.mrb[16].mxu1 %vm916_vm3, %v11708_v20 }
 0x81a   : > { %8780 = vmatprep.mubr.msk.f32.mxu1 %vm916_vm3, %v11713_v8 }
 0x81d   : > { %8781 = vmatmul.mubr.msk.f32.gmra.mrb[18].mxu1 %vm916_vm3, %v11718_v30 }
 0x81e   : > { %8783 = vmatprep.mubr.msk.f32.mxu1 %vm916_vm3, %v11723_v15 }
 0x821   : > { %8784 = vmatmul.mubr.msk.f32.gmra.mrb[20].mxu1 %vm916_vm3, %v11728_v43 }
 0x822   : > { %8786 = vmatprep.mubr.msk.f32.mxu1 %vm916_vm3, %v11733_v23 }
 0x825   : > { %8787 = vmatmul.mubr.msk.f32.gmra.mrb[22].mxu1 %vm916_vm3, %v11738_v57 }
 0x826   : > { %8789 = vmatprep.mubr.msk.f32.mxu1 %vm916_vm3, %v11743_v49 }
 0x829   : > { %8790 = vmatmul.mubr.msk.f32.gmra.mrb[24].mxu1 %vm916_vm3, %v11748_v5 }
 0x82a   : > { %8792 = vmatprep.mubr.msk.f32.mxu1 %vm916_vm3, %v11753_v41 }
 0x82d   : > { %8793 = vmatmul.mubr.msk.f32.gmra.mrb[26].mxu1 %vm916_vm3, %v11758_v53 }
 0x82e   : > { %8795 = vmatprep.mubr.msk.f32.mxu1 %vm916_vm3, %v11763_v28 }
 0x831   : > { %8796 = vmatmul.mubr.msk.f32.gmra.mrb[28].mxu1 %vm916_vm3, %v11768_v52 }
 0x832   : > { %8798 = vmatprep.mubr.msk.f32.mxu1 %vm916_vm3, %v11774_v18 }
 0x835   : > { %8799 = vmatmul.mubr.msk.f32.gmra.mrb[30].mxu1 %vm916_vm3, %v11780_v61 }
 0x836   : > { %8801 = vmatprep.mubr.msk.f32.mxu1 %vm916_vm3, %v11786_v45 }
 0x839   : > { %8802 = vmatmul.mubr.msk.f32.gmra.mrb[32].mxu1 %vm916_vm3, %v11793_v12  ;;  %v14141_v12 = vld [vmem:[#allocation31_spill] sm:$0xff] }
 0x83a   : > { %8804 = vmatprep.mubr.msk.f32.mxu1 %vm916_vm3, %v12218_v50  ;;  %v9205_v50 = vpack.c.bf16 %v5149_v11, %v5148_v32  ;;  %v14147_v32 = vld [vmem:[#allocation37_spill] sm:$0xff]  ;;  %v14148_v11 = vld [vmem:[#allocation38_spill] sm:$0xff] }
 0x83d   : > { %8805 = vmatmul.mubr.msk.f32.gmra.mrb[34].mxu1 %vm916_vm3, %v12330_v16 }
 0x83e   : > { %8815 = vmatprep.mubr.msk.f32.mxu1 %vm916_vm3, %v14139_v54  ;;  %v14144_v54 = vld [vmem:[#allocation34_spill] sm:$0xff] }
 0x841   : > { %8816 = vmatmul.mubr.msk.f32.vlgmr.msra.gmra.mrb[4].mxu1 %vm916_vm3, %v12065_v56  ;;  %v14145_v56 = vld [vmem:[#allocation35_spill] sm:$0xff] }
 0x842   : > { %8818 = vmatprep.mubr.msk.f32.mxu1 %vm916_vm3, %v14140_v19  ;;  %9200 = vmatpush3.bf16.msra.mxu1 %v9197_v34  ;;  %v14146_v34 = vld [vmem:[#allocation36_spill] sm:$0xff] }
 0x843   : > { %9202 = vmatprep.subr.bf16.mxu1 %v9201_v36 }
 0x845   : > { %8819 = vmatmul.mubr.msk.f32.gmra.mrb[6].mxu1 %vm916_vm3, %v14141_v12 }
 0x846   : > { %8821 = vmatprep.mubr.msk.f32.mxu1 %vm916_vm3, %v14142_v42  ;;  %9204 = vmatpush3.bf16.msra.mxu1 %v9201_v36  ;;  %v14149_v36 = vld [vmem:[#allocation39_spill] sm:$0xff]  ;;  %v14150_v42 = vld [vmem:[#allocation40_spill] sm:$0xff] }
 0x847   : > { %9206 = vmatprep.subr.bf16.mxu1 %v9205_v50 }
 0x849   : > { %8822 = vmatmul.mubr.msk.f32.gmra.mrb[8].mxu1 %vm916_vm3, %v14143_v60  ;;  %v14151_v60 = vld [vmem:[#allocation41_spill] sm:$0xff] }
 0x84a   : > { %8824 = vmatprep.mubr.msk.f32.mxu1 %vm916_vm3, %v14144_v54  ;;  %v14152_v54 = vld [vmem:[#allocation42_spill] sm:$0xff] }
 0x84d   : > { %8825 = vmatmul.mubr.msk.f32.gmra.mrb[10].mxu1 %vm916_vm3, %v14145_v56  ;;  %v14153_v56 = vld [vmem:[#allocation43_spill] sm:$0xff] }
 0x84e   : > { %8827 = vmatprep.mubr.msk.f32.mxu1 %vm916_vm3, %v14146_v34  ;;  %v14154_v34 = vld [vmem:[#allocation44_spill] sm:$0xff] }
 0x851   : > { %8828 = vmatmul.mubr.msk.f32.gmra.mrb[12].mxu1 %vm916_vm3, %v14147_v32  ;;  %v14155_v32 = vld [vmem:[#allocation45_spill] sm:$0xff] }
 0x852   : > { %8830 = vmatprep.mubr.msk.f32.mxu1 %vm916_vm3, %v14148_v11  ;;  %v14156_v11 = vld [vmem:[#allocation46_spill] sm:$0xff] }
 0x855   : > { %8831 = vmatmul.mubr.msk.f32.gmra.mrb[14].mxu1 %vm916_vm3, %v14149_v36  ;;  %v14157_v36 = vld [vmem:[#allocation47_spill] sm:$0xff] }
 0x856   : > { %8833 = vmatprep.mubr.msk.f32.mxu1 %vm916_vm3, %v14150_v42 }
 0x859   : > { %8834 = vmatmul.mubr.msk.f32.gmra.mrb[16].mxu1 %vm916_vm3, %v14151_v60 }
 0x85a   : > { %8836 = vmatprep.mubr.msk.f32.mxu1 %vm916_vm3, %v14152_v54  ;;  %v14158_v54 = vld [vmem:[#allocation49_spill] sm:$0xff] }
 0x85d   : > { %8837 = vmatmul.mubr.msk.f32.gmra.mrb[18].mxu1 %vm916_vm3, %v14153_v56 }
 0x85e   : > { %8839 = vmatprep.mubr.msk.f32.mxu1 %vm916_vm3, %v14154_v34 }
 0x861   : > { %8840 = vmatmul.mubr.msk.f32.gmra.mrb[20].mxu1 %vm916_vm3, %v14155_v32 }
 0x862   : > { %8842 = vmatprep.mubr.msk.f32.mxu1 %vm916_vm3, %v14156_v11 }
 0x865   : > { %8843 = vmatmul.mubr.msk.f32.gmra.mrb[22].mxu1 %vm916_vm3, %v14157_v36 }
 0x866   : > { %8845 = vmatprep.mubr.msk.f32.mxu1 %vm916_vm3, %v12198_v31 }
 0x869   : > { %8846 = vmatmul.mubr.msk.f32.gmra.mrb[24].mxu1 %vm916_vm3, %v12205_v39  ;;  %v4612_v39 = vrot.slane %v12330_v16, 1 }
 0x86a   : > { %8848 = vmatprep.mubr.msk.f32.mxu1 %vm916_vm3, %v14158_v54 }
 0x86d   : > { %8849 = vmatmul.mubr.msk.f32.gmra.mrb[26].mxu1 %vm916_vm3, %v12221_v59  ;;  %v14159_v59 = vrot.slane %v12237_v29, 1  ;;  %v5410_v29 = vld [vmem:[%s13943_s6 + $0x108] sm:$0xff] }
 0x86e   : > { %8851 = vmatprep.mubr.msk.f32.mxu1 %vm916_vm3, %v12227_v1 }
 0x86f   : > { %v12514_v1 = vsel %vm3685_vm12, %v14159_v59, %v4612_v39 }
 0x871   : > { %8852 = vmatmul.mubr.msk.f32.gmra.mrb[28].mxu1 %vm916_vm3, %v12234_v38 }
 0x872   : > { %8854 = vmatprep.mubr.msk.f32.mxu1 %vm916_vm3, %v12242_v48  ;;  %v12519_v48 = vsel %vm3685_vm12, %v4612_v39, 0.0  ;;  %v5409_v39 = vld [vmem:[%s13943_s6 + $0x100] sm:$0xff] }
 0x873   : > { %14160 = vst [vmem:[#allocation7_spill] sm:$0xff] %v12519_v48 }
 0x875   : > { %8855 = vmatmul.mubr.msk.f32.gmra.mrb[30].mxu1 %vm916_vm3, %v12248_v63  ;;  %v5150_v63 = vld [vmem:[%s13943_s6 + $0xf0] sm:$0xff] }
 0x876   : > { %8857 = vmatprep.mubr.msk.f32.mxu1 %vm916_vm3, %v12254_v6  ;;  %v5151_v6 = vld [vmem:[%s13943_s6 + $0xf8] sm:$0xff] }
 0x877   : > { %v9209_v59 = vpack.c.bf16 %v5151_v6, %v5150_v63  ;;  %v14173_v63 = vld [vmem:[#allocation28_spill] sm:$0xff]  ;;  %v14174_v6 = vld [vmem:[#allocation21_spill] sm:$0xff] }
 0x879   : > { %8858 = vmatmul.mubr.msk.f32.gmra.mrb[32].mxu1 %vm916_vm3, %v12261_v35 }
 0x87a   : > { %8860 = vmatprep.mubr.msk.f32.mxu1 %vm916_vm3, %v12514_v1 }
 0x87d   : > { %8861 = vmatmul.mubr.msk.f32.gmra.mrb[34].mxu1 %vm916_vm3, %v12519_v48  ;;  %v9213_v48 = vpack.c.bf16 %v5410_v29, %v5409_v39  ;;  %v5412_v39 = vld [vmem:[%s13943_s6 + $0x118] sm:$0xff]  ;;  %v14178_v29 = vmov 0.0  }
 0x87e   : > { %8871 = vmatprep.mubr.msk.f32.mxu1 %vm916_vm3, %v11834_v7  ;;  %v14161_v7 = vld [vmem:[#allocation12_spill] sm:$0xff] }
 0x881   : > { %8872 = vmatmul.mubr.msk.f32.vlgmr.msra.gmra.mrb[4].mxu1 %vm916_vm3, %v11843_v62  ;;  %v14162_v62 = vld [vmem:[#allocation13_spill] sm:$0xff] }
 0x882   : > { %8874 = vmatprep.mubr.msk.f32.mxu1 %vm916_vm3, %v11849_v27  ;;  %9208 = vmatpush3.bf16.msra.mxu1 %v9205_v50  ;;  %v14163_v27 = vld [vmem:[#allocation14_spill] sm:$0xff]  ;;  %v14172_v50 = vld [vmem:[#allocation27_spill] sm:$0xff] }
 0x883   : > { %9210 = vmatprep.subr.bf16.mxu1 %v9209_v59 }
 0x885   : > { %8875 = vmatmul.mubr.msk.f32.gmra.mrb[6].mxu1 %vm916_vm3, %v11857_v44  ;;  %v14164_v44 = vld [vmem:[#allocation15_spill] sm:$0xff] }
 0x886   : > { %8877 = vmatprep.mubr.msk.f32.mxu1 %vm916_vm3, %v11863_v17  ;;  %9212 = vmatpush3.bf16.msra.mxu1 %v9209_v59  ;;  %v14165_v17 = vld [vmem:[#allocation16_spill] sm:$0xff] }
 0x887   : > { %9214 = vmatprep.subr.bf16.mxu1 %v9213_v48 }
 0x889   : > { %8878 = vmatmul.mubr.msk.f32.gmra.mrb[8].mxu1 %vm916_vm3, %v11871_v40  ;;  %v14166_v40 = vld [vmem:[#allocation17_spill] sm:$0xff] }
 0x88a   : > { %8880 = vmatprep.mubr.msk.f32.mxu1 %vm916_vm3, %v11877_v9  ;;  %v14167_v9 = vld [vmem:[#allocation18_spill] sm:$0xff] }
 0x88d   : > { %8881 = vmatmul.mubr.msk.f32.gmra.mrb[10].mxu1 %vm916_vm3, %v11885_v21  ;;  %v14168_v21 = vld [vmem:[#allocation19_spill] sm:$0xff] }
 0x88e   : > { %8883 = vmatprep.mubr.msk.f32.mxu1 %vm916_vm3, %v11891_v47  ;;  %v14169_v47 = vld [vmem:[#allocation23_spill] sm:$0xff] }
 0x891   : > { %8884 = vmatmul.mubr.msk.f32.gmra.mrb[12].mxu1 %vm916_vm3, %v11899_v46  ;;  %v14170_v46 = vld [vmem:[#allocation24_spill] sm:$0xff] }
 0x892   : > { %8886 = vmatprep.mubr.msk.f32.mxu1 %vm916_vm3, %v11905_v14  ;;  %v14171_v14 = vld [vmem:[#allocation26_spill] sm:$0xff] }
 0x895   : > { %8887 = vmatmul.mubr.msk.f32.gmra.mrb[14].mxu1 %vm916_vm3, %v14161_v7  ;;  %v5709_v7 = vld [vmem:[%s13945_s8] sm:$0xff] }
 0x896   : > { %8889 = vmatprep.mubr.msk.f32.mxu1 %vm916_vm3, %v14162_v62  ;;  %v5710_v62 = vld [vmem:[%s13945_s8 + $0x8] sm:$0xff] }
 0x899   : > { %8890 = vmatmul.mubr.msk.f32.gmra.mrb[16].mxu1 %vm916_vm3, %v14163_v27  ;;  %v9222_v27 = vpack.c.bf16 %v5710_v62, %v5709_v7 }
 0x89a   : > { %8892 = vmatprep.mubr.msk.f32.mxu1 %vm916_vm3, %v14164_v44 }
 0x89b   : > { %9223 = vmatpush3.bf16.msra.mxu0 %v9222_v27 }
 0x89d   : > { %8893 = vmatmul.mubr.msk.f32.gmra.mrb[18].mxu1 %vm916_vm3, %v14165_v17  ;;  %v14179_v17 = vmov 0.0|0.0  }
 0x89e   : > { %8895 = vmatprep.mubr.msk.f32.mxu1 %vm916_vm3, %v14166_v40  ;;  %9224 = vmatprep.subr.bf16.mxu0 %v14179_v17 }
 0x8a1   : > { %8896 = vmatmul.mubr.msk.f32.gmra.mrb[20].mxu1 %vm916_vm3, %v14167_v9 }
 0x8a2   : > { %8898 = vmatprep.mubr.msk.f32.mxu1 %vm916_vm3, %v14168_v21 }
 0x8a5   : > { %8899 = vmatmul.mubr.msk.f32.gmra.mrb[22].mxu1 %vm916_vm3, %v14122_v13 }
 0x8a6   : > { %8901 = vmatprep.mubr.msk.f32.mxu1 %vm916_vm3, %v14123_v3  ;;  %v14175_v3 = vld [vmem:[#allocation22_spill] sm:$0xff] }
 0x8a9   : > { %8902 = vmatmul.mubr.msk.f32.gmra.mrb[24].mxu1 %vm916_vm3, %v14124_v22  ;;  %v14176_v22 = vld [vmem:[#allocation20_spill] sm:$0xff] }
 0x8aa   : > { %8904 = vmatprep.mubr.msk.f32.mxu1 %vm916_vm3, %v14169_v47  ;;  %v14177_v13 = vrot.slane %v14176_v22, 7 }
 0x8ac   : > { %v4883_v59 = vsel %vm1056_vm4, %v14177_v13, 0.0 }
 0x8ad   : > { %8905 = vmatmul.mubr.msk.f32.gmra.mrb[26].mxu1 %vm916_vm3, %v14170_v46 }
 0x8ae   : > { %8907 = vmatprep.mubr.msk.f32.mxu1 %vm916_vm3, %v14171_v14 }
 0x8b1   : > { %8908 = vmatmul.mubr.msk.f32.gmra.mrb[28].mxu1 %vm916_vm3, %v12014_v26  ;;  %v5411_v26 = vld [vmem:[%s13943_s6 + $0x110] sm:$0xff] }
 0x8b2   : > { %8910 = vmatprep.mubr.msk.f32.mxu1 %vm916_vm3, %v14172_v50  ;;  %v9217_v44 = vpack.c.bf16 %v5412_v39, %v5411_v26 }
 0x8b5   : > { %8911 = vmatmul.mubr.msk.f32.gmra.mrb[30].mxu1 %vm916_vm3, %v14173_v63 }
 0x8b6   : > { %8913 = vmatprep.mubr.msk.f32.mxu1 %vm916_vm3, %v14174_v6 }
 0x8b9   : > { %8914 = vmatmul.mubr.msk.f32.gmra.mrb[32].mxu1 %vm916_vm3, %v14175_v3 }
 0x8ba   : > { %8916 = vmatprep.mubr.msk.f32.mxu1 %vm916_vm3, %v4883_v59 }
 0x8bd   : > { %8917 = vmatmul.mubr.f32.gmra.mrb[34].mxu1 %v14178_v29 }
 0x8be   : > { %8927 = vmatprep.mubr.msk.f32.mxu1 %vm916_vm3, %v14137_v33 }
 0x8c1   : > { %8928 = vmatmul.mubr.msk.f32.vlgmr.msra.gmra.mrb[4].mxu1 %vm916_vm3, %v11649_v51  ;;  %v14180_v51 = vld [vmem:[#allocation6_spill] sm:$0xff] }
 0x8c2   : > { %8930 = vmatprep.mubr.msk.f32.mxu1 %vm916_vm3, %v14138_v55  ;;  %9216 = vmatpush3.bf16.msra.mxu1 %v9213_v48 }
 0x8c3   : > { %9218 = vmatprep.subr.bf16.mxu1 %v9217_v44 }
 0x8c5   : > { %8931 = vmatmul.mubr.msk.f32.gmra.mrb[6].mxu1 %vm916_vm3, %v11667_v25  ;;  %v14181_v25 = vld [vmem:[#allocation50_spill] sm:$0xff] }
 0x8c6   : > { %8933 = vmatprep.mubr.msk.f32.mxu1 %vm916_vm3, %v11673_v24  ;;  %9220 = vmatpush3.bf16.msra.mxu1 %v9217_v44  ;;  %v14182_v24 = vld [vmem:[#allocation32_spill] sm:$0xff] }
 0x8c7   : > { %9323 = vmatprep.subr.bf16.mxu1 %v14179_v17 }
 0x8c9   : > { %8934 = vmatmul.mubr.msk.f32.gmra.mrb[8].mxu1 %vm916_vm3, %v11678_v37  ;;  %v14183_v37 = vld [vmem:[#allocation33_spill] sm:$0xff] }
 0x8ca   : > { %8936 = vmatprep.mubr.msk.f32.mxu1 %vm916_vm3, %v11683_v58  ;;  %v14184_v58 = vld [vmem:[#allocation34_spill] sm:$0xff] }
 0x8cd   : > { %8937 = vmatmul.mubr.msk.f32.gmra.mrb[10].mxu1 %vm916_vm3, %v11688_v0  ;;  %v14185_v0 = vld [vmem:[#allocation35_spill] sm:$0xff] }
 0x8ce   : > { %8939 = vmatprep.mubr.msk.f32.mxu1 %vm916_vm3, %v11693_v2  ;;  %v14186_v2 = vld [vmem:[#allocation36_spill] sm:$0xff] }
 0x8d1   : > { %8940 = vmatmul.mubr.msk.f32.gmra.mrb[12].mxu1 %vm916_vm3, %v11698_v10  ;;  %v14187_v10 = vld [vmem:[#allocation37_spill] sm:$0xff] }
 0x8d2   : > { %8942 = vmatprep.mubr.msk.f32.mxu1 %vm916_vm3, %v11703_v4  ;;  %v14188_v4 = vld [vmem:[#allocation38_spill] sm:$0xff] }
 0x8d5   : > { %8943 = vmatmul.mubr.msk.f32.gmra.mrb[14].mxu1 %vm916_vm3, %v11708_v20  ;;  %v14189_v20 = vld [vmem:[#allocation39_spill] sm:$0xff] }
 0x8d6   : > { %8945 = vmatprep.mubr.msk.f32.mxu1 %vm916_vm3, %v11713_v8  ;;  %v14190_v8 = vld [vmem:[#allocation42_spill] sm:$0xff] }
 0x8d9   : > { %8946 = vmatmul.mubr.msk.f32.gmra.mrb[16].mxu1 %vm916_vm3, %v11718_v30  ;;  %v14191_v30 = vld [vmem:[#allocation48_spill] sm:$0xff] }
 0x8da   : > { %8948 = vmatprep.mubr.msk.f32.mxu1 %vm916_vm3, %v11723_v15  ;;  %v14192_v15 = vld [vmem:[#allocation51_spill] sm:$0xff] }
 0x8dd   : > { %8949 = vmatmul.mubr.msk.f32.gmra.mrb[18].mxu1 %vm916_vm3, %v11728_v43  ;;  %v14193_v43 = vld [vmem:[#allocation52_spill] sm:$0xff] }
 0x8de   : > { %8951 = vmatprep.mubr.msk.f32.mxu1 %vm916_vm3, %v11733_v23  ;;  %v14194_v23 = vld [vmem:[#allocation53_spill] sm:$0xff] }
 0x8e1   : > { %8952 = vmatmul.mubr.msk.f32.gmra.mrb[20].mxu1 %vm916_vm3, %v11738_v57  ;;  %v14195_v57 = vld [vmem:[#allocation54_spill] sm:$0xff] }
 0x8e2   : > { %8954 = vmatprep.mubr.msk.f32.mxu1 %vm916_vm3, %v11743_v49  ;;  %v14196_v49 = vld [vmem:[#allocation55_spill] sm:$0xff] }
 0x8e5   : > { %8955 = vmatmul.mubr.msk.f32.gmra.mrb[22].mxu1 %vm916_vm3, %v11748_v5  ;;  %v14197_v5 = vld [vmem:[#allocation7_spill] sm:$0xff] }
 0x8e6   : > { %8957 = vmatprep.mubr.msk.f32.mxu1 %vm916_vm3, %v11753_v41  ;;  %v5711_v41 = vld [vmem:[%s13945_s8 + $0x10] sm:$0xff] }
 0x8e9   : > { %8958 = vmatmul.mubr.msk.f32.gmra.mrb[24].mxu1 %vm916_vm3, %v11758_v53  ;;  %v5712_v53 = vld [vmem:[%s13945_s8 + $0x18] sm:$0xff] }
 0x8ea   : > { %8960 = vmatprep.mubr.msk.f32.mxu1 %vm916_vm3, %v11763_v28  ;;  %v9225_v28 = vpack.c.bf16 %v5712_v53, %v5711_v41 }
 0x8ec   : > { %9226 = vmatpush3.bf16.msra.mxu0 %v9225_v28 }
 0x8ed   : > { %8961 = vmatmul.mubr.msk.f32.gmra.mrb[26].mxu1 %vm916_vm3, %v11768_v52  ;;  %9042 = vmatprep.subr.mxu0 %v14178_v29  ;;  %v12748_v52 = vld [vmem:[%s13944_s7] ss:$0 sm:$0xff] }
 0x8ee   : > { %8963 = vmatprep.mubr.msk.f32.mxu1 %vm916_vm3, %v11774_v18 }
 0x8f1   : > { %8964 = vmatmul.mubr.msk.f32.gmra.mrb[28].mxu1 %vm916_vm3, %v11780_v61 }
 0x8f2   : > { %8966 = vmatprep.mubr.msk.f32.mxu1 %vm916_vm3, %v11786_v45 }
 0x8f5   : > { %8967 = vmatmul.mubr.msk.f32.gmra.mrb[30].mxu1 %vm916_vm3, %v14180_v51 }
 0x8f6   : > { %8969 = vmatprep.mubr.msk.f32.mxu1 %vm916_vm3, %v14181_v25 }
 0x8f9   : > { %8970 = vmatmul.mubr.msk.f32.gmra.mrb[32].mxu1 %vm916_vm3, %v12330_v16 }
 0x8fa   : > { %8972 = vmatprep.mubr.f32.mxu1 %v14178_v29 }
 0x8fd   : > { %8973 = vmatmul.mubr.f32.gmra.mrb[34].mxu1 %v14178_v29 }
 0x8fe   : > { %8983 = vmatprep.mubr.msk.f32.mxu1 %vm916_vm3, %v14140_v19 }
 0x901   : > { %8984 = vmatmul.mubr.msk.f32.vlgmr.msra.gmra.mrb[4].mxu1 %vm916_vm3, %v14141_v12 }
 0x902   : > { %8986 = vmatprep.mubr.msk.f32.mxu1 %vm916_vm3, %v14182_v24 }
 0x905   : > { %8987 = vmatmul.mubr.msk.f32.gmra.mrb[6].mxu1 %vm916_vm3, %v14183_v37 }
 0x906   : > { %8989 = vmatprep.mubr.msk.f32.mxu1 %vm916_vm3, %v14184_v58 }
 0x909   : > { %8990 = vmatmul.mubr.msk.f32.gmra.mrb[8].mxu1 %vm916_vm3, %v14185_v0 }
 0x90a   : > { %8992 = vmatprep.mubr.msk.f32.mxu1 %vm916_vm3, %v14186_v2 }
 0x90d   : > { %8993 = vmatmul.mubr.msk.f32.gmra.mrb[10].mxu1 %vm916_vm3, %v14187_v10 }
 0x90e   : > { %8995 = vmatprep.mubr.msk.f32.mxu1 %vm916_vm3, %v14188_v4 }
 0x911   : > { %8996 = vmatmul.mubr.msk.f32.gmra.mrb[12].mxu1 %vm916_vm3, %v14189_v20 }
 0x912   : > { %8998 = vmatprep.mubr.msk.f32.mxu1 %vm916_vm3, %v14150_v42 }
 0x915   : > { %8999 = vmatmul.mubr.msk.f32.gmra.mrb[14].mxu1 %vm916_vm3, %v14151_v60 }
 0x916   : > { %9001 = vmatprep.mubr.msk.f32.mxu1 %vm916_vm3, %v14190_v8 }
 0x919   : > { %9002 = vmatmul.mubr.msk.f32.gmra.mrb[16].mxu1 %vm916_vm3, %v14153_v56 }
 0x91a   : > { %9004 = vmatprep.mubr.msk.f32.mxu1 %vm916_vm3, %v14154_v34 }
 0x91d   : > { %9005 = vmatmul.mubr.msk.f32.gmra.mrb[18].mxu1 %vm916_vm3, %v14155_v32 }
 0x91e   : > { %9007 = vmatprep.mubr.msk.f32.mxu1 %vm916_vm3, %v14156_v11 }
 0x921   : > { %9008 = vmatmul.mubr.msk.f32.gmra.mrb[20].mxu1 %vm916_vm3, %v14157_v36 }
 0x922   : > { %9010 = vmatprep.mubr.msk.f32.mxu1 %vm916_vm3, %v12198_v31 }
 0x925   : > { %9011 = vmatmul.mubr.msk.f32.gmra.mrb[22].mxu1 %vm916_vm3, %v14191_v30 }
 0x926   : > { %9013 = vmatprep.mubr.msk.f32.mxu1 %vm916_vm3, %v14158_v54 }
 0x929   : > { %9014 = vmatmul.mubr.msk.f32.gmra.mrb[24].mxu1 %vm916_vm3, %v14192_v15 }
 0x92a   : > { %9016 = vmatprep.mubr.msk.f32.mxu1 %vm916_vm3, %v14193_v43 }
 0x92d   : > { %9017 = vmatmul.mubr.msk.f32.gmra.mrb[26].mxu1 %vm916_vm3, %v12234_v38 }
 0x92e   : > { %9019 = vmatprep.mubr.msk.f32.mxu1 %vm916_vm3, %v14194_v23 }
 0x931   : > { %9020 = vmatmul.mubr.msk.f32.gmra.mrb[28].mxu1 %vm916_vm3, %v14195_v57 }
 0x932   : > { %9022 = vmatprep.mubr.msk.f32.mxu1 %vm916_vm3, %v14196_v49 }
 0x935   : > { %9023 = vmatmul.mubr.msk.f32.gmra.mrb[30].mxu1 %vm916_vm3, %v12261_v35 }
 0x936   : > { %9025 = vmatprep.mubr.msk.f32.mxu1 %vm916_vm3, %v12514_v1 }
 0x939   : > { %9026 = vmatmul.mubr.msk.f32.gmra.mrb[32].mxu1 %vm916_vm3, %v14197_v5 }
 0x93a   : > { %9028 = vmatprep.mubr.f32.mxu1 %v14178_v29 }
 0x93d   : > { %9029 = vmatmul.mubr.f32.gmra.mrb[34].mxu1 %v14178_v29 }
 0x9d4   : > { %v8985_v18 = vpop.f32.mrb[4].mxu1 }
 0x9d5   : > { %v12751_v61 = vadd.f32 %v8985_v18, %v12748_v52  ;;  %v5479_v45 = vpop.f32.mrb[5].mxu1 }
 0x9d6   : > { %v12754_v12 = vadd.f32 %v12748_v52, %v5479_v45 }
 0x9d7   : > { %v5843_v16 = vsel %vm916_vm3, %v12751_v61, 0.0 }
 0x9d8   : > { %v5842_v33 = vsel %vm916_vm3, %v12754_v12, 0.0  ;;  %v8988_v31 = vpop.f32.mrb[6].mxu1 }
 0x9d9   : > { %v5489_v1 = vpop.f32.mrb[7].mxu1  ;;  %v12761_v38 = vadd.f32 %v8988_v31, %v12748_v52  ;;  %v5844_v35 = vadd.f32 %v5843_v16, %v5842_v33 }
 0x9da   : > { %v12764_v48 = vadd.f32 %v12748_v52, %v5489_v1 }
 0x9db   : > { %v5847_v54 = vsel %vm916_vm3, %v12761_v38, 0.0 }
 0x9dc   : > { %v5845_v55 = vsel %vm916_vm3, %v12764_v48, 0.0  ;;  %v8991_v19 = vpop.f32.mrb[8].mxu1 }
 0x9dd   : > { %v5846_v42 = vadd.f32 %v5845_v55, %v5844_v35  ;;  %v5499_v60 = vpop.f32.mrb[9].mxu1  ;;  %v12771_v56 = vadd.f32 %v8991_v19, %v12748_v52 }
 0x9de   : > { %v12774_v34 = vadd.f32 %v12748_v52, %v5499_v60 }
 0x9df   : > { %v5848_v32 = vadd.f32 %v5847_v54, %v5846_v42  ;;  %v5851_v21 = vsel %vm916_vm3, %v12771_v56, 0.0 }
 0x9e0   : > { %v5849_v11 = vsel %vm916_vm3, %v12774_v34, 0.0  ;;  %v8994_v36 = vpop.f32.mrb[10].mxu1 }
 0x9e1   : > { %v5850_v40 = vadd.f32 %v5849_v11, %v5848_v32  ;;  %v5509_v9 = vpop.f32.mrb[11].mxu1  ;;  %v12781_v47 = vadd.f32 %v8994_v36, %v12748_v52  ;;  %v5918_v36 = vsel %vm916_vm3, %v12771_v56, -inf }
 0x9e2   : > { %v12784_v46 = vadd.f32 %v12748_v52, %v5509_v9 }
 0x9e3   : > { %v5852_v14 = vadd.f32 %v5851_v21, %v5850_v40  ;;  %v5855_v22 = vsel %vm916_vm3, %v12781_v47, 0.0  ;;  %v5913_v21 = vsel %vm916_vm3, %v12751_v61, -inf }
 0x9e4   : > { %v5853_v50 = vsel %vm916_vm3, %v12784_v46, 0.0  ;;  %v8997_v63 = vpop.f32.mrb[12].mxu1 }
 0x9e5   : > { %v5854_v6 = vadd.f32 %v5853_v50, %v5852_v14  ;;  %v5519_v3 = vpop.f32.mrb[13].mxu1  ;;  %v12791_v13 = vadd.f32 %v8997_v63, %v12748_v52  ;;  %v5912_v14 = vsel %vm916_vm3, %v12754_v12, -inf  ;;  %v5916_v50 = vsel %vm916_vm3, %v12774_v34, -inf }
 0x9e6   : > { %v12794_v59 = vadd.f32 %v12748_v52, %v5519_v3  ;;  %v5922_v3 = vsel %vm916_vm3, %v12781_v47, -inf }
 0x9e7   : > { %v5856_v26 = vadd.f32 %v5855_v22, %v5854_v6  ;;  %v5859_v44 = vsel %vm916_vm3, %v12791_v13, 0.0 }
 0x9e8   : > { %v5857_v39 = vsel %vm916_vm3, %v12794_v59, 0.0  ;;  %v9000_v7 = vpop.f32.mrb[14].mxu1 }
 0x9e9   : > { %v5858_v62 = vadd.f32 %v5857_v39, %v5856_v26  ;;  %v5529_v27 = vpop.f32.mrb[15].mxu1  ;;  %v12801_v51 = vadd.f32 %v9000_v7, %v12748_v52  ;;  %v5915_v7 = vsel %vm916_vm3, %v12761_v38, -inf }
 0x9ea   : > { %v12804_v25 = vadd.f32 %v12748_v52, %v5529_v27  ;;  %v5919_v27 = vmax.f32 %v5913_v21, %v5918_v36 }
 0x9eb   : > { %v5860_v24 = vadd.f32 %v5859_v44, %v5858_v62  ;;  %v5863_v10 = vsel %vm916_vm3, %v12801_v51, 0.0  ;;  %v5914_v62 = vsel %vm916_vm3, %v12764_v48, -inf }
 0x9ec   : > { %v5861_v37 = vsel %vm916_vm3, %v12804_v25, 0.0  ;;  %v9003_v58 = vpop.f32.mrb[16].mxu1 }
 0x9ed   : > { %v5862_v0 = vadd.f32 %v5861_v37, %v5860_v24  ;;  %v5539_v2 = vpop.f32.mrb[17].mxu1  ;;  %v12811_v4 = vadd.f32 %v9003_v58, %v12748_v52  ;;  %v5920_v24 = vsel %vm916_vm3, %v12784_v46, -inf  ;;  %v5926_v37 = vsel %vm916_vm3, %v12791_v13, -inf }
 0x9ee   : > { %v12814_v20 = vadd.f32 %v12748_v52, %v5539_v2  ;;  %v5924_v58 = vsel %vm916_vm3, %v12794_v59, -inf }
 0x9ef   : > { %v5864_v8 = vadd.f32 %v5863_v10, %v5862_v0  ;;  %v5867_v57 = vsel %vm916_vm3, %v12811_v4, 0.0  ;;  %v5917_v10 = vmax.f32 %v5912_v14, %v5916_v50 }
 0x9f0   : > { %v5865_v30 = vsel %vm916_vm3, %v12814_v20, 0.0  ;;  %v9006_v15 = vpop.f32.mrb[18].mxu1 }
 0x9f1   : > { %v5866_v43 = vadd.f32 %v5865_v30, %v5864_v8  ;;  %v5549_v23 = vpop.f32.mrb[19].mxu1  ;;  %v12821_v49 = vadd.f32 %v9006_v15, %v12748_v52  ;;  %v5923_v8 = vmax.f32 %v5915_v7, %v5922_v3  ;;  %v5930_v30 = vsel %vm916_vm3, %v12801_v51, -inf }
 0x9f2   : > { %v12824_v5 = vadd.f32 %v12748_v52, %v5549_v23  ;;  %v5928_v23 = vsel %vm916_vm3, %v12804_v25, -inf }
 0x9f3   : > { %v5868_v41 = vadd.f32 %v5867_v57, %v5866_v43  ;;  %v5871_v16 = vsel %vm916_vm3, %v12821_v49, 0.0 }
 0x9f4   : > { %v5869_v53 = vsel %vm916_vm3, %v12824_v5, 0.0  ;;  %v9009_v28 = vpop.f32.mrb[20].mxu1  ;;  %v5936_v36 = vsel %vm916_vm3, %v12824_v5, -inf }
 0x9f5   : > { %v5870_v18 = vadd.f32 %v5869_v53, %v5868_v41  ;;  %v5559_v45 = vpop.f32.mrb[21].mxu1  ;;  %v12831_v33 = vadd.f32 %v9009_v28, %v12748_v52  ;;  %v5921_v28 = vmax.f32 %v5914_v62, %v5920_v24 }
 0x9f6   : > { %v12834_v31 = vadd.f32 %v12748_v52, %v5559_v45  ;;  %v5925_v45 = vmax.f32 %v5917_v10, %v5924_v58 }
 0x9f7   : > { %v5872_v1 = vadd.f32 %v5871_v16, %v5870_v18  ;;  %v5875_v60 = vsel %vm916_vm3, %v12831_v33, 0.0  ;;  %v5927_v18 = vmax.f32 %v5919_v27, %v5926_v37  ;;  %v5942_v21 = vsel %vm916_vm3, %v12831_v33, -inf }
 0x9f8   : > { %v5873_v35 = vsel %vm916_vm3, %v12834_v31, 0.0  ;;  %v9012_v55 = vpop.f32.mrb[22].mxu1  ;;  %v5940_v27 = vsel %vm916_vm3, %v12834_v31, -inf }
 0x9f9   : > { %v5874_v19 = vadd.f32 %v5873_v35, %v5872_v1  ;;  %v5569_v42 = vpop.f32.mrb[23].mxu1  ;;  %v12841_v54 = vadd.f32 %v9012_v55, %v12748_v52  ;;  %v5934_v1 = vsel %vm916_vm3, %v12811_v4, -inf  ;;  %v5932_v35 = vsel %vm916_vm3, %v12814_v20, -inf }
 0x9fa   : > { %v12844_v32 = vadd.f32 %v12748_v52, %v5569_v42  ;;  %v5938_v55 = vsel %vm916_vm3, %v12821_v49, -inf  ;;  %v5933_v3 = vmax.f32 %v5925_v45, %v5932_v35 }
 0x9fb   : > { %v5876_v11 = vadd.f32 %v5875_v60, %v5874_v19  ;;  %v5879_v22 = vsel %vm916_vm3, %v12841_v54, 0.0  ;;  %v5931_v60 = vmax.f32 %v5923_v8, %v5930_v30 }
 0x9fc   : > { %v5877_v40 = vsel %vm916_vm3, %v12844_v32, 0.0  ;;  %v9015_v9 = vpop.f32.mrb[24].mxu1 }
 0x9fd   : > { %v5878_v63 = vadd.f32 %v5877_v40, %v5876_v11  ;;  %v5579_v6 = vpop.f32.mrb[25].mxu1  ;;  %v12861_v26 = vadd.f32 %v9015_v9, %v12748_v52  ;;  %v5929_v11 = vmax.f32 %v5921_v28, %v5928_v23 }
 0x9fe   : > { %v12864_v39 = vadd.f32 %v12748_v52, %v5579_v6  ;;  %v5935_v6 = vmax.f32 %v5927_v18, %v5934_v1 }
 0x9ff   : > { %v5880_v44 = vadd.f32 %v5879_v22, %v5878_v63  ;;  %v5883_v57 = vsel %vm916_vm3, %v12861_v26, 0.0  ;;  %v5939_v22 = vmax.f32 %v5931_v60, %v5938_v55  ;;  %v5937_v62 = vmax.f32 %v5929_v11, %v5936_v36 }
 0xa00   : > { %v5881_v0 = vsel %vm916_vm3, %v12864_v39, 0.0  ;;  %v9018_v2 = vpop.f32.mrb[26].mxu1  ;;  %v5943_v58 = vmax.f32 %v5935_v6, %v5942_v21  ;;  %v5948_v30 = vsel %vm916_vm3, %v12864_v39, -inf }
 0xa01   : > { %v5882_v15 = vadd.f32 %v5881_v0, %v5880_v44  ;;  %v5589_v43 = vpop.f32.mrb[27].mxu1  ;;  %v12885_v41 = vadd.f32 %v9018_v2, %v12748_v52  ;;  %v5946_v44 = vsel %vm916_vm3, %v12841_v54, -inf  ;;  %v5944_v0 = vsel %vm916_vm3, %v12844_v32, -inf }
 0xa02   : > { %v12888_v53 = vadd.f32 %v12748_v52, %v5589_v43  ;;  %v5950_v2 = vsel %vm916_vm3, %v12861_v26, -inf  ;;  %v5947_v28 = vmax.f32 %v5939_v22, %v5946_v44  ;;  %v5945_v45 = vmax.f32 %v5937_v62, %v5944_v0 }
 0xa03   : > { %v5884_v16 = vadd.f32 %v5883_v57, %v5882_v15  ;;  %v5887_v14 = vsel %vm916_vm3, %v12885_v41, 0.0  ;;  %v5941_v57 = vmax.f32 %v5933_v3, %v5940_v27  ;;  %v5954_v1 = vsel %vm916_vm3, %v12885_v41, -inf }
 0xa04   : > { %v5885_v19 = vsel %vm916_vm3, %v12888_v53, 0.0  ;;  %v9021_v42 = vpop.f32.mrb[28].mxu1  ;;  %v5955_v6 = vmax.f32 %v5947_v28, %v5954_v1 }
 0xa05   : > { %v5886_v40 = vadd.f32 %v5885_v19, %v5884_v16  ;;  %v5599_v9 = vpop.f32.mrb[29].mxu1  ;;  %v12905_v50 = vadd.f32 %v9021_v42, %v12748_v52  ;;  %v5951_v16 = vmax.f32 %v5943_v58, %v5950_v2  ;;  %v5949_v19 = vmax.f32 %v5941_v57, %v5948_v30 }
 0xa06   : > { %v12908_v63 = vadd.f32 %v12748_v52, %v5599_v9  ;;  %v5952_v42 = vsel %vm916_vm3, %v12888_v53, -inf }
 0xa07   : > { %v5888_v7 = vadd.f32 %v5887_v14, %v5886_v40  ;;  %v5891_v15 = vsel %vm916_vm3, %v12905_v50, 0.0  ;;  %v5958_v40 = vsel %vm916_vm3, %v12905_v50, -inf  ;;  %v5953_v62 = vmax.f32 %v5945_v45, %v5952_v42 }
 0xa08   : > { %v5889_v24 = vsel %vm916_vm3, %v12908_v63, 0.0  ;;  %v9024_v37 = vpop.f32.mrb[30].mxu1  ;;  %v5956_v9 = vsel %vm916_vm3, %v12908_v63, -inf  ;;  %v5959_v58 = vmax.f32 %v5951_v16, %v5958_v40 }
 0xa09   : > { %v5890_v10 = vadd.f32 %v5889_v24, %v5888_v7  ;;  %v5609_v8 = vpop.f32.mrb[31].mxu1  ;;  %v12925_v43 = vadd.f32 %v9024_v37, %v12748_v52  ;;  %v5957_v0 = vmax.f32 %v5949_v19, %v5956_v9 }
 0xa0a   : > { %v12928_v23 = vadd.f32 %v12748_v52, %v5609_v8 }
 0xa0b   : > { %v5892_v18 = vadd.f32 %v5891_v15, %v5890_v10  ;;  %v5895_v21 = vsel %vm916_vm3, %v12925_v43, 0.0  ;;  %v5962_v3 = vsel %vm916_vm3, %v12925_v43, -inf }
 0xa0c   : > { %v5893_v35 = vsel %vm916_vm3, %v12928_v23, 0.0  ;;  %v9027_v55 = vpop.f32.mrb[32].mxu1  ;;  %v5960_v22 = vsel %vm916_vm3, %v12928_v23, -inf  ;;  %v5963_v30 = vmax.f32 %v5955_v6, %v5962_v3 }
 0xa0d   : > { %v5894_v60 = vadd.f32 %v5893_v35, %v5892_v18  ;;  %v12937_v11 = vadd.f32 %v9027_v55, %v12748_v52  ;;  %v5619_v36 = vpop.f32.mrb[33].mxu1  ;;  %v5961_v15 = vmax.f32 %v5953_v62, %v5960_v22 }
 0xa0e   : > { %v12946_v14 = vadd.f32 %v12748_v52, %v5619_v36 }
 0xa0f   : > { %v5896_v7 = vadd.f32 %v5895_v21, %v5894_v60  ;;  %v5966_v27 = vsel %vm916_vm3, %v12937_v11, -inf  ;;  %v5899_v57 = vsel %vm916_vm3, %v12937_v11, 0.0 }
 0xa10   : > { %v5897_v44 = vsel %vm916_vm3, %v12946_v14, 0.0  ;;  %v5964_v24 = vsel %vm916_vm3, %v12946_v14, -inf  ;;  %v9030_v37 = vpop.f32.mrb[34].mxu1  ;;  %v5967_v18 = vmax.f32 %v5959_v58, %v5966_v27 }
 0xa11   : > { %v5898_v2 = vadd.f32 %v5897_v44, %v5896_v7  ;;  %v12959_v10 = vadd.f32 %v9030_v37, %v12748_v52  ;;  %v5629_v8 = vpop.f32.mrb[35].mxu1  ;;  %v5965_v45 = vmax.f32 %v5957_v0, %v5964_v24 }
 0xa12   : > { %v12964_v28 = vadd.f32 %v12748_v52, %v5629_v8 }
 0xa13   : > { %v5970_v1 = vsel %vm916_vm3, %v12959_v10, -inf  ;;  %v5900_v16 = vadd.f32 %v5899_v57, %v5898_v2  ;;  %v5903_v36 = vsel %vm916_vm3, %v12959_v10, 0.0  ;;  %v5972_v52 = vmax.f32 %v5965_v45, %v5967_v18 }
 0xa14   : > { %v5971_v35 = vmax.f32 %v5963_v30, %v5970_v1  ;;  %v5901_v55 = vsel %vm916_vm3, %v12964_v28, 0.0  ;;  %v5968_v19 = vsel %vm916_vm3, %v12964_v28, -inf }
 0xa15   : > { %v5902_v42 = vadd.f32 %v5901_v55, %v5900_v16  ;;  %v5969_v60 = vmax.f32 %v5961_v15, %v5968_v19  ;;  %v5713_v15 = vld [vmem:[%s13946_s9] sm:$0xff] }
 0xa17   : > { %v5904_v40 = vadd.f32 %v5903_v36, %v5902_v42  ;;  %v5973_v9 = vmax.f32 %v5969_v60, %v5971_v35  ;;  %v14198_v36 = vld [vmem:[#allocation5_spill] sm:$0xff] }
 0xa19   : > { %v5905_v21 = vrot.slane %v5904_v40, 4  ;;  %v5974_v6 = vmax.f32 %v5972_v52, %v5973_v9  ;;  %v14199_v52 = vsub.s32 0, %v14198_v36 }
 0xa1b   : > { %v5906_v3 = vadd.f32 %v5905_v21, %v5904_v40  ;;  %v5975_v22 = vrot.slane %v5974_v6, 4 }
 0xa1d   : > { %v5907_v7 = vrot.slane %v5906_v3, 2  ;;  %v5976_v62 = vmax.f32 %v5974_v6, %v5975_v22 }
 0xa1f   : > { %v5908_v27 = vadd.f32 %v5907_v7, %v5906_v3  ;;  %v5977_v44 = vrot.slane %v5976_v62, 2 }
 0xa21   : > { %v5909_v24 = vrot.slane %v5908_v27, 1  ;;  %v5978_v37 = vmax.f32 %v5976_v62, %v5977_v44 }
 0xa23   : > { %v5910_v58 = vadd.f32 %v5909_v24, %v5908_v27  ;;  %v5979_v0 = vrot.slane %v5978_v37, 1 }
 0xa25   : > { %v5911_v2 = vmul.f32 0.00390625, %v5910_v58  ;;  %v5980_v8 = vmax.f32 %v5978_v37, %v5979_v0 }
 0xa27   : > { %v5981_v30 = vsel %vm1056_vm4, %v5911_v2, %v5980_v8 }
 0xa28   : > { %9040 = vmatmul.mubr.msk.f32.vlgmr.msra.gmra.mrb[96].mxu0 %vm916_vm3, %v5981_v30 }
 0xa29   : > { %9044 = vmatprep.mubr.msk.f32.mxu0 %vm10429_vm2, %v14178_v29  ;;  %9043 = vmatpush3.msra.mxu0 %v5713_v15 }
 0xa2a   : > { %9227 = vmatprep.subr.bf16.mxu0 %v14179_v17 }
 0xafb   : > { %v6051_v57 = vpop.f32.mrb[96].mxu0 }
 0xafc   : > { %v6055_v18 = vmax.f32 %v6051_v57, 0.0  ;;  %v9041_v45 = vpop.f32.mrb[97].mxu0 }
 0xafe   : > { %9045 = vmatmul.mubr.msk.f32.vlgmr.msra.gmra.mrb[98].mxu0 %vm1132_vm5, %v6055_v18 }
 0xbd1   : > { %v6125_v1 = vpop.f32.mrb[98].mxu0 }
 0xbd2   : > { %v6130_v16 = vrot.slane %v6125_v1, 1  ;;  %v9046_v35 = vpop.f32.mrb[99].mxu0 }
 0xbd4   : > { %v6132_v55 = vadd.f32 %v6130_v16, %v6125_v1 }
 0xbd6   : > { %v8050_v19 = vmul.f32 -1.442695, %v6132_v55 }
 0xbd8   : > { %10232 = vpow2.f32 %v8050_v19 }
 0xbe2   : > { %v10233_v42 = vpop.eup %10232 }
 0xbe3   : > { %v6136_v29 = vadd.f32 1.0, %v10233_v42 }
 0xbe5   : > { %10234 = vrcp.f32 %v6136_v29 }
 0xbef   : > { %v10235_v60 = vpop.eup %10234 }
 0xbf0   : > { %v12985_v40 = vrot.slane %v10235_v60, %v14199_v52 }
 0xbf2   : > { %v12989_v9 = vmul.f32 %v12985_v40, %v12754_v12  ;;  %v12993_v21 = vmul.f32 %v12985_v40, %v12751_v61  ;;  %v12997_v6 = vmul.f32 %v12985_v40, %v12764_v48  ;;  %v13001_v3 = vmul.f32 %v12985_v40, %v12761_v38 }
 0xbf3   : > { %v13009_v61 = vmul.f32 %v12985_v40, %v12774_v34  ;;  %v13013_v12 = vmul.f32 %v12985_v40, %v12771_v56  ;;  %v13021_v62 = vmul.f32 %v12985_v40, %v12784_v46  ;;  %v13025_v34 = vmul.f32 %v12985_v40, %v12781_v47 }
 0xbf4   : > { %v6178_v22 = vsel %vm916_vm3, %v12993_v21, 0.0  ;;  %v6175_v7 = vsel %vm916_vm3, %v12989_v9, 0.0  ;;  %v6181_v38 = vsel %vm916_vm3, %v12997_v6, 0.0  ;;  %v6184_v48 = vsel %vm916_vm3, %v13001_v3, 0.0 }
 0xbf5   : > { %6179 = vadd.xlane.f32.xlu0 %v6178_v22  ;;  %6176 = vadd.xlane.f32.xlu1 %v6175_v7  ;;  %v6187_v56 = vsel %vm916_vm3, %v13009_v61, 0.0  ;;  %v6190_v27 = vsel %vm916_vm3, %v13013_v12, 0.0  ;;  %v13033_v44 = vmul.f32 %v12985_v40, %v12794_v59  ;;  %v13037_v46 = vmul.f32 %v12985_v40, %v12791_v13 }
 0xbf6   : > { %v6193_v47 = vsel %vm916_vm3, %v13021_v62, 0.0  ;;  %v6196_v24 = vsel %vm916_vm3, %v13025_v34, 0.0  ;;  %v13045_v37 = vmul.f32 %v12985_v40, %v12804_v25  ;;  %v13049_v59 = vmul.f32 %v12985_v40, %v12801_v51 }
 0xbf7   : > { %v6199_v13 = vsel %vm916_vm3, %v13033_v44, 0.0  ;;  %v6202_v58 = vsel %vm916_vm3, %v13037_v46, 0.0  ;;  %v13057_v0 = vmul.f32 %v12985_v40, %v12814_v20  ;;  %v13061_v25 = vmul.f32 %v12985_v40, %v12811_v4 }
 0xbf8   : > { %v6205_v51 = vsel %vm916_vm3, %v13045_v37, 0.0  ;;  %v6208_v2 = vsel %vm916_vm3, %v13049_v59, 0.0  ;;  %v13069_v8 = vmul.f32 %v12985_v40, %v12824_v5  ;;  %v13073_v20 = vmul.f32 %v12985_v40, %v12821_v49 }
 0xbf9   : > { %6182 = vadd.xlane.f32.xlu0 %v6181_v38  ;;  %6185 = vadd.xlane.f32.xlu1 %v6184_v48  ;;  %v6211_v4 = vsel %vm916_vm3, %v13057_v0, 0.0  ;;  %v6214_v30 = vsel %vm916_vm3, %v13061_v25, 0.0  ;;  %v13081_v15 = vmul.f32 %v12985_v40, %v12834_v31  ;;  %v13085_v5 = vmul.f32 %v12985_v40, %v12831_v33 }
 0xbfa   : > { %v6217_v49 = vsel %vm916_vm3, %v13069_v8, 0.0  ;;  %v6220_v57 = vsel %vm916_vm3, %v13073_v20, 0.0  ;;  %v13093_v18 = vmul.f32 %v12985_v40, %v12844_v32  ;;  %v13097_v31 = vmul.f32 %v12985_v40, %v12841_v54 }
 0xbfb   : > { %v6223_v33 = vsel %vm916_vm3, %v13081_v15, 0.0  ;;  %v6226_v45 = vsel %vm916_vm3, %v13085_v5, 0.0  ;;  %v13105_v1 = vmul.f32 %v12985_v40, %v12864_v39  ;;  %v13109_v32 = vmul.f32 %v12985_v40, %v12861_v26 }
 0xbfc   : > { %v6229_v54 = vsel %vm916_vm3, %v13093_v18, 0.0  ;;  %v6232_v16 = vsel %vm916_vm3, %v13097_v31, 0.0  ;;  %v13117_v35 = vmul.f32 %v12985_v40, %v12888_v53  ;;  %v13121_v39 = vmul.f32 %v12985_v40, %v12885_v41 }
 0xbfd   : > { %6188 = vadd.xlane.f32.xlu0 %v6187_v56  ;;  %6191 = vadd.xlane.f32.xlu1 %v6190_v27  ;;  %14200 = vst [vmem:[#allocation25_spill] sm:$0xff] %v13109_v32  ;;  %v6235_v26 = vsel %vm916_vm3, %v13105_v1, 0.0  ;;  %v6238_v55 = vsel %vm916_vm3, %v13109_v32, 0.0  ;;  %v13129_v19 = vmul.f32 %v12985_v40, %v12908_v63  ;;  %v13133_v53 = vmul.f32 %v12985_v40, %v12905_v50 }
 0xbfe   : > { %14201 = vst [vmem:[#allocation8_spill] sm:$0xff] %v13117_v35  ;;  %14202 = vst [vmem:[#allocation9_spill] sm:$0xff] %v13121_v39  ;;  %v6241_v41 = vsel %vm916_vm3, %v13117_v35, 0.0  ;;  %v6244_v42 = vsel %vm916_vm3, %v13121_v39, 0.0  ;;  %v13141_v29 = vmul.f32 %v12985_v40, %v12928_v23  ;;  %v13145_v63 = vmul.f32 %v12985_v40, %v12925_v43 }
 0xbff   : > { %14203 = vst [vmem:[#allocation10_spill] sm:$0xff] %v13129_v19  ;;  %14204 = vst [vmem:[#allocation11_spill] sm:$0xff] %v13133_v53  ;;  %v6247_v50 = vsel %vm916_vm3, %v13129_v19, 0.0  ;;  %v6250_v60 = vsel %vm916_vm3, %v13133_v53, 0.0  ;;  %v13153_v36 = vmul.f32 %v12985_v40, %v12946_v14  ;;  %v13157_v23 = vmul.f32 %v12985_v40, %v12937_v11 }
 0xc00   : > { %14205 = vst [vmem:[#allocation29_spill] sm:$0xff] %v13141_v29  ;;  %14206 = vst [vmem:[#allocation30_spill] sm:$0xff] %v13145_v63  ;;  %v6253_v43 = vsel %vm916_vm3, %v13141_v29, 0.0  ;;  %v6256_v52 = vsel %vm916_vm3, %v13145_v63, 0.0  ;;  %v13165_v22 = vmul.f32 %v12985_v40, %v12964_v28  ;;  %v13169_v14 = vmul.f32 %v12985_v40, %v12959_v10 }
 0xc01   : > { %6194 = vadd.xlane.f32.xlu0 %v6193_v47  ;;  %6197 = vadd.xlane.f32.xlu1 %v6196_v24  ;;  %14207 = vst [vmem:[#allocation31_spill] sm:$0xff] %v13153_v36  ;;  %14208 = vst [vmem:[#allocation40_spill] sm:$0xff] %v13157_v23  ;;  %v6259_v11 = vsel %vm916_vm3, %v13153_v36, 0.0  ;;  %v6262_v7 = vsel %vm916_vm3, %v13157_v23, 0.0  ;;  %v6306_v10 = vsel %vm916_vm3, %v12993_v21, -inf  ;;  %v6303_v28 = vsel %vm916_vm3, %v12989_v9, -inf }
 0xc02   : > { %v6265_v38 = vsel %vm916_vm3, %v13165_v22, 0.0  ;;  %v6268_v48 = vsel %vm916_vm3, %v13169_v14, 0.0  ;;  %v6315_v40 = vsel %vm916_vm3, %v13009_v61, -inf  ;;  %v6309_v56 = vsel %vm916_vm3, %v12997_v6, -inf }
 0xc03   : > { %v6327_v27 = vsel %vm916_vm3, %v13033_v44, -inf  ;;  %v6312_v47 = vsel %vm916_vm3, %v13001_v3, -inf  ;;  %v6336_v24 = vsel %vm916_vm3, %v13049_v59, -inf }
 0xc05   : > { %6200 = vadd.xlane.f32.xlu0 %v6199_v13  ;;  %6203 = vadd.xlane.f32.xlu1 %v6202_v58  ;;  %v6318_v13 = vsel %vm916_vm3, %v13013_v12, -inf  ;;  %v6342_v58 = vsel %vm916_vm3, %v13061_v25, -inf }
 0xc09   : > { %6206 = vadd.xlane.f32.xlu0 %v6205_v51  ;;  %6209 = vadd.xlane.f32.xlu1 %v6208_v2  ;;  %v6321_v51 = vsel %vm916_vm3, %v13021_v62, -inf  ;;  %v6348_v2 = vsel %vm916_vm3, %v13073_v20, -inf }
 0xc0d   : > { %6212 = vadd.xlane.f32.xlu0 %v6211_v4  ;;  %6215 = vadd.xlane.f32.xlu1 %v6214_v30  ;;  %v6324_v4 = vsel %vm916_vm3, %v13025_v34, -inf  ;;  %v6354_v30 = vsel %vm916_vm3, %v13085_v5, -inf }
 0xc11   : > { %6218 = vadd.xlane.f32.xlu0 %v6217_v49  ;;  %6221 = vadd.xlane.f32.xlu1 %v6220_v57  ;;  %v6330_v49 = vsel %vm916_vm3, %v13037_v46, -inf  ;;  %v6357_v57 = vsel %vm916_vm3, %v13093_v18, -inf }
 0xc15   : > { %6224 = vadd.xlane.f32.xlu0 %v6223_v33  ;;  %6227 = vadd.xlane.f32.xlu1 %v6226_v45  ;;  %v6333_v33 = vsel %vm916_vm3, %v13045_v37, -inf  ;;  %v6360_v45 = vsel %vm916_vm3, %v13097_v31, -inf }
 0xc19   : > { %6230 = vadd.xlane.f32.xlu0 %v6229_v54  ;;  %6233 = vadd.xlane.f32.xlu1 %v6232_v16  ;;  %v6339_v54 = vsel %vm916_vm3, %v13057_v0, -inf  ;;  %v6363_v16 = vsel %vm916_vm3, %v13105_v1, -inf }
 0xc1d   : > { %6236 = vadd.xlane.f32.xlu0 %v6235_v26  ;;  %6239 = vadd.xlane.f32.xlu1 %v6238_v55  ;;  %v6345_v26 = vsel %vm916_vm3, %v13069_v8, -inf  ;;  %v6366_v55 = vsel %vm916_vm3, %v13109_v32, -inf }
 0xc21   : > { %6242 = vadd.xlane.f32.xlu0 %v6241_v41  ;;  %6245 = vadd.xlane.f32.xlu1 %v6244_v42  ;;  %v6351_v41 = vsel %vm916_vm3, %v13081_v15, -inf  ;;  %v6369_v42 = vsel %vm916_vm3, %v13117_v35, -inf }
 0xc25   : > { %6248 = vadd.xlane.f32.xlu0 %v6247_v50  ;;  %6251 = vadd.xlane.f32.xlu1 %v6250_v60  ;;  %v6372_v50 = vsel %vm916_vm3, %v13121_v39, -inf  ;;  %v6375_v60 = vsel %vm916_vm3, %v13129_v19, -inf }
 0xc29   : > { %6254 = vadd.xlane.f32.xlu0 %v6253_v43  ;;  %6257 = vadd.xlane.f32.xlu1 %v6256_v52  ;;  %v6378_v43 = vsel %vm916_vm3, %v13133_v53, -inf  ;;  %v6381_v52 = vsel %vm916_vm3, %v13141_v29, -inf }
 0xc2d   : > { %6260 = vadd.xlane.f32.xlu0 %v6259_v11  ;;  %6263 = vadd.xlane.f32.xlu1 %v6262_v7  ;;  %v6384_v11 = vsel %vm916_vm3, %v13145_v63, -inf }
 0xc31   : > { %6266 = vadd.xlane.f32.xlu0 %v6265_v38  ;;  %6269 = vadd.xlane.f32.xlu1 %v6268_v48 }
 0xc35   : > { %6307 = vmax.xlane.f32.xlu0 %v6306_v10  ;;  %6304 = vmax.xlane.f32.xlu1 %v6303_v28 }
 0xc39   : > { %6316 = vmax.xlane.f32.xlu0 %v6315_v40  ;;  %6310 = vmax.xlane.f32.xlu1 %v6309_v56 }
 0xc3d   : > { %6328 = vmax.xlane.f32.xlu0 %v6327_v27  ;;  %6313 = vmax.xlane.f32.xlu1 %v6312_v47 }
 0xc41   : > { %6337 = vmax.xlane.f32.xlu0 %v6336_v24  ;;  %6319 = vmax.xlane.f32.xlu1 %v6318_v13 }
 0xc45   : > { %6343 = vmax.xlane.f32.xlu0 %v6342_v58  ;;  %6322 = vmax.xlane.f32.xlu1 %v6321_v51 }
 0xc49   : > { %6349 = vmax.xlane.f32.xlu0 %v6348_v2  ;;  %6325 = vmax.xlane.f32.xlu1 %v6324_v4 }
 0xc4d   : > { %6355 = vmax.xlane.f32.xlu0 %v6354_v30  ;;  %6331 = vmax.xlane.f32.xlu1 %v6330_v49 }
 0xc51   : > { %6358 = vmax.xlane.f32.xlu0 %v6357_v57  ;;  %6334 = vmax.xlane.f32.xlu1 %v6333_v33 }
 0xc55   : > { %6361 = vmax.xlane.f32.xlu0 %v6360_v45  ;;  %6340 = vmax.xlane.f32.xlu1 %v6339_v54 }
 0xc59   : > { %6364 = vmax.xlane.f32.xlu0 %v6363_v16  ;;  %6346 = vmax.xlane.f32.xlu1 %v6345_v26 }
 0xc5d   : > { %6367 = vmax.xlane.f32.xlu0 %v6366_v55  ;;  %6352 = vmax.xlane.f32.xlu1 %v6351_v41 }
 0xc61   : > { %6370 = vmax.xlane.f32.xlu0 %v6369_v42  ;;  %6373 = vmax.xlane.f32.xlu1 %v6372_v50 }
 0xc65   : > { %6376 = vmax.xlane.f32.xlu0 %v6375_v60  ;;  %6379 = vmax.xlane.f32.xlu1 %v6378_v43 }
 0xc69   : > { %6382 = vmax.xlane.f32.xlu0 %v6381_v52  ;;  %6385 = vmax.xlane.f32.xlu1 %v6384_v11 }
 0xc82   : > { %v6180_v7 = vpop.xlane.xlu0 %6179  ;;  %v6177_v38 = vpop.xlane.xlu1 %6176 }
 0xc83   : > { %v6272_v48 = vmul.f32 0.03125, %v6180_v7  ;;  %v6271_v10 = vmul.f32 0.03125, %v6177_v38 }
 0xc85   : > { %v9940_v28 = vpack.i.bf16 %v6272_v48, %v6271_v10 }
 0xc86   : > { %v6183_v40 = vpop.xlane.xlu0 %6182  ;;  %v6186_v56 = vpop.xlane.xlu1 %6185 }
 0xc87   : > { %v6273_v27 = vmul.f32 0.03125, %v6183_v40  ;;  %v6274_v47 = vmul.f32 0.03125, %v6186_v56  ;;  %9941 = vperm.xlu0 %9778, %v9940_v28  }
 0xc89   : > { %v9945_v24 = vpack.i.bf16 %v6274_v47, %v6273_v27 }
 0xc8a   : > { %v6189_v13 = vpop.xlane.xlu0 %6188  ;;  %v6192_v58 = vpop.xlane.xlu1 %6191 }
 0xc8b   : > { %v6275_v51 = vmul.f32 0.03125, %v6189_v13  ;;  %v6276_v2 = vmul.f32 0.03125, %v6192_v58  ;;  %9946 = vperm.xlu1 %9784, %v9945_v24  }
 0xc8d   : > { %v9950_v4 = vpack.i.bf16 %v6276_v2, %v6275_v51 }
 0xc8e   : > { %v6195_v30 = vpop.xlane.xlu0 %6194  ;;  %v6198_v49 = vpop.xlane.xlu1 %6197 }
 0xc8f   : > { %v6277_v57 = vmul.f32 0.03125, %v6195_v30  ;;  %v6278_v33 = vmul.f32 0.03125, %v6198_v49  ;;  %9951 = vperm.xlu1 %9784, %v9950_v4  }
 0xc91   : > { %v9955_v45 = vpack.i.bf16 %v6278_v33, %v6277_v57 }
 0xc92   : > { %v6201_v54 = vpop.xlane.xlu0 %6200  ;;  %v6204_v16 = vpop.xlane.xlu1 %6203 }
 0xc93   : > { %v6279_v26 = vmul.f32 0.03125, %v6201_v54  ;;  %v6280_v55 = vmul.f32 0.03125, %v6204_v16  ;;  %9956 = vperm.xlu0 %9778, %v9955_v45  }
 0xc95   : > { %v9960_v41 = vpack.i.bf16 %v6280_v55, %v6279_v26 }
 0xc96   : > { %v6207_v42 = vpop.xlane.xlu0 %6206  ;;  %v6210_v50 = vpop.xlane.xlu1 %6209 }
 0xc97   : > { %v6281_v60 = vmul.f32 0.03125, %v6207_v42  ;;  %v6282_v43 = vmul.f32 0.03125, %v6210_v50  ;;  %9961 = vperm.xlu1 %9784, %v9960_v41  }
 0xc99   : > { %v9965_v52 = vpack.i.bf16 %v6282_v43, %v6281_v60 }
 0xc9a   : > { %v6213_v11 = vpop.xlane.xlu0 %6212  ;;  %v6216_v7 = vpop.xlane.xlu1 %6215 }
 0xc9b   : > { %v6283_v38 = vmul.f32 0.03125, %v6213_v11  ;;  %v6284_v48 = vmul.f32 0.03125, %v6216_v7  ;;  %9966 = vperm.xlu0 %9778, %v9965_v52  }
 0xc9d   : > { %v9970_v10 = vpack.i.bf16 %v6284_v48, %v6283_v38 }
 0xc9e   : > { %v6219_v28 = vpop.xlane.xlu0 %6218  ;;  %v6222_v40 = vpop.xlane.xlu1 %6221 }
 0xc9f   : > { %v6285_v56 = vmul.f32 0.03125, %v6219_v28  ;;  %v6286_v27 = vmul.f32 0.03125, %v6222_v40  ;;  %9971 = vperm.xlu1 %9784, %v9970_v10  }
 0xca1   : > { %v9975_v47 = vpack.i.bf16 %v6286_v27, %v6285_v56 }
 0xca2   : > { %v6225_v24 = vpop.xlane.xlu0 %6224  ;;  %v6228_v13 = vpop.xlane.xlu1 %6227 }
 0xca3   : > { %v6287_v58 = vmul.f32 0.03125, %v6225_v24  ;;  %v6288_v51 = vmul.f32 0.03125, %v6228_v13  ;;  %9976 = vperm.xlu0 %9778, %v9975_v47  }
 0xca5   : > { %v9980_v2 = vpack.i.bf16 %v6288_v51, %v6287_v58 }
 0xca6   : > { %v6231_v4 = vpop.xlane.xlu0 %6230  ;;  %v6234_v30 = vpop.xlane.xlu1 %6233 }
 0xca7   : > { %v6289_v49 = vmul.f32 0.03125, %v6231_v4  ;;  %v6290_v57 = vmul.f32 0.03125, %v6234_v30  ;;  %9981 = vperm.xlu0 %9778, %v9980_v2   ;;  %v6387_v4 = vsel %vm916_vm3, %v13153_v36, -inf }
 0xca9   : > { %v9985_v33 = vpack.i.bf16 %v6290_v57, %v6289_v49 }
 0xcaa   : > { %v6237_v45 = vpop.xlane.xlu0 %6236  ;;  %v6240_v54 = vpop.xlane.xlu1 %6239 }
 0xcab   : > { %v6291_v16 = vmul.f32 0.03125, %v6237_v45  ;;  %v6292_v26 = vmul.f32 0.03125, %v6240_v54  ;;  %9986 = vperm.xlu1 %9784, %v9985_v33  }
 0xcad   : > { %v9990_v55 = vpack.i.bf16 %v6292_v26, %v6291_v16  ;;  %v6390_v26 = vsel %vm916_vm3, %v13157_v23, -inf }
 0xcae   : > { %v6243_v41 = vpop.xlane.xlu0 %6242  ;;  %v6246_v42 = vpop.xlane.xlu1 %6245 }
 0xcaf   : > { %v6293_v50 = vmul.f32 0.03125, %v6243_v41  ;;  %v6294_v60 = vmul.f32 0.03125, %v6246_v42  ;;  %9991 = vperm.xlu0 %9778, %v9990_v55  }
 0xcb1   : > { %v9995_v43 = vpack.i.bf16 %v6294_v60, %v6293_v50 }
 0xcb2   : > { %v6249_v52 = vpop.xlane.xlu0 %6248  ;;  %v6252_v11 = vpop.xlane.xlu1 %6251 }
 0xcb3   : > { %9996 = vperm.xlu1 %9784, %v9995_v43   ;;  %v6295_v42 = vmul.f32 0.03125, %v6249_v52  ;;  %v6296_v50 = vmul.f32 0.03125, %v6252_v11 }
 0xcb5   : > { %v10000_v43 = vpack.i.bf16 %v6296_v50, %v6295_v42 }
 0xcb6   : > { %v6255_v7 = vpop.xlane.xlu0 %6254  ;;  %v6258_v38 = vpop.xlane.xlu1 %6257 }
 0xcb7   : > { %v6298_v57 = vmul.f32 0.03125, %v6258_v38 }
 0xcba   : > { %v6261_v48 = vpop.xlane.xlu0 %6260  ;;  %v6264_v10 = vpop.xlane.xlu1 %6263 }
 0xcbb   : > { %v6299_v2 = vmul.f32 0.03125, %v6261_v48  ;;  %v6300_v47 = vmul.f32 0.03125, %v6264_v10 }
 0xcbe   : > { %v6267_v28 = vpop.xlane.xlu0 %6266  ;;  %v6270_v40 = vpop.xlane.xlu1 %6269 }
 0xcbf   : > { %v6301_v29 = vmul.f32 0.03125, %v6267_v28  ;;  %v6302_v53 = vmul.f32 0.03125, %v6270_v40 }
 0xcc1   : > { %v10015_v52 = vpack.i.bf16 %v6302_v53, %v6301_v29 }
 0xcc2   : > { %v13235_v56 = vpop.xlane.xlu0 %6307  ;;  %v13237_v27 = vpop.xlane.xlu1 %6304 }
 0xcc6   : > { %v13241_v24 = vpop.xlane.xlu0 %6316  ;;  %v13243_v13 = vpop.xlane.xlu1 %6310 }
 0xcca   : > { %v13245_v58 = vpop.xlane.xlu0 %6328  ;;  %v13247_v51 = vpop.xlane.xlu1 %6313 }
 0xcce   : > { %v13253_v30 = vpop.xlane.xlu0 %6337  ;;  %6388 = vmax.xlane.f32.xlu0 %v6387_v4  ;;  %v13255_v49 = vpop.xlane.xlu1 %6319  ;;  %v6297_v4 = vmul.f32 0.03125, %v6255_v7 }
 0xcd0   : > { %v10005_v23 = vpack.i.bf16 %v6298_v57, %v6297_v4 }
 0xcd2   : > { %v13259_v33 = vpop.xlane.xlu0 %6343  ;;  %v13261_v45 = vpop.xlane.xlu1 %6322 }
 0xcd6   : > { %v13263_v54 = vpop.xlane.xlu0 %6349  ;;  %v13265_v16 = vpop.xlane.xlu1 %6325 }
 0xcd7   : > { %6391 = vmax.xlane.f32.xlu1 %v6390_v26  ;;  %v10010_v26 = vpack.i.bf16 %v6300_v47, %v6299_v2  ;;  %v6393_v47 = vsel %vm916_vm3, %v13165_v22, -inf }
 0xcda   : > { %v13269_v55 = vpop.xlane.xlu0 %6355  ;;  %v13271_v41 = vpop.xlane.xlu1 %6331 }
 0xcde   : > { %v13273_v60 = vpop.xlane.xlu0 %6358  ;;  %v13275_v36 = vpop.xlane.xlu1 %6334 }
 0xce2   : > { %v13277_v63 = vpop.xlane.xlu0 %6361  ;;  %v13279_v19 = vpop.xlane.xlu1 %6340 }
 0xce4   : > { %10001 = vperm.xlu0 %9778, %v10000_v43  }
 0xce6   : > { %v13281_v11 = vpop.xlane.xlu0 %6364  ;;  %v13283_v7 = vpop.xlane.xlu1 %6346 }
 0xce8   : > { %10006 = vperm.xlu1 %9784, %v10005_v23   ;;  %10011 = vperm.xlu0 %9778, %v10010_v26  }
 0xcea   : > { %v13285_v38 = vpop.xlane.xlu0 %6367  ;;  %v13287_v48 = vpop.xlane.xlu1 %6352 }
 0xcec   : > { %10016 = vperm.xlu1 %9784, %v10015_v52  }
 0xcee   : > { %v13289_v10 = vpop.xlane.xlu0 %6370  ;;  %v13291_v57 = vpop.xlane.xlu1 %6373 }
 0xcf2   : > { %v13293_v28 = vpop.xlane.xlu0 %6376  ;;  %v13295_v40 = vpop.xlane.xlu1 %6379 }
 0xcf6   : > { %v13297_v23 = vpop.xlane.xlu0 %6382  ;;  %v13299_v53 = vpop.xlane.xlu1 %6385 }
 0xd06   : > { %v9942_v29 = vpop.permute.xlu0 %9941 }
 0xd07   : > { %v9944_v2 = vunpack.i.h.bf16 %v9942_v29  ;;  %v9943_v42 = vunpack.i.l.bf16 %v9942_v29  ;;  %6394 = vmax.xlane.f32.xlu0 %v6393_v47  ;;  %v6396_v29 = vsel %vm916_vm3, %v13169_v14, -inf }
 0xd09   : > { %v9228_v50 = vpack.c.bf16 %v9944_v2, %v9943_v42 }
 0xd0a   : > { %v9947_v43 = vpop.permute.xlu1 %9946 }
 0xd0b   : > { %v9949_v4 = vunpack.i.h.bf16 %v9947_v43  ;;  %v9948_v26 = vunpack.i.l.bf16 %v9947_v43  ;;  %9229 = vmatpush1.bf16.msra.mxu0 %v9228_v50  ;;  %9339 = vmatpush1.bf16.msra.mxu1 %v9228_v50 }
 0xd0c   : > { %9230 = vmatprep.subr.bf16.mxu0 %v14179_v17  ;;  %9324 = vmatprep.subr.bf16.mxu1 %v14179_v17 }
 0xd0d   : > { %v9231_v52 = vpack.c.bf16 %v9949_v4, %v9948_v26 }
 0xd0e   : > { %v9952_v39 = vpop.permute.xlu1 %9951 }
 0xd0f   : > { %v9954_v35 = vunpack.i.h.bf16 %v9952_v39  ;;  %v9953_v32 = vunpack.i.l.bf16 %v9952_v39  ;;  %9232 = vmatpush1.bf16.msra.mxu0 %v9231_v52  ;;  %9340 = vmatpush1.bf16.msra.mxu1 %v9231_v52 }
 0xd10   : > { %6397 = vmax.xlane.f32.xlu1 %v6396_v29  ;;  %9233 = vmatprep.subr.bf16.mxu0 %v14179_v17 }
 0xd11   : > { %v9234_v47 = vpack.c.bf16 %v9954_v35, %v9953_v32  ;;  %9325 = vmatprep.subr.bf16.mxu1 %v14179_v17 }
 0xd12   : > { %v9957_v2 = vpop.permute.xlu0 %9956 }
 0xd13   : > { %v9959_v42 = vunpack.i.h.bf16 %v9957_v2  ;;  %v9958_v50 = vunpack.i.l.bf16 %v9957_v2  ;;  %9235 = vmatpush1.bf16.msra.mxu0 %v9234_v47  ;;  %9341 = vmatpush1.bf16.msra.mxu1 %v9234_v47  ;;  %v14209_v2 = vpack.i.bf16 %v13235_v56, %v13237_v27  ;;  %v14210_v56 = vpack.i.bf16 %v13247_v51, %v13243_v13 }
 0xd14   : > { %9236 = vmatprep.subr.bf16.mxu0 %v14179_v17  ;;  %9326 = vmatprep.subr.bf16.mxu1 %v14179_v17  ;;  %v10040_v51 = vpack.i.bf16 %v13271_v41, %v13245_v58  ;;  %v10050_v58 = vpack.i.bf16 %v13259_v33, %v13279_v19 }
 0xd15   : > { %v9237_v39 = vpack.c.bf16 %v9959_v42, %v9958_v50  ;;  %v10035_v50 = vpack.i.bf16 %v13265_v16, %v13261_v45  ;;  %v10045_v45 = vpack.i.bf16 %v13253_v30, %v13275_v36  ;;  %v10055_v36 = vpack.i.bf16 %v13263_v54, %v13283_v7 }
 0xd16   : > { %v9962_v43 = vpop.permute.xlu1 %9961 }
 0xd17   : > { %v9964_v4 = vunpack.i.h.bf16 %v9962_v43  ;;  %v9963_v26 = vunpack.i.l.bf16 %v9962_v43  ;;  %9238 = vmatpush1.bf16.msra.mxu0 %v9237_v39  ;;  %9342 = vmatpush1.bf16.msra.mxu1 %v9237_v39 }
 0xd18   : > { %9239 = vmatprep.subr.bf16.mxu0 %v14179_v17  ;;  %9327 = vmatprep.subr.bf16.mxu1 %v14179_v17 }
 0xd19   : > { %v9240_v32 = vpack.c.bf16 %v9964_v4, %v9963_v26  ;;  %v5715_v4 = vld [vmem:[%s13947_s10 + $0x8] sm:$0xff] }
 0xd1a   : > { %v9967_v35 = vpop.permute.xlu0 %9966  ;;  %6783 = vmatprep.mubr.f32.mxu0 %v5715_v4 }
 0xd1b   : > { %v9969_v52 = vunpack.i.h.bf16 %v9967_v35  ;;  %v9968_v29 = vunpack.i.l.bf16 %v9967_v35  ;;  %9241 = vmatpush1.bf16.msra.mxu0 %v9240_v32  ;;  %9343 = vmatpush1.bf16.msra.mxu1 %v9240_v32 }
 0xd1c   : > { %9242 = vmatprep.subr.bf16.mxu0 %v14179_v17  ;;  %9328 = vmatprep.subr.bf16.mxu1 %v14179_v17 }
 0xd1d   : > { %v9243_v47 = vpack.c.bf16 %v9969_v52, %v9968_v29  ;;  %10021 = vperm.xlu0 %9778, %v14209_v2   ;;  %v14211_v52 = vpack.i.bf16 %v13255_v49, %v13241_v24  ;;  %v10065_v49 = vpack.i.bf16 %v13277_v63, %v13273_v60  ;;  %v10075_v63 = vpack.i.bf16 %v13291_v57, %v13289_v10 }
 0xd1e   : > { %v9972_v42 = vpop.permute.xlu1 %9971 }
 0xd1f   : > { %v9974_v39 = vunpack.i.h.bf16 %v9972_v42  ;;  %v9973_v43 = vunpack.i.l.bf16 %v9972_v42  ;;  %9244 = vmatpush1.bf16.msra.mxu0 %v9243_v47  ;;  %9344 = vmatpush1.bf16.msra.mxu1 %v9243_v47  ;;  %v10060_v42 = vpack.i.bf16 %v13269_v55, %v13287_v48  ;;  %v10085_v55 = vpack.i.bf16 %v13299_v53, %v13297_v23 }
 0xd20   : > { %9245 = vmatprep.subr.bf16.mxu0 %v14179_v17  ;;  %9329 = vmatprep.subr.bf16.mxu1 %v14179_v17 }
 0xd21   : > { %v9246_v26 = vpack.c.bf16 %v9974_v39, %v9973_v43  ;;  %10026 = vperm.xlu1 %9784, %v14210_v56   ;;  %10036 = vperm.xlu0 %9778, %v10035_v50   ;;  %v10070_v39 = vpack.i.bf16 %v13285_v38, %v13281_v11  ;;  %v10080_v43 = vpack.i.bf16 %v13295_v40, %v13293_v28 }
 0xd22   : > { %v9977_v27 = vpop.permute.xlu0 %9976 }
 0xd23   : > { %v9979_v16 = vunpack.i.h.bf16 %v9977_v27  ;;  %v9978_v32 = vunpack.i.l.bf16 %v9977_v27  ;;  %9247 = vmatpush1.bf16.msra.mxu0 %v9246_v26  ;;  %9345 = vmatpush1.bf16.msra.mxu1 %v9246_v26 }
 0xd24   : > { %9248 = vmatprep.subr.bf16.mxu0 %v14179_v17  ;;  %9330 = vmatprep.subr.bf16.mxu1 %v14179_v17 }
 0xd25   : > { %v9249_v35 = vpack.c.bf16 %v9979_v16, %v9978_v32  ;;  %10031 = vperm.xlu1 %9784, %v14211_v52   ;;  %10046 = vperm.xlu0 %9778, %v10045_v45  }
 0xd26   : > { %v9982_v13 = vpop.permute.xlu0 %9981 }
 0xd27   : > { %v9984_v30 = vunpack.i.h.bf16 %v9982_v13  ;;  %v9983_v29 = vunpack.i.l.bf16 %v9982_v13  ;;  %9250 = vmatpush1.bf16.msra.mxu0 %v9249_v35  ;;  %9346 = vmatpush1.bf16.msra.mxu1 %v9249_v35 }
 0xd28   : > { %9251 = vmatprep.subr.bf16.mxu0 %v14179_v17  ;;  %9331 = vmatprep.subr.bf16.mxu1 %v14179_v17 }
 0xd29   : > { %v9252_v47 = vpack.c.bf16 %v9984_v30, %v9983_v29  ;;  %10041 = vperm.xlu1 %9784, %v10040_v51   ;;  %10056 = vperm.xlu0 %9778, %v10055_v36   ;;  %v5714_v29 = vld [vmem:[%s13947_s10] sm:$0xff] }
 0xd2a   : > { %v9987_v24 = vpop.permute.xlu1 %9986 }
 0xd2b   : > { %v9989_v41 = vunpack.i.h.bf16 %v9987_v24  ;;  %v9988_v54 = vunpack.i.l.bf16 %v9987_v24  ;;  %9253 = vmatpush1.bf16.msra.mxu0 %v9252_v47  ;;  %9347 = vmatpush1.bf16.msra.mxu1 %v9252_v47  ;;  %v5719_v47 = vld [vmem:[%s13947_s10 + $0x28] sm:$0xff]  ;;  %v5718_v24 = vld [vmem:[%s13947_s10 + $0x20] sm:$0xff] }
 0xd2c   : > { %9254 = vmatprep.subr.bf16.mxu0 %v14179_v17  ;;  %9332 = vmatprep.subr.bf16.mxu1 %v14179_v17 }
 0xd2d   : > { %v9255_v7 = vpack.c.bf16 %v9989_v41, %v9988_v54  ;;  %10051 = vperm.xlu1 %9784, %v10050_v58   ;;  %10066 = vperm.xlu0 %9778, %v10065_v49   ;;  %v5723_v49 = vld [vmem:[%s13947_s10 + $0x48] sm:$0xff]  ;;  %v5722_v58 = vld [vmem:[%s13947_s10 + $0x40] sm:$0xff] }
 0xd2e   : > { %v9992_v2 = vpop.permute.xlu0 %9991  ;;  %v5727_v41 = vld [vmem:[%s13947_s10 + $0x68] sm:$0xff]  ;;  %v5726_v54 = vld [vmem:[%s13947_s10 + $0x60] sm:$0xff] }
 0xd2f   : > { %v9994_v60 = vunpack.i.h.bf16 %v9992_v2  ;;  %v9993_v19 = vunpack.i.l.bf16 %v9992_v2  ;;  %9256 = vmatpush1.bf16.msra.mxu0 %v9255_v7  ;;  %9348 = vmatpush1.bf16.msra.mxu1 %v9255_v7  ;;  %v5731_v7 = vld [vmem:[%s13947_s10 + $0x88] sm:$0xff]  ;;  %v5730_v2 = vld [vmem:[%s13947_s10 + $0x80] sm:$0xff] }
 0xd30   : > { %9257 = vmatprep.subr.bf16.mxu0 %v14179_v17  ;;  %9333 = vmatprep.subr.bf16.mxu1 %v14179_v17 }
 0xd31   : > { %v9258_v33 = vpack.c.bf16 %v9994_v60, %v9993_v19  ;;  %10061 = vperm.xlu1 %9784, %v10060_v42   ;;  %10076 = vperm.xlu0 %9778, %v10075_v63   ;;  %v5735_v42 = vld [vmem:[%s13947_s10 + $0xa8] sm:$0xff]  ;;  %v5734_v63 = vld [vmem:[%s13947_s10 + $0xa0] sm:$0xff] }
 0xd32   : > { %v9997_v50 = vpop.permute.xlu1 %9996  ;;  %v5739_v60 = vld [vmem:[%s13947_s10 + $0xc8] sm:$0xff]  ;;  %v5738_v19 = vld [vmem:[%s13947_s10 + $0xc0] sm:$0xff] }
 0xd33   : > { %v9999_v48 = vunpack.i.h.bf16 %v9997_v50  ;;  %v9998_v10 = vunpack.i.l.bf16 %v9997_v50  ;;  %9259 = vmatpush1.bf16.msra.mxu0 %v9258_v33  ;;  %9349 = vmatpush1.bf16.msra.mxu1 %v9258_v33  ;;  %v5743_v33 = vld [vmem:[%s13947_s10 + $0xe8] sm:$0xff]  ;;  %v5742_v50 = vld [vmem:[%s13947_s10 + $0xe0] sm:$0xff] }
 0xd34   : > { %9260 = vmatprep.subr.bf16.mxu0 %v14179_v17  ;;  %9334 = vmatprep.subr.bf16.mxu1 %v14179_v17 }
 0xd35   : > { %v9261_v57 = vpack.c.bf16 %v9999_v48, %v9998_v10  ;;  %10071 = vperm.xlu1 %9784, %v10070_v39   ;;  %10086 = vperm.xlu0 %9778, %v10085_v55   ;;  %v5747_v39 = vld [vmem:[%s13947_s10 + $0x108] sm:$0xff]  ;;  %v5746_v55 = vld [vmem:[%s13947_s10 + $0x100] sm:$0xff] }
 0xd36   : > { %v5751_v48 = vld [vmem:[%s13947_s10 + $0x128] sm:$0xff] }
 0xd37   : > { %9262 = vmatpush1.bf16.msra.mxu0 %v9261_v57  ;;  %9350 = vmatpush1.bf16.msra.mxu1 %v9261_v57  ;;  %v5750_v57 = vld [vmem:[%s13947_s10 + $0x120] sm:$0xff] }
 0xd38   : > { %9263 = vmatprep.subr.bf16.mxu0 %v14179_v17  ;;  %9335 = vmatprep.subr.bf16.mxu1 %v14179_v17 }
 0xd39   : > { %10081 = vperm.xlu1 %9784, %v10080_v43   ;;  %v5755_v43 = vld [vmem:[%s13947_s10 + $0x148] sm:$0xff] }
 0xd5b   : > { %v6389_v11 = vpop.xlane.xlu0 %6388 }
 0xd63   : > { %v10002_v38 = vpop.permute.xlu0 %10001 }
 0xd64   : > { %v10004_v23 = vunpack.i.h.bf16 %v10002_v38  ;;  %v10003_v53 = vunpack.i.l.bf16 %v10002_v38  ;;  %v6392_v4 = vpop.xlane.xlu1 %6391 }
 0xd65   : > { %v10090_v26 = vpack.i.bf16 %v6392_v4, %v6389_v11  ;;  %v5754_v4 = vld [vmem:[%s13947_s10 + $0x140] sm:$0xff] }
 0xd66   : > { %v9264_v56 = vpack.c.bf16 %v10004_v23, %v10003_v53 }
 0xd67   : > { %10091 = vperm.xlu1 %9784, %v10090_v26   ;;  %v10012_v27 = vpop.permute.xlu0 %10011 }
 0xd68   : > { %v10007_v45 = vpop.permute.xlu1 %10006  ;;  %9265 = vmatpush1.bf16.msra.mxu0 %v9264_v56  ;;  %9351 = vmatpush1.bf16.msra.mxu1 %v9264_v56  ;;  %v10014_v16 = vunpack.i.h.bf16 %v10012_v27  ;;  %v10013_v32 = vunpack.i.l.bf16 %v10012_v27  ;;  %v5759_v56 = vld [vmem:[%s13947_s10 + $0x168] sm:$0xff] }
 0xd69   : > { %v10009_v28 = vunpack.i.h.bf16 %v10007_v45  ;;  %v10008_v40 = vunpack.i.l.bf16 %v10007_v45  ;;  %9266 = vmatprep.subr.bf16.mxu0 %v14179_v17  ;;  %9336 = vmatprep.subr.bf16.mxu1 %v14179_v17 }
 0xd6a   : > { %v9270_v13 = vpack.c.bf16 %v10014_v16, %v10013_v32  ;;  %v5763_v32 = vld [vmem:[%s13947_s10 + $0x188] sm:$0xff] }
 0xd6b   : > { %v9267_v35 = vpack.c.bf16 %v10009_v28, %v10008_v40  ;;  %v5758_v28 = vld [vmem:[%s13947_s10 + $0x160] sm:$0xff] }
 0xd6c   : > { %v10017_v52 = vpop.permute.xlu1 %10016 }
 0xd6d   : > { %9268 = vmatpush1.bf16.msra.mxu0 %v9267_v35  ;;  %9352 = vmatpush1.bf16.msra.mxu1 %v9267_v35  ;;  %v10019_v51 = vunpack.i.h.bf16 %v10017_v52  ;;  %v10018_v36 = vunpack.i.l.bf16 %v10017_v52 }
 0xd6e   : > { %9269 = vmatprep.subr.bf16.mxu0 %v14179_v17  ;;  %9337 = vmatprep.subr.bf16.mxu1 %v14179_v17 }
 0xd6f   : > { %v9273_v30 = vpack.c.bf16 %v10019_v51, %v10018_v36  ;;  %v5762_v51 = vld [vmem:[%s13947_s10 + $0x180] sm:$0xff] }
 0xd71   : > { %9271 = vmatpush1.bf16.msra.mxu0 %v9270_v13  ;;  %9353 = vmatpush1.bf16.msra.mxu1 %v9270_v13 }
 0xd72   : > { %9272 = vmatprep.subr.bf16.mxu0 %v14179_v17  ;;  %9338 = vmatprep.subr.bf16.mxu1 %v14179_v17 }
 0xd75   : > { %9274 = vmatpush1.bf16.msra.mxu0 %v9273_v30  ;;  %9354 = vmatpush1.bf16.msra.mxu1 %v9273_v30 }
 0xd76   : > { %9275 = vmatprep.subr.bf16.mxu0 %v14179_v17 }
 0xd78   : > { %6784 = vmatmul.mubr.f32.vlgmr.msra.gmra.mrb[100].mxu0 %v5714_v29  ;;  %v5767_v29 = vld [vmem:[%s13947_s10 + $0x1a8] sm:$0xff] }
 0xd79   : > { %6788 = vmatprep.mubr.f32.mxu0 %v5719_v47 }
 0xd7c   : > { %6789 = vmatmul.mubr.f32.gmra.mrb[102].mxu0 %v5718_v24 }
 0xd7d   : > { %6793 = vmatprep.mubr.f32.mxu0 %v5723_v49 }
 0xd80   : > { %6794 = vmatmul.mubr.f32.gmra.mrb[104].mxu0 %v5722_v58 }
 0xd81   : > { %6798 = vmatprep.mubr.f32.mxu0 %v5727_v41  ;;  %v5766_v41 = vld [vmem:[%s13947_s10 + $0x1a0] sm:$0xff] }
 0xd84   : > { %6799 = vmatmul.mubr.f32.gmra.mrb[106].mxu0 %v5726_v54  ;;  %v5771_v54 = vld [vmem:[%s13947_s10 + $0x1c8] sm:$0xff] }
 0xd85   : > { %6803 = vmatprep.mubr.f32.mxu0 %v5731_v7 }
 0xd88   : > { %6804 = vmatmul.mubr.f32.gmra.mrb[108].mxu0 %v5730_v2 }
 0xd89   : > { %6808 = vmatprep.mubr.f32.mxu0 %v5735_v42 }
 0xd8c   : > { %6809 = vmatmul.mubr.f32.gmra.mrb[110].mxu0 %v5734_v63 }
 0xd8d   : > { %6813 = vmatprep.mubr.f32.mxu0 %v5739_v60  ;;  %v5770_v60 = vld [vmem:[%s13947_s10 + $0x1c0] sm:$0xff] }
 0xd90   : > { %6814 = vmatmul.mubr.f32.gmra.mrb[112].mxu0 %v5738_v19  ;;  %v5775_v19 = vld [vmem:[%s13947_s10 + $0x1e8] sm:$0xff] }
 0xd91   : > { %6818 = vmatprep.mubr.f32.mxu0 %v5743_v33 }
 0xd94   : > { %6819 = vmatmul.mubr.f32.gmra.mrb[114].mxu0 %v5742_v50  ;;  %v6395_v10 = vpop.xlane.xlu0 %6394 }
 0xd95   : > { %6823 = vmatprep.mubr.f32.mxu0 %v5747_v39 }
 0xd98   : > { %6824 = vmatmul.mubr.f32.gmra.mrb[116].mxu0 %v5746_v55 }
 0xd99   : > { %6828 = vmatprep.mubr.f32.mxu0 %v5751_v48  ;;  %v5774_v48 = vld [vmem:[%s13947_s10 + $0x1e0] sm:$0xff] }
 0xd9c   : > { %v10022_v11 = vpop.permute.xlu0 %10021  ;;  %6829 = vmatmul.mubr.f32.gmra.mrb[118].mxu0 %v5750_v57 }
 0xd9d   : > { %v10024_v38 = vunpack.i.h.bf16 %v10022_v11  ;;  %v10023_v23 = vunpack.i.l.bf16 %v10022_v11  ;;  %v6398_v53 = vpop.xlane.xlu1 %6397  ;;  %6833 = vmatprep.mubr.f32.mxu0 %v5755_v43 }
 0xd9e   : > { %v10095_v26 = vpack.i.bf16 %v6398_v53, %v6395_v10  ;;  %v5779_v10 = vld [vmem:[%s13947_s10 + $0x208] sm:$0xff] }
 0xd9f   : > { %v9276_v27 = vpack.c.bf16 %v10024_v38, %v10023_v23  ;;  %v5778_v23 = vld [vmem:[%s13947_s10 + $0x200] sm:$0xff]  ;;  %v5783_v53 = vld [vmem:[%s13947_s10 + $0x228] sm:$0xff] }
 0xda0   : > { %10096 = vperm.xlu0 %9778, %v10095_v26   ;;  %6834 = vmatmul.mubr.f32.gmra.mrb[120].mxu0 %v5754_v4  ;;  %v10037_v52 = vpop.permute.xlu0 %10036 }
 0xda1   : > { %v10027_v45 = vpop.permute.xlu1 %10026  ;;  %9277 = vmatpush1.bf16.msra.mxu0 %v9276_v27  ;;  %6838 = vmatprep.mubr.f32.mxu0 %v5759_v56  ;;  %v10039_v47 = vunpack.i.h.bf16 %v10037_v52  ;;  %v10038_v24 = vunpack.i.l.bf16 %v10037_v52  ;;  %v5786_v52 = vld [vmem:[%s13947_s10 + $0x240] sm:$0xff] }
 0xda2   : > { %v10029_v40 = vunpack.i.h.bf16 %v10027_v45  ;;  %v10028_v16 = vunpack.i.l.bf16 %v10027_v45  ;;  %9278 = vmatprep.subr.bf16.mxu0 %v14179_v17  ;;  %v5782_v45 = vld [vmem:[%s13947_s10 + $0x220] sm:$0xff] }
 0xda3   : > { %v9285_v7 = vpack.c.bf16 %v10039_v47, %v10038_v24  ;;  %v5790_v47 = vld [vmem:[%s13947_s10 + $0x260] sm:$0xff]  ;;  %v5795_v24 = vld [vmem:[%s13947_s10 + $0x288] sm:$0xff] }
 0xda4   : > { %v9279_v35 = vpack.c.bf16 %v10029_v40, %v10028_v16  ;;  %6839 = vmatmul.mubr.f32.gmra.mrb[122].mxu0 %v5758_v28  ;;  %v10047_v63 = vpop.permute.xlu0 %10046  ;;  %v5787_v28 = vld [vmem:[%s13947_s10 + $0x248] sm:$0xff] }
 0xda5   : > { %v10032_v13 = vpop.permute.xlu1 %10031  ;;  %6843 = vmatprep.mubr.f32.mxu0 %v5763_v32  ;;  %v10049_v33 = vunpack.i.h.bf16 %v10047_v63  ;;  %v10048_v50 = vunpack.i.l.bf16 %v10047_v63 }
 0xda6   : > { %v10034_v36 = vunpack.i.h.bf16 %v10032_v13  ;;  %v10033_v30 = vunpack.i.l.bf16 %v10032_v13  ;;  %9280 = vmatpush1.bf16.msra.mxu0 %v9279_v35  ;;  %v5791_v13 = vld [vmem:[%s13947_s10 + $0x268] sm:$0xff] }
 0xda7   : > { %9281 = vmatprep.subr.bf16.mxu0 %v14179_v17  ;;  %v9291_v57 = vpack.c.bf16 %v10049_v33, %v10048_v50  ;;  %v5798_v33 = vld [vmem:[%s13947_s10 + $0x2a0] sm:$0xff]  ;;  %v5803_v50 = vld [vmem:[%s13947_s10 + $0x2c8] sm:$0xff] }
 0xda8   : > { %v9282_v49 = vpack.c.bf16 %v10034_v36, %v10033_v30  ;;  %6844 = vmatmul.mubr.f32.gmra.mrb[124].mxu0 %v5762_v51  ;;  %v10057_v38 = vpop.permute.xlu0 %10056 }
 0xda9   : > { %v10042_v58 = vpop.permute.xlu1 %10041  ;;  %6848 = vmatprep.mubr.f32.mxu0 %v5767_v29  ;;  %v10059_v4 = vunpack.i.h.bf16 %v10057_v38  ;;  %v10058_v26 = vunpack.i.l.bf16 %v10057_v38 }
 0xdaa   : > { %9283 = vmatpush1.bf16.msra.mxu0 %v9282_v49  ;;  %v10044_v2 = vunpack.i.h.bf16 %v10042_v58  ;;  %v10043_v42 = vunpack.i.l.bf16 %v10042_v58 }
 0xdab   : > { %9284 = vmatprep.subr.bf16.mxu0 %v14179_v17  ;;  %v9297_v40 = vpack.c.bf16 %v10059_v4, %v10058_v26  ;;  %v5811_v4 = vld [vmem:[%s13947_s10 + $0x308] sm:$0xff] }
 0xdac   : > { %6849 = vmatmul.mubr.f32.gmra.mrb[126].mxu0 %v5766_v41  ;;  %v9288_v39 = vpack.c.bf16 %v10044_v2, %v10043_v42  ;;  %v10067_v35 = vpop.permute.xlu0 %10066  ;;  %v5799_v2 = vld [vmem:[%s13947_s10 + $0x2a8] sm:$0xff] }
 0xdad   : > { %6853 = vmatprep.mubr.f32.mxu0 %v5771_v54  ;;  %v10052_v55 = vpop.permute.xlu1 %10051  ;;  %v10069_v51 = vunpack.i.h.bf16 %v10067_v35  ;;  %v10068_v36 = vunpack.i.l.bf16 %v10067_v35 }
 0xdae   : > { %9286 = vmatpush1.bf16.msra.mxu0 %v9285_v7  ;;  %v10054_v43 = vunpack.i.h.bf16 %v10052_v55  ;;  %v10053_v11 = vunpack.i.l.bf16 %v10052_v55  ;;  %v5794_v7 = vld [vmem:[%s13947_s10 + $0x280] sm:$0xff] }
 0xdaf   : > { %9287 = vmatprep.subr.bf16.mxu0 %v14179_v17  ;;  %v9303_v49 = vpack.c.bf16 %v10069_v51, %v10068_v36  ;;  %v5823_v51 = vld [vmem:[%s13947_s10 + $0x368] sm:$0xff]  ;;  %v5822_v36 = vld [vmem:[%s13947_s10 + $0x360] sm:$0xff] }
 0xdb0   : > { %6854 = vmatmul.mubr.f32.gmra.mrb[128].mxu0 %v5770_v60  ;;  %v9294_v56 = vpack.c.bf16 %v10054_v43, %v10053_v11  ;;  %v10077_v54 = vpop.permute.xlu0 %10076  ;;  %v5807_v43 = vld [vmem:[%s13947_s10 + $0x2e8] sm:$0xff] }
 0xdb1   : > { %6858 = vmatprep.mubr.f32.mxu0 %v5775_v19  ;;  %v10062_v27 = vpop.permute.xlu1 %10061  ;;  %v10079_v42 = vunpack.i.h.bf16 %v10077_v54  ;;  %v10078_v63 = vunpack.i.l.bf16 %v10077_v54 }
 0xdb2   : > { %9289 = vmatpush1.bf16.msra.mxu0 %v9288_v39  ;;  %v10064_v16 = vunpack.i.h.bf16 %v10062_v27  ;;  %v10063_v32 = vunpack.i.l.bf16 %v10062_v27  ;;  %v5815_v27 = vld [vmem:[%s13947_s10 + $0x328] sm:$0xff] }
 0xdb3   : > { %9290 = vmatprep.subr.bf16.mxu0 %v14179_v17  ;;  %v9309_v39 = vpack.c.bf16 %v10079_v42, %v10078_v63  ;;  %v5716_v63 = vld [vmem:[%s13947_s10 + $0x10] sm:$0xff] }
 0xdb4   : > { %6859 = vmatmul.mubr.f32.gmra.mrb[130].mxu0 %v5774_v48  ;;  %v9300_v30 = vpack.c.bf16 %v10064_v16, %v10063_v32 }
 0xdb5   : > { %6863 = vmatprep.mubr.f32.mxu0 %v5779_v10  ;;  %v10072_v29 = vpop.permute.xlu1 %10071  ;;  %v10087_v10 = vpop.permute.xlu0 %10086 }
 0xdb6   : > { %9292 = vmatpush1.bf16.msra.mxu0 %v9291_v57  ;;  %v10074_v58 = vunpack.i.h.bf16 %v10072_v29  ;;  %v10073_v41 = vunpack.i.l.bf16 %v10072_v29  ;;  %v5802_v57 = vld [vmem:[%s13947_s10 + $0x2c0] sm:$0xff]  ;;  %v10089_v11 = vunpack.i.h.bf16 %v10087_v10  ;;  %v10088_v38 = vunpack.i.l.bf16 %v10087_v10  ;;  %v5831_v29 = vld [vmem:[%s13947_s10 + $0x3a8] sm:$0xff]  ;;  %v5732_v10 = vld [vmem:[%s13947_s10 + $0x90] sm:$0xff] }
 0xdb7   : > { %9293 = vmatprep.subr.bf16.mxu0 %v14179_v17 }
 0xdb8   : > { %6864 = vmatmul.mubr.f32.gmra.mrb[132].mxu0 %v5778_v23  ;;  %v9306_v60 = vpack.c.bf16 %v10074_v58, %v10073_v41  ;;  %v9315_v26 = vpack.c.bf16 %v10089_v11, %v10088_v38  ;;  %v5839_v41 = vld [vmem:[%s13947_s10 + $0x3e8] sm:$0xff]  ;;  %v5741_v11 = vld [vmem:[%s13947_s10 + $0xd8] sm:$0xff]  ;;  %v5740_v38 = vld [vmem:[%s13947_s10 + $0xd0] sm:$0xff] }
 0xdb9   : > { %6868 = vmatprep.mubr.f32.mxu0 %v5783_v53  ;;  %v10082_v19 = vpop.permute.xlu1 %10081  ;;  %v5806_v53 = vld [vmem:[%s13947_s10 + $0x2e0] sm:$0xff] }
 0xdba   : > { %9295 = vmatpush1.bf16.msra.mxu0 %v9294_v56  ;;  %v10084_v55 = vunpack.i.h.bf16 %v10082_v19  ;;  %v10083_v48 = vunpack.i.l.bf16 %v10082_v19  ;;  %v5810_v56 = vld [vmem:[%s13947_s10 + $0x300] sm:$0xff]  ;;  %v5720_v19 = vld [vmem:[%s13947_s10 + $0x30] sm:$0xff] }
 0xdbb   : > { %9296 = vmatprep.subr.bf16.mxu0 %v14179_v17 }
 0xdbc   : > { %6869 = vmatmul.mubr.f32.gmra.mrb[134].mxu0 %v5782_v45  ;;  %v9312_v23 = vpack.c.bf16 %v10084_v55, %v10083_v48  ;;  %v5814_v45 = vld [vmem:[%s13947_s10 + $0x320] sm:$0xff]  ;;  %v5728_v55 = vld [vmem:[%s13947_s10 + $0x70] sm:$0xff]  ;;  %v5733_v48 = vld [vmem:[%s13947_s10 + $0x98] sm:$0xff] }
 0xdbd   : > { %6873 = vmatprep.mubr.f32.mxu0 %v5787_v28  ;;  %v5717_v28 = vld [vmem:[%s13947_s10 + $0x18] sm:$0xff] }
 0xdbe   : > { %9298 = vmatpush1.bf16.msra.mxu0 %v9297_v40 }
 0xdbf   : > { %9299 = vmatprep.subr.bf16.mxu0 %v14179_v17 }
 0xdc0   : > { %6874 = vmatmul.mubr.f32.gmra.mrb[136].mxu0 %v5786_v52  ;;  %v5819_v52 = vld [vmem:[%s13947_s10 + $0x348] sm:$0xff] }
 0xdc1   : > { %6878 = vmatprep.mubr.f32.mxu0 %v5791_v13  ;;  %6913 = vmatprep.mubr.f32.mxu1 %v5819_v52  ;;  %v5818_v13 = vld [vmem:[%s13947_s10 + $0x340] sm:$0xff]  ;;  %v5769_v52 = vld [vmem:[%s13947_s10 + $0x1b8] sm:$0xff] }
 0xdc2   : > { %9301 = vmatpush1.bf16.msra.mxu0 %v9300_v30  ;;  %6914 = vmatmul.mubr.f32.vlgmr.msra.gmra.mrb[36].mxu1 %v5818_v13  ;;  %v5826_v30 = vld [vmem:[%s13947_s10 + $0x380] sm:$0xff]  ;;  %v5768_v13 = vld [vmem:[%s13947_s10 + $0x1b0] sm:$0xff] }
 0xdc3   : > { %9302 = vmatprep.subr.bf16.mxu0 %v14179_v17  ;;  %6918 = vmatprep.mubr.f32.mxu1 %v5823_v51  ;;  %v5773_v51 = vld [vmem:[%s13947_s10 + $0x1d8] sm:$0xff] }
 0xdc4   : > { %6879 = vmatmul.mubr.f32.gmra.mrb[138].mxu0 %v5790_v47  ;;  %v5830_v47 = vld [vmem:[%s13947_s10 + $0x3a0] sm:$0xff] }
 0xdc5   : > { %6883 = vmatprep.mubr.f32.mxu0 %v5795_v24  ;;  %v5835_v24 = vld [vmem:[%s13947_s10 + $0x3c8] sm:$0xff] }
 0xdc6   : > { %9304 = vmatpush1.bf16.msra.mxu0 %v9303_v49  ;;  %6919 = vmatmul.mubr.f32.gmra.mrb[38].mxu1 %v5822_v36  ;;  %v5834_v49 = vld [vmem:[%s13947_s10 + $0x3c0] sm:$0xff]  ;;  %v5772_v36 = vld [vmem:[%s13947_s10 + $0x1d0] sm:$0xff] }
 0xdc7   : > { %9305 = vmatprep.subr.bf16.mxu0 %v14179_v17 }
 0xdc8   : > { %6884 = vmatmul.mubr.f32.gmra.mrb[140].mxu0 %v5794_v7 }
 0xdc9   : > { %6888 = vmatprep.mubr.f32.mxu0 %v5799_v2  ;;  %v5838_v2 = vld [vmem:[%s13947_s10 + $0x3e0] sm:$0xff] }
 0xdca   : > { %9307 = vmatpush1.bf16.msra.mxu0 %v9306_v60  ;;  %v5721_v60 = vld [vmem:[%s13947_s10 + $0x38] sm:$0xff] }
 0xdcb   : > { %9308 = vmatprep.subr.bf16.mxu0 %v14179_v17 }
 0xdcc   : > { %6889 = vmatmul.mubr.f32.gmra.mrb[142].mxu0 %v5798_v33  ;;  %v5725_v33 = vld [vmem:[%s13947_s10 + $0x58] sm:$0xff] }
 0xdcd   : > { %6893 = vmatprep.mubr.f32.mxu0 %v5803_v50  ;;  %v5724_v50 = vld [vmem:[%s13947_s10 + $0x50] sm:$0xff] }
 0xdce   : > { %9310 = vmatpush1.bf16.msra.mxu0 %v9309_v39  ;;  %v5729_v39 = vld [vmem:[%s13947_s10 + $0x78] sm:$0xff] }
 0xdcf   : > { %9311 = vmatprep.subr.bf16.mxu0 %v14179_v17 }
 0xdd0   : > { %6894 = vmatmul.mubr.f32.gmra.mrb[144].mxu0 %v5802_v57  ;;  %v5737_v57 = vld [vmem:[%s13947_s10 + $0xb8] sm:$0xff] }
 0xdd1   : > { %6898 = vmatprep.mubr.f32.mxu0 %v5807_v43  ;;  %v5736_v43 = vld [vmem:[%s13947_s10 + $0xb0] sm:$0xff] }
 0xdd2   : > { %9313 = vmatpush1.bf16.msra.mxu0 %v9312_v23  ;;  %v5745_v23 = vld [vmem:[%s13947_s10 + $0xf8] sm:$0xff] }
 0xdd3   : > { %9314 = vmatprep.subr.bf16.mxu0 %v14179_v17 }
 0xdd4   : > { %6899 = vmatmul.mubr.f32.gmra.mrb[146].mxu0 %v5806_v53  ;;  %v5744_v53 = vld [vmem:[%s13947_s10 + $0xf0] sm:$0xff] }
 0xdd5   : > { %6903 = vmatprep.mubr.f32.mxu0 %v5811_v4  ;;  %v5749_v4 = vld [vmem:[%s13947_s10 + $0x118] sm:$0xff] }
 0xdd6   : > { %9316 = vmatpush1.bf16.msra.mxu0 %v9315_v26  ;;  %v5748_v26 = vld [vmem:[%s13947_s10 + $0x110] sm:$0xff] }
 0xdd7   : > { %9317 = vmatprep.subr.bf16.mxu0 %v14179_v17 }
 0xdd8   : > { %6904 = vmatmul.mubr.f32.gmra.mrb[148].mxu0 %v5810_v56  ;;  %v5753_v56 = vld [vmem:[%s13947_s10 + $0x138] sm:$0xff] }
 0xdd9   : > { %6908 = vmatprep.mubr.f32.mxu0 %v5815_v27  ;;  %v5752_v27 = vld [vmem:[%s13947_s10 + $0x130] sm:$0xff] }
 0xddc   : > { %6909 = vmatmul.mubr.f32.gmra.mrb[150].mxu0 %v5814_v45  ;;  %v5757_v45 = vld [vmem:[%s13947_s10 + $0x158] sm:$0xff] }
 0xddd   : > { %7008 = vmatprep.mubr.f32.mxu0 %v5717_v28  ;;  %v5756_v28 = vld [vmem:[%s13947_s10 + $0x150] sm:$0xff] }
 0xde6   : > { %v10092_v40 = vpop.permute.xlu1 %10091 }
 0xde7   : > { %v10094_v16 = vunpack.i.h.bf16 %v10092_v40  ;;  %v10093_v32 = vunpack.i.l.bf16 %v10092_v40  ;;  %v5761_v40 = vld [vmem:[%s13947_s10 + $0x178] sm:$0xff] }
 0xde9   : > { %v9318_v35 = vpack.c.bf16 %v10094_v16, %v10093_v32  ;;  %v5760_v16 = vld [vmem:[%s13947_s10 + $0x170] sm:$0xff]  ;;  %v5765_v32 = vld [vmem:[%s13947_s10 + $0x198] sm:$0xff] }
 0xdeb   : > { %9319 = vmatpush1.bf16.msra.mxu0 %v9318_v35  ;;  %v5764_v35 = vld [vmem:[%s13947_s10 + $0x190] sm:$0xff] }
 0xdec   : > { %9320 = vmatprep.subr.bf16.mxu0 %v14179_v17  ;;  %v5827_v17 = vld [vmem:[%s13947_s10 + $0x388] sm:$0xff] }
 0xded   : > { %6923 = vmatprep.mubr.f32.mxu1 %v5827_v17  ;;  %v5777_v17 = vld [vmem:[%s13947_s10 + $0x1f8] sm:$0xff] }
 0xdee   : > { %6924 = vmatmul.mubr.f32.gmra.mrb[40].mxu1 %v5826_v30  ;;  %v5776_v30 = vld [vmem:[%s13947_s10 + $0x1f0] sm:$0xff] }
 0xdef   : > { %6928 = vmatprep.mubr.f32.mxu1 %v5831_v29  ;;  %v5781_v29 = vld [vmem:[%s13947_s10 + $0x218] sm:$0xff] }
 0xdf2   : > { %6929 = vmatmul.mubr.f32.gmra.mrb[42].mxu1 %v5830_v47  ;;  %v5780_v47 = vld [vmem:[%s13947_s10 + $0x210] sm:$0xff] }
 0xdf3   : > { %6933 = vmatprep.mubr.f32.mxu1 %v5835_v24  ;;  %v5785_v24 = vld [vmem:[%s13947_s10 + $0x238] sm:$0xff] }
 0xdf6   : > { %6934 = vmatmul.mubr.f32.gmra.mrb[44].mxu1 %v5834_v49  ;;  %v5784_v49 = vld [vmem:[%s13947_s10 + $0x230] sm:$0xff] }
 0xdf7   : > { %6938 = vmatprep.mubr.f32.mxu1 %v5839_v41  ;;  %v5788_v41 = vld [vmem:[%s13947_s10 + $0x250] sm:$0xff] }
 0xdfa   : > { %6939 = vmatmul.mubr.f32.gmra.mrb[46].mxu1 %v5838_v2  ;;  %v5797_v2 = vld [vmem:[%s13947_s10 + $0x298] sm:$0xff] }
 0xe1f   : > { %v10097_v58 = vpop.permute.xlu0 %10096 }
 0xe20   : > { %v10099_v54 = vunpack.i.h.bf16 %v10097_v58  ;;  %v10098_v7 = vunpack.i.l.bf16 %v10097_v58  ;;  %v5789_v58 = vld [vmem:[%s13947_s10 + $0x258] sm:$0xff] }
 0xe22   : > { %v9321_v42 = vpack.c.bf16 %v10099_v54, %v10098_v7  ;;  %v5793_v54 = vld [vmem:[%s13947_s10 + $0x278] sm:$0xff]  ;;  %v5792_v7 = vld [vmem:[%s13947_s10 + $0x270] sm:$0xff] }
 0xe24   : > { %9322 = vmatpush1.bf16.msra.mxu0 %v9321_v42  ;;  %v5796_v42 = vld [vmem:[%s13947_s10 + $0x290] sm:$0xff] }
 0xe27   : > { %7009 = vmatmul.mubr.f32.vlgmr.msra.gmra.mrb[100].mxu0 %v5716_v63  ;;  %v5801_v63 = vld [vmem:[%s13947_s10 + $0x2b8] sm:$0xff] }
 0xe28   : > { %7013 = vmatprep.mubr.f32.mxu0 %v5721_v60  ;;  %v5800_v60 = vld [vmem:[%s13947_s10 + $0x2b0] sm:$0xff] }
 0xe2b   : > { %7014 = vmatmul.mubr.f32.gmra.mrb[102].mxu0 %v5720_v19  ;;  %v5805_v19 = vld [vmem:[%s13947_s10 + $0x2d8] sm:$0xff] }
 0xe2c   : > { %7018 = vmatprep.mubr.f32.mxu0 %v5725_v33  ;;  %v5804_v33 = vld [vmem:[%s13947_s10 + $0x2d0] sm:$0xff] }
 0xe2f   : > { %7019 = vmatmul.mubr.f32.gmra.mrb[104].mxu0 %v5724_v50  ;;  %v5809_v50 = vld [vmem:[%s13947_s10 + $0x2f8] sm:$0xff] }
 0xe30   : > { %7023 = vmatprep.mubr.f32.mxu0 %v5729_v39  ;;  %v5808_v39 = vld [vmem:[%s13947_s10 + $0x2f0] sm:$0xff] }
 0xe33   : > { %7024 = vmatmul.mubr.f32.gmra.mrb[106].mxu0 %v5728_v55  ;;  %v5813_v55 = vld [vmem:[%s13947_s10 + $0x318] sm:$0xff] }
 0xe34   : > { %7028 = vmatprep.mubr.f32.mxu0 %v5733_v48  ;;  %v5812_v48 = vld [vmem:[%s13947_s10 + $0x310] sm:$0xff] }
 0xe37   : > { %7029 = vmatmul.mubr.f32.gmra.mrb[108].mxu0 %v5732_v10  ;;  %v5817_v10 = vld [vmem:[%s13947_s10 + $0x338] sm:$0xff] }
 0xe38   : > { %7033 = vmatprep.mubr.f32.mxu0 %v5737_v57  ;;  %v5816_v57 = vld [vmem:[%s13947_s10 + $0x330] sm:$0xff] }
 0xe3b   : > { %7034 = vmatmul.mubr.f32.gmra.mrb[110].mxu0 %v5736_v43  ;;  %v5821_v43 = vld [vmem:[%s13947_s10 + $0x358] sm:$0xff] }
 0xe3c   : > { %7038 = vmatprep.mubr.f32.mxu0 %v5741_v11  ;;  %v5820_v11 = vld [vmem:[%s13947_s10 + $0x350] sm:$0xff] }
 0xe3f   : > { %7039 = vmatmul.mubr.f32.gmra.mrb[112].mxu0 %v5740_v38  ;;  %v5825_v38 = vld [vmem:[%s13947_s10 + $0x378] sm:$0xff] }
 0xe40   : > { %7043 = vmatprep.mubr.f32.mxu0 %v5745_v23  ;;  %v5824_v23 = vld [vmem:[%s13947_s10 + $0x370] sm:$0xff] }
 0xe43   : > { %7044 = vmatmul.mubr.f32.gmra.mrb[114].mxu0 %v5744_v53  ;;  %v5829_v53 = vld [vmem:[%s13947_s10 + $0x398] sm:$0xff] }
 0xe44   : > { %7048 = vmatprep.mubr.f32.mxu0 %v5749_v4  ;;  %v5828_v4 = vld [vmem:[%s13947_s10 + $0x390] sm:$0xff] }
 0xe47   : > { %7049 = vmatmul.mubr.f32.gmra.mrb[116].mxu0 %v5748_v26  ;;  %v5833_v26 = vld [vmem:[%s13947_s10 + $0x3b8] sm:$0xff] }
 0xe48   : > { %7053 = vmatprep.mubr.f32.mxu0 %v5753_v56  ;;  %v5832_v56 = vld [vmem:[%s13947_s10 + $0x3b0] sm:$0xff] }
 0xe4b   : > { %7054 = vmatmul.mubr.f32.gmra.mrb[118].mxu0 %v5752_v27  ;;  %v5837_v27 = vld [vmem:[%s13947_s10 + $0x3d8] sm:$0xff] }
 0xe4c   : > { %7058 = vmatprep.mubr.f32.mxu0 %v5757_v45  ;;  %v5836_v45 = vld [vmem:[%s13947_s10 + $0x3d0] sm:$0xff] }
 0xe4f   : > { %7059 = vmatmul.mubr.f32.gmra.mrb[120].mxu0 %v5756_v28  ;;  %v5841_v28 = vld [vmem:[%s13947_s10 + $0x3f8] sm:$0xff] }
 0xe50   : > { %7063 = vmatprep.mubr.f32.mxu0 %v5761_v40  ;;  %v5840_v40 = vld [vmem:[%s13947_s10 + $0x3f0] sm:$0xff] }
 0xe53   : > { %7064 = vmatmul.mubr.f32.gmra.mrb[122].mxu0 %v5760_v16 }
 0xe54   : > { %7068 = vmatprep.mubr.f32.mxu0 %v5765_v32 }
 0xe57   : > { %7069 = vmatmul.mubr.f32.gmra.mrb[124].mxu0 %v5764_v35 }
 0xe58   : > { %7073 = vmatprep.mubr.f32.mxu0 %v5769_v52 }
 0xe5b   : > { %7074 = vmatmul.mubr.f32.gmra.mrb[126].mxu0 %v5768_v13 }
 0xe5c   : > { %7078 = vmatprep.mubr.f32.mxu0 %v5773_v51 }
 0xe5f   : > { %7079 = vmatmul.mubr.f32.gmra.mrb[128].mxu0 %v5772_v36 }
 0xe60   : > { %7083 = vmatprep.mubr.f32.mxu0 %v5777_v17 }
 0xe63   : > { %7084 = vmatmul.mubr.f32.gmra.mrb[130].mxu0 %v5776_v30 }
 0xe64   : > { %7088 = vmatprep.mubr.f32.mxu0 %v5781_v29 }
 0xe67   : > { %7089 = vmatmul.mubr.f32.gmra.mrb[132].mxu0 %v5780_v47 }
 0xe68   : > { %7093 = vmatprep.mubr.f32.mxu0 %v5785_v24 }
 0xe6b   : > { %7094 = vmatmul.mubr.f32.gmra.mrb[134].mxu0 %v5784_v49 }
 0xe6c   : > { %7098 = vmatprep.mubr.f32.mxu0 %v5789_v58 }
 0xe6f   : > { %7099 = vmatmul.mubr.f32.gmra.mrb[136].mxu0 %v5788_v41 }
 0xe70   : > { %7103 = vmatprep.mubr.f32.mxu0 %v5793_v54 }
 0xe73   : > { %7104 = vmatmul.mubr.f32.gmra.mrb[138].mxu0 %v5792_v7 }
 0xe74   : > { %7108 = vmatprep.mubr.f32.mxu0 %v5797_v2 }
 0xe77   : > { %7109 = vmatmul.mubr.f32.gmra.mrb[140].mxu0 %v5796_v42 }
 0xe78   : > { %7113 = vmatprep.mubr.f32.mxu0 %v5801_v63 }
 0xe7b   : > { %7114 = vmatmul.mubr.f32.gmra.mrb[142].mxu0 %v5800_v60 }
 0xe7c   : > { %7118 = vmatprep.mubr.f32.mxu0 %v5805_v19 }
 0xe7f   : > { %7119 = vmatmul.mubr.f32.gmra.mrb[144].mxu0 %v5804_v33 }
 0xe80   : > { %7123 = vmatprep.mubr.f32.mxu0 %v5809_v50 }
 0xe83   : > { %7124 = vmatmul.mubr.f32.gmra.mrb[146].mxu0 %v5808_v39 }
 0xe84   : > { %7128 = vmatprep.mubr.f32.mxu0 %v5813_v55 }
 0xe87   : > { %7129 = vmatmul.mubr.f32.gmra.mrb[148].mxu0 %v5812_v48 }
 0xe88   : > { %7133 = vmatprep.mubr.f32.mxu0 %v5817_v10 }
 0xe8b   : > { %7134 = vmatmul.mubr.f32.gmra.mrb[150].mxu0 %v5816_v57 }
 0xe8c   : > { %7138 = vmatprep.mubr.f32.mxu0 %v5821_v43 }
 0xe8f   : > { %7139 = vmatmul.mubr.f32.gmra.mrb[152].mxu0 %v5820_v11 }
 0xe90   : > { %7143 = vmatprep.mubr.f32.mxu0 %v5825_v38 }
 0xe93   : > { %7144 = vmatmul.mubr.f32.gmra.mrb[154].mxu0 %v5824_v23 }
 0xe94   : > { %7148 = vmatprep.mubr.f32.mxu0 %v5829_v53 }
 0xe95   : > { %v13766_v16 = vpop.f32.mrb[36].mxu1 }
 0xe96   : > { %v6917_v32 = vpop.f32.mrb[37].mxu1 }
 0xe97   : > { %7149 = vmatmul.mubr.f32.gmra.mrb[156].mxu0 %v5828_v4 }
 0xe98   : > { %7153 = vmatprep.mubr.f32.mxu0 %v5833_v26 }
 0xe99   : > { %v13768_v35 = vpop.f32.mrb[38].mxu1 }
 0xe9a   : > { %v6922_v52 = vpop.f32.mrb[39].mxu1 }
 0xe9b   : > { %7154 = vmatmul.mubr.f32.gmra.mrb[158].mxu0 %v5832_v56 }
 0xe9c   : > { %7158 = vmatprep.mubr.f32.mxu0 %v5837_v27 }
 0xe9f   : > { %7159 = vmatmul.mubr.f32.gmra.mrb[160].mxu0 %v5836_v45 }
 0xea0   : > { %7163 = vmatprep.mubr.f32.mxu0 %v5841_v28 }
 0xea3   : > { %7164 = vmatmul.mubr.f32.gmra.mrb[162].mxu0 %v5840_v40 }
 0xec1   : > { %v13770_v13 = vpop.f32.mrb[40].mxu1 }
 0xec2   : > { %v6927_v51 = vpop.f32.mrb[41].mxu1 }
 0xec5   : > { %v13772_v29 = vpop.f32.mrb[42].mxu1 }
 0xec6   : > { %v6932_v47 = vpop.f32.mrb[43].mxu1 }
 0xec9   : > { %v13774_v41 = vpop.f32.mrb[44].mxu1 }
 0xeca   : > { %v6937_v54 = vpop.f32.mrb[45].mxu1 }
 0xecd   : > { %v13776_v63 = vpop.f32.mrb[46].mxu1 }
 0xece   : > { %v6942_v60 = vpop.f32.mrb[47].mxu1 }
 0xefa   : > { %v7010_v36 = vpop.f32.mrb[100].mxu0 }
 0xefb   : > { %v8051_v17 = vmul.f32 -1.442695, %v7010_v36  ;;  %v7012_v30 = vpop.f32.mrb[101].mxu0 }
 0xefd   : > { %10236 = vpow2.f32 %v8051_v17 }
 0xefe   : > { %v7015_v24 = vpop.f32.mrb[102].mxu0 }
 0xeff   : > { %v8052_v49 = vmul.f32 -1.442695, %v7015_v24  ;;  %v7017_v58 = vpop.f32.mrb[103].mxu0 }
 0xf01   : > { %10238 = vpow2.f32 %v8052_v49 }
 0xf02   : > { %v7020_v7 = vpop.f32.mrb[104].mxu0 }
 0xf03   : > { %v8053_v2 = vmul.f32 -1.442695, %v7020_v7  ;;  %v7022_v42 = vpop.f32.mrb[105].mxu0 }
 0xf05   : > { %10240 = vpow2.f32 %v8053_v2 }
 0xf06   : > { %v7025_v19 = vpop.f32.mrb[106].mxu0 }
 0xf07   : > { %v10237_v33 = vpop.eup %10236  ;;  %v8054_v50 = vmul.f32 -1.442695, %v7025_v19  ;;  %v7027_v39 = vpop.f32.mrb[107].mxu0 }
 0xf08   : > { %v7265_v55 = vadd.f32 1.0, %v10237_v33 }
 0xf09   : > { %10242 = vpow2.f32 %v8054_v50 }
 0xf0a   : > { %10244 = vrcp.f32 %v7265_v55  ;;  %v7030_v48 = vpop.f32.mrb[108].mxu0 }
 0xf0b   : > { %v10239_v10 = vpop.eup %10238  ;;  %v8055_v57 = vmul.f32 -1.442695, %v7030_v48  ;;  %v7032_v43 = vpop.f32.mrb[109].mxu0 }
 0xf0c   : > { %v7266_v11 = vadd.f32 1.0, %v10239_v10 }
 0xf0d   : > { %10246 = vpow2.f32 %v8055_v57 }
 0xf0e   : > { %10248 = vrcp.f32 %v7266_v11  ;;  %v7035_v38 = vpop.f32.mrb[110].mxu0 }
 0xf0f   : > { %v10241_v23 = vpop.eup %10240  ;;  %v8056_v53 = vmul.f32 -1.442695, %v7035_v38  ;;  %v7037_v4 = vpop.f32.mrb[111].mxu0 }
 0xf10   : > { %v7267_v26 = vadd.f32 1.0, %v10241_v23 }
 0xf11   : > { %10250 = vpow2.f32 %v8056_v53 }
 0xf12   : > { %10252 = vrcp.f32 %v7267_v26  ;;  %v7040_v56 = vpop.f32.mrb[112].mxu0 }
 0xf13   : > { %v10243_v27 = vpop.eup %10242  ;;  %v8057_v45 = vmul.f32 -1.442695, %v7040_v56  ;;  %v7042_v28 = vpop.f32.mrb[113].mxu0 }
 0xf14   : > { %v10245_v40 = vpop.eup %10244  ;;  %v7268_v32 = vadd.f32 1.0, %v10243_v27 }
 0xf15   : > { %10254 = vpow2.f32 %v8057_v45  ;;  %7363 = vperm.xlu1 %9784, %v10245_v40  }
 0xf16   : > { %10256 = vrcp.f32 %v7268_v32  ;;  %v7045_v52 = vpop.f32.mrb[114].mxu0 }
 0xf17   : > { %v10247_v51 = vpop.eup %10246  ;;  %v8058_v36 = vmul.f32 -1.442695, %v7045_v52  ;;  %v7047_v17 = vpop.f32.mrb[115].mxu0 }
 0xf18   : > { %v10249_v30 = vpop.eup %10248  ;;  %v7269_v47 = vadd.f32 1.0, %v10247_v51 }
 0xf19   : > { %10258 = vpow2.f32 %v8058_v36  ;;  %7368 = vperm.xlu0 %9778, %v10249_v30  }
 0xf1a   : > { %10260 = vrcp.f32 %v7269_v47  ;;  %v7050_v24 = vpop.f32.mrb[116].mxu0 }
 0xf1b   : > { %v10251_v49 = vpop.eup %10250  ;;  %v8059_v58 = vmul.f32 -1.442695, %v7050_v24  ;;  %v7052_v54 = vpop.f32.mrb[117].mxu0 }
 0xf1c   : > { %v10253_v7 = vpop.eup %10252  ;;  %v7270_v2 = vadd.f32 1.0, %v10251_v49 }
 0xf1d   : > { %10262 = vpow2.f32 %v8059_v58  ;;  %7373 = vperm.xlu1 %9784, %v10253_v7  }
 0xf1e   : > { %10264 = vrcp.f32 %v7270_v2  ;;  %v7055_v42 = vpop.f32.mrb[118].mxu0 }
 0xf1f   : > { %v10255_v60 = vpop.eup %10254  ;;  %v8060_v19 = vmul.f32 -1.442695, %v7055_v42  ;;  %v7057_v33 = vpop.f32.mrb[119].mxu0 }
 0xf20   : > { %v10257_v50 = vpop.eup %10256  ;;  %v7271_v39 = vadd.f32 1.0, %v10255_v60 }
 0xf21   : > { %10266 = vpow2.f32 %v8060_v19  ;;  %7378 = vperm.xlu0 %9778, %v10257_v50  }
 0xf22   : > { %10268 = vrcp.f32 %v7271_v39  ;;  %v7060_v55 = vpop.f32.mrb[120].mxu0 }
 0xf23   : > { %v10259_v48 = vpop.eup %10258  ;;  %v8061_v10 = vmul.f32 -1.442695, %v7060_v55  ;;  %v7062_v57 = vpop.f32.mrb[121].mxu0 }
 0xf24   : > { %v10261_v43 = vpop.eup %10260  ;;  %v7272_v11 = vadd.f32 1.0, %v10259_v48 }
 0xf25   : > { %10270 = vpow2.f32 %v8061_v10  ;;  %7383 = vperm.xlu1 %9784, %v10261_v43  }
 0xf26   : > { %10272 = vrcp.f32 %v7272_v11  ;;  %v7065_v38 = vpop.f32.mrb[122].mxu0 }
 0xf27   : > { %v10263_v23 = vpop.eup %10262  ;;  %v8062_v53 = vmul.f32 -1.442695, %v7065_v38  ;;  %v7067_v4 = vpop.f32.mrb[123].mxu0 }
 0xf28   : > { %v10265_v26 = vpop.eup %10264  ;;  %v7273_v56 = vadd.f32 1.0, %v10263_v23 }
 0xf29   : > { %10274 = vpow2.f32 %v8062_v53  ;;  %7388 = vperm.xlu0 %9778, %v10265_v26  }
 0xf2a   : > { %10276 = vrcp.f32 %v7273_v56  ;;  %v7070_v27 = vpop.f32.mrb[124].mxu0 }
 0xf2b   : > { %v10267_v45 = vpop.eup %10266  ;;  %v8063_v28 = vmul.f32 -1.442695, %v7070_v27  ;;  %v7072_v40 = vpop.f32.mrb[125].mxu0 }
 0xf2c   : > { %v10269_v32 = vpop.eup %10268  ;;  %v7274_v52 = vadd.f32 1.0, %v10267_v45 }
 0xf2d   : > { %10278 = vpow2.f32 %v8063_v28  ;;  %7393 = vperm.xlu1 %9784, %v10269_v32  }
 0xf2e   : > { %10280 = vrcp.f32 %v7274_v52  ;;  %v7075_v51 = vpop.f32.mrb[126].mxu0 }
 0xf2f   : > { %v10271_v36 = vpop.eup %10270  ;;  %v8064_v17 = vmul.f32 -1.442695, %v7075_v51  ;;  %v7077_v30 = vpop.f32.mrb[127].mxu0 }
 0xf30   : > { %v10273_v47 = vpop.eup %10272  ;;  %v7275_v24 = vadd.f32 1.0, %v10271_v36 }
 0xf31   : > { %10282 = vpow2.f32 %v8064_v17  ;;  %7398 = vperm.xlu0 %9778, %v10273_v47  }
 0xf32   : > { %10284 = vrcp.f32 %v7275_v24  ;;  %v7080_v49 = vpop.f32.mrb[128].mxu0 }
 0xf33   : > { %v10275_v58 = vpop.eup %10274  ;;  %v8065_v54 = vmul.f32 -1.442695, %v7080_v49  ;;  %v7082_v7 = vpop.f32.mrb[129].mxu0 }
 0xf34   : > { %v10277_v2 = vpop.eup %10276  ;;  %v7276_v42 = vadd.f32 1.0, %v10275_v58 }
 0xf35   : > { %10286 = vpow2.f32 %v8065_v54  ;;  %7403 = vperm.xlu1 %9784, %v10277_v2  }
 0xf36   : > { %10288 = vrcp.f32 %v7276_v42  ;;  %v7085_v60 = vpop.f32.mrb[130].mxu0 }
 0xf37   : > { %v10279_v19 = vpop.eup %10278  ;;  %v8066_v33 = vmul.f32 -1.442695, %v7085_v60  ;;  %v7087_v50 = vpop.f32.mrb[131].mxu0 }
 0xf38   : > { %v10281_v39 = vpop.eup %10280  ;;  %v7277_v55 = vadd.f32 1.0, %v10279_v19 }
 0xf39   : > { %10290 = vpow2.f32 %v8066_v33  ;;  %7408 = vperm.xlu0 %9778, %v10281_v39  }
 0xf3a   : > { %10292 = vrcp.f32 %v7277_v55  ;;  %v7090_v48 = vpop.f32.mrb[132].mxu0 }
 0xf3b   : > { %v10283_v10 = vpop.eup %10282  ;;  %v8067_v57 = vmul.f32 -1.442695, %v7090_v48  ;;  %v7092_v43 = vpop.f32.mrb[133].mxu0 }
 0xf3c   : > { %v10285_v11 = vpop.eup %10284  ;;  %v7278_v38 = vadd.f32 1.0, %v10283_v10 }
 0xf3d   : > { %10294 = vpow2.f32 %v8067_v57  ;;  %7413 = vperm.xlu1 %9784, %v10285_v11  }
 0xf3e   : > { %10296 = vrcp.f32 %v7278_v38  ;;  %v7095_v23 = vpop.f32.mrb[134].mxu0 }
 0xf3f   : > { %v10287_v53 = vpop.eup %10286  ;;  %v8068_v4 = vmul.f32 -1.442695, %v7095_v23  ;;  %v7097_v26 = vpop.f32.mrb[135].mxu0 }
 0xf40   : > { %v10289_v56 = vpop.eup %10288  ;;  %v7279_v27 = vadd.f32 1.0, %v10287_v53 }
 0xf41   : > { %10298 = vpow2.f32 %v8068_v4  ;;  %7418 = vperm.xlu0 %9778, %v10289_v56  }
 0xf42   : > { %10300 = vrcp.f32 %v7279_v27  ;;  %v7100_v45 = vpop.f32.mrb[136].mxu0 }
 0xf43   : > { %v10291_v28 = vpop.eup %10290  ;;  %v8069_v40 = vmul.f32 -1.442695, %v7100_v45  ;;  %v7102_v32 = vpop.f32.mrb[137].mxu0 }
 0xf44   : > { %v10293_v52 = vpop.eup %10292  ;;  %v7280_v51 = vadd.f32 1.0, %v10291_v28 }
 0xf45   : > { %10302 = vpow2.f32 %v8069_v40  ;;  %7423 = vperm.xlu1 %9784, %v10293_v52  }
 0xf46   : > { %10304 = vrcp.f32 %v7280_v51  ;;  %v7105_v36 = vpop.f32.mrb[138].mxu0 }
 0xf47   : > { %v10295_v17 = vpop.eup %10294  ;;  %v8070_v30 = vmul.f32 -1.442695, %v7105_v36  ;;  %v7107_v47 = vpop.f32.mrb[139].mxu0 }
 0xf48   : > { %v10297_v24 = vpop.eup %10296  ;;  %v7281_v49 = vadd.f32 1.0, %v10295_v17 }
 0xf49   : > { %10306 = vpow2.f32 %v8070_v30  ;;  %7428 = vperm.xlu0 %9778, %v10297_v24  }
 0xf4a   : > { %10308 = vrcp.f32 %v7281_v49  ;;  %v7110_v58 = vpop.f32.mrb[140].mxu0 }
 0xf4b   : > { %v10299_v54 = vpop.eup %10298  ;;  %v8071_v7 = vmul.f32 -1.442695, %v7110_v58  ;;  %v7112_v2 = vpop.f32.mrb[141].mxu0 }
 0xf4c   : > { %v10301_v42 = vpop.eup %10300  ;;  %v7282_v60 = vadd.f32 1.0, %v10299_v54 }
 0xf4d   : > { %10310 = vpow2.f32 %v8071_v7  ;;  %7433 = vperm.xlu1 %9784, %v10301_v42  }
 0xf4e   : > { %10312 = vrcp.f32 %v7282_v60  ;;  %v7115_v19 = vpop.f32.mrb[142].mxu0 }
 0xf4f   : > { %v10303_v33 = vpop.eup %10302  ;;  %v8072_v50 = vmul.f32 -1.442695, %v7115_v19  ;;  %v7117_v39 = vpop.f32.mrb[143].mxu0 }
 0xf50   : > { %v10305_v55 = vpop.eup %10304  ;;  %v7283_v48 = vadd.f32 1.0, %v10303_v33 }
 0xf51   : > { %10314 = vpow2.f32 %v8072_v50  ;;  %7438 = vperm.xlu0 %9778, %v10305_v55  }
 0xf52   : > { %10316 = vrcp.f32 %v7283_v48  ;;  %v7120_v10 = vpop.f32.mrb[144].mxu0 }
 0xf53   : > { %v10307_v57 = vpop.eup %10306  ;;  %v8073_v43 = vmul.f32 -1.442695, %v7120_v10  ;;  %v7122_v11 = vpop.f32.mrb[145].mxu0 }
 0xf54   : > { %v10309_v38 = vpop.eup %10308  ;;  %v7284_v23 = vadd.f32 1.0, %v10307_v57 }
 0xf55   : > { %10318 = vpow2.f32 %v8073_v43  ;;  %7443 = vperm.xlu1 %9784, %v10309_v38  }
 0xf56   : > { %10320 = vrcp.f32 %v7284_v23  ;;  %v7125_v53 = vpop.f32.mrb[146].mxu0 }
 0xf57   : > { %v10311_v4 = vpop.eup %10310  ;;  %v8074_v26 = vmul.f32 -1.442695, %v7125_v53  ;;  %v7127_v56 = vpop.f32.mrb[147].mxu0 }
 0xf58   : > { %v10313_v27 = vpop.eup %10312  ;;  %v7285_v45 = vadd.f32 1.0, %v10311_v4 }
 0xf59   : > { %10322 = vpow2.f32 %v8074_v26  ;;  %7448 = vperm.xlu0 %9778, %v10313_v27  }
 0xf5a   : > { %10324 = vrcp.f32 %v7285_v45  ;;  %v7130_v28 = vpop.f32.mrb[148].mxu0 }
 0xf5b   : > { %v10315_v40 = vpop.eup %10314  ;;  %v8075_v32 = vmul.f32 -1.442695, %v7130_v28  ;;  %v7132_v52 = vpop.f32.mrb[149].mxu0 }
 0xf5c   : > { %v10317_v51 = vpop.eup %10316  ;;  %v7286_v36 = vadd.f32 1.0, %v10315_v40 }
 0xf5d   : > { %10326 = vpow2.f32 %v8075_v32  ;;  %7453 = vperm.xlu1 %9784, %v10317_v51  }
 0xf5e   : > { %10328 = vrcp.f32 %v7286_v36  ;;  %v7135_v17 = vpop.f32.mrb[150].mxu0 }
 0xf5f   : > { %v10319_v30 = vpop.eup %10318  ;;  %v8076_v47 = vmul.f32 -1.442695, %v7135_v17  ;;  %v7137_v24 = vpop.f32.mrb[151].mxu0 }
 0xf60   : > { %v10321_v49 = vpop.eup %10320  ;;  %v7287_v58 = vadd.f32 1.0, %v10319_v30 }
 0xf61   : > { %10330 = vpow2.f32 %v8076_v47  ;;  %7458 = vperm.xlu0 %9778, %v10321_v49  }
 0xf62   : > { %10332 = vrcp.f32 %v7287_v58  ;;  %v7140_v54 = vpop.f32.mrb[152].mxu0 }
 0xf63   : > { %v10323_v7 = vpop.eup %10322  ;;  %v7141_v2 = vadd.f32 %v7140_v54, %v13766_v16  ;;  %v7142_v42 = vpop.f32.mrb[153].mxu0 }
 0xf64   : > { %v10325_v60 = vpop.eup %10324  ;;  %v7288_v19 = vadd.f32 1.0, %v10323_v7 }
 0xf65   : > { %v8077_v33 = vmul.f32 -1.442695, %v7141_v2  ;;  %7463 = vperm.xlu1 %9784, %v10325_v60  }
 0xf66   : > { %10334 = vrcp.f32 %v7288_v19  ;;  %v7145_v50 = vpop.f32.mrb[154].mxu0 }
 0xf67   : > { %v10327_v39 = vpop.eup %10326  ;;  %10336 = vpow2.f32 %v8077_v33  ;;  %v7146_v55 = vadd.f32 %v7145_v50, %v13768_v35  ;;  %v7147_v48 = vpop.f32.mrb[155].mxu0 }
 0xf68   : > { %v10329_v10 = vpop.eup %10328  ;;  %v7289_v57 = vadd.f32 1.0, %v10327_v39 }
 0xf69   : > { %v8078_v43 = vmul.f32 -1.442695, %v7146_v55  ;;  %7468 = vperm.xlu0 %9778, %v10329_v10  }
 0xf6a   : > { %10338 = vrcp.f32 %v7289_v57  ;;  %v7150_v11 = vpop.f32.mrb[156].mxu0 }
 0xf6b   : > { %v10331_v38 = vpop.eup %10330  ;;  %10340 = vpow2.f32 %v8078_v43  ;;  %v7151_v16 = vadd.f32 %v7150_v11, %v13770_v13  ;;  %v7152_v23 = vpop.f32.mrb[157].mxu0 }
 0xf6c   : > { %v10333_v53 = vpop.eup %10332  ;;  %v7290_v4 = vadd.f32 1.0, %v10331_v38 }
 0xf6d   : > { %v8079_v26 = vmul.f32 -1.442695, %v7151_v16  ;;  %7473 = vperm.xlu1 %9784, %v10333_v53  }
 0xf6e   : > { %10342 = vrcp.f32 %v7290_v4  ;;  %v7155_v56 = vpop.f32.mrb[158].mxu0 }
 0xf6f   : > { %10344 = vpow2.f32 %v8079_v26  ;;  %v7156_v35 = vadd.f32 %v7155_v56, %v13772_v29  ;;  %v7157_v27 = vpop.f32.mrb[159].mxu0 }
 0xf70   : > { %v10335_v45 = vpop.eup %10334 }
 0xf71   : > { %v10337_v28 = vpop.eup %10336  ;;  %v8080_v40 = vmul.f32 -1.442695, %v7156_v35  ;;  %7478 = vperm.xlu0 %9778, %v10335_v45  }
 0xf72   : > { %v7291_v32 = vadd.f32 1.0, %v10337_v28  ;;  %v7160_v52 = vpop.f32.mrb[160].mxu0 }
 0xf73   : > { %10346 = vpow2.f32 %v8080_v40  ;;  %v7161_v13 = vadd.f32 %v7160_v52, %v13774_v41  ;;  %v7162_v51 = vpop.f32.mrb[161].mxu0 }
 0xf74   : > { %v10339_v36 = vpop.eup %10338  ;;  %10348 = vrcp.f32 %v7291_v32 }
 0xf75   : > { %v10341_v17 = vpop.eup %10340  ;;  %v8081_v30 = vmul.f32 -1.442695, %v7161_v13  ;;  %7483 = vperm.xlu1 %9784, %v10339_v36  }
 0xf76   : > { %v7292_v47 = vadd.f32 1.0, %v10341_v17  ;;  %v7165_v24 = vpop.f32.mrb[162].mxu0 }
 0xf77   : > { %10350 = vpow2.f32 %v8081_v30  ;;  %v7166_v29 = vadd.f32 %v7165_v24, %v13776_v63  ;;  %v7167_v49 = vpop.f32.mrb[163].mxu0 }
 0xf78   : > { %v10343_v58 = vpop.eup %10342  ;;  %10352 = vrcp.f32 %v7292_v47 }
 0xf79   : > { %v10345_v54 = vpop.eup %10344  ;;  %v8082_v7 = vmul.f32 -1.442695, %v7166_v29  ;;  %7488 = vperm.xlu0 %9778, %v10343_v58   ;;  %v14212_v58 = vld [vmem:[#allocation25_spill] sm:$0xff] }
 0xf7a   : > { %v7293_v2 = vadd.f32 1.0, %v10345_v54 }
 0xf7b   : > { %10354 = vpow2.f32 %v8082_v7  ;;  %v14213_v7 = vld [vmem:[#allocation8_spill] sm:$0xff] }
 0xf7c   : > { %10356 = vrcp.f32 %v7293_v2 }
 0xf7d   : > { %v10347_v41 = vpop.eup %10346 }
 0xf7e   : > { %v10349_v42 = vpop.eup %10348  ;;  %v7294_v60 = vadd.f32 1.0, %v10347_v41  ;;  %v14214_v41 = vld [vmem:[#allocation9_spill] sm:$0xff] }
 0xf7f   : > { %7493 = vperm.xlu1 %9784, %v10349_v42  }
 0xf80   : > { %10358 = vrcp.f32 %v7294_v60  ;;  %v14215_v60 = vld [vmem:[#allocation10_spill] sm:$0xff] }
 0xf81   : > { %v10351_v19 = vpop.eup %10350 }
 0xf82   : > { %v10353_v33 = vpop.eup %10352  ;;  %v7295_v50 = vadd.f32 1.0, %v10351_v19 }
 0xf83   : > { %7498 = vperm.xlu0 %9778, %v10353_v33  }
 0xf84   : > { %10360 = vrcp.f32 %v7295_v50  ;;  %v14216_v50 = vld [vmem:[#allocation11_spill] sm:$0xff] }
 0xf85   : > { %v10355_v63 = vpop.eup %10354 }
 0xf86   : > { %v10357_v39 = vpop.eup %10356  ;;  %v7296_v55 = vadd.f32 1.0, %v10355_v63 }
 0xf87   : > { %7503 = vperm.xlu1 %9784, %v10357_v39  }
 0xf88   : > { %10362 = vrcp.f32 %v7296_v55  ;;  %v14217_v55 = vld [vmem:[#allocation29_spill] sm:$0xff] }
 0xf8a   : > { %v10359_v48 = vpop.eup %10358 }
 0xf8b   : > { %7508 = vperm.xlu0 %9778, %v10359_v48  }
 0xf8e   : > { %v10361_v10 = vpop.eup %10360 }
 0xf8f   : > { %7513 = vperm.xlu1 %9784, %v10361_v10  }
 0xf92   : > { %v10363_v57 = vpop.eup %10362 }
 0xf93   : > { %7518 = vperm.xlu0 %9778, %v10363_v57   ;;  %v14218_v57 = vld [vmem:[#allocation30_spill] sm:$0xff] }
 0xf94   : > { %v7364_v43 = vpop.permute.xlu1 %7363 }
 0xf95   : > { %v7521_v11 = vmul.f32 %v7364_v43, %v12989_v9 }
 0xf97   : > { %7553 = vst.msk [vmem:[%s13788_s22] sm:$0xff] %vm916_vm3, %v7521_v11 }
 0xf98   : > { %v7369_v38 = vpop.permute.xlu0 %7368 }
 0xf99   : > { %v7522_v16 = vmul.f32 %v7369_v38, %v12993_v21  ;;  %v14219_v38 = vld [vmem:[#allocation31_spill] sm:$0xff] }
 0xf9b   : > { %7554 = vst.msk [vmem:[%s13788_s22 + $0x8] sm:$0xff] %vm916_vm3, %v7522_v16 }
 0xf9c   : > { %v7374_v23 = vpop.permute.xlu1 %7373 }
 0xf9d   : > { %v7523_v53 = vmul.f32 %v7374_v23, %v12997_v6 }
 0xf9f   : > { %7555 = vst.msk [vmem:[%s13788_s22 + $0x10] sm:$0xff] %vm916_vm3, %v7523_v53  ;;  %v14220_v53 = vld [vmem:[#allocation40_spill] sm:$0xff] }
 0xfa0   : > { %v7379_v9 = vpop.permute.xlu0 %7378 }
 0xfa1   : > { %v7524_v4 = vmul.f32 %v7379_v9, %v13001_v3 }
 0xfa3   : > { %7556 = vst.msk [vmem:[%s13788_s22 + $0x18] sm:$0xff] %vm916_vm3, %v7524_v4 }
 0xfa4   : > { %v7384_v26 = vpop.permute.xlu1 %7383 }
 0xfa5   : > { %v7525_v56 = vmul.f32 %v7384_v26, %v13009_v61 }
 0xfa7   : > { %7557 = vst.msk [vmem:[%s13788_s22 + $0x20] sm:$0xff] %vm916_vm3, %v7525_v56 }
 0xfa8   : > { %v7389_v21 = vpop.permute.xlu0 %7388 }
 0xfa9   : > { %v7526_v35 = vmul.f32 %v7389_v21, %v13013_v12 }
 0xfab   : > { %7558 = vst.msk [vmem:[%s13788_s22 + $0x28] sm:$0xff] %vm916_vm3, %v7526_v35 }
 0xfac   : > { %v7394_v6 = vpop.permute.xlu1 %7393 }
 0xfad   : > { %v7527_v27 = vmul.f32 %v7394_v6, %v13021_v62 }
 0xfaf   : > { %7559 = vst.msk [vmem:[%s13788_s22 + $0x30] sm:$0xff] %vm916_vm3, %v7527_v27 }
 0xfb0   : > { %v7399_v3 = vpop.permute.xlu0 %7398 }
 0xfb1   : > { %v7528_v45 = vmul.f32 %v7399_v3, %v13025_v34 }
 0xfb3   : > { %7560 = vst.msk [vmem:[%s13788_s22 + $0x38] sm:$0xff] %vm916_vm3, %v7528_v45 }
 0xfb4   : > { %v7404_v61 = vpop.permute.xlu1 %7403 }
 0xfb5   : > { %v7529_v28 = vmul.f32 %v7404_v61, %v13033_v44 }
 0xfb7   : > { %7561 = vst.msk [vmem:[%s13788_s22 + $0x40] sm:$0xff] %vm916_vm3, %v7529_v28 }
 0xfb8   : > { %v7409_v12 = vpop.permute.xlu0 %7408 }
 0xfb9   : > { %v7530_v40 = vmul.f32 %v7409_v12, %v13037_v46 }
 0xfbb   : > { %7562 = vst.msk [vmem:[%s13788_s22 + $0x48] sm:$0xff] %vm916_vm3, %v7530_v40 }
 0xfbc   : > { %v7414_v62 = vpop.permute.xlu1 %7413 }
 0xfbd   : > { %v7531_v32 = vmul.f32 %v7414_v62, %v13045_v37 }
 0xfbf   : > { %7563 = vst.msk [vmem:[%s13788_s22 + $0x50] sm:$0xff] %vm916_vm3, %v7531_v32 }
 0xfc0   : > { %v7419_v34 = vpop.permute.xlu0 %7418 }
 0xfc1   : > { %v7532_v52 = vmul.f32 %v7419_v34, %v13049_v59 }
 0xfc3   : > { %7564 = vst.msk [vmem:[%s13788_s22 + $0x58] sm:$0xff] %vm916_vm3, %v7532_v52 }
 0xfc4   : > { %v7424_v44 = vpop.permute.xlu1 %7423 }
 0xfc5   : > { %v7533_v13 = vmul.f32 %v7424_v44, %v13057_v0 }
 0xfc7   : > { %7565 = vst.msk [vmem:[%s13788_s22 + $0x60] sm:$0xff] %vm916_vm3, %v7533_v13 }
 0xfc8   : > { %v7429_v46 = vpop.permute.xlu0 %7428 }
 0xfc9   : > { %v7534_v51 = vmul.f32 %v7429_v46, %v13061_v25 }
 0xfcb   : > { %7566 = vst.msk [vmem:[%s13788_s22 + $0x68] sm:$0xff] %vm916_vm3, %v7534_v51 }
 0xfcc   : > { %v7434_v37 = vpop.permute.xlu1 %7433 }
 0xfcd   : > { %v7535_v36 = vmul.f32 %v7434_v37, %v13069_v8 }
 0xfcf   : > { %7567 = vst.msk [vmem:[%s13788_s22 + $0x70] sm:$0xff] %vm916_vm3, %v7535_v36 }
 0xfd0   : > { %v7439_v59 = vpop.permute.xlu0 %7438 }
 0xfd1   : > { %v7536_v17 = vmul.f32 %v7439_v59, %v13073_v20 }
 0xfd3   : > { %7568 = vst.msk [vmem:[%s13788_s22 + $0x78] sm:$0xff] %vm916_vm3, %v7536_v17 }
 0xfd4   : > { %v7444_v0 = vpop.permute.xlu1 %7443 }
 0xfd5   : > { %v7537_v30 = vmul.f32 %v7444_v0, %v13081_v15 }
 0xfd7   : > { %7569 = vst.msk [vmem:[%s13788_s22 + $0x80] sm:$0xff] %vm916_vm3, %v7537_v30 }
 0xfd8   : > { %v7449_v25 = vpop.permute.xlu0 %7448 }
 0xfd9   : > { %v7538_v47 = vmul.f32 %v7449_v25, %v13085_v5 }
 0xfdb   : > { %7570 = vst.msk [vmem:[%s13788_s22 + $0x88] sm:$0xff] %vm916_vm3, %v7538_v47 }
 0xfdc   : > { %v7454_v8 = vpop.permute.xlu1 %7453 }
 0xfdd   : > { %v7539_v24 = vmul.f32 %v7454_v8, %v13093_v18 }
 0xfdf   : > { %7571 = vst.msk [vmem:[%s13788_s22 + $0x90] sm:$0xff] %vm916_vm3, %v7539_v24 }
 0xfe0   : > { %v7459_v20 = vpop.permute.xlu0 %7458 }
 0xfe1   : > { %v7540_v29 = vmul.f32 %v7459_v20, %v13097_v31 }
 0xfe3   : > { %7572 = vst.msk [vmem:[%s13788_s22 + $0x98] sm:$0xff] %vm916_vm3, %v7540_v29 }
 0xfe4   : > { %v7464_v15 = vpop.permute.xlu1 %7463 }
 0xfe5   : > { %v7541_v49 = vmul.f32 %v7464_v15, %v13105_v1 }
 0xfe7   : > { %7573 = vst.msk [vmem:[%s13788_s22 + $0xa0] sm:$0xff] %vm916_vm3, %v7541_v49 }
 0xfe8   : > { %v7469_v5 = vpop.permute.xlu0 %7468 }
 0xfe9   : > { %v7542_v54 = vmul.f32 %v7469_v5, %v14212_v58 }
 0xfeb   : > { %7574 = vst.msk [vmem:[%s13788_s22 + $0xa8] sm:$0xff] %vm916_vm3, %v7542_v54 }
 0xfec   : > { %v7474_v18 = vpop.permute.xlu1 %7473 }
 0xfed   : > { %v7543_v2 = vmul.f32 %v7474_v18, %v14213_v7 }
 0xfef   : > { %7575 = vst.msk [vmem:[%s13788_s22 + $0xb0] sm:$0xff] %vm916_vm3, %v7543_v2 }
 0xff0   : > { %v7479_v31 = vpop.permute.xlu0 %7478 }
 0xff1   : > { %v7544_v42 = vmul.f32 %v7479_v31, %v14214_v41 }
 0xff3   : > { %7576 = vst.msk [vmem:[%s13788_s22 + $0xb8] sm:$0xff] %vm916_vm3, %v7544_v42 }
 0xff4   : > { %v7484_v1 = vpop.permute.xlu1 %7483 }
 0xff5   : > { %v7545_v19 = vmul.f32 %v7484_v1, %v14215_v60 }
 0xff7   : > { %7577 = vst.msk [vmem:[%s13788_s22 + $0xc0] sm:$0xff] %vm916_vm3, %v7545_v19 }
 0xff8   : > { %v7489_v33 = vpop.permute.xlu0 %7488 }
 0xff9   : > { %v7546_v63 = vmul.f32 %v7489_v33, %v14216_v50 }
 0xffb   : > { %7578 = vst.msk [vmem:[%s13788_s22 + $0xc8] sm:$0xff] %vm916_vm3, %v7546_v63 }
 0xffe   : > { %v7494_v39 = vpop.permute.xlu1 %7493 }
 0xfff   : > { %v7547_v48 = vmul.f32 %v7494_v39, %v14217_v55 }
0x1001   : > { %7579 = vst.msk [vmem:[%s13788_s22 + $0xd0] sm:$0xff] %vm916_vm3, %v7547_v48 }
0x1002   : > { %v7499_v10 = vpop.permute.xlu0 %7498 }
0x1003   : > { %v7548_v43 = vmul.f32 %v7499_v10, %v14218_v57 }
0x1005   : > { %7580 = vst.msk [vmem:[%s13788_s22 + $0xd8] sm:$0xff] %vm916_vm3, %v7548_v43 }
0x1006   : > { %v7504_v11 = vpop.permute.xlu1 %7503 }
0x1007   : > { %v7549_v16 = vmul.f32 %v7504_v11, %v14219_v38 }
0x1009   : > { %7581 = vst.msk [vmem:[%s13788_s22 + $0xe0] sm:$0xff] %vm916_vm3, %v7549_v16 }
0x100a   : > { %v7509_v23 = vpop.permute.xlu0 %7508 }
0x100b   : > { %v7550_v9 = vmul.f32 %v7509_v23, %v14220_v53 }
0x100d   : > { %7582 = vst.msk [vmem:[%s13788_s22 + $0xe8] sm:$0xff] %vm916_vm3, %v7550_v9 }
0x100e   : > { %v7514_v4 = vpop.permute.xlu1 %7513 }
0x100f   : > { %v7551_v26 = vmul.f32 %v7514_v4, %v13165_v22 }
0x1011   : > { %7583 = vst.msk [vmem:[%s13788_s22 + $0xf0] sm:$0xff] %vm916_vm3, %v7551_v26 }
0x1012   : > { %v7519_v56 = vpop.permute.xlu0 %7518 }
0x1013   : > { %v7552_v21 = vmul.f32 %v7519_v56, %v13169_v14 }
0x1015   : > { %7584 = vst.msk [vmem:[%s13788_s22 + $0xf8] sm:$0xff] %vm916_vm3, %v7552_v21 }
0x1016   : > { %10377 = shalt.err (!%p10374_p3)
}
0x1017   : > { %s10378_s15 = scalar_lea.hbm %s13887_s12, 4096  ;;  %s10382_s30 = scalar_lea.hbm %s13948_s11, 8192 }
0x1018   : > { %p10379_p4 = scmp.ne.s32.totalorder %s13887_s12, %s10378_s15  ;;  %p10383_p9 = scmp.lt.u32.totalorder %s13887_s12, %s13948_s11 }
0x1019   : > { %p10384_p10 = scmp.lt.u32.totalorder %s10382_s30, %s10378_s15  ;;  %p10386_p12 = scmp.lt.u32.totalorder %s10378_s15, %s13887_s12 }
0x101a   : > { %p10380_p7 = pnand %p10379_p4, %p10533_p5 }
0x101b   : > { %p10385_p11 = por %p10384_p10, %p10383_p9 }
0x101c   : > { %p10381_p8 = pneg %p10380_p7 }
0x101d   : > { %p10387_p13 = por %p10386_p12, %p10385_p11 }
0x101f   : > { %p10388_p0 = pnand %p10387_p13, %p10381_p8 }
0x1021   : > { %10391 = shalt.err (!%p10388_p0)
}
0x1022   : > { %s10433_s13 = smov 128   ;;  %s10434_s24 = smov 8  }
0x1023   : > { %9733 = dma.vmem_to_hbm [thread:$0]  (%p10533_p5), %s13889_s25, 4096, %s13887_s12, %s13896_s21, %s10433_s13, %s10433_s13, %s10434_s24  }
0x1024 PF: > { %p9739_p1 = scmp.ge.s32.totalorder %s10426_s20, 2  ;;  %s7614_s22 = sand.u32 1, %s10414_s17  }
0x1025   : > { %s7615_s15 = scalar_lea.sflag [#allocation3], %s7614_s22 }
0x1026   : > { %p9736_p2 = pnand %p9739_p1, %p10537_p6 }
0x1028   : > { %10409 = dma.done.wait (!%p9736_p2), %s7615_s15, 4096  }
0x1029   : > { %10411 = vsyncadd (!%p9736_p2), %s7615_s15, 4294963200  ;;  %p21_p3 = scmp.ge.s32.totalorder %s10520_s23, 4   ;;  %s14221_s17 = smov %s10418_s18 }
0x102a   : > { %s14222_s18 = smov %s10422_s19  ;;  %s14223_s19 = smov %s10531_s26 }
0x102b   : > { %s14224_s20 = smov %s10520_s23  ;;  %23 = sbr.rel (!%p21_p3) target bundleno = 3 (0x3), region = 99 }
0x1032   :  { %7620 = vsyncpa [#allocation3], 1 }
0x1033   :  { %7622 = vsyncpa [#allocation3 + $0x1], 1 }

</bundles_post_ra>
